<compile_context>
chip_gen: v5e
topology: v5e:2x2
jax: 0.10.0
libtpu: 0.0.40
codegen_flags: <defaults>
</compile_context>

<pallas_src>
import jax
import jax.numpy as jnp
from jax import lax
from jax.experimental import pallas as pl
from jax.experimental.pallas import tpu as pltpu

EPS = 1e-5
LANE = 128                       # pad channel dims to the TPU lane width


def _round_up(x, m):
    return (x + m - 1) // m * m


def _vmem_limit_bytes():
    """Generation-aware VMEM budget (leave ~25% headroom, cap at 100 MiB)."""
    cap = 128 * 1024 * 1024
    try:
        info = pltpu.get_tpu_info()
        cap = int(getattr(info, "vmem_capacity_bytes", cap) or cap)
    except Exception:
        pass
    return int(min(cap * 3 // 4, 100 * 1024 * 1024))


_VMEM_LIMIT = _vmem_limit_bytes()


def _cparams(*sem):
    return pltpu.CompilerParams(dimension_semantics=sem,
                                vmem_limit_bytes=_VMEM_LIMIT)


def _pick_row_tile(M, tm_max, c_max, vmem_limit):
    """Largest row tile that divides M, is a multiple of 8, and keeps the
    double-buffered in/out tiles comfortably inside the VMEM budget."""
    vm_rows = max(128, (vmem_limit // 4) // max(1, 16 * c_max))
    t = min(tm_max, vm_rows, M)
    if t >= M:
        return M
    t -= t % 8
    for cand in range(t, 7, -8):
        if M % cand == 0:
            return cand
    return M


# ----------------------------------------------------------------------------
# shared helper: per-tile partial BN statistics  [sum ; sum of squares] in f32
# ----------------------------------------------------------------------------
def _write_partial_stats(st_ref, y_f32):
    st_ref[0, 0:1, :] = jnp.sum(y_f32, axis=0, keepdims=True)
    st_ref[0, 1:2, :] = jnp.sum(y_f32 * y_f32, axis=0, keepdims=True)


# ----------------------------------------------------------------------------
# Stage 1: conv1 (1x1) -> bf16 output + partial BN1 stats.   grid over M tiles.
# ----------------------------------------------------------------------------
def conv1_stats_kernel(x_ref, w_ref, y_ref, st_ref):
    xb = x_ref[...].astype(jnp.bfloat16)                       # bf16 MXU input
    y = jnp.dot(xb, w_ref[...], preferred_element_type=jnp.float32)
    y_ref[...] = y.astype(y_ref.dtype)                          # bf16 store
    _write_partial_stats(st_ref, y)                             # stats from f32


# ----------------------------------------------------------------------------
# Stage 2: folded BN1 + ReLU, 3x3 conv as ONE (H*W, 9C)x(9C, C) matmul over an
# in-VMEM bf16 im2col slab built from a bf16 halo tile (no HBM im2col), emits
# bf16 output + partial BN2 stats.                            grid over images.
# ----------------------------------------------------------------------------
def bn_conv3x3_stats_kernel(y1_ref, s1_ref, w2_ref, y2_ref, st_ref,
                            pad_ref, col_ref):
    _, H, W, C = y1_ref.shape
    f32, bf16 = jnp.float32, jnp.bfloat16

    # BN1 folded to a single FMA, then ReLU (f32)
    a = jnp.maximum(y1_ref[0].astype(f32) * s1_ref[0:1, :] + s1_ref[1:2, :],
                    0.0)                                          # (H, W, C)

    # Halo tile (bf16): only the two border rows are zeroed per step; the
    # W-axis halo comes from a value-level concat so every interior row is
    # fully overwritten -> no cross-step state, grid stays "parallel".
    zrow = jnp.zeros((1, W + 2, C), bf16)
    pad_ref[0:1, :, :] = zrow
    pad_ref[H + 1:H + 2, :, :] = zrow
    zcol = jnp.zeros((H, 1, C), f32)
    pad_ref[1:H + 1, :, :] = jnp.concatenate([zcol, a, zcol],
                                             axis=1).astype(bf16)  # one cast

    # Build the bf16 im2col slab (H*W, 9*C); tap-major columns match the
    # (dy, dx, i)-major rows of the pre-reshaped w2.
    for dy in range(3):
        for dx in range(3):
            t = dy * 3 + dx
            col_ref[:, t * C:(t + 1) * C] = (
                pad_ref[dy:dy + H, dx:dx + W, :].reshape(H * W, C))

    # Single full-K MXU matmul, f32 accumulation.
    y = jnp.dot(col_ref[...], w2_ref[...], preferred_element_type=f32)

    y2_ref[...] = y[None].astype(y2_ref.dtype)                   # bf16 store
    _write_partial_stats(st_ref, y)


# ----------------------------------------------------------------------------
# Stage 3: folded BN2 + ReLU, conv3 (1x1) -> bf16 output + partial BN3 stats.
#                                                             grid over M tiles.
# ----------------------------------------------------------------------------
def bn_conv1x1_stats_kernel(y2_ref, s2_ref, w3_ref, y3_ref, st_ref):
    a = jnp.maximum(y2_ref[...].astype(jnp.float32) * s2_ref[0:1, :]
                    + s2_ref[1:2, :], 0.0)
    y = jnp.dot(a.astype(jnp.bfloat16), w3_ref[...],
                preferred_element_type=jnp.float32)
    y3_ref[...] = y.astype(y3_ref.dtype)
    _write_partial_stats(st_ref, y)


# ----------------------------------------------------------------------------
# Stage 4: folded BN3, residual add, ReLU.                    grid over M tiles.
# ----------------------------------------------------------------------------
def bn_add_relu_kernel(y3_ref, s3_ref, id_ref, o_ref):
    y = y3_ref[...].astype(jnp.float32) * s3_ref[0:1, :] + s3_ref[1:2, :]
    o_ref[...] = jnp.maximum(y + id_ref[...], 0.0)


# ----------------------------------------------------------------------------
# Wrapper
# ----------------------------------------------------------------------------
def _fold_bn(partials, gamma, beta, count):
    """Reduce per-tile [sum; sumsq] partials and fold BN into scale/shift."""
    tot = jnp.sum(partials, axis=0)                        # (2, C)
    mean = tot[0] / count
    var = jnp.maximum(tot[1] / count - mean * mean, 0.0)   # E[y^2] - mean^2
    scale = gamma * lax.rsqrt(var + EPS)
    shift = beta - mean * scale
    return jnp.stack([scale, shift]).astype(jnp.float32)   # (2, C)


def _pad_last(a, target):
    pad = [(0, 0)] * (a.ndim - 1) + [(0, target - a.shape[-1])]
    return jnp.pad(a, pad)


def bottleneck_forward(x_nchw, params, *, tm=512):
    (w1, g1, b1, w2_hwio, g2, b2, w3, g3, b3) = params
    N, Cin, H, W = x_nchw.shape
    width = w1.shape[1]
    Cout = w3.shape[1]
    assert Cin == Cout, "downsample=None requires in_channel == out_channel*4"

    CinP = _round_up(Cin, LANE)
    WidP = _round_up(width, LANE)
    CoutP = _round_up(Cout, LANE)
    M = N * H * W
    TM = _pick_row_tile(M, tm, max(CinP, WidP, CoutP), _VMEM_LIMIT)
    nM = M // TM

    f32, bf16 = jnp.float32, jnp.bfloat16

    # ---- layout glue: NCHW -> NHWC, channel-pad to lane width (the pad is a
    # no-op whenever the channel count is already a multiple of 128) ----------
    x = jnp.transpose(x_nchw, (0, 2, 3, 1)).astype(f32)            # (N,H,W,Cin)
    x_flat = _pad_last(x, CinP).reshape(M, CinP)                   # (M, CinP)

    # zero-padded weights (padded rows contribute 0, padded cols stay 0)
    w1_p = _pad_last(jnp.pad(w1, ((0, CinP - Cin), (0, 0))), WidP).astype(bf16)
    w2_p = _pad_last(jnp.pad(w2_hwio,
                             ((0, 0), (0, 0), (0, WidP - width), (0, 0))), WidP)
    w2_p = w2_p.reshape(9 * WidP, WidP).astype(bf16)   # (dy,dx,i)-major rows
    w3_p = _pad_last(jnp.pad(w3, ((0, WidP - width), (0, 0))), CoutP).astype(bf16)
    g1p, b1p = _pad_last(g1, WidP), _pad_last(b1, WidP)
    g2p, b2p = _pad_last(g2, WidP), _pad_last(b2, WidP)
    g3p, b3p = _pad_last(g3, CoutP), _pad_last(b3, CoutP)

    # ---- stage 1: conv1 (1x1) + partial BN1 stats --------------------------
    y1_raw, st1 = pl.pallas_call(
        conv1_stats_kernel,
        out_shape=(jax.ShapeDtypeStruct((M, WidP), bf16),
                   jax.ShapeDtypeStruct((nM, 2, WidP), f32)),
        grid_spec=pltpu.PrefetchScalarGridSpec(
            num_scalar_prefetch=0, grid=(nM,),
            in_specs=[pl.BlockSpec((TM, CinP), lambda i: (i, 0)),
                      pl.BlockSpec((CinP, WidP), lambda i: (0, 0))],
            out_specs=[pl.BlockSpec((TM, WidP), lambda i: (i, 0)),
                       pl.BlockSpec((1, 2, WidP), lambda i: (i, 0, 0))]),
        compiler_params=_cparams("parallel"),
    )(x_flat, w1_p)
    s1 = _fold_bn(st1, g1p, b1p, M)

    # ---- stage 2: BN1+ReLU -> 3x3 conv (in-VMEM im2col) + partial BN2 stats -
    y1_img = y1_raw.reshape(N, H, W, WidP)
    y2_raw, st2 = pl.pallas_call(
        bn_conv3x3_stats_kernel,
        out_shape=(jax.ShapeDtypeStruct((N, H * W, WidP), bf16),
                   jax.ShapeDtypeStruct((N, 2, WidP), f32)),
        grid_spec=pltpu.PrefetchScalarGridSpec(
            num_scalar_prefetch=0, grid=(N,),
            in_specs=[pl.BlockSpec((1, H, W, WidP), lambda n: (n, 0, 0, 0)),
                      pl.BlockSpec((2, WidP), lambda n: (0, 0)),
                      pl.BlockSpec((9 * WidP, WidP), lambda n: (0, 0))],
            out_specs=[pl.BlockSpec((1, H * W, WidP), lambda n: (n, 0, 0)),
                       pl.BlockSpec((1, 2, WidP), lambda n: (n, 0, 0))],
            scratch_shapes=[pltpu.VMEM((H + 2, W + 2, WidP), bf16),
                            pltpu.VMEM((H * W, 9 * WidP), bf16)]),
        compiler_params=_cparams("parallel"),
    )(y1_img, s1, w2_p)
    s2 = _fold_bn(st2, g2p, b2p, M)

    # ---- stage 3: BN2+ReLU -> conv3 (1x1) + partial BN3 stats --------------
    y2_flat = y2_raw.reshape(M, WidP)
    y3_raw, st3 = pl.pallas_call(
        bn_conv1x1_stats_kernel,
        out_shape=(jax.ShapeDtypeStruct((M, CoutP), bf16),
                   jax.ShapeDtypeStruct((nM, 2, CoutP), f32)),
        grid_spec=pltpu.PrefetchScalarGridSpec(
            num_scalar_prefetch=0, grid=(nM,),
            in_specs=[pl.BlockSpec((TM, WidP), lambda i: (i, 0)),
                      pl.BlockSpec((2, WidP), lambda i: (0, 0)),
                      pl.BlockSpec((WidP, CoutP), lambda i: (0, 0))],
            out_specs=[pl.BlockSpec((TM, CoutP), lambda i: (i, 0)),
                       pl.BlockSpec((1, 2, CoutP), lambda i: (i, 0, 0))]),
        compiler_params=_cparams("parallel"),
    )(y2_flat, s2, w3_p)
    s3 = _fold_bn(st3, g3p, b3p, M)

    # ---- stage 4: BN3 + residual add + ReLU (output aliased onto x_flat) ---
    alias = {2: 0} if CinP == CoutP else {}
    out_flat = pl.pallas_call(
        bn_add_relu_kernel,
        out_shape=jax.ShapeDtypeStruct((M, CoutP), f32),
        grid_spec=pltpu.PrefetchScalarGridSpec(
            num_scalar_prefetch=0, grid=(nM,),
            in_specs=[pl.BlockSpec((TM, CoutP), lambda i: (i, 0)),
                      pl.BlockSpec((2, CoutP), lambda i: (0, 0)),
                      pl.BlockSpec((TM, CinP), lambda i: (i, 0))],
            out_specs=pl.BlockSpec((TM, CoutP), lambda i: (i, 0))),
        compiler_params=_cparams("parallel"),
        input_output_aliases=alias,
    )(y3_raw, s3, x_flat)

    out = out_flat.reshape(N, H, W, CoutP)[..., :Cout]
    return jnp.transpose(out, (0, 3, 1, 2))                 # back to NCHW


# ----------------------------------------------------------------------------
# Pure-JAX reference (bf16 matmul inputs / f32 accumulation, f32 everywhere
# else — the kernel additionally stores inter-stage activations in bf16)
# ----------------------------------------------------------------------------
def ref_forward(x_nchw, params):
    (w1, g1, b1, w2_hwio, g2, b2, w3, g3, b3) = params
    x = jnp.transpose(x_nchw, (0, 2, 3, 1)).astype(jnp.float32)
    bf16 = jnp.bfloat16

    def bn(y, g, b):
        mean = y.mean(axis=(0, 1, 2))
        var = ((y - mean) ** 2).mean(axis=(0, 1, 2))
        return (y - mean) * lax.rsqrt(var + EPS) * g + b

    y1 = jnp.einsum('nhwc,cd->nhwd', x.astype(bf16), w1.astype(bf16),
                    preferred_element_type=jnp.float32)
    a1 = jnp.maximum(bn(y1, g1, b1), 0.0)
    y2 = lax.conv_general_dilated(
        a1.astype(bf16), w2_hwio.astype(bf16), window_strides=(1, 1),
        padding='SAME', dimension_numbers=('NHWC', 'HWIO', 'NHWC'),
        preferred_element_type=jnp.float32)
    a2 = jnp.maximum(bn(y2, g2, b2), 0.0)
    y3 = jnp.einsum('nhwc,cd->nhwd', a2.astype(bf16), w3.astype(bf16),
                    preferred_element_type=jnp.float32)
    out = jnp.maximum(bn(y3, g3, b3) + x, 0.0)
    return jnp.transpose(out, (0, 3, 1, 2))


if __name__ == "__main__":
    key = jax.random.PRNGKey(0)
    N, H, W = 2, 16, 16
    out_channel = 4
    in_channel = out_channel * 4           # 16 (required since downsample=None)
    width = out_channel                    # groups=1, width_per_group=64

    ks = jax.random.split(key, 10)
    x = jax.random.normal(ks[0], (N, in_channel, H, W), jnp.float32)
    w1 = 0.1 * jax.random.normal(ks[1], (in_channel, width), jnp.float32)
    g1 = 1.0 + 0.1 * jax.random.normal(ks[2], (width,), jnp.float32)
    b1 = 0.1 * jax.random.normal(ks[3], (width,), jnp.float32)
    w2 = 0.1 * jax.random.normal(ks[4], (3, 3, width, width), jnp.float32)  # HWIO
    g2 = 1.0 + 0.1 * jax.random.normal(ks[5], (width,), jnp.float32)
    b2 = 0.1 * jax.random.normal(ks[6], (width,), jnp.float32)
    w3 = 0.1 * jax.random.normal(ks[7], (width, in_channel), jnp.float32)
    g3 = 1.0 + 0.1 * jax.random.normal(ks[8], (in_channel,), jnp.float32)
    b3 = 0.1 * jax.random.normal(ks[9], (in_channel,), jnp.float32)
    params = (w1, g1, b1, w2, g2, b2, w3, g3, b3)

    out = jax.jit(bottleneck_forward)(x, params)
    out = jax.block_until_ready(out)

    ref = ref_forward(x, params)
    max_err = float(jnp.max(jnp.abs(out - ref)))
    mean_err = float(jnp.mean(jnp.abs(out - ref)))
    assert out.shape == (N, in_channel, H, W), out.shape
    # bf16 inter-stage activation storage adds ~1% relative error vs the
    # f32-intermediate reference; outputs here are O(1)-O(5).
    assert max_err < 0.15 and mean_err < 0.03, (max_err, mean_err)
    print("KERNEL_OK")
</pallas_src>

<mosaic_0001>
module attributes {stable_mosaic.version = 11 : i64} {
  func.func @conv1_stats_kernel(%arg0: i32, %arg1: memref<512x128xf32, #tpu.memory_space<vmem>>, %arg2: memref<128x128xbf16, #tpu.memory_space<vmem>>, %arg3: memref<512x128xbf16, #tpu.memory_space<vmem>>, %arg4: memref<1x2x128xf32, #tpu.memory_space<vmem>>) attributes {dimension_semantics = [#tpu.dimension_semantics<parallel>], iteration_bounds = array<i64: 1>, scalar_prefetch = 0 : i64, scratch_operands = 0 : i64, tpu.core_type = #tpu.core_type<tc>, window_params = [{transform_indices = @transform_0, window_bounds = array<i64: 512, 128>}, {pipeline_mode = #tpu.pipeline_mode<synchronous>, transform_indices = @transform_1, window_bounds = array<i64: 128, 128>}, {transform_indices = @transform_2, window_bounds = array<i64: 512, 128>}, {transform_indices = @transform_3, window_bounds = array<i64: 1, 2, 128>}]} {
    %c0 = arith.constant 0 : index
    %c0_0 = arith.constant 0 : index
    %0 = vector.load %arg1[%c0, %c0_0] : memref<512x128xf32, #tpu.memory_space<vmem>>, vector<512x128xf32>
    %1 = arith.truncf %0 : vector<512x128xf32> to vector<512x128xbf16>
    %c0_1 = arith.constant 0 : index
    %c0_2 = arith.constant 0 : index
    %2 = vector.load %arg2[%c0_1, %c0_2] : memref<128x128xbf16, #tpu.memory_space<vmem>>, vector<128x128xbf16>
    %cst = arith.constant dense<0.000000e+00> : vector<512x128xf32>
    %3 = tpu.matmul %1, %2, %cst {dimension_numbers = #tpu.dot_dimension_numbers<[1], [0], [0], [1], [0, 0, 1, 1], [], []>} : vector<512x128xbf16>, vector<128x128xbf16>, vector<512x128xf32> -> vector<512x128xf32>
    %4 = arith.truncf %3 : vector<512x128xf32> to vector<512x128xbf16>
    %c0_3 = arith.constant 0 : index
    %c0_4 = arith.constant 0 : index
    %5 = vector.load %arg3[%c0_3, %c0_4] : memref<512x128xbf16, #tpu.memory_space<vmem>>, vector<512x128xbf16>
    tpu.vector_store %arg3[%c0_3, %c0_4], %4 {strides = array<i32>} : memref<512x128xbf16, #tpu.memory_space<vmem>>, vector<512x128xbf16>,
    %cst_5 = arith.constant dense<0.000000e+00> : vector<128xf32>
    %6 = vector.multi_reduction <add>, %3, %cst_5 [0] : vector<512x128xf32> to vector<128xf32>
    %7 = vector.shape_cast %6 : vector<128xf32> to vector<1x128xf32>
    %c0_6 = arith.constant 0 : index
    %c0_7 = arith.constant 0 : index
    %c0_8 = arith.constant 0 : index
    %8 = vector.load %arg4[%c0_6, %c0_7, %c0_8] : memref<1x2x128xf32, #tpu.memory_space<vmem>>, vector<1x1x128xf32>
    %9 = vector.shape_cast %8 : vector<1x1x128xf32> to vector<1x128xf32>
    %10 = vector.shape_cast %7 : vector<1x128xf32> to vector<1x1x128xf32>
    tpu.vector_store %arg4[%c0_6, %c0_7, %c0_8], %10 {strides = array<i32>} : memref<1x2x128xf32, #tpu.memory_space<vmem>>, vector<1x1x128xf32>,
    %11 = arith.mulf %3, %3 : vector<512x128xf32>
    %cst_9 = arith.constant dense<0.000000e+00> : vector<128xf32>
    %12 = vector.multi_reduction <add>, %11, %cst_9 [0] : vector<512x128xf32> to vector<128xf32>
    %13 = vector.shape_cast %12 : vector<128xf32> to vector<1x128xf32>
    %c0_10 = arith.constant 0 : index
    %c1 = arith.constant 1 : index
    %c0_11 = arith.constant 0 : index
    %14 = vector.load %arg4[%c0_10, %c1, %c0_11] : memref<1x2x128xf32, #tpu.memory_space<vmem>>, vector<1x1x128xf32>
    %15 = vector.shape_cast %14 : vector<1x1x128xf32> to vector<1x128xf32>
    %16 = vector.shape_cast %13 : vector<1x128xf32> to vector<1x1x128xf32>
    tpu.vector_store %arg4[%c0_10, %c1, %c0_11], %16 {strides = array<i32>} : memref<1x2x128xf32, #tpu.memory_space<vmem>>, vector<1x1x128xf32>,
    return
  }
  func.func @transform_0(%arg0: i32) -> (i32, i32) {
    %c0_i32 = arith.constant 0 : i32
    %c0_i32_0 = arith.constant 0 : i32
    return %arg0, %c0_i32 : i32, i32
  }
  func.func @transform_1(%arg0: i32) -> (i32, i32) {
    %c0_i32 = arith.constant 0 : i32
    %c0_i32_0 = arith.constant 0 : i32
    %c0_i32_1 = arith.constant 0 : i32
    return %c0_i32, %c0_i32_0 : i32, i32
  }
  func.func @transform_2(%arg0: i32) -> (i32, i32) {
    %c0_i32 = arith.constant 0 : i32
    %c0_i32_0 = arith.constant 0 : i32
    return %arg0, %c0_i32 : i32, i32
  }
  func.func @transform_3(%arg0: i32) -> (i32, i32, i32) {
    %c0_i32 = arith.constant 0 : i32
    %c0_i32_0 = arith.constant 0 : i32
    %c0_i32_1 = arith.constant 0 : i32
    return %arg0, %c0_i32, %c0_i32_0 : i32, i32, i32
  }
}

module attributes {stable_mosaic.version = 11 : i64} {
  func.func @bn_conv3x3_stats_kernel(%arg0: i32, %arg1: memref<1x16x16x128xbf16, #tpu.memory_space<vmem>>, %arg2: memref<2x128xf32, #tpu.memory_space<vmem>>, %arg3: memref<1152x128xbf16, #tpu.memory_space<vmem>>, %arg4: memref<1x256x128xbf16, #tpu.memory_space<vmem>>, %arg5: memref<1x2x128xf32, #tpu.memory_space<vmem>>, %arg6: memref<18x18x128xbf16, #tpu.memory_space<vmem>>, %arg7: memref<256x1152xbf16, #tpu.memory_space<vmem>>) attributes {dimension_semantics = [#tpu.dimension_semantics<parallel>], iteration_bounds = array<i64: 2>, scalar_prefetch = 0 : i64, scratch_operands = 2 : i64, tpu.core_type = #tpu.core_type<tc>, window_params = [{transform_indices = @transform_0, window_bounds = array<i64: 1, 16, 16, 128>}, {pipeline_mode = #tpu.pipeline_mode<synchronous>, transform_indices = @transform_1, window_bounds = array<i64: 2, 128>}, {pipeline_mode = #tpu.pipeline_mode<synchronous>, transform_indices = @transform_2, window_bounds = array<i64: 1152, 128>}, {transform_indices = @transform_3, window_bounds = array<i64: 1, 256, 128>}, {transform_indices = @transform_4, window_bounds = array<i64: 1, 2, 128>}]} {
    %c0 = arith.constant 0 : index
    %c0_0 = arith.constant 0 : index
    %c0_1 = arith.constant 0 : index
    %c0_2 = arith.constant 0 : index
    %0 = vector.load %arg1[%c0, %c0_0, %c0_1, %c0_2] : memref<1x16x16x128xbf16, #tpu.memory_space<vmem>>, vector<1x16x16x128xbf16>
    %1 = vector.shape_cast %0 : vector<1x16x16x128xbf16> to vector<16x16x128xbf16>
    %2 = arith.extf %1 : vector<16x16x128xbf16> to vector<16x16x128xf32>
    %c0_3 = arith.constant 0 : index
    %c0_4 = arith.constant 0 : index
    %3 = vector.load %arg2[%c0_3, %c0_4] : memref<2x128xf32, #tpu.memory_space<vmem>>, vector<1x128xf32>
    %4 = vector.shape_cast %3 : vector<1x128xf32> to vector<1x1x128xf32>
    %5 = vector.broadcast %4 : vector<1x1x128xf32> to vector<16x16x128xf32>
    %6 = arith.mulf %2, %5 : vector<16x16x128xf32>
    %c1 = arith.constant 1 : index
    %c0_5 = arith.constant 0 : index
    %7 = vector.load %arg2[%c1, %c0_5] : memref<2x128xf32, #tpu.memory_space<vmem>>, vector<1x128xf32>
    %8 = vector.shape_cast %7 : vector<1x128xf32> to vector<1x1x128xf32>
    %9 = vector.broadcast %8 : vector<1x1x128xf32> to vector<16x16x128xf32>
    %10 = arith.addf %6, %9 : vector<16x16x128xf32>
    %cst = arith.constant 0.000000e+00 : f32
    %11 = vector.broadcast %cst : f32 to vector<16x16x128xf32>
    %12 = arith.maximumf %10, %11 : vector<16x16x128xf32>
    %cst_6 = arith.constant 0.000000e+00 : bf16
    %13 = vector.broadcast %cst_6 : bf16 to vector<1x18x128xbf16>
    %c0_7 = arith.constant 0 : index
    %c0_8 = arith.constant 0 : index
    %c0_9 = arith.constant 0 : index
    %14 = vector.load %arg6[%c0_7, %c0_8, %c0_9] : memref<18x18x128xbf16, #tpu.memory_space<vmem>>, vector<1x18x128xbf16>
    tpu.vector_store %arg6[%c0_7, %c0_8, %c0_9], %13 {strides = array<i32>} : memref<18x18x128xbf16, #tpu.memory_space<vmem>>, vector<1x18x128xbf16>,
    %c17 = arith.constant 17 : index
    %c0_10 = arith.constant 0 : index
    %c0_11 = arith.constant 0 : index
    %15 = vector.load %arg6[%c17, %c0_10, %c0_11] : memref<18x18x128xbf16, #tpu.memory_space<vmem>>, vector<1x18x128xbf16>
    tpu.vector_store %arg6[%c17, %c0_10, %c0_11], %13 {strides = array<i32>} : memref<18x18x128xbf16, #tpu.memory_space<vmem>>, vector<1x18x128xbf16>,
    %cst_12 = arith.constant 0.000000e+00 : f32
    %16 = vector.broadcast %cst_12 : f32 to vector<16x1x128xf32>
    %17 = tpu.concatenate %16, %12, %16 in 1 : vector<16x1x128xf32>, vector<16x16x128xf32>, vector<16x1x128xf32> -> vector<16x18x128xf32>
    %18 = arith.truncf %17 : vector<16x18x128xf32> to vector<16x18x128xbf16>
    %c1_13 = arith.constant 1 : index
    %c0_14 = arith.constant 0 : index
    %c0_15 = arith.constant 0 : index
    %19 = vector.load %arg6[%c1_13, %c0_14, %c0_15] : memref<18x18x128xbf16, #tpu.memory_space<vmem>>, vector<16x18x128xbf16>
    tpu.vector_store %arg6[%c1_13, %c0_14, %c0_15], %18 {strides = array<i32>} : memref<18x18x128xbf16, #tpu.memory_space<vmem>>, vector<16x18x128xbf16>,
    %c0_16 = arith.constant 0 : index
    %c0_17 = arith.constant 0 : index
    %c0_18 = arith.constant 0 : index
    %20 = vector.load %arg6[%c0_16, %c0_17, %c0_18] : memref<18x18x128xbf16, #tpu.memory_space<vmem>>, vector<16x16x128xbf16>
    %21 = vector.shape_cast %20 : vector<16x16x128xbf16> to vector<256x128xbf16>
    %c0_19 = arith.constant 0 : index
    %c0_20 = arith.constant 0 : index
    %22 = vector.load %arg7[%c0_19, %c0_20] : memref<256x1152xbf16, #tpu.memory_space<vmem>>, vector<256x128xbf16>
    tpu.vector_store %arg7[%c0_19, %c0_20], %21 {strides = array<i32>} : memref<256x1152xbf16, #tpu.memory_space<vmem>>, vector<256x128xbf16>,
    %c0_21 = arith.constant 0 : index
    %c1_22 = arith.constant 1 : index
    %c0_23 = arith.constant 0 : index
    %23 = vector.load %arg6[%c0_21, %c1_22, %c0_23] : memref<18x18x128xbf16, #tpu.memory_space<vmem>>, vector<16x16x128xbf16>
    %24 = vector.shape_cast %23 : vector<16x16x128xbf16> to vector<256x128xbf16>
    %c0_24 = arith.constant 0 : index
    %c128 = arith.constant 128 : index
    %25 = vector.load %arg7[%c0_24, %c128] : memref<256x1152xbf16, #tpu.memory_space<vmem>>, vector<256x128xbf16>
    tpu.vector_store %arg7[%c0_24, %c128], %24 {strides = array<i32>} : memref<256x1152xbf16, #tpu.memory_space<vmem>>, vector<256x128xbf16>,
    %c0_25 = arith.constant 0 : index
    %c2 = arith.constant 2 : index
    %c0_26 = arith.constant 0 : index
    %26 = vector.load %arg6[%c0_25, %c2, %c0_26] : memref<18x18x128xbf16, #tpu.memory_space<vmem>>, vector<16x16x128xbf16>
    %27 = vector.shape_cast %26 : vector<16x16x128xbf16> to vector<256x128xbf16>
    %c0_27 = arith.constant 0 : index
    %c256 = arith.constant 256 : index
    %28 = vector.load %arg7[%c0_27, %c256] : memref<256x1152xbf16, #tpu.memory_space<vmem>>, vector<256x128xbf16>
    tpu.vector_store %arg7[%c0_27, %c256], %27 {strides = array<i32>} : memref<256x1152xbf16, #tpu.memory_space<vmem>>, vector<256x128xbf16>,
    %c1_28 = arith.constant 1 : index
    %c0_29 = arith.constant 0 : index
    %c0_30 = arith.constant 0 : index
    %29 = vector.load %arg6[%c1_28, %c0_29, %c0_30] : memref<18x18x128xbf16, #tpu.memory_space<vmem>>, vector<16x16x128xbf16>
    %30 = vector.shape_cast %29 : vector<16x16x128xbf16> to vector<256x128xbf16>
    %c0_31 = arith.constant 0 : index
    %c384 = arith.constant 384 : index
    %31 = vector.load %arg7[%c0_31, %c384] : memref<256x1152xbf16, #tpu.memory_space<vmem>>, vector<256x128xbf16>
    tpu.vector_store %arg7[%c0_31, %c384], %30 {strides = array<i32>} : memref<256x1152xbf16, #tpu.memory_space<vmem>>, vector<256x128xbf16>,
    %c1_32 = arith.constant 1 : index
    %c1_33 = arith.constant 1 : index
    %c0_34 = arith.constant 0 : index
    %32 = vector.load %arg6[%c1_32, %c1_33, %c0_34] : memref<18x18x128xbf16, #tpu.memory_space<vmem>>, vector<16x16x128xbf16>
    %33 = vector.shape_cast %32 : vector<16x16x128xbf16> to vector<256x128xbf16>
    %c0_35 = arith.constant 0 : index
    %c512 = arith.constant 512 : index
    %34 = vector.load %arg7[%c0_35, %c512] : memref<256x1152xbf16, #tpu.memory_space<vmem>>, vector<256x128xbf16>
    tpu.vector_store %arg7[%c0_35, %c512], %33 {strides = array<i32>} : memref<256x1152xbf16, #tpu.memory_space<vmem>>, vector<256x128xbf16>,
    %c1_36 = arith.constant 1 : index
    %c2_37 = arith.constant 2 : index
    %c0_38 = arith.constant 0 : index
    %35 = vector.load %arg6[%c1_36, %c2_37, %c0_38] : memref<18x18x128xbf16, #tpu.memory_space<vmem>>, vector<16x16x128xbf16>
    %36 = vector.shape_cast %35 : vector<16x16x128xbf16> to vector<256x128xbf16>
    %c0_39 = arith.constant 0 : index
    %c640 = arith.constant 640 : index
    %37 = vector.load %arg7[%c0_39, %c640] : memref<256x1152xbf16, #tpu.memory_space<vmem>>, vector<256x128xbf16>
    tpu.vector_store %arg7[%c0_39, %c640], %36 {strides = array<i32>} : memref<256x1152xbf16, #tpu.memory_space<vmem>>, vector<256x128xbf16>,
    %c2_40 = arith.constant 2 : index
    %c0_41 = arith.constant 0 : index
    %c0_42 = arith.constant 0 : index
    %38 = vector.load %arg6[%c2_40, %c0_41, %c0_42] : memref<18x18x128xbf16, #tpu.memory_space<vmem>>, vector<16x16x128xbf16>
    %39 = vector.shape_cast %38 : vector<16x16x128xbf16> to vector<256x128xbf16>
    %c0_43 = arith.constant 0 : index
    %c768 = arith.constant 768 : index
    %40 = vector.load %arg7[%c0_43, %c768] : memref<256x1152xbf16, #tpu.memory_space<vmem>>, vector<256x128xbf16>
    tpu.vector_store %arg7[%c0_43, %c768], %39 {strides = array<i32>} : memref<256x1152xbf16, #tpu.memory_space<vmem>>, vector<256x128xbf16>,
    %c2_44 = arith.constant 2 : index
    %c1_45 = arith.constant 1 : index
    %c0_46 = arith.constant 0 : index
    %41 = vector.load %arg6[%c2_44, %c1_45, %c0_46] : memref<18x18x128xbf16, #tpu.memory_space<vmem>>, vector<16x16x128xbf16>
    %42 = vector.shape_cast %41 : vector<16x16x128xbf16> to vector<256x128xbf16>
    %c0_47 = arith.constant 0 : index
    %c896 = arith.constant 896 : index
    %43 = vector.load %arg7[%c0_47, %c896] : memref<256x1152xbf16, #tpu.memory_space<vmem>>, vector<256x128xbf16>
    tpu.vector_store %arg7[%c0_47, %c896], %42 {strides = array<i32>} : memref<256x1152xbf16, #tpu.memory_space<vmem>>, vector<256x128xbf16>,
    %c2_48 = arith.constant 2 : index
    %c2_49 = arith.constant 2 : index
    %c0_50 = arith.constant 0 : index
    %44 = vector.load %arg6[%c2_48, %c2_49, %c0_50] : memref<18x18x128xbf16, #tpu.memory_space<vmem>>, vector<16x16x128xbf16>
    %45 = vector.shape_cast %44 : vector<16x16x128xbf16> to vector<256x128xbf16>
    %c0_51 = arith.constant 0 : index
    %c1024 = arith.constant 1024 : index
    %46 = vector.load %arg7[%c0_51, %c1024] : memref<256x1152xbf16, #tpu.memory_space<vmem>>, vector<256x128xbf16>
    tpu.vector_store %arg7[%c0_51, %c1024], %45 {strides = array<i32>} : memref<256x1152xbf16, #tpu.memory_space<vmem>>, vector<256x128xbf16>,
    %c0_52 = arith.constant 0 : index
    %c0_53 = arith.constant 0 : index
    %47 = vector.load %arg7[%c0_52, %c0_53] : memref<256x1152xbf16, #tpu.memory_space<vmem>>, vector<256x1152xbf16>
    %c0_54 = arith.constant 0 : index
    %c0_55 = arith.constant 0 : index
    %48 = vector.load %arg3[%c0_54, %c0_55] : memref<1152x128xbf16, #tpu.memory_space<vmem>>, vector<1152x128xbf16>
    %cst_56 = arith.constant dense<0.000000e+00> : vector<256x128xf32>
    %49 = tpu.matmul %47, %48, %cst_56 {dimension_numbers = #tpu.dot_dimension_numbers<[1], [0], [0], [1], [0, 0, 1, 1], [], []>} : vector<256x1152xbf16>, vector<1152x128xbf16>, vector<256x128xf32> -> vector<256x128xf32>
    %50 = vector.shape_cast %49 : vector<256x128xf32> to vector<1x256x128xf32>
    %51 = arith.truncf %50 : vector<1x256x128xf32> to vector<1x256x128xbf16>
    %c0_57 = arith.constant 0 : index
    %c0_58 = arith.constant 0 : index
    %c0_59 = arith.constant 0 : index
    %52 = vector.load %arg4[%c0_57, %c0_58, %c0_59] : memref<1x256x128xbf16, #tpu.memory_space<vmem>>, vector<1x256x128xbf16>
    tpu.vector_store %arg4[%c0_57, %c0_58, %c0_59], %51 {strides = array<i32>} : memref<1x256x128xbf16, #tpu.memory_space<vmem>>, vector<1x256x128xbf16>,
    %cst_60 = arith.constant dense<0.000000e+00> : vector<128xf32>
    %53 = vector.multi_reduction <add>, %49, %cst_60 [0] : vector<256x128xf32> to vector<128xf32>
    %54 = vector.shape_cast %53 : vector<128xf32> to vector<1x128xf32>
    %c0_61 = arith.constant 0 : index
    %c0_62 = arith.constant 0 : index
    %c0_63 = arith.constant 0 : index
    %55 = vector.load %arg5[%c0_61, %c0_62, %c0_63] : memref<1x2x128xf32, #tpu.memory_space<vmem>>, vector<1x1x128xf32>
    %56 = vector.shape_cast %55 : vector<1x1x128xf32> to vector<1x128xf32>
    %57 = vector.shape_cast %54 : vector<1x128xf32> to vector<1x1x128xf32>
    tpu.vector_store %arg5[%c0_61, %c0_62, %c0_63], %57 {strides = array<i32>} : memref<1x2x128xf32, #tpu.memory_space<vmem>>, vector<1x1x128xf32>,
    %58 = arith.mulf %49, %49 : vector<256x128xf32>
    %cst_64 = arith.constant dense<0.000000e+00> : vector<128xf32>
    %59 = vector.multi_reduction <add>, %58, %cst_64 [0] : vector<256x128xf32> to vector<128xf32>
    %60 = vector.shape_cast %59 : vector<128xf32> to vector<1x128xf32>
    %c0_65 = arith.constant 0 : index
    %c1_66 = arith.constant 1 : index
    %c0_67 = arith.constant 0 : index
    %61 = vector.load %arg5[%c0_65, %c1_66, %c0_67] : memref<1x2x128xf32, #tpu.memory_space<vmem>>, vector<1x1x128xf32>
    %62 = vector.shape_cast %61 : vector<1x1x128xf32> to vector<1x128xf32>
    %63 = vector.shape_cast %60 : vector<1x128xf32> to vector<1x1x128xf32>
    tpu.vector_store %arg5[%c0_65, %c1_66, %c0_67], %63 {strides = array<i32>} : memref<1x2x128xf32, #tpu.memory_space<vmem>>, vector<1x1x128xf32>,
    return
  }
  func.func @transform_0(%arg0: i32) -> (i32, i32, i32, i32) {
    %c0_i32 = arith.constant 0 : i32
    %c0_i32_0 = arith.constant 0 : i32
    %c0_i32_1 = arith.constant 0 : i32
    %c0_i32_2 = arith.constant 0 : i32
    return %arg0, %c0_i32, %c0_i32_0, %c0_i32_1 : i32, i32, i32, i32
  }
  func.func @transform_1(%arg0: i32) -> (i32, i32) {
    %c0_i32 = arith.constant 0 : i32
    %c0_i32_0 = arith.constant 0 : i32
    %c0_i32_1 = arith.constant 0 : i32
    return %c0_i32, %c0_i32_0 : i32, i32
  }
  func.func @transform_2(%arg0: i32) -> (i32, i32) {
    %c0_i32 = arith.constant 0 : i32
    %c0_i32_0 = arith.constant 0 : i32
    %c0_i32_1 = arith.constant 0 : i32
    return %c0_i32, %c0_i32_0 : i32, i32
  }
  func.func @transform_3(%arg0: i32) -> (i32, i32, i32) {
    %c0_i32 = arith.constant 0 : i32
    %c0_i32_0 = arith.constant 0 : i32
    %c0_i32_1 = arith.constant 0 : i32
    return %arg0, %c0_i32, %c0_i32_0 : i32, i32, i32
  }
  func.func @transform_4(%arg0: i32) -> (i32, i32, i32) {
    %c0_i32 = arith.constant 0 : i32
    %c0_i32_0 = arith.constant 0 : i32
    %c0_i32_1 = arith.constant 0 : i32
    return %arg0, %c0_i32, %c0_i32_0 : i32, i32, i32
  }
}

module attributes {stable_mosaic.version = 11 : i64} {
  func.func @bn_add_relu_kernel(%arg0: i32, %arg1: memref<512x128xbf16, #tpu.memory_space<vmem>>, %arg2: memref<2x128xf32, #tpu.memory_space<vmem>>, %arg3: memref<512x128xf32, #tpu.memory_space<vmem>>, %arg4: memref<512x128xf32, #tpu.memory_space<vmem>>) attributes {dimension_semantics = [#tpu.dimension_semantics<parallel>], iteration_bounds = array<i64: 1>, scalar_prefetch = 0 : i64, scratch_operands = 0 : i64, tpu.core_type = #tpu.core_type<tc>, window_params = [{transform_indices = @transform_0, window_bounds = array<i64: 512, 128>}, {pipeline_mode = #tpu.pipeline_mode<synchronous>, transform_indices = @transform_1, window_bounds = array<i64: 2, 128>}, {transform_indices = @transform_2, window_bounds = array<i64: 512, 128>}, {transform_indices = @transform_3, window_bounds = array<i64: 512, 128>}]} {
    %c0 = arith.constant 0 : index
    %c0_0 = arith.constant 0 : index
    %0 = vector.load %arg1[%c0, %c0_0] : memref<512x128xbf16, #tpu.memory_space<vmem>>, vector<512x128xbf16>
    %1 = arith.extf %0 : vector<512x128xbf16> to vector<512x128xf32>
    %c0_1 = arith.constant 0 : index
    %c0_2 = arith.constant 0 : index
    %2 = vector.load %arg2[%c0_1, %c0_2] : memref<2x128xf32, #tpu.memory_space<vmem>>, vector<1x128xf32>
    %3 = vector.broadcast %2 : vector<1x128xf32> to vector<512x128xf32>
    %4 = arith.mulf %1, %3 : vector<512x128xf32>
    %c1 = arith.constant 1 : index
    %c0_3 = arith.constant 0 : index
    %5 = vector.load %arg2[%c1, %c0_3] : memref<2x128xf32, #tpu.memory_space<vmem>>, vector<1x128xf32>
    %6 = vector.broadcast %5 : vector<1x128xf32> to vector<512x128xf32>
    %7 = arith.addf %4, %6 : vector<512x128xf32>
    %c0_4 = arith.constant 0 : index
    %c0_5 = arith.constant 0 : index
    %8 = vector.load %arg3[%c0_4, %c0_5] : memref<512x128xf32, #tpu.memory_space<vmem>>, vector<512x128xf32>
    %9 = arith.addf %7, %8 : vector<512x128xf32>
    %cst = arith.constant 0.000000e+00 : f32
    %10 = vector.broadcast %cst : f32 to vector<512x128xf32>
    %11 = arith.maximumf %9, %10 : vector<512x128xf32>
    %c0_6 = arith.constant 0 : index
    %c0_7 = arith.constant 0 : index
    %12 = vector.load %arg4[%c0_6, %c0_7] : memref<512x128xf32, #tpu.memory_space<vmem>>, vector<512x128xf32>
    tpu.vector_store %arg4[%c0_6, %c0_7], %11 {strides = array<i32>} : memref<512x128xf32, #tpu.memory_space<vmem>>, vector<512x128xf32>,
    return
  }
  func.func @transform_0(%arg0: i32) -> (i32, i32) {
    %c0_i32 = arith.constant 0 : i32
    %c0_i32_0 = arith.constant 0 : i32
    return %arg0, %c0_i32 : i32, i32
  }
  func.func @transform_1(%arg0: i32) -> (i32, i32) {
    %c0_i32 = arith.constant 0 : i32
    %c0_i32_0 = arith.constant 0 : i32
    %c0_i32_1 = arith.constant 0 : i32
    return %c0_i32, %c0_i32_0 : i32, i32
  }
  func.func @transform_2(%arg0: i32) -> (i32, i32) {
    %c0_i32 = arith.constant 0 : i32
    %c0_i32_0 = arith.constant 0 : i32
    return %arg0, %c0_i32 : i32, i32
  }
  func.func @transform_3(%arg0: i32) -> (i32, i32) {
    %c0_i32 = arith.constant 0 : i32
    %c0_i32_0 = arith.constant 0 : i32
    return %arg0, %c0_i32 : i32, i32
  }
}

module attributes {stable_mosaic.version = 11 : i64} {
  func.func @bn_conv1x1_stats_kernel(%arg0: i32, %arg1: memref<512x128xbf16, #tpu.memory_space<vmem>>, %arg2: memref<2x128xf32, #tpu.memory_space<vmem>>, %arg3: memref<128x128xbf16, #tpu.memory_space<vmem>>, %arg4: memref<512x128xbf16, #tpu.memory_space<vmem>>, %arg5: memref<1x2x128xf32, #tpu.memory_space<vmem>>) attributes {dimension_semantics = [#tpu.dimension_semantics<parallel>], iteration_bounds = array<i64: 1>, scalar_prefetch = 0 : i64, scratch_operands = 0 : i64, tpu.core_type = #tpu.core_type<tc>, window_params = [{transform_indices = @transform_0, window_bounds = array<i64: 512, 128>}, {pipeline_mode = #tpu.pipeline_mode<synchronous>, transform_indices = @transform_1, window_bounds = array<i64: 2, 128>}, {pipeline_mode = #tpu.pipeline_mode<synchronous>, transform_indices = @transform_2, window_bounds = array<i64: 128, 128>}, {transform_indices = @transform_3, window_bounds = array<i64: 512, 128>}, {transform_indices = @transform_4, window_bounds = array<i64: 1, 2, 128>}]} {
    %c0 = arith.constant 0 : index
    %c0_0 = arith.constant 0 : index
    %0 = vector.load %arg1[%c0, %c0_0] : memref<512x128xbf16, #tpu.memory_space<vmem>>, vector<512x128xbf16>
    %1 = arith.extf %0 : vector<512x128xbf16> to vector<512x128xf32>
    %c0_1 = arith.constant 0 : index
    %c0_2 = arith.constant 0 : index
    %2 = vector.load %arg2[%c0_1, %c0_2] : memref<2x128xf32, #tpu.memory_space<vmem>>, vector<1x128xf32>
    %3 = vector.broadcast %2 : vector<1x128xf32> to vector<512x128xf32>
    %4 = arith.mulf %1, %3 : vector<512x128xf32>
    %c1 = arith.constant 1 : index
    %c0_3 = arith.constant 0 : index
    %5 = vector.load %arg2[%c1, %c0_3] : memref<2x128xf32, #tpu.memory_space<vmem>>, vector<1x128xf32>
    %6 = vector.broadcast %5 : vector<1x128xf32> to vector<512x128xf32>
    %7 = arith.addf %4, %6 : vector<512x128xf32>
    %cst = arith.constant 0.000000e+00 : f32
    %8 = vector.broadcast %cst : f32 to vector<512x128xf32>
    %9 = arith.maximumf %7, %8 : vector<512x128xf32>
    %10 = arith.truncf %9 : vector<512x128xf32> to vector<512x128xbf16>
    %c0_4 = arith.constant 0 : index
    %c0_5 = arith.constant 0 : index
    %11 = vector.load %arg3[%c0_4, %c0_5] : memref<128x128xbf16, #tpu.memory_space<vmem>>, vector<128x128xbf16>
    %cst_6 = arith.constant dense<0.000000e+00> : vector<512x128xf32>
    %12 = tpu.matmul %10, %11, %cst_6 {dimension_numbers = #tpu.dot_dimension_numbers<[1], [0], [0], [1], [0, 0, 1, 1], [], []>} : vector<512x128xbf16>, vector<128x128xbf16>, vector<512x128xf32> -> vector<512x128xf32>
    %13 = arith.truncf %12 : vector<512x128xf32> to vector<512x128xbf16>
    %c0_7 = arith.constant 0 : index
    %c0_8 = arith.constant 0 : index
    %14 = vector.load %arg4[%c0_7, %c0_8] : memref<512x128xbf16, #tpu.memory_space<vmem>>, vector<512x128xbf16>
    tpu.vector_store %arg4[%c0_7, %c0_8], %13 {strides = array<i32>} : memref<512x128xbf16, #tpu.memory_space<vmem>>, vector<512x128xbf16>,
    %cst_9 = arith.constant dense<0.000000e+00> : vector<128xf32>
    %15 = vector.multi_reduction <add>, %12, %cst_9 [0] : vector<512x128xf32> to vector<128xf32>
    %16 = vector.shape_cast %15 : vector<128xf32> to vector<1x128xf32>
    %c0_10 = arith.constant 0 : index
    %c0_11 = arith.constant 0 : index
    %c0_12 = arith.constant 0 : index
    %17 = vector.load %arg5[%c0_10, %c0_11, %c0_12] : memref<1x2x128xf32, #tpu.memory_space<vmem>>, vector<1x1x128xf32>
    %18 = vector.shape_cast %17 : vector<1x1x128xf32> to vector<1x128xf32>
    %19 = vector.shape_cast %16 : vector<1x128xf32> to vector<1x1x128xf32>
    tpu.vector_store %arg5[%c0_10, %c0_11, %c0_12], %19 {strides = array<i32>} : memref<1x2x128xf32, #tpu.memory_space<vmem>>, vector<1x1x128xf32>,
    %20 = arith.mulf %12, %12 : vector<512x128xf32>
    %cst_13 = arith.constant dense<0.000000e+00> : vector<128xf32>
    %21 = vector.multi_reduction <add>, %20, %cst_13 [0] : vector<512x128xf32> to vector<128xf32>
    %22 = vector.shape_cast %21 : vector<128xf32> to vector<1x128xf32>
    %c0_14 = arith.constant 0 : index
    %c1_15 = arith.constant 1 : index
    %c0_16 = arith.constant 0 : index
    %23 = vector.load %arg5[%c0_14, %c1_15, %c0_16] : memref<1x2x128xf32, #tpu.memory_space<vmem>>, vector<1x1x128xf32>
    %24 = vector.shape_cast %23 : vector<1x1x128xf32> to vector<1x128xf32>
    %25 = vector.shape_cast %22 : vector<1x128xf32> to vector<1x1x128xf32>
    tpu.vector_store %arg5[%c0_14, %c1_15, %c0_16], %25 {strides = array<i32>} : memref<1x2x128xf32, #tpu.memory_space<vmem>>, vector<1x1x128xf32>,
    return
  }
  func.func @transform_0(%arg0: i32) -> (i32, i32) {
    %c0_i32 = arith.constant 0 : i32
    %c0_i32_0 = arith.constant 0 : i32
    return %arg0, %c0_i32 : i32, i32
  }
  func.func @transform_1(%arg0: i32) -> (i32, i32) {
    %c0_i32 = arith.constant 0 : i32
    %c0_i32_0 = arith.constant 0 : i32
    %c0_i32_1 = arith.constant 0 : i32
    return %c0_i32, %c0_i32_0 : i32, i32
  }
  func.func @transform_2(%arg0: i32) -> (i32, i32) {
    %c0_i32 = arith.constant 0 : i32
    %c0_i32_0 = arith.constant 0 : i32
    %c0_i32_1 = arith.constant 0 : i32
    return %c0_i32, %c0_i32_0 : i32, i32
  }
  func.func @transform_3(%arg0: i32) -> (i32, i32) {
    %c0_i32 = arith.constant 0 : i32
    %c0_i32_0 = arith.constant 0 : i32
    return %arg0, %c0_i32 : i32, i32
  }
  func.func @transform_4(%arg0: i32) -> (i32, i32, i32) {
    %c0_i32 = arith.constant 0 : i32
    %c0_i32_0 = arith.constant 0 : i32
    %c0_i32_1 = arith.constant 0 : i32
    return %arg0, %c0_i32, %c0_i32_0 : i32, i32, i32
  }
}

</mosaic_0001>

<bundles_post_ra>
// kernel: bottleneck_forward.4
= control target key start
LH: loop header
LB: loop body
LE: loop exit
PB: predicated region body
PF: predicated region fallthrough
CT: control target
= control target key end

     0   :  { %s1563_s1 = inlined_call_operand.vmem [shape: bf16[128,128], index: 1, kind: input, shape index: {}]   ;;  %s1564_s0 = inlined_call_operand.vmem [shape: f32[512,128], index: 0, kind: input, shape index: {}]   ;;  %s1565_s2 = inlined_call_operand.vmem [shape: bf16[512,128], index: 2, kind: output, shape index: {0}]   ;;  %s1566_s3 = inlined_call_operand.vmem [shape: f32[1,2,128], index: 3, kind: output, shape index: {1}]  }
   0x1   :  { %v721_v0 = vld [vmem:[%s1563_s1 + $0x38] sm:$0xff]  ;;  %v720_v1 = vld [vmem:[%s1563_s1 + $0x30] sm:$0xff]  ;;  %v719_v2 = vld [vmem:[%s1563_s1 + $0x28] sm:$0xff] }
   0x2   :  { %173 = vmatpush.bf16.msra.mxu0 %v721_v0  ;;  %913 = vmatpush.bf16.msra.mxu1 %v721_v0  ;;  %v718_v3 = vld [vmem:[%s1563_s1 + $0x20] sm:$0xff]  ;;  %v717_v4 = vld [vmem:[%s1563_s1 + $0x18] sm:$0xff]  ;;  %v716_v5 = vld [vmem:[%s1563_s1 + $0x10] sm:$0xff] }
   0x3   :  { %914 = vmatpush.bf16.msra.mxu2 %v721_v0  ;;  %915 = vmatpush.bf16.msra.mxu3 %v721_v0  ;;  %v715_v6 = vld [vmem:[%s1563_s1 + $0x8] sm:$0xff]  ;;  %v714_v7 = vld [vmem:[%s1563_s1] sm:$0xff]  ;;  %v15_v14 = vld [vmem:[%s1564_s0 + $0x10] sm:$0xff] }
   0x4   :  { %v13_v8 = vld [vmem:[%s1564_s0] sm:$0xff]  ;;  %v14_v9 = vld [vmem:[%s1564_s0 + $0x8] sm:$0xff]  ;;  %v16_v15 = vld [vmem:[%s1564_s0 + $0x18] sm:$0xff] }
   0x5   :  { %v29_v10 = vld [vmem:[%s1564_s0 + $0x80] sm:$0xff]  ;;  %v30_v11 = vld [vmem:[%s1564_s0 + $0x88] sm:$0xff]  ;;  %v77_v12 = vpack.c.bf16 %v14_v9, %v13_v8  ;;  %v31_v16 = vld [vmem:[%s1564_s0 + $0x90] sm:$0xff]  ;;  %v78_v18 = vpack.c.bf16 %v16_v15, %v15_v14 }
   0x6   :  { %174 = vmatpush.bf16.msra.mxu0 %v720_v1  ;;  %916 = vmatpush.bf16.msra.mxu1 %v720_v1  ;;  %v85_v13 = vpack.c.bf16 %v30_v11, %v29_v10  ;;  %v32_v17 = vld [vmem:[%s1564_s0 + $0x98] sm:$0xff]  ;;  %v45_v20 = vld [vmem:[%s1564_s0 + $0x100] sm:$0xff]  ;;  %v46_v21 = vld [vmem:[%s1564_s0 + $0x108] sm:$0xff] }
   0x7   :  { %917 = vmatpush.bf16.msra.mxu2 %v720_v1  ;;  %918 = vmatpush.bf16.msra.mxu3 %v720_v1  ;;  %v86_v19 = vpack.c.bf16 %v32_v17, %v31_v16  ;;  %v93_v22 = vpack.c.bf16 %v46_v21, %v45_v20  ;;  %v17_v23 = vld [vmem:[%s1564_s0 + $0x20] sm:$0xff]  ;;  %v18_v24 = vld [vmem:[%s1564_s0 + $0x28] sm:$0xff]  ;;  %v47_v29 = vld [vmem:[%s1564_s0 + $0x110] sm:$0xff] }
   0x8   :  { %v33_v25 = vld [vmem:[%s1564_s0 + $0xa0] sm:$0xff]  ;;  %v34_v26 = vld [vmem:[%s1564_s0 + $0xa8] sm:$0xff]  ;;  %v79_v27 = vpack.c.bf16 %v18_v24, %v17_v23  ;;  %v48_v30 = vld [vmem:[%s1564_s0 + $0x118] sm:$0xff] }
   0x9   :  { %v87_v28 = vpack.c.bf16 %v34_v26, %v33_v25  ;;  %v94_v31 = vpack.c.bf16 %v48_v30, %v47_v29  ;;  %v19_v32 = vld [vmem:[%s1564_s0 + $0x30] sm:$0xff]  ;;  %v20_v33 = vld [vmem:[%s1564_s0 + $0x38] sm:$0xff]  ;;  %v49_v38 = vld [vmem:[%s1564_s0 + $0x120] sm:$0xff] }
   0xa   :  { %175 = vmatpush.bf16.msra.mxu0 %v719_v2  ;;  %919 = vmatpush.bf16.msra.mxu1 %v719_v2  ;;  %v35_v34 = vld [vmem:[%s1564_s0 + $0xb0] sm:$0xff]  ;;  %v36_v35 = vld [vmem:[%s1564_s0 + $0xb8] sm:$0xff]  ;;  %v80_v36 = vpack.c.bf16 %v20_v33, %v19_v32  ;;  %v50_v39 = vld [vmem:[%s1564_s0 + $0x128] sm:$0xff] }
   0xb   :  { %920 = vmatpush.bf16.msra.mxu2 %v719_v2  ;;  %921 = vmatpush.bf16.msra.mxu3 %v719_v2  ;;  %v88_v37 = vpack.c.bf16 %v36_v35, %v35_v34  ;;  %v61_v40 = vld [vmem:[%s1564_s0 + $0x180] sm:$0xff]  ;;  %v95_v41 = vpack.c.bf16 %v50_v39, %v49_v38  ;;  %v62_v42 = vld [vmem:[%s1564_s0 + $0x188] sm:$0xff]  ;;  %v51_v50 = vld [vmem:[%s1564_s0 + $0x130] sm:$0xff] }
   0xc   :  { %v101_v43 = vpack.c.bf16 %v62_v42, %v61_v40  ;;  %v21_v44 = vld [vmem:[%s1564_s0 + $0x40] sm:$0xff]  ;;  %v22_v45 = vld [vmem:[%s1564_s0 + $0x48] sm:$0xff]  ;;  %v52_v51 = vld [vmem:[%s1564_s0 + $0x138] sm:$0xff] }
   0xd   :  { %v37_v46 = vld [vmem:[%s1564_s0 + $0xc0] sm:$0xff]  ;;  %v38_v47 = vld [vmem:[%s1564_s0 + $0xc8] sm:$0xff]  ;;  %v81_v48 = vpack.c.bf16 %v22_v45, %v21_v44  ;;  %v63_v52 = vld [vmem:[%s1564_s0 + $0x190] sm:$0xff]  ;;  %v96_v53 = vpack.c.bf16 %v52_v51, %v51_v50 }
   0xe   :  { %176 = vmatpush.bf16.msra.mxu0 %v718_v3  ;;  %922 = vmatpush.bf16.msra.mxu1 %v718_v3  ;;  %v89_v49 = vpack.c.bf16 %v38_v47, %v37_v46  ;;  %v64_v54 = vld [vmem:[%s1564_s0 + $0x198] sm:$0xff]  ;;  %v23_v56 = vld [vmem:[%s1564_s0 + $0x50] sm:$0xff]  ;;  %v53_v62 = vld [vmem:[%s1564_s0 + $0x140] sm:$0xff] }
   0xf   :  { %923 = vmatpush.bf16.msra.mxu2 %v718_v3  ;;  %924 = vmatpush.bf16.msra.mxu3 %v718_v3  ;;  %v102_v55 = vpack.c.bf16 %v64_v54, %v63_v52  ;;  %v24_v57 = vld [vmem:[%s1564_s0 + $0x58] sm:$0xff]  ;;  %v39_v58 = vld [vmem:[%s1564_s0 + $0xd0] sm:$0xff]  ;;  %v54_v63 = vld [vmem:[%s1564_s0 + $0x148] sm:$0xff] }
  0x10   :  { %v40_v59 = vld [vmem:[%s1564_s0 + $0xd8] sm:$0xff]  ;;  %v82_v60 = vpack.c.bf16 %v24_v57, %v23_v56  ;;  %v65_v0 = vld [vmem:[%s1564_s0 + $0x1a0] sm:$0xff]  ;;  %v97_v1 = vpack.c.bf16 %v54_v63, %v53_v62  ;;  %v66_v2 = vld [vmem:[%s1564_s0 + $0x1a8] sm:$0xff] }
  0x11   :  { %v90_v61 = vpack.c.bf16 %v40_v59, %v39_v58  ;;  %v103_v3 = vpack.c.bf16 %v66_v2, %v65_v0  ;;  %v55_v10 = vld [vmem:[%s1564_s0 + $0x150] sm:$0xff]  ;;  %v56_v11 = vld [vmem:[%s1564_s0 + $0x158] sm:$0xff]  ;;  %v58_v23 = vld [vmem:[%s1564_s0 + $0x168] sm:$0xff] }
  0x12   :  { %177 = vmatpush.bf16.msra.mxu0 %v717_v4  ;;  %925 = vmatpush.bf16.msra.mxu1 %v717_v4  ;;  %v68_v14 = vld [vmem:[%s1564_s0 + $0x1b8] sm:$0xff]  ;;  %v27_v16 = vld [vmem:[%s1564_s0 + $0x70] sm:$0xff]  ;;  %v69_v24 = vld [vmem:[%s1564_s0 + $0x1c0] sm:$0xff] }
  0x13   :  { %926 = vmatpush.bf16.msra.mxu2 %v717_v4  ;;  %927 = vmatpush.bf16.msra.mxu3 %v717_v4  ;;  %v25_v4 = vld [vmem:[%s1564_s0 + $0x60] sm:$0xff]  ;;  %v28_v17 = vld [vmem:[%s1564_s0 + $0x78] sm:$0xff]  ;;  %v70_v26 = vld [vmem:[%s1564_s0 + $0x1c8] sm:$0xff] }
  0x14   :  { %v84_v20 = vpack.c.bf16 %v28_v17, %v27_v16  ;;  %v59_v30 = vld [vmem:[%s1564_s0 + $0x170] sm:$0xff]  ;;  %v72_v34 = vld [vmem:[%s1564_s0 + $0x1d8] sm:$0xff] }
  0x15   :  { %v71_v32 = vld [vmem:[%s1564_s0 + $0x1d0] sm:$0xff] }
  0x16   :  { %178 = vmatpush.bf16.msra.mxu0 %v716_v5  ;;  %928 = vmatpush.bf16.msra.mxu1 %v716_v5  ;;  %v106_v35 = vpack.c.bf16 %v72_v34, %v71_v32  ;;  %v75_v2 = vld [vmem:[%s1564_s0 + $0x1f0] sm:$0xff] }
  0x17   :  { %929 = vmatpush.bf16.msra.mxu2 %v716_v5  ;;  %930 = vmatpush.bf16.msra.mxu3 %v716_v5  ;;  %v26_v5 = vld [vmem:[%s1564_s0 + $0x68] sm:$0xff] }
  0x18   :  { %v83_v8 = vpack.c.bf16 %v26_v5, %v25_v4 }
  0x1a   :  { %179 = vmatpush.bf16.msra.mxu0 %v715_v6  ;;  %931 = vmatpush.bf16.msra.mxu1 %v715_v6 }
  0x1b   :  { %932 = vmatpush.bf16.msra.mxu2 %v715_v6  ;;  %933 = vmatpush.bf16.msra.mxu3 %v715_v6  ;;  %v41_v6 = vld [vmem:[%s1564_s0 + $0xe0] sm:$0xff] }
  0x1e   :  { %180 = vmatpush.bf16.msra.mxu0 %v714_v7  ;;  %934 = vmatpush.bf16.msra.mxu1 %v714_v7 }
  0x1f   :  { %935 = vmatpush.bf16.msra.mxu2 %v714_v7  ;;  %936 = vmatpush.bf16.msra.mxu3 %v714_v7  ;;  %v42_v7 = vld [vmem:[%s1564_s0 + $0xe8] sm:$0xff] }
  0x20   :  { %v91_v9 = vpack.c.bf16 %v42_v7, %v41_v6 }
  0x21   :  { %181 = vmatmul.bf16.vlgmr.msra.gmra.mxu0 %v77_v12  ;;  %221 = vmatmul.bf16.vlgmr.msra.gmra.mxu1 %v85_v13  ;;  %v67_v12 = vld [vmem:[%s1564_s0 + $0x1b0] sm:$0xff]  ;;  %v98_v13 = vpack.c.bf16 %v56_v11, %v55_v10 }
  0x22   :  { %261 = vmatmul.bf16.vlgmr.msra.gmra.mxu2 %v93_v22  ;;  %301 = vmatmul.bf16.vlgmr.msra.gmra.mxu3 %v101_v43  ;;  %v104_v15 = vpack.c.bf16 %v68_v14, %v67_v12  ;;  %v57_v22 = vld [vmem:[%s1564_s0 + $0x160] sm:$0xff] }
  0x23   :  { %v99_v25 = vpack.c.bf16 %v58_v23, %v57_v22 }
  0x31   :  { %186 = vmatmul.bf16.gmra.mxu0 %v78_v18  ;;  %226 = vmatmul.bf16.gmra.mxu1 %v86_v19  ;;  %v43_v18 = vld [vmem:[%s1564_s0 + $0xf0] sm:$0xff]  ;;  %v44_v19 = vld [vmem:[%s1564_s0 + $0xf8] sm:$0xff] }
  0x32   :  { %266 = vmatmul.bf16.gmra.mxu2 %v94_v31  ;;  %306 = vmatmul.bf16.gmra.mxu3 %v102_v55  ;;  %v92_v21 = vpack.c.bf16 %v44_v19, %v43_v18  ;;  %v60_v31 = vld [vmem:[%s1564_s0 + $0x178] sm:$0xff] }
  0x33   :  { %v100_v33 = vpack.c.bf16 %v60_v31, %v59_v30 }
  0x41   :  { %191 = vmatmul.bf16.gmra.mxu0 %v79_v27  ;;  %231 = vmatmul.bf16.gmra.mxu1 %v87_v28  ;;  %v105_v27 = vpack.c.bf16 %v70_v26, %v69_v24 }
  0x42   :  { %271 = vmatmul.bf16.gmra.mxu2 %v95_v41  ;;  %311 = vmatmul.bf16.gmra.mxu3 %v103_v3  ;;  %v76_v3 = vld [vmem:[%s1564_s0 + $0x1f8] sm:$0xff] }
  0x43   :  { %v108_v5 = vpack.c.bf16 %v76_v3, %v75_v2 }
  0x51   :  { %196 = vmatmul.bf16.gmra.mxu0 %v80_v36  ;;  %236 = vmatmul.bf16.gmra.mxu1 %v88_v37 }
  0x52   :  { %276 = vmatmul.bf16.gmra.mxu2 %v96_v53  ;;  %316 = vmatmul.bf16.gmra.mxu3 %v104_v15 }
  0x61   :  { %201 = vmatmul.bf16.gmra.mxu0 %v81_v48  ;;  %241 = vmatmul.bf16.gmra.mxu1 %v89_v49  ;;  %v73_v48 = vld [vmem:[%s1564_s0 + $0x1e0] sm:$0xff]  ;;  %v74_v49 = vld [vmem:[%s1564_s0 + $0x1e8] sm:$0xff] }
  0x62   :  { %281 = vmatmul.bf16.gmra.mxu2 %v97_v1  ;;  %321 = vmatmul.bf16.gmra.mxu3 %v105_v27  ;;  %v107_v51 = vpack.c.bf16 %v74_v49, %v73_v48 }
  0x71   :  { %206 = vmatmul.bf16.gmra.mxu0 %v82_v60  ;;  %246 = vmatmul.bf16.gmra.mxu1 %v90_v61 }
  0x72   :  { %286 = vmatmul.bf16.gmra.mxu2 %v98_v13  ;;  %326 = vmatmul.bf16.gmra.mxu3 %v106_v35 }
  0x81   :  { %211 = vmatmul.bf16.gmra.mxu0 %v83_v8  ;;  %251 = vmatmul.bf16.gmra.mxu1 %v91_v9 }
  0x82   :  { %291 = vmatmul.bf16.gmra.mxu2 %v99_v25  ;;  %331 = vmatmul.bf16.gmra.mxu3 %v107_v51 }
  0x91   :  { %216 = vmatmul.bf16.gmra.mxu0 %v84_v20  ;;  %256 = vmatmul.bf16.gmra.mxu1 %v92_v21 }
  0x92   :  { %296 = vmatmul.bf16.gmra.mxu2 %v100_v33  ;;  %336 = vmatmul.bf16.gmra.mxu3 %v108_v5 }
  0x9e   :  { %v182_v28 = vpop.f32.mrf.mxu0  ;;  %v1149_v29 = vpop.f32.mrf.mxu1 }
  0x9f   :  { %v540_v36 = vmul.f32 %v182_v28, %v182_v28 }
  0xa5   :  { %v1185_v58 = vpop.f32.mrf.mxu2  ;;  %v1239_v20 = vpop.f32.mrf.mxu3 }
  0xa6   :  { %v184_v37 = vpop.f32.mrf.mxu0  ;;  %v1163_v38 = vpop.f32.mrf.mxu1 }
  0xa7   :  { %v725_v39 = vpack.c.bf16 %v184_v37, %v182_v28  ;;  %v470_v40 = vadd.f32 %v184_v37, %v182_v28  ;;  %v541_v41 = vmul.f32 %v184_v37, %v184_v37  ;;  %v765_v42 = vpack.c.bf16 %v1163_v38, %v1149_v29 }
  0xa9   :  { %726 = vst [vmem:[%s1565_s2] sm:$0xff] %v725_v39   ;;  %v604_v43 = vadd.f32 %v541_v41, %v540_v36 }
  0xaa   :  { %889 = vst [vmem:[%s1565_s2 + $0x40] sm:$0xff] %v765_v42  }
  0xad   :  { %v1197_v0 = vpop.f32.mrf.mxu2  ;;  %v1251_v24 = vpop.f32.mrf.mxu3 }
  0xae   :  { %v187_v44 = vpop.f32.mrf.mxu0  ;;  %v1173_v45 = vpop.f32.mrf.mxu1  ;;  %v805_v1 = vpack.c.bf16 %v1197_v0, %v1185_v58  ;;  %v845_v26 = vpack.c.bf16 %v1251_v24, %v1239_v20 }
  0xaf   :  { %v471_v46 = vadd.f32 %v470_v40, %v187_v44  ;;  %v542_v47 = vmul.f32 %v187_v44, %v187_v44 }
  0xb0   :  { %897 = vst [vmem:[%s1565_s2 + $0x80] sm:$0xff] %v805_v1  }
  0xb1   :  { %v605_v50 = vadd.f32 %v604_v43, %v542_v47  ;;  %905 = vst [vmem:[%s1565_s2 + $0xc0] sm:$0xff] %v845_v26  }
  0xb5   :  { %v1216_v10 = vpop.f32.mrf.mxu2  ;;  %v1269_v33 = vpop.f32.mrf.mxu3 }
  0xb6   :  { %v189_v52 = vpop.f32.mrf.mxu0  ;;  %v1181_v53 = vpop.f32.mrf.mxu1 }
  0xb7   :  { %v730_v54 = vpack.c.bf16 %v189_v52, %v187_v44  ;;  %v472_v55 = vadd.f32 %v471_v46, %v189_v52  ;;  %v543_v56 = vmul.f32 %v189_v52, %v189_v52  ;;  %v770_v57 = vpack.c.bf16 %v1181_v53, %v1173_v45 }
  0xb9   :  { %882 = vst [vmem:[%s1565_s2 + $0x8] sm:$0xff] %v730_v54   ;;  %v606_v59 = vadd.f32 %v605_v50, %v543_v56 }
  0xba   :  { %890 = vst [vmem:[%s1565_s2 + $0x48] sm:$0xff] %v770_v57  }
  0xbd   :  { %v1226_v13 = vpop.f32.mrf.mxu2  ;;  %v1281_v37 = vpop.f32.mrf.mxu3 }
  0xbe   :  { %v192_v60 = vpop.f32.mrf.mxu0  ;;  %v1193_v61 = vpop.f32.mrf.mxu1  ;;  %v810_v14 = vpack.c.bf16 %v1226_v13, %v1216_v10  ;;  %v850_v40 = vpack.c.bf16 %v1281_v37, %v1269_v33 }
  0xbf   :  { %v1195_v62 = vadd.f32 %v472_v55, %v192_v60  ;;  %v544_v63 = vmul.f32 %v192_v60, %v192_v60 }
  0xc0   :  { %898 = vst [vmem:[%s1565_s2 + $0x88] sm:$0xff] %v810_v14  }
  0xc1   :  { %v1207_v4 = vadd.f32 %v606_v59, %v544_v63  ;;  %906 = vst [vmem:[%s1565_s2 + $0xc8] sm:$0xff] %v850_v40  }
  0xc5   :  { %v1237_v19 = vpop.f32.mrf.mxu2  ;;  %v1299_v47 = vpop.f32.mrf.mxu3 }
  0xc6   :  { %v194_v6 = vpop.f32.mrf.mxu0  ;;  %v1212_v7 = vpop.f32.mrf.mxu1 }
  0xc7   :  { %v735_v8 = vpack.c.bf16 %v194_v6, %v192_v60  ;;  %v775_v9 = vpack.c.bf16 %v1212_v7, %v1193_v61  ;;  %v545_v52 = vmul.f32 %v194_v6, %v194_v6  ;;  %v474_v57 = vadd.f32 %v1195_v62, %v194_v6 }
  0xc9   :  { %883 = vst [vmem:[%s1565_s2 + $0x10] sm:$0xff] %v735_v8   ;;  %v608_v59 = vadd.f32 %v1207_v4, %v545_v52 }
  0xca   :  { %891 = vst [vmem:[%s1565_s2 + $0x50] sm:$0xff] %v775_v9  }
  0xcd   :  { %v1249_v23 = vpop.f32.mrf.mxu2  ;;  %v1311_v51 = vpop.f32.mrf.mxu3 }
  0xce   :  { %v197_v11 = vpop.f32.mrf.mxu0  ;;  %v1224_v12 = vpop.f32.mrf.mxu1  ;;  %v815_v25 = vpack.c.bf16 %v1249_v23, %v1237_v19  ;;  %v855_v55 = vpack.c.bf16 %v1311_v51, %v1299_v47 }
  0xcf   :  { %v546_v56 = vmul.f32 %v197_v11, %v197_v11  ;;  %v475_v63 = vadd.f32 %v474_v57, %v197_v11 }
  0xd0   :  { %899 = vst [vmem:[%s1565_s2 + $0x90] sm:$0xff] %v815_v25  }
  0xd1   :  { %907 = vst [vmem:[%s1565_s2 + $0xd0] sm:$0xff] %v855_v55   ;;  %v609_v1 = vadd.f32 %v608_v59, %v546_v56 }
  0xd5   :  { %v1267_v32 = vpop.f32.mrf.mxu2  ;;  %v1331_v62 = vpop.f32.mrf.mxu3 }
  0xd6   :  { %v199_v15 = vpop.f32.mrf.mxu0  ;;  %v1233_v16 = vpop.f32.mrf.mxu1 }
  0xd7   :  { %v740_v17 = vpack.c.bf16 %v199_v15, %v197_v11  ;;  %v780_v18 = vpack.c.bf16 %v1233_v16, %v1224_v12  ;;  %v547_v60 = vmul.f32 %v199_v15, %v199_v15  ;;  %v476_v8 = vadd.f32 %v475_v63, %v199_v15 }
  0xd9   :  { %884 = vst [vmem:[%s1565_s2 + $0x18] sm:$0xff] %v740_v17   ;;  %v610_v6 = vadd.f32 %v609_v1, %v547_v60 }
  0xda   :  { %892 = vst [vmem:[%s1565_s2 + $0x58] sm:$0xff] %v780_v18  }
  0xdd   :  { %v1279_v36 = vpop.f32.mrf.mxu2 }
  0xde   :  { %v202_v21 = vpop.f32.mrf.mxu0  ;;  %v1247_v22 = vpop.f32.mrf.mxu1  ;;  %v820_v39 = vpack.c.bf16 %v1279_v36, %v1267_v32 }
  0xdf   :  { %v548_v2 = vmul.f32 %v202_v21, %v202_v21  ;;  %v477_v25 = vadd.f32 %v476_v8, %v202_v21 }
  0xe0   :  { %900 = vst [vmem:[%s1565_s2 + $0x98] sm:$0xff] %v820_v39  }
  0xe1   :  { %v611_v4 = vadd.f32 %v610_v6, %v548_v2 }
  0xe5   :  { %v1297_v46 = vpop.f32.mrf.mxu2 }
  0xe6   :  { %v204_v27 = vpop.f32.mrf.mxu0  ;;  %v1263_v28 = vpop.f32.mrf.mxu1 }
  0xe7   :  { %v745_v30 = vpack.c.bf16 %v204_v27, %v202_v21  ;;  %v785_v31 = vpack.c.bf16 %v1263_v28, %v1247_v22  ;;  %v549_v18 = vmul.f32 %v204_v27, %v204_v27  ;;  %v478_v15 = vadd.f32 %v477_v25, %v204_v27 }
  0xe9   :  { %885 = vst [vmem:[%s1565_s2 + $0x20] sm:$0xff] %v745_v30   ;;  %v612_v26 = vadd.f32 %v611_v4, %v549_v18 }
  0xea   :  { %893 = vst [vmem:[%s1565_s2 + $0x60] sm:$0xff] %v785_v31  }
  0xed   :  { %v1309_v50 = vpop.f32.mrf.mxu2 }
  0xee   :  { %v207_v34 = vpop.f32.mrf.mxu0  ;;  %v1277_v35 = vpop.f32.mrf.mxu1  ;;  %v825_v54 = vpack.c.bf16 %v1309_v50, %v1297_v46 }
  0xef   :  { %v550_v11 = vmul.f32 %v207_v34, %v207_v34  ;;  %v479_v31 = vadd.f32 %v478_v15, %v207_v34 }
  0xf0   :  { %901 = vst [vmem:[%s1565_s2 + $0xa0] sm:$0xff] %v825_v54   ;;  %v1343_v54 = vpop.f32.mrf.mxu3 }
  0xf1   :  { %v613_v39 = vadd.f32 %v612_v26, %v550_v11  ;;  %v860_v27 = vpack.c.bf16 %v1343_v54, %v1331_v62  ;;  %v557_v26 = vmul.f32 %v1163_v38, %v1163_v38 }
  0xf3   :  { %908 = vst [vmem:[%s1565_s2 + $0xd8] sm:$0xff] %v860_v27  }
  0xf5   :  { %v1329_v17 = vpop.f32.mrf.mxu2 }
  0xf6   :  { %v209_v41 = vpop.f32.mrf.mxu0  ;;  %v1293_v42 = vpop.f32.mrf.mxu1 }
  0xf7   :  { %v750_v43 = vpack.c.bf16 %v209_v41, %v207_v34  ;;  %v790_v44 = vpack.c.bf16 %v1293_v42, %v1277_v35  ;;  %v551_v30 = vmul.f32 %v209_v41, %v209_v41  ;;  %v480_v21 = vadd.f32 %v479_v31, %v209_v41 }
  0xf8   :  { %v1361_v4 = vpop.f32.mrf.mxu3 }
  0xf9   :  { %886 = vst [vmem:[%s1565_s2 + $0x28] sm:$0xff] %v750_v43   ;;  %v614_v55 = vadd.f32 %v613_v39, %v551_v30  ;;  %v558_v39 = vmul.f32 %v1173_v45, %v1173_v45 }
  0xfa   :  { %894 = vst [vmem:[%s1565_s2 + $0x68] sm:$0xff] %v790_v44  }
  0xfd   :  { %v1341_v52 = vpop.f32.mrf.mxu2 }
  0xfe   :  { %v212_v48 = vpop.f32.mrf.mxu0  ;;  %v1307_v49 = vpop.f32.mrf.mxu1  ;;  %v830_v57 = vpack.c.bf16 %v1341_v52, %v1329_v17 }
  0xff   :  { %v552_v40 = vmul.f32 %v212_v48, %v212_v48  ;;  %v481_v59 = vadd.f32 %v480_v21, %v212_v48 }
 0x100   :  { %902 = vst [vmem:[%s1565_s2 + $0xa8] sm:$0xff] %v830_v57   ;;  %v1383_v57 = vpop.f32.mrf.mxu3 }
 0x101   :  { %v615_v34 = vadd.f32 %v614_v55, %v552_v40  ;;  %v865_v27 = vpack.c.bf16 %v1383_v57, %v1361_v4 }
 0x103   :  { %909 = vst [vmem:[%s1565_s2 + $0xe0] sm:$0xff] %v865_v27  }
 0x105   :  { %v1359_v25 = vpop.f32.mrf.mxu2 }
 0x106   :  { %v214_v3 = vpop.f32.mrf.mxu0  ;;  %v1325_v5 = vpop.f32.mrf.mxu1 }
 0x107   :  { %v755_v9 = vpack.c.bf16 %v214_v3, %v212_v48  ;;  %v795_v14 = vpack.c.bf16 %v1325_v5, %v1307_v49  ;;  %v553_v56 = vmul.f32 %v214_v3, %v214_v3  ;;  %v482_v41 = vadd.f32 %v481_v59, %v214_v3 }
 0x108   :  { %v556_v3 = vmul.f32 %v1149_v29, %v1149_v29  ;;  %v569_v27 = vmul.f32 %v1325_v5, %v1325_v5 }
 0x109   :  { %887 = vst [vmem:[%s1565_s2 + $0x30] sm:$0xff] %v755_v9   ;;  %v616_v63 = vadd.f32 %v615_v34, %v553_v56 }
 0x10a   :  { %895 = vst [vmem:[%s1565_s2 + $0x70] sm:$0xff] %v795_v14  }
 0x10d   :  { %v1381_v56 = vpop.f32.mrf.mxu2 }
 0x10e   :  { %v217_v43 = vpop.f32.mrf.mxu0  ;;  %v1339_v44 = vpop.f32.mrf.mxu1 }
 0x10f   :  { %v554_v60 = vmul.f32 %v217_v43, %v217_v43  ;;  %v483_v1 = vadd.f32 %v482_v41, %v217_v43 }
 0x111   :  { %v617_v2 = vadd.f32 %v616_v63, %v554_v60  ;;  %v562_v63 = vmul.f32 %v1224_v12, %v1224_v12 }
 0x116   :  { %v219_v8 = vpop.f32.mrf.mxu0  ;;  %v1355_v9 = vpop.f32.mrf.mxu1 }
 0x117   :  { %v760_v14 = vpack.c.bf16 %v219_v8, %v217_v43  ;;  %v484_v6 = vadd.f32 %v483_v1, %v219_v8  ;;  %v555_v48 = vmul.f32 %v219_v8, %v219_v8  ;;  %v800_v18 = vpack.c.bf16 %v1355_v9, %v1339_v44 }
 0x119   :  { %888 = vst [vmem:[%s1565_s2 + $0x38] sm:$0xff] %v760_v14   ;;  %v485_v11 = vadd.f32 %v484_v6, %v1149_v29  ;;  %v618_v15 = vadd.f32 %v617_v2, %v555_v48  ;;  %v559_v29 = vmul.f32 %v1181_v53, %v1181_v53  ;;  %v563_v2 = vmul.f32 %v1233_v16, %v1233_v16  ;;  %v1407_v6 = vpop.f32.mrf.mxu2 }
 0x11a   :  { %896 = vst [vmem:[%s1565_s2 + $0x78] sm:$0xff] %v800_v18   ;;  %v564_v48 = vmul.f32 %v1247_v22, %v1247_v22 }
 0x11b   :  { %v486_v30 = vadd.f32 %v485_v11, %v1163_v38  ;;  %v619_v31 = vadd.f32 %v618_v15, %v556_v3  ;;  %v835_v38 = vpack.c.bf16 %v1381_v56, %v1359_v25  ;;  %v565_v11 = vmul.f32 %v1263_v28, %v1263_v28 }
 0x11d   :  { %v487_v40 = vadd.f32 %v486_v30, %v1173_v45  ;;  %v620_v43 = vadd.f32 %v619_v31, %v557_v26  ;;  %v560_v45 = vmul.f32 %v1193_v61, %v1193_v61  ;;  %903 = vst [vmem:[%s1565_s2 + $0xb0] sm:$0xff] %v835_v38   ;;  %v567_v31 = vmul.f32 %v1293_v42, %v1293_v42 }
 0x11f   :  { %v488_v21 = vadd.f32 %v487_v40, %v1181_v53  ;;  %v621_v55 = vadd.f32 %v620_v43, %v558_v39  ;;  %v561_v53 = vmul.f32 %v1212_v7, %v1212_v7 }
 0x121   :  { %v489_v59 = vadd.f32 %v488_v21, %v1193_v61  ;;  %v622_v34 = vadd.f32 %v621_v55, %v559_v29 }
 0x123   :  { %v490_v60 = vadd.f32 %v489_v59, %v1212_v7  ;;  %v623_v41 = vadd.f32 %v622_v34, %v560_v45  ;;  %v1409_v7 = vpop.f32.mrf.mxu3 }
 0x125   :  { %v624_v1 = vadd.f32 %v623_v41, %v561_v53  ;;  %v491_v61 = vadd.f32 %v490_v60, %v1224_v12  ;;  %v571_v60 = vmul.f32 %v1355_v9, %v1355_v9 }
 0x127   :  { %v492_v8 = vadd.f32 %v491_v61, %v1233_v16  ;;  %v625_v14 = vadd.f32 %v624_v1, %v562_v63  ;;  %v566_v16 = vmul.f32 %v1277_v35, %v1277_v35  ;;  %v573_v61 = vmul.f32 %v1197_v0, %v1197_v0 }
 0x129   :  { %v493_v18 = vadd.f32 %v492_v8, %v1247_v22  ;;  %v626_v3 = vadd.f32 %v625_v14, %v563_v2  ;;  %v1423_v22 = vpop.f32.mrf.mxu2  ;;  %v574_v8 = vmul.f32 %v1216_v10, %v1216_v10 }
 0x12b   :  { %v494_v12 = vadd.f32 %v493_v18, %v1263_v28  ;;  %v627_v15 = vadd.f32 %v626_v3, %v564_v48  ;;  %v1425_v43 = vpop.f32.mrf.mxu3  ;;  %v840_v28 = vpack.c.bf16 %v1423_v22, %v1407_v6  ;;  %v575_v48 = vmul.f32 %v1226_v13, %v1226_v13 }
 0x12c   :  { %v870_v29 = vpack.c.bf16 %v1425_v43, %v1409_v7 }
 0x12d   :  { %v495_v26 = vadd.f32 %v494_v12, %v1277_v35  ;;  %v628_v30 = vadd.f32 %v627_v15, %v565_v11  ;;  %v568_v35 = vmul.f32 %v1307_v49, %v1307_v49  ;;  %904 = vst [vmem:[%s1565_s2 + $0xb8] sm:$0xff] %v840_v28  }
 0x12e   :  { %910 = vst [vmem:[%s1565_s2 + $0xe8] sm:$0xff] %v870_v29   ;;  %v580_v29 = vmul.f32 %v1297_v46, %v1297_v46 }
 0x12f   :  { %v496_v39 = vadd.f32 %v495_v26, %v1293_v42  ;;  %v629_v40 = vadd.f32 %v628_v30, %v566_v16  ;;  %v578_v26 = vmul.f32 %v1267_v32, %v1267_v32 }
 0x131   :  { %v497_v21 = vadd.f32 %v496_v39, %v1307_v49  ;;  %v630_v55 = vadd.f32 %v629_v40, %v567_v31  ;;  %v570_v49 = vmul.f32 %v1339_v44, %v1339_v44 }
 0x133   :  { %v631_v42 = vadd.f32 %v630_v55, %v568_v35  ;;  %v498_v38 = vadd.f32 %v497_v21, %v1325_v5  ;;  %v1449_v41 = vpop.f32.mrf.mxu3  ;;  %v572_v5 = vmul.f32 %v1185_v58, %v1185_v58  ;;  %v581_v35 = vmul.f32 %v1309_v50, %v1309_v50 }
 0x135   :  { %v632_v45 = vadd.f32 %v631_v42, %v569_v27  ;;  %v499_v59 = vadd.f32 %v498_v38, %v1339_v44  ;;  %v582_v42 = vmul.f32 %v1329_v17, %v1329_v17 }
 0x137   :  { %v633_v34 = vadd.f32 %v632_v45, %v570_v49  ;;  %v500_v53 = vadd.f32 %v499_v59, %v1355_v9  ;;  %v583_v45 = vmul.f32 %v1341_v52, %v1341_v52 }
 0x139   :  { %v501_v63 = vadd.f32 %v500_v53, %v1185_v58  ;;  %v634_v1 = vadd.f32 %v633_v34, %v571_v60 }
 0x13b   :  { %v502_v2 = vadd.f32 %v501_v63, %v1197_v0  ;;  %v635_v44 = vadd.f32 %v634_v1, %v572_v5  ;;  %v1463_v58 = vpop.f32.mrf.mxu3  ;;  %v576_v0 = vmul.f32 %v1237_v19, %v1237_v19  ;;  %v586_v1 = vmul.f32 %v1407_v6, %v1407_v6 }
 0x13c   :  { %v875_v11 = vpack.c.bf16 %v1463_v58, %v1449_v41 }
 0x13d   :  { %v503_v14 = vadd.f32 %v502_v2, %v1216_v10  ;;  %v636_v9 = vadd.f32 %v635_v44, %v573_v61  ;;  %v577_v10 = vmul.f32 %v1249_v23, %v1249_v23  ;;  %v588_v44 = vmul.f32 %v1239_v20, %v1239_v20 }
 0x13e   :  { %911 = vst [vmem:[%s1565_s2 + $0xf0] sm:$0xff] %v875_v11  }
 0x13f   :  { %v504_v18 = vadd.f32 %v503_v14, %v1226_v13  ;;  %v637_v3 = vadd.f32 %v636_v9, %v574_v8 }
 0x141   :  { %v505_v12 = vadd.f32 %v504_v18, %v1237_v19  ;;  %v638_v15 = vadd.f32 %v637_v3, %v575_v48  ;;  %v579_v19 = vmul.f32 %v1279_v36, %v1279_v36 }
 0x143   :  { %v506_v13 = vadd.f32 %v505_v12, %v1249_v23  ;;  %v639_v16 = vadd.f32 %v638_v15, %v576_v0  ;;  %v1482_v28 = vpop.f32.mrf.mxu3 }
 0x145   :  { %v640_v30 = vadd.f32 %v639_v16, %v577_v10  ;;  %v507_v31 = vadd.f32 %v506_v13, %v1267_v32 }
 0x147   :  { %v508_v39 = vadd.f32 %v507_v31, %v1279_v36  ;;  %v641_v40 = vadd.f32 %v640_v30, %v578_v26 }
 0x149   :  { %v509_v23 = vadd.f32 %v508_v39, %v1297_v46  ;;  %v642_v21 = vadd.f32 %v641_v40, %v579_v19 }
 0x14b   :  { %v510_v55 = vadd.f32 %v509_v23, %v1309_v50  ;;  %v643_v32 = vadd.f32 %v642_v21, %v580_v29  ;;  %v339_v46 = vpop.f32.mrf.mxu3  ;;  %v584_v50 = vmul.f32 %v1359_v25, %v1359_v25 }
 0x14c   :  { %v880_v49 = vpack.c.bf16 %v339_v46, %v1482_v28 }
 0x14d   :  { %v511_v36 = vadd.f32 %v510_v55, %v1329_v17  ;;  %v644_v38 = vadd.f32 %v643_v32, %v581_v35  ;;  %v599_v35 = vmul.f32 %v1425_v43, %v1425_v43 }
 0x14e   :  { %912 = vst [vmem:[%s1565_s2 + $0xf8] sm:$0xff] %v880_v49   ;;  %v603_v49 = vmul.f32 %v339_v46, %v339_v46 }
 0x14f   :  { %v512_v27 = vadd.f32 %v511_v36, %v1341_v52  ;;  %v645_v59 = vadd.f32 %v644_v38, %v582_v42  ;;  %v585_v52 = vmul.f32 %v1381_v56, %v1381_v56  ;;  %v600_v42 = vmul.f32 %v1449_v41, %v1449_v41 }
 0x150   :  { %v601_v38 = vmul.f32 %v1463_v58, %v1463_v58 }
 0x151   :  { %v646_v34 = vadd.f32 %v645_v59, %v583_v45  ;;  %v513_v53 = vadd.f32 %v512_v27, %v1359_v25  ;;  %v587_v25 = vmul.f32 %v1423_v22, %v1423_v22  ;;  %v602_v45 = vmul.f32 %v1482_v28, %v1482_v28 }
 0x153   :  { %v647_v17 = vadd.f32 %v646_v34, %v584_v50  ;;  %v514_v60 = vadd.f32 %v513_v53, %v1381_v56  ;;  %v589_v56 = vmul.f32 %v1251_v24, %v1251_v24 }
 0x155   :  { %v648_v5 = vadd.f32 %v647_v17, %v585_v52  ;;  %v515_v63 = vadd.f32 %v514_v60, %v1407_v6  ;;  %v590_v6 = vmul.f32 %v1269_v33, %v1269_v33 }
 0x157   :  { %v649_v61 = vadd.f32 %v648_v5, %v586_v1  ;;  %v516_v2 = vadd.f32 %v515_v63, %v1423_v22  ;;  %v591_v22 = vmul.f32 %v1281_v37, %v1281_v37 }
 0x159   :  { %v517_v8 = vadd.f32 %v516_v2, %v1239_v20  ;;  %v650_v14 = vadd.f32 %v649_v61, %v587_v25  ;;  %v592_v20 = vmul.f32 %v1299_v47, %v1299_v47 }
 0x15b   :  { %v518_v9 = vadd.f32 %v517_v8, %v1251_v24  ;;  %v651_v48 = vadd.f32 %v650_v14, %v588_v44  ;;  %v593_v24 = vmul.f32 %v1311_v51, %v1311_v51 }
 0x15d   :  { %v519_v18 = vadd.f32 %v518_v9, %v1269_v33  ;;  %v652_v3 = vadd.f32 %v651_v48, %v589_v56  ;;  %v594_v33 = vmul.f32 %v1331_v62, %v1331_v62 }
 0x15f   :  { %v520_v11 = vadd.f32 %v519_v18, %v1281_v37  ;;  %v653_v0 = vadd.f32 %v652_v3, %v590_v6  ;;  %v595_v37 = vmul.f32 %v1343_v54, %v1343_v54 }
 0x161   :  { %v521_v12 = vadd.f32 %v520_v11, %v1299_v47  ;;  %v654_v15 = vadd.f32 %v653_v0, %v591_v22  ;;  %v596_v47 = vmul.f32 %v1361_v4, %v1361_v4 }
 0x163   :  { %v522_v10 = vadd.f32 %v521_v12, %v1311_v51  ;;  %v655_v13 = vadd.f32 %v654_v15, %v592_v20  ;;  %v597_v51 = vmul.f32 %v1383_v57, %v1383_v57 }
 0x165   :  { %v656_v16 = vadd.f32 %v655_v13, %v593_v24  ;;  %v523_v26 = vadd.f32 %v522_v10, %v1331_v62  ;;  %v598_v62 = vmul.f32 %v1409_v7, %v1409_v7 }
 0x167   :  { %v524_v30 = vadd.f32 %v523_v26, %v1343_v54  ;;  %v657_v31 = vadd.f32 %v656_v16, %v594_v33 }
 0x169   :  { %v525_v19 = vadd.f32 %v524_v30, %v1361_v4  ;;  %v658_v39 = vadd.f32 %v657_v31, %v595_v37 }
 0x16b   :  { %v526_v40 = vadd.f32 %v525_v19, %v1383_v57  ;;  %v659_v29 = vadd.f32 %v658_v39, %v596_v47 }
 0x16d   :  { %v527_v23 = vadd.f32 %v526_v40, %v1409_v7  ;;  %v660_v21 = vadd.f32 %v659_v29, %v597_v51 }
 0x16f   :  { %v528_v54 = vadd.f32 %v527_v23, %v1425_v43  ;;  %v661_v55 = vadd.f32 %v660_v21, %v598_v62 }
 0x171   :  { %v662_v4 = vadd.f32 %v661_v55, %v599_v35  ;;  %v529_v32 = vadd.f32 %v528_v54, %v1449_v41 }
 0x173   :  { %v663_v57 = vadd.f32 %v662_v4, %v600_v42  ;;  %v530_v36 = vadd.f32 %v529_v32, %v1463_v58 }
 0x175   :  { %v664_v7 = vadd.f32 %v663_v57, %v601_v38  ;;  %v531_v27 = vadd.f32 %v530_v36, %v1482_v28 }
 0x177   :  { %v665_v43 = vadd.f32 %v664_v7, %v602_v45  ;;  %v532_v59 = vadd.f32 %v531_v27, %v339_v46 }
 0x179   :  { %v533_v34 = vrot.slane %v532_v59, 4  ;;  %v666_v53 = vadd.f32 %v665_v43, %v603_v49 }
 0x17b   :  { %v534_v50 = vadd.f32 %v533_v34, %v532_v59  ;;  %v667_v17 = vrot.slane %v666_v53, 4 }
 0x17d   :  { %v535_v41 = vrot.slane %v534_v50, 2  ;;  %v668_v60 = vadd.f32 %v667_v17, %v666_v53 }
 0x17f   :  { %v536_v52 = vadd.f32 %v535_v41, %v534_v50  ;;  %v669_v5 = vrot.slane %v668_v60, 2 }
 0x181   :  { %v537_v63 = vrot.slane %v536_v52, 1  ;;  %v670_v1 = vadd.f32 %v669_v5, %v668_v60 }
 0x183   :  { %v538_v58 = vadd.f32 %v537_v63, %v536_v52  ;;  %v671_v61 = vrot.slane %v670_v1, 1 }
 0x185   :  { %539 = vst [vmem:[%s1566_s3] sm:$0x1] %v538_v58  ;;  %v672_v28 = vadd.f32 %v671_v61, %v670_v1 }
 0x187   :  { %673 = vst [vmem:[%s1566_s3 + $0x1] sm:$0x1] %v672_v28 }

// kernel: bottleneck_forward.7
= control target key start
LH: loop header
LB: loop body
LE: loop exit
PB: predicated region body
PF: predicated region fallthrough
CT: control target
= control target key end

     0   :  { %s1333_s0 = inlined_call_operand.vmem [shape: bf16[512,128], index: 0, kind: input, shape index: {}]   ;;  %s1334_s1 = inlined_call_operand.vmem [shape: f32[2,128], index: 1, kind: input, shape index: {}]   ;;  %s1335_s2 = inlined_call_operand.vmem [shape: f32[512,128], index: 2, kind: input, shape index: {}, may-alias: {2,3}]   ;;  %s1336_s3 = inlined_call_operand.vmem [shape: f32[512,128], index: 3, kind: output, shape index: {}, may-alias: {2,3}]  }
   0x1   :  { %v535_v0 = vld [vmem:[%s1333_s0] sm:$0xff]   ;;  %v662_v5 = vld [vmem:[%s1333_s0 + $0x8] sm:$0xff]   ;;  %v663_v10 = vld [vmem:[%s1333_s0 + $0x10] sm:$0xff]  }
   0x2   :  { %v721_v1 = vld [vmem:[%s1334_s1] ss:$0 sm:$0xff]  ;;  %v536_v2 = vunpack.c.l.bf16 %v535_v0  ;;  %v726_v3 = vld [vmem:[%s1334_s1 + $0x1] ss:$0 sm:$0xff]  ;;  %v537_v4 = vunpack.c.h.bf16 %v535_v0  ;;  %v540_v8 = vunpack.c.l.bf16 %v662_v5  ;;  %v541_v9 = vunpack.c.h.bf16 %v662_v5  ;;  %v275_v12 = vld [vmem:[%s1335_s2 + $0x8] sm:$0xff] }
   0x3   :  { %v274_v11 = vld [vmem:[%s1335_s2] sm:$0xff]  ;;  %v544_v13 = vunpack.c.l.bf16 %v663_v10  ;;  %v545_v14 = vunpack.c.h.bf16 %v663_v10  ;;  %v664_v15 = vld [vmem:[%s1333_s0 + $0x18] sm:$0xff]   ;;  %v276_v20 = vld [vmem:[%s1335_s2 + $0x10] sm:$0xff] }
   0x4   :  { %v144_v6 = vmul.f32 %v721_v1, %v536_v2  ;;  %v145_v7 = vmul.f32 %v721_v1, %v537_v4  ;;  %v146_v18 = vmul.f32 %v721_v1, %v540_v8  ;;  %v147_v19 = vmul.f32 %v721_v1, %v541_v9  ;;  %v277_v21 = vld [vmem:[%s1335_s2 + $0x18] sm:$0xff]  ;;  %v278_v30 = vld [vmem:[%s1335_s2 + $0x20] sm:$0xff]  ;;  %v279_v31 = vld [vmem:[%s1335_s2 + $0x28] sm:$0xff] }
   0x5   :  { %v148_v22 = vmul.f32 %v721_v1, %v544_v13  ;;  %v149_v23 = vmul.f32 %v721_v1, %v545_v14  ;;  %v548_v24 = vunpack.c.l.bf16 %v664_v15  ;;  %v549_v25 = vunpack.c.h.bf16 %v664_v15  ;;  %v665_v36 = vld [vmem:[%s1333_s0 + $0x20] sm:$0xff]   ;;  %v280_v41 = vld [vmem:[%s1335_s2 + $0x30] sm:$0xff]  ;;  %v281_v42 = vld [vmem:[%s1335_s2 + $0x38] sm:$0xff] }
   0x6   :  { %v210_v16 = vadd.f32 %v726_v3, %v144_v6  ;;  %v211_v17 = vadd.f32 %v726_v3, %v145_v7  ;;  %v212_v28 = vadd.f32 %v726_v3, %v146_v18  ;;  %v213_v29 = vadd.f32 %v726_v3, %v147_v19  ;;  %v666_v47 = vld [vmem:[%s1333_s0 + $0x28] sm:$0xff]   ;;  %v667_v52 = vld [vmem:[%s1333_s0 + $0x30] sm:$0xff]   ;;  %v668_v61 = vld [vmem:[%s1333_s0 + $0x38] sm:$0xff]  }
   0x7   :  { %v214_v32 = vadd.f32 %v726_v3, %v148_v22  ;;  %v215_v33 = vadd.f32 %v726_v3, %v149_v23  ;;  %v150_v34 = vmul.f32 %v721_v1, %v548_v24  ;;  %v151_v35 = vmul.f32 %v721_v1, %v549_v25 }
   0x8   :  { %v338_v26 = vadd.f32 %v274_v11, %v210_v16  ;;  %v339_v27 = vadd.f32 %v275_v12, %v211_v17  ;;  %v340_v39 = vadd.f32 %v276_v20, %v212_v28  ;;  %v341_v40 = vadd.f32 %v277_v21, %v213_v29 }
   0x9   :  { %v342_v43 = vadd.f32 %v278_v30, %v214_v32  ;;  %v343_v44 = vadd.f32 %v279_v31, %v215_v33  ;;  %v216_v45 = vadd.f32 %v726_v3, %v150_v34  ;;  %v217_v46 = vadd.f32 %v726_v3, %v151_v35 }
   0xa   :  { %v402_v37 = vmax.f32 %v338_v26, 0.0  ;;  %v403_v38 = vmax.f32 %v339_v27, 0.0  ;;  %v404_v48 = vmax.f32 %v340_v39, 0.0  ;;  %v405_v49 = vmax.f32 %v341_v40, 0.0  ;;  %v669_v26 = vld [vmem:[%s1333_s0 + $0x40] sm:$0xff]  }
   0xb   :  { %v552_v50 = vunpack.c.l.bf16 %v665_v36  ;;  %v553_v51 = vunpack.c.h.bf16 %v665_v36  ;;  %v406_v53 = vmax.f32 %v342_v43, 0.0  ;;  %v407_v54 = vmax.f32 %v343_v44, 0.0 }
   0xc   :  { %466 = vst [vmem:[%s1336_s3] sm:$0xff] %v402_v37  ;;  %v344_v55 = vadd.f32 %v280_v41, %v216_v45  ;;  %v345_v56 = vadd.f32 %v281_v42, %v217_v46  ;;  %v556_v59 = vunpack.c.l.bf16 %v666_v47  ;;  %v557_v60 = vunpack.c.h.bf16 %v666_v47  ;;  %v670_v37 = vld [vmem:[%s1333_s0 + $0x48] sm:$0xff]   ;;  %v671_v42 = vld [vmem:[%s1333_s0 + $0x50] sm:$0xff]  }
   0xd   :  { %467 = vst [vmem:[%s1336_s3 + $0x8] sm:$0xff] %v403_v38  ;;  %v152_v57 = vmul.f32 %v721_v1, %v552_v50  ;;  %v153_v58 = vmul.f32 %v721_v1, %v553_v51  ;;  %v560_v4 = vunpack.c.l.bf16 %v667_v52  ;;  %v561_v5 = vunpack.c.h.bf16 %v667_v52  ;;  %v672_v51 = vld [vmem:[%s1333_s0 + $0x58] sm:$0xff]  }
   0xe   :  { %468 = vst [vmem:[%s1336_s3 + $0x10] sm:$0xff] %v404_v48  ;;  %v408_v62 = vmax.f32 %v344_v55, 0.0  ;;  %v409_v63 = vmax.f32 %v345_v56, 0.0  ;;  %v154_v8 = vmul.f32 %v721_v1, %v556_v59  ;;  %v155_v9 = vmul.f32 %v721_v1, %v557_v60 }
   0xf   :  { %469 = vst [vmem:[%s1336_s3 + $0x18] sm:$0xff] %v405_v49  ;;  %v218_v6 = vadd.f32 %v726_v3, %v152_v57  ;;  %v219_v7 = vadd.f32 %v726_v3, %v153_v58  ;;  %v156_v12 = vmul.f32 %v721_v1, %v560_v4  ;;  %v157_v13 = vmul.f32 %v721_v1, %v561_v5 }
  0x10   :  { %v564_v14 = vunpack.c.l.bf16 %v668_v61  ;;  %v565_v15 = vunpack.c.h.bf16 %v668_v61  ;;  %v220_v18 = vadd.f32 %v726_v3, %v154_v8  ;;  %v221_v19 = vadd.f32 %v726_v3, %v155_v9 }
  0x11   :  { %v222_v22 = vadd.f32 %v726_v3, %v156_v12  ;;  %v223_v23 = vadd.f32 %v726_v3, %v157_v13  ;;  %v568_v40 = vunpack.c.l.bf16 %v669_v26  ;;  %v569_v41 = vunpack.c.h.bf16 %v669_v26 }
  0x12   :  { %v158_v24 = vmul.f32 %v721_v1, %v564_v14  ;;  %v159_v25 = vmul.f32 %v721_v1, %v565_v15  ;;  %v572_v49 = vunpack.c.l.bf16 %v670_v37  ;;  %v573_v50 = vunpack.c.h.bf16 %v670_v37 }
  0x13   :  { %v160_v47 = vmul.f32 %v721_v1, %v568_v40  ;;  %v161_v48 = vmul.f32 %v721_v1, %v569_v41  ;;  %v576_v56 = vunpack.c.l.bf16 %v671_v42  ;;  %v577_v57 = vunpack.c.h.bf16 %v671_v42  ;;  %v676_v41 = vld [vmem:[%s1333_s0 + $0x78] sm:$0xff]  }
  0x14   :  { %v224_v35 = vadd.f32 %v726_v3, %v158_v24  ;;  %v225_v36 = vadd.f32 %v726_v3, %v159_v25  ;;  %v162_v60 = vmul.f32 %v721_v1, %v572_v49  ;;  %v163_v61 = vmul.f32 %v721_v1, %v573_v50 }
  0x15   :  { %v226_v58 = vadd.f32 %v726_v3, %v160_v47  ;;  %v227_v59 = vadd.f32 %v726_v3, %v161_v48  ;;  %v580_v4 = vunpack.c.l.bf16 %v672_v51  ;;  %v581_v5 = vunpack.c.h.bf16 %v672_v51 }
  0x16   :  { %v282_v0 = vld [vmem:[%s1335_s2 + $0x40] sm:$0xff]  ;;  %v283_v2 = vld [vmem:[%s1335_s2 + $0x48] sm:$0xff]  ;;  %v228_v8 = vadd.f32 %v726_v3, %v162_v60  ;;  %v229_v9 = vadd.f32 %v726_v3, %v163_v61 }
  0x17   :  { %470 = vst [vmem:[%s1336_s3 + $0x20] sm:$0xff] %v406_v53  ;;  %v346_v16 = vadd.f32 %v282_v0, %v218_v6  ;;  %v347_v17 = vadd.f32 %v283_v2, %v219_v7  ;;  %v164_v0 = vmul.f32 %v721_v1, %v576_v56  ;;  %v165_v2 = vmul.f32 %v721_v1, %v577_v57 }
  0x18   :  { %471 = vst [vmem:[%s1336_s3 + $0x28] sm:$0xff] %v407_v54  ;;  %v166_v14 = vmul.f32 %v721_v1, %v580_v4  ;;  %v167_v15 = vmul.f32 %v721_v1, %v581_v5  ;;  %v596_v56 = vunpack.c.l.bf16 %v676_v41  ;;  %v597_v57 = vunpack.c.h.bf16 %v676_v41 }
  0x19   :  { %v410_v27 = vmax.f32 %v346_v16, 0.0  ;;  %v411_v28 = vmax.f32 %v347_v17, 0.0  ;;  %v230_v12 = vadd.f32 %v726_v3, %v164_v0  ;;  %v231_v13 = vadd.f32 %v726_v3, %v165_v2  ;;  %v673_v16 = vld [vmem:[%s1333_s0 + $0x60] sm:$0xff]  }
  0x1a   :  { %v232_v25 = vadd.f32 %v726_v3, %v166_v14  ;;  %v233_v26 = vadd.f32 %v726_v3, %v167_v15  ;;  %v174_v4 = vmul.f32 %v721_v1, %v596_v56  ;;  %v175_v5 = vmul.f32 %v721_v1, %v597_v57 }
  0x1c   :  { %v240_v15 = vadd.f32 %v726_v3, %v174_v4 }
  0x1f   :  { %v284_v10 = vld [vmem:[%s1335_s2 + $0x50] sm:$0xff]  ;;  %v285_v11 = vld [vmem:[%s1335_s2 + $0x58] sm:$0xff] }
  0x20   :  { %472 = vst [vmem:[%s1336_s3 + $0x30] sm:$0xff] %v408_v62  ;;  %v348_v29 = vadd.f32 %v284_v10, %v220_v18  ;;  %v349_v30 = vadd.f32 %v285_v11, %v221_v19 }
  0x22   :  { %v412_v38 = vmax.f32 %v348_v29, 0.0  ;;  %v413_v39 = vmax.f32 %v349_v30, 0.0  ;;  %v584_v30 = vunpack.c.l.bf16 %v673_v16 }
  0x24   :  { %v168_v37 = vmul.f32 %v721_v1, %v584_v30 }
  0x26   :  { %v234_v48 = vadd.f32 %v726_v3, %v168_v37 }
  0x27   :  { %v286_v20 = vld [vmem:[%s1335_s2 + $0x60] sm:$0xff]  ;;  %v287_v21 = vld [vmem:[%s1335_s2 + $0x68] sm:$0xff] }
  0x28   :  { %473 = vst [vmem:[%s1336_s3 + $0x38] sm:$0xff] %v409_v63  ;;  %v350_v33 = vadd.f32 %v286_v20, %v222_v22  ;;  %v351_v34 = vadd.f32 %v287_v21, %v223_v23 }
  0x2a   :  { %v414_v43 = vmax.f32 %v350_v33, 0.0  ;;  %v415_v44 = vmax.f32 %v351_v34, 0.0 }
  0x2f   :  { %v288_v31 = vld [vmem:[%s1335_s2 + $0x70] sm:$0xff]  ;;  %v289_v32 = vld [vmem:[%s1335_s2 + $0x78] sm:$0xff] }
  0x30   :  { %474 = vst [vmem:[%s1336_s3 + $0x40] sm:$0xff] %v410_v27  ;;  %v352_v45 = vadd.f32 %v288_v31, %v224_v35  ;;  %v353_v46 = vadd.f32 %v289_v32, %v225_v36  ;;  %v674_v27 = vld [vmem:[%s1333_s0 + $0x68] sm:$0xff]   ;;  %v585_v31 = vunpack.c.h.bf16 %v673_v16  ;;  %v675_v32 = vld [vmem:[%s1333_s0 + $0x70] sm:$0xff]   ;;  %v241_v16 = vadd.f32 %v726_v3, %v175_v5 }
  0x31   :  { %475 = vst [vmem:[%s1336_s3 + $0x48] sm:$0xff] %v411_v28  ;;  %v589_v40 = vunpack.c.h.bf16 %v674_v27  ;;  %v593_v47 = vunpack.c.h.bf16 %v675_v32 }
  0x32   :  { %476 = vst [vmem:[%s1336_s3 + $0x50] sm:$0xff] %v412_v38  ;;  %v416_v52 = vmax.f32 %v352_v45, 0.0  ;;  %v417_v53 = vmax.f32 %v353_v46, 0.0  ;;  %v169_v38 = vmul.f32 %v721_v1, %v585_v31  ;;  %v592_v46 = vunpack.c.l.bf16 %v675_v32  ;;  %v680_v31 = vld [vmem:[%s1333_s0 + $0x98] sm:$0xff]  }
  0x33   :  { %477 = vst [vmem:[%s1336_s3 + $0x58] sm:$0xff] %v413_v39  ;;  %v588_v39 = vunpack.c.l.bf16 %v674_v27  ;;  %v171_v51 = vmul.f32 %v721_v1, %v589_v40 }
  0x34   :  { %v235_v49 = vadd.f32 %v726_v3, %v169_v38 }
  0x35   :  { %v170_v50 = vmul.f32 %v721_v1, %v588_v39  ;;  %v237_v61 = vadd.f32 %v726_v3, %v171_v51 }
  0x37   :  { %v236_v60 = vadd.f32 %v726_v3, %v170_v50 }
  0x3a   :  { %v290_v54 = vld [vmem:[%s1335_s2 + $0x80] sm:$0xff]  ;;  %v291_v55 = vld [vmem:[%s1335_s2 + $0x88] sm:$0xff] }
  0x3b   :  { %478 = vst [vmem:[%s1336_s3 + $0x60] sm:$0xff] %v414_v43  ;;  %v354_v6 = vadd.f32 %v290_v54, %v226_v58  ;;  %v355_v7 = vadd.f32 %v291_v55, %v227_v59  ;;  %v172_v54 = vmul.f32 %v721_v1, %v592_v46  ;;  %v173_v55 = vmul.f32 %v721_v1, %v593_v47 }
  0x3c   :  { %479 = vst [vmem:[%s1336_s3 + $0x68] sm:$0xff] %v415_v44  ;;  %v612_v46 = vunpack.c.l.bf16 %v680_v31  ;;  %v613_v47 = vunpack.c.h.bf16 %v680_v31 }
  0x3d   :  { %v418_v17 = vmax.f32 %v354_v6, 0.0  ;;  %v419_v18 = vmax.f32 %v355_v7, 0.0  ;;  %v238_v0 = vadd.f32 %v726_v3, %v172_v54  ;;  %v239_v2 = vadd.f32 %v726_v3, %v173_v55  ;;  %v677_v6 = vld [vmem:[%s1333_s0 + $0x80] sm:$0xff]  }
  0x3e   :  { %v182_v56 = vmul.f32 %v721_v1, %v612_v46  ;;  %v183_v57 = vmul.f32 %v721_v1, %v613_v47 }
  0x40   :  { %v248_v5 = vadd.f32 %v726_v3, %v182_v56 }
  0x43   :  { %v292_v62 = vld [vmem:[%s1335_s2 + $0x90] sm:$0xff]  ;;  %v293_v63 = vld [vmem:[%s1335_s2 + $0x98] sm:$0xff] }
  0x44   :  { %480 = vst [vmem:[%s1336_s3 + $0x70] sm:$0xff] %v416_v52  ;;  %v356_v19 = vadd.f32 %v292_v62, %v228_v8  ;;  %v357_v20 = vadd.f32 %v293_v63, %v229_v9 }
  0x46   :  { %v420_v28 = vmax.f32 %v356_v19, 0.0  ;;  %v421_v29 = vmax.f32 %v357_v20, 0.0  ;;  %v600_v20 = vunpack.c.l.bf16 %v677_v6 }
  0x48   :  { %v176_v27 = vmul.f32 %v721_v1, %v600_v20 }
  0x4a   :  { %v242_v38 = vadd.f32 %v726_v3, %v176_v27 }
  0x4b   :  { %v294_v10 = vld [vmem:[%s1335_s2 + $0xa0] sm:$0xff]  ;;  %v295_v11 = vld [vmem:[%s1335_s2 + $0xa8] sm:$0xff] }
  0x4c   :  { %481 = vst [vmem:[%s1336_s3 + $0x78] sm:$0xff] %v417_v53  ;;  %v358_v23 = vadd.f32 %v294_v10, %v230_v12  ;;  %v359_v24 = vadd.f32 %v295_v11, %v231_v13 }
  0x4e   :  { %v422_v33 = vmax.f32 %v358_v23, 0.0  ;;  %v423_v34 = vmax.f32 %v359_v24, 0.0 }
  0x53   :  { %v296_v21 = vld [vmem:[%s1335_s2 + $0xb0] sm:$0xff]  ;;  %v297_v22 = vld [vmem:[%s1335_s2 + $0xb8] sm:$0xff] }
  0x54   :  { %482 = vst [vmem:[%s1336_s3 + $0x80] sm:$0xff] %v418_v17  ;;  %v360_v35 = vadd.f32 %v296_v21, %v232_v25  ;;  %v361_v36 = vadd.f32 %v297_v22, %v233_v26  ;;  %v678_v17 = vld [vmem:[%s1333_s0 + $0x88] sm:$0xff]   ;;  %v601_v21 = vunpack.c.h.bf16 %v677_v6  ;;  %v679_v22 = vld [vmem:[%s1333_s0 + $0x90] sm:$0xff]   ;;  %v249_v6 = vadd.f32 %v726_v3, %v183_v57 }
  0x55   :  { %483 = vst [vmem:[%s1336_s3 + $0x88] sm:$0xff] %v419_v18  ;;  %v605_v30 = vunpack.c.h.bf16 %v678_v17  ;;  %v609_v37 = vunpack.c.h.bf16 %v679_v22 }
  0x56   :  { %484 = vst [vmem:[%s1336_s3 + $0x90] sm:$0xff] %v420_v28  ;;  %v424_v42 = vmax.f32 %v360_v35, 0.0  ;;  %v425_v43 = vmax.f32 %v361_v36, 0.0  ;;  %v177_v28 = vmul.f32 %v721_v1, %v601_v21  ;;  %v608_v36 = vunpack.c.l.bf16 %v679_v22  ;;  %v684_v21 = vld [vmem:[%s1333_s0 + $0xb8] sm:$0xff]  }
  0x57   :  { %485 = vst [vmem:[%s1336_s3 + $0x98] sm:$0xff] %v421_v29  ;;  %v604_v29 = vunpack.c.l.bf16 %v678_v17  ;;  %v179_v41 = vmul.f32 %v721_v1, %v605_v30 }
  0x58   :  { %v243_v39 = vadd.f32 %v726_v3, %v177_v28 }
  0x59   :  { %v178_v40 = vmul.f32 %v721_v1, %v604_v29  ;;  %v245_v51 = vadd.f32 %v726_v3, %v179_v41 }
  0x5b   :  { %v244_v50 = vadd.f32 %v726_v3, %v178_v40 }
  0x5e   :  { %v298_v44 = vld [vmem:[%s1335_s2 + $0xc0] sm:$0xff]  ;;  %v299_v45 = vld [vmem:[%s1335_s2 + $0xc8] sm:$0xff] }
  0x5f   :  { %486 = vst [vmem:[%s1336_s3 + $0xa0] sm:$0xff] %v422_v33  ;;  %v362_v58 = vadd.f32 %v298_v44, %v234_v48  ;;  %v363_v59 = vadd.f32 %v299_v45, %v235_v49  ;;  %v180_v44 = vmul.f32 %v721_v1, %v608_v36  ;;  %v181_v45 = vmul.f32 %v721_v1, %v609_v37 }
  0x60   :  { %487 = vst [vmem:[%s1336_s3 + $0xa8] sm:$0xff] %v423_v34  ;;  %v628_v36 = vunpack.c.l.bf16 %v684_v21  ;;  %v629_v37 = vunpack.c.h.bf16 %v684_v21 }
  0x61   :  { %v426_v7 = vmax.f32 %v362_v58, 0.0  ;;  %v427_v8 = vmax.f32 %v363_v59, 0.0  ;;  %v246_v54 = vadd.f32 %v726_v3, %v180_v44  ;;  %v247_v55 = vadd.f32 %v726_v3, %v181_v45  ;;  %v681_v58 = vld [vmem:[%s1333_s0 + $0xa0] sm:$0xff]  }
  0x62   :  { %v190_v46 = vmul.f32 %v721_v1, %v628_v36  ;;  %v191_v47 = vmul.f32 %v721_v1, %v629_v37 }
  0x64   :  { %v256_v57 = vadd.f32 %v726_v3, %v190_v46 }
  0x67   :  { %v300_v52 = vld [vmem:[%s1335_s2 + $0xd0] sm:$0xff]  ;;  %v301_v53 = vld [vmem:[%s1335_s2 + $0xd8] sm:$0xff] }
  0x68   :  { %488 = vst [vmem:[%s1336_s3 + $0xb0] sm:$0xff] %v424_v42  ;;  %v364_v9 = vadd.f32 %v300_v52, %v236_v60  ;;  %v365_v10 = vadd.f32 %v301_v53, %v237_v61 }
  0x6a   :  { %v428_v18 = vmax.f32 %v364_v9, 0.0  ;;  %v429_v19 = vmax.f32 %v365_v10, 0.0  ;;  %v616_v10 = vunpack.c.l.bf16 %v681_v58 }
  0x6c   :  { %v184_v17 = vmul.f32 %v721_v1, %v616_v10 }
  0x6e   :  { %v250_v28 = vadd.f32 %v726_v3, %v184_v17 }
  0x6f   :  { %v302_v62 = vld [vmem:[%s1335_s2 + $0xe0] sm:$0xff]  ;;  %v303_v63 = vld [vmem:[%s1335_s2 + $0xe8] sm:$0xff] }
  0x70   :  { %489 = vst [vmem:[%s1336_s3 + $0xb8] sm:$0xff] %v425_v43  ;;  %v366_v13 = vadd.f32 %v302_v62, %v238_v0  ;;  %v367_v14 = vadd.f32 %v303_v63, %v239_v2 }
  0x72   :  { %v430_v23 = vmax.f32 %v366_v13, 0.0  ;;  %v431_v24 = vmax.f32 %v367_v14, 0.0 }
  0x77   :  { %v304_v11 = vld [vmem:[%s1335_s2 + $0xf0] sm:$0xff]  ;;  %v305_v12 = vld [vmem:[%s1335_s2 + $0xf8] sm:$0xff] }
  0x78   :  { %490 = vst [vmem:[%s1336_s3 + $0xc0] sm:$0xff] %v426_v7  ;;  %v368_v25 = vadd.f32 %v304_v11, %v240_v15  ;;  %v369_v26 = vadd.f32 %v305_v12, %v241_v16  ;;  %v682_v7 = vld [vmem:[%s1333_s0 + $0xa8] sm:$0xff]   ;;  %v617_v11 = vunpack.c.h.bf16 %v681_v58  ;;  %v683_v12 = vld [vmem:[%s1333_s0 + $0xb0] sm:$0xff]   ;;  %v257_v58 = vadd.f32 %v726_v3, %v191_v47 }
  0x79   :  { %491 = vst [vmem:[%s1336_s3 + $0xc8] sm:$0xff] %v427_v8  ;;  %v621_v20 = vunpack.c.h.bf16 %v682_v7  ;;  %v625_v27 = vunpack.c.h.bf16 %v683_v12 }
  0x7a   :  { %492 = vst [vmem:[%s1336_s3 + $0xd0] sm:$0xff] %v428_v18  ;;  %v432_v32 = vmax.f32 %v368_v25, 0.0  ;;  %v433_v33 = vmax.f32 %v369_v26, 0.0  ;;  %v185_v18 = vmul.f32 %v721_v1, %v617_v11  ;;  %v624_v26 = vunpack.c.l.bf16 %v683_v12  ;;  %v688_v11 = vld [vmem:[%s1333_s0 + $0xd8] sm:$0xff]  }
  0x7b   :  { %493 = vst [vmem:[%s1336_s3 + $0xd8] sm:$0xff] %v429_v19  ;;  %v620_v19 = vunpack.c.l.bf16 %v682_v7  ;;  %v187_v31 = vmul.f32 %v721_v1, %v621_v20 }
  0x7c   :  { %v251_v29 = vadd.f32 %v726_v3, %v185_v18 }
  0x7d   :  { %v186_v30 = vmul.f32 %v721_v1, %v620_v19  ;;  %v253_v41 = vadd.f32 %v726_v3, %v187_v31 }
  0x7f   :  { %v252_v40 = vadd.f32 %v726_v3, %v186_v30 }
  0x82   :  { %v306_v34 = vld [vmem:[%s1335_s2 + $0x100] sm:$0xff]  ;;  %v307_v35 = vld [vmem:[%s1335_s2 + $0x108] sm:$0xff] }
  0x83   :  { %494 = vst [vmem:[%s1336_s3 + $0xe0] sm:$0xff] %v430_v23  ;;  %v370_v48 = vadd.f32 %v306_v34, %v242_v38  ;;  %v371_v49 = vadd.f32 %v307_v35, %v243_v39  ;;  %v188_v34 = vmul.f32 %v721_v1, %v624_v26  ;;  %v189_v35 = vmul.f32 %v721_v1, %v625_v27 }
  0x84   :  { %495 = vst [vmem:[%s1336_s3 + $0xe8] sm:$0xff] %v431_v24  ;;  %v644_v26 = vunpack.c.l.bf16 %v688_v11  ;;  %v645_v27 = vunpack.c.h.bf16 %v688_v11 }
  0x85   :  { %v434_v59 = vmax.f32 %v370_v48, 0.0  ;;  %v435_v60 = vmax.f32 %v371_v49, 0.0  ;;  %v254_v44 = vadd.f32 %v726_v3, %v188_v34  ;;  %v255_v45 = vadd.f32 %v726_v3, %v189_v35  ;;  %v685_v48 = vld [vmem:[%s1333_s0 + $0xc0] sm:$0xff]  }
  0x86   :  { %v198_v36 = vmul.f32 %v721_v1, %v644_v26  ;;  %v199_v37 = vmul.f32 %v721_v1, %v645_v27 }
  0x88   :  { %v264_v47 = vadd.f32 %v726_v3, %v198_v36 }
  0x8b   :  { %v308_v42 = vld [vmem:[%s1335_s2 + $0x110] sm:$0xff]  ;;  %v309_v43 = vld [vmem:[%s1335_s2 + $0x118] sm:$0xff] }
  0x8c   :  { %496 = vst [vmem:[%s1336_s3 + $0xf0] sm:$0xff] %v432_v32  ;;  %v372_v61 = vadd.f32 %v308_v42, %v244_v50  ;;  %v373_v62 = vadd.f32 %v309_v43, %v245_v51 }
  0x8e   :  { %v436_v8 = vmax.f32 %v372_v61, 0.0  ;;  %v437_v9 = vmax.f32 %v373_v62, 0.0  ;;  %v632_v62 = vunpack.c.l.bf16 %v685_v48 }
  0x90   :  { %v192_v7 = vmul.f32 %v721_v1, %v632_v62 }
  0x92   :  { %v258_v18 = vadd.f32 %v726_v3, %v192_v7 }
  0x93   :  { %v310_v52 = vld [vmem:[%s1335_s2 + $0x120] sm:$0xff]  ;;  %v311_v53 = vld [vmem:[%s1335_s2 + $0x128] sm:$0xff] }
  0x94   :  { %497 = vst [vmem:[%s1336_s3 + $0xf8] sm:$0xff] %v433_v33  ;;  %v374_v2 = vadd.f32 %v310_v52, %v246_v54  ;;  %v375_v4 = vadd.f32 %v311_v53, %v247_v55 }
  0x96   :  { %v438_v13 = vmax.f32 %v374_v2, 0.0  ;;  %v439_v14 = vmax.f32 %v375_v4, 0.0 }
  0x9b   :  { %v312_v63 = vld [vmem:[%s1335_s2 + $0x130] sm:$0xff]  ;;  %v313_v0 = vld [vmem:[%s1335_s2 + $0x138] sm:$0xff] }
  0x9c   :  { %498 = vst [vmem:[%s1336_s3 + $0x100] sm:$0xff] %v434_v59  ;;  %v376_v15 = vadd.f32 %v312_v63, %v248_v5  ;;  %v377_v16 = vadd.f32 %v313_v0, %v249_v6  ;;  %v686_v59 = vld [vmem:[%s1333_s0 + $0xc8] sm:$0xff]   ;;  %v633_v63 = vunpack.c.h.bf16 %v685_v48  ;;  %v687_v0 = vld [vmem:[%s1333_s0 + $0xd0] sm:$0xff]   ;;  %v265_v48 = vadd.f32 %v726_v3, %v199_v37 }
  0x9d   :  { %499 = vst [vmem:[%s1336_s3 + $0x108] sm:$0xff] %v435_v60  ;;  %v637_v10 = vunpack.c.h.bf16 %v686_v59  ;;  %v641_v17 = vunpack.c.h.bf16 %v687_v0 }
  0x9e   :  { %500 = vst [vmem:[%s1336_s3 + $0x110] sm:$0xff] %v436_v8  ;;  %v440_v22 = vmax.f32 %v376_v15, 0.0  ;;  %v441_v23 = vmax.f32 %v377_v16, 0.0  ;;  %v193_v8 = vmul.f32 %v721_v1, %v633_v63  ;;  %v640_v16 = vunpack.c.l.bf16 %v687_v0  ;;  %v692_v63 = vld [vmem:[%s1333_s0 + $0xf8] sm:$0xff]  }
  0x9f   :  { %501 = vst [vmem:[%s1336_s3 + $0x118] sm:$0xff] %v437_v9  ;;  %v636_v9 = vunpack.c.l.bf16 %v686_v59  ;;  %v195_v21 = vmul.f32 %v721_v1, %v637_v10 }
  0xa0   :  { %v259_v19 = vadd.f32 %v726_v3, %v193_v8 }
  0xa1   :  { %v194_v20 = vmul.f32 %v721_v1, %v636_v9  ;;  %v261_v31 = vadd.f32 %v726_v3, %v195_v21 }
  0xa3   :  { %v260_v30 = vadd.f32 %v726_v3, %v194_v20 }
  0xa6   :  { %v314_v24 = vld [vmem:[%s1335_s2 + $0x140] sm:$0xff]  ;;  %v315_v25 = vld [vmem:[%s1335_s2 + $0x148] sm:$0xff] }
  0xa7   :  { %502 = vst [vmem:[%s1336_s3 + $0x120] sm:$0xff] %v438_v13  ;;  %v378_v38 = vadd.f32 %v314_v24, %v250_v28  ;;  %v379_v39 = vadd.f32 %v315_v25, %v251_v29  ;;  %v196_v24 = vmul.f32 %v721_v1, %v640_v16  ;;  %v197_v25 = vmul.f32 %v721_v1, %v641_v17 }
  0xa8   :  { %503 = vst [vmem:[%s1336_s3 + $0x128] sm:$0xff] %v439_v14  ;;  %v660_v16 = vunpack.c.l.bf16 %v692_v63  ;;  %v661_v17 = vunpack.c.h.bf16 %v692_v63 }
  0xa9   :  { %v442_v49 = vmax.f32 %v378_v38, 0.0  ;;  %v443_v50 = vmax.f32 %v379_v39, 0.0  ;;  %v262_v34 = vadd.f32 %v726_v3, %v196_v24  ;;  %v263_v35 = vadd.f32 %v726_v3, %v197_v25  ;;  %v689_v38 = vld [vmem:[%s1333_s0 + $0xe0] sm:$0xff]  }
  0xaa   :  { %v206_v26 = vmul.f32 %v721_v1, %v660_v16  ;;  %v207_v27 = vmul.f32 %v721_v1, %v661_v17 }
  0xac   :  { %v272_v36 = vadd.f32 %v726_v3, %v206_v26  ;;  %v273_v37 = vadd.f32 %v726_v3, %v207_v27 }
  0xaf   :  { %v316_v32 = vld [vmem:[%s1335_s2 + $0x150] sm:$0xff]  ;;  %v317_v33 = vld [vmem:[%s1335_s2 + $0x158] sm:$0xff] }
  0xb0   :  { %504 = vst [vmem:[%s1336_s3 + $0x130] sm:$0xff] %v440_v22  ;;  %v380_v51 = vadd.f32 %v316_v32, %v252_v40  ;;  %v381_v52 = vadd.f32 %v317_v33, %v253_v41 }
  0xb2   :  { %v444_v60 = vmax.f32 %v380_v51, 0.0  ;;  %v445_v61 = vmax.f32 %v381_v52, 0.0  ;;  %v648_v52 = vunpack.c.l.bf16 %v689_v38 }
  0xb4   :  { %v200_v59 = vmul.f32 %v721_v1, %v648_v52 }
  0xb6   :  { %v266_v8 = vadd.f32 %v726_v3, %v200_v59 }
  0xb7   :  { %v318_v42 = vld [vmem:[%s1335_s2 + $0x160] sm:$0xff]  ;;  %v319_v43 = vld [vmem:[%s1335_s2 + $0x168] sm:$0xff] }
  0xb8   :  { %505 = vst [vmem:[%s1336_s3 + $0x138] sm:$0xff] %v441_v23  ;;  %v382_v55 = vadd.f32 %v318_v42, %v254_v44  ;;  %v383_v56 = vadd.f32 %v319_v43, %v255_v45 }
  0xba   :  { %v446_v2 = vmax.f32 %v382_v55, 0.0  ;;  %v447_v4 = vmax.f32 %v383_v56, 0.0 }
  0xbf   :  { %v320_v53 = vld [vmem:[%s1335_s2 + $0x170] sm:$0xff]  ;;  %v321_v54 = vld [vmem:[%s1335_s2 + $0x178] sm:$0xff] }
  0xc0   :  { %506 = vst [vmem:[%s1336_s3 + $0x140] sm:$0xff] %v442_v49  ;;  %v384_v5 = vadd.f32 %v320_v53, %v256_v57  ;;  %v385_v6 = vadd.f32 %v321_v54, %v257_v58  ;;  %v690_v49 = vld [vmem:[%s1333_s0 + $0xe8] sm:$0xff]   ;;  %v649_v53 = vunpack.c.h.bf16 %v689_v38  ;;  %v691_v54 = vld [vmem:[%s1333_s0 + $0xf0] sm:$0xff]  }
  0xc1   :  { %507 = vst [vmem:[%s1336_s3 + $0x148] sm:$0xff] %v443_v50  ;;  %v653_v62 = vunpack.c.h.bf16 %v690_v49  ;;  %v657_v7 = vunpack.c.h.bf16 %v691_v54 }
  0xc2   :  { %508 = vst [vmem:[%s1336_s3 + $0x150] sm:$0xff] %v444_v60  ;;  %v448_v12 = vmax.f32 %v384_v5, 0.0  ;;  %v449_v13 = vmax.f32 %v385_v6, 0.0  ;;  %v201_v60 = vmul.f32 %v721_v1, %v649_v53  ;;  %v656_v6 = vunpack.c.l.bf16 %v691_v54 }
  0xc3   :  { %509 = vst [vmem:[%s1336_s3 + $0x158] sm:$0xff] %v445_v61  ;;  %v652_v61 = vunpack.c.l.bf16 %v690_v49  ;;  %v203_v11 = vmul.f32 %v721_v1, %v653_v62 }
  0xc4   :  { %v267_v9 = vadd.f32 %v726_v3, %v201_v60 }
  0xc5   :  { %v202_v10 = vmul.f32 %v721_v1, %v652_v61  ;;  %v269_v21 = vadd.f32 %v726_v3, %v203_v11 }
  0xc7   :  { %v268_v20 = vadd.f32 %v726_v3, %v202_v10 }
  0xca   :  { %v322_v14 = vld [vmem:[%s1335_s2 + $0x180] sm:$0xff]  ;;  %v323_v15 = vld [vmem:[%s1335_s2 + $0x188] sm:$0xff] }
  0xcb   :  { %510 = vst [vmem:[%s1336_s3 + $0x160] sm:$0xff] %v446_v2  ;;  %v386_v28 = vadd.f32 %v322_v14, %v258_v18  ;;  %v387_v29 = vadd.f32 %v323_v15, %v259_v19  ;;  %v204_v14 = vmul.f32 %v721_v1, %v656_v6  ;;  %v205_v15 = vmul.f32 %v721_v1, %v657_v7 }
  0xcc   :  { %511 = vst [vmem:[%s1336_s3 + $0x168] sm:$0xff] %v447_v4 }
  0xcd   :  { %v450_v39 = vmax.f32 %v386_v28, 0.0  ;;  %v451_v40 = vmax.f32 %v387_v29, 0.0  ;;  %v270_v24 = vadd.f32 %v726_v3, %v204_v14  ;;  %v271_v25 = vadd.f32 %v726_v3, %v205_v15 }
  0xd3   :  { %v324_v22 = vld [vmem:[%s1335_s2 + $0x190] sm:$0xff]  ;;  %v325_v23 = vld [vmem:[%s1335_s2 + $0x198] sm:$0xff] }
  0xd4   :  { %512 = vst [vmem:[%s1336_s3 + $0x170] sm:$0xff] %v448_v12  ;;  %v388_v41 = vadd.f32 %v324_v22, %v260_v30  ;;  %v389_v42 = vadd.f32 %v325_v23, %v261_v31 }
  0xd6   :  { %v452_v50 = vmax.f32 %v388_v41, 0.0  ;;  %v453_v51 = vmax.f32 %v389_v42, 0.0 }
  0xdb   :  { %v326_v32 = vld [vmem:[%s1335_s2 + $0x1a0] sm:$0xff]  ;;  %v327_v33 = vld [vmem:[%s1335_s2 + $0x1a8] sm:$0xff] }
  0xdc   :  { %513 = vst [vmem:[%s1336_s3 + $0x178] sm:$0xff] %v449_v13  ;;  %v390_v45 = vadd.f32 %v326_v32, %v262_v34  ;;  %v391_v46 = vadd.f32 %v327_v33, %v263_v35 }
  0xde   :  { %v454_v55 = vmax.f32 %v390_v45, 0.0  ;;  %v455_v56 = vmax.f32 %v391_v46, 0.0 }
  0xe3   :  { %v328_v43 = vld [vmem:[%s1335_s2 + $0x1b0] sm:$0xff]  ;;  %v329_v44 = vld [vmem:[%s1335_s2 + $0x1b8] sm:$0xff] }
  0xe4   :  { %514 = vst [vmem:[%s1336_s3 + $0x180] sm:$0xff] %v450_v39  ;;  %v392_v57 = vadd.f32 %v328_v43, %v264_v47  ;;  %v393_v58 = vadd.f32 %v329_v44, %v265_v48 }
  0xe5   :  { %515 = vst [vmem:[%s1336_s3 + $0x188] sm:$0xff] %v451_v40 }
  0xe6   :  { %516 = vst [vmem:[%s1336_s3 + $0x190] sm:$0xff] %v452_v50  ;;  %v456_v0 = vmax.f32 %v392_v57, 0.0  ;;  %v457_v2 = vmax.f32 %v393_v58, 0.0 }
  0xe7   :  { %517 = vst [vmem:[%s1336_s3 + $0x198] sm:$0xff] %v453_v51 }
  0xee   :  { %v330_v4 = vld [vmem:[%s1335_s2 + $0x1c0] sm:$0xff]  ;;  %v331_v5 = vld [vmem:[%s1335_s2 + $0x1c8] sm:$0xff] }
  0xef   :  { %518 = vst [vmem:[%s1336_s3 + $0x1a0] sm:$0xff] %v454_v55  ;;  %v394_v18 = vadd.f32 %v330_v4, %v266_v8  ;;  %v395_v19 = vadd.f32 %v331_v5, %v267_v9 }
  0xf0   :  { %519 = vst [vmem:[%s1336_s3 + $0x1a8] sm:$0xff] %v455_v56 }
  0xf1   :  { %v458_v28 = vmax.f32 %v394_v18, 0.0  ;;  %v459_v29 = vmax.f32 %v395_v19, 0.0 }
  0xf7   :  { %v332_v12 = vld [vmem:[%s1335_s2 + $0x1d0] sm:$0xff]  ;;  %v333_v13 = vld [vmem:[%s1335_s2 + $0x1d8] sm:$0xff] }
  0xf8   :  { %520 = vst [vmem:[%s1336_s3 + $0x1b0] sm:$0xff] %v456_v0  ;;  %v396_v30 = vadd.f32 %v332_v12, %v268_v20  ;;  %v397_v31 = vadd.f32 %v333_v13, %v269_v21 }
  0xfa   :  { %v460_v1 = vmax.f32 %v396_v30, 0.0  ;;  %v461_v38 = vmax.f32 %v397_v31, 0.0 }
  0xff   :  { %v334_v22 = vld [vmem:[%s1335_s2 + $0x1e0] sm:$0xff]  ;;  %v335_v23 = vld [vmem:[%s1335_s2 + $0x1e8] sm:$0xff] }
 0x100   :  { %521 = vst [vmem:[%s1336_s3 + $0x1b8] sm:$0xff] %v457_v2  ;;  %v398_v34 = vadd.f32 %v334_v22, %v270_v24  ;;  %v399_v35 = vadd.f32 %v335_v23, %v271_v25 }
 0x102   :  { %v462_v39 = vmax.f32 %v398_v34, 0.0  ;;  %v463_v40 = vmax.f32 %v399_v35, 0.0 }
 0x107   :  { %v336_v32 = vld [vmem:[%s1335_s2 + $0x1f0] sm:$0xff]  ;;  %v337_v33 = vld [vmem:[%s1335_s2 + $0x1f8] sm:$0xff] }
 0x108   :  { %522 = vst [vmem:[%s1336_s3 + $0x1c0] sm:$0xff] %v458_v28  ;;  %v400_v41 = vadd.f32 %v336_v32, %v272_v36  ;;  %v401_v42 = vadd.f32 %v337_v33, %v273_v37 }
 0x109   :  { %523 = vst [vmem:[%s1336_s3 + $0x1c8] sm:$0xff] %v459_v29 }
 0x10a   :  { %524 = vst [vmem:[%s1336_s3 + $0x1d0] sm:$0xff] %v460_v1  ;;  %v464_v3 = vmax.f32 %v400_v41, 0.0  ;;  %v465_v43 = vmax.f32 %v401_v42, 0.0 }
 0x10b   :  { %525 = vst [vmem:[%s1336_s3 + $0x1d8] sm:$0xff] %v461_v38 }
 0x10c   :  { %526 = vst [vmem:[%s1336_s3 + $0x1e0] sm:$0xff] %v462_v39 }
 0x10d   :  { %527 = vst [vmem:[%s1336_s3 + $0x1e8] sm:$0xff] %v463_v40 }
 0x10e   :  { %528 = vst [vmem:[%s1336_s3 + $0x1f0] sm:$0xff] %v464_v3 }
 0x10f   :  { %529 = vst [vmem:[%s1336_s3 + $0x1f8] sm:$0xff] %v465_v43 }

// kernel: bottleneck_forward.6
= control target key start
LH: loop header
LB: loop body
LE: loop exit
PB: predicated region body
PF: predicated region fallthrough
CT: control target
= control target key end

     0   :  { %s2034_s2 = inlined_call_operand.vmem [shape: bf16[128,128], index: 2, kind: input, shape index: {}]   ;;  %s2035_s1 = inlined_call_operand.vmem [shape: f32[2,128], index: 1, kind: input, shape index: {}]   ;;  %s2036_s0 = inlined_call_operand.vmem [shape: bf16[512,128], index: 0, kind: input, shape index: {}]   ;;  %s2037_s3 = inlined_call_operand.vmem [shape: bf16[512,128], index: 3, kind: output, shape index: {0}]   ;;  %s2038_s4 = inlined_call_operand.vmem [shape: f32[1,2,128], index: 4, kind: output, shape index: {1}]  }
   0x1   :  { %v984_v0 = vld [vmem:[%s2034_s2 + $0x38] sm:$0xff]  ;;  %v983_v1 = vld [vmem:[%s2034_s2 + $0x30] sm:$0xff]  ;;  %v982_v2 = vld [vmem:[%s2034_s2 + $0x28] sm:$0xff] }
   0x2   :  { %436 = vmatpush.bf16.msra.mxu0 %v984_v0  ;;  %1335 = vmatpush.bf16.msra.mxu1 %v984_v0  ;;  %v981_v3 = vld [vmem:[%s2034_s2 + $0x20] sm:$0xff]  ;;  %v980_v8 = vld [vmem:[%s2034_s2 + $0x18] sm:$0xff]  ;;  %v979_v17 = vld [vmem:[%s2034_s2 + $0x10] sm:$0xff] }
   0x3   :  { %1336 = vmatpush.bf16.msra.mxu2 %v984_v0  ;;  %1337 = vmatpush.bf16.msra.mxu3 %v984_v0  ;;  %v986_v4 = vld [vmem:[%s2036_s0] sm:$0xff]   ;;  %v978_v22 = vld [vmem:[%s2034_s2 + $0x8] sm:$0xff]  ;;  %v1274_v47 = vld [vmem:[%s2036_s0 + $0x10] sm:$0xff]  }
   0x4   :  { %v987_v5 = vunpack.c.l.bf16 %v986_v4  ;;  %v988_v6 = vunpack.c.h.bf16 %v986_v4  ;;  %v1404_v7 = vld [vmem:[%s2035_s1] ss:$0 sm:$0xff]  ;;  %v1417_v14 = vld [vmem:[%s2035_s1 + $0x1] ss:$0 sm:$0xff]  ;;  %v1273_v25 = vld [vmem:[%s2036_s0 + $0x8] sm:$0xff]   ;;  %v995_v54 = vunpack.c.l.bf16 %v1274_v47  ;;  %v996_v55 = vunpack.c.h.bf16 %v1274_v47 }
   0x5   :  { %v1280_v9 = vld [vmem:[%s2036_s0 + $0x40] sm:$0xff]   ;;  %v991_v29 = vunpack.c.l.bf16 %v1273_v25  ;;  %v992_v30 = vunpack.c.h.bf16 %v1273_v25  ;;  %v1281_v33 = vld [vmem:[%s2036_s0 + $0x48] sm:$0xff]   ;;  %v1282_v60 = vld [vmem:[%s2036_s0 + $0x50] sm:$0xff]  }
   0x6   :  { %437 = vmatpush.bf16.msra.mxu0 %v983_v1  ;;  %1338 = vmatpush.bf16.msra.mxu1 %v983_v1  ;;  %v1019_v10 = vunpack.c.l.bf16 %v1280_v9  ;;  %v1020_v11 = vunpack.c.h.bf16 %v1280_v9  ;;  %v146_v12 = vmul.f32 %v1404_v7, %v987_v5  ;;  %v147_v13 = vmul.f32 %v1404_v7, %v988_v6  ;;  %v977_v28 = vld [vmem:[%s2034_s2] sm:$0xff] }
   0x7   :  { %1339 = vmatpush.bf16.msra.mxu2 %v983_v1  ;;  %1340 = vmatpush.bf16.msra.mxu3 %v983_v1  ;;  %v1023_v34 = vunpack.c.l.bf16 %v1281_v33  ;;  %v1024_v35 = vunpack.c.h.bf16 %v1281_v33  ;;  %v148_v36 = vmul.f32 %v1404_v7, %v991_v29  ;;  %v149_v37 = vmul.f32 %v1404_v7, %v992_v30  ;;  %v1288_v46 = vld [vmem:[%s2036_s0 + $0x80] sm:$0xff]  }
   0x8   :  { %v162_v15 = vmul.f32 %v1404_v7, %v1019_v10  ;;  %v163_v16 = vmul.f32 %v1404_v7, %v1020_v11  ;;  %v212_v18 = vadd.f32 %v1417_v14, %v146_v12  ;;  %v213_v19 = vadd.f32 %v1417_v14, %v147_v13  ;;  %v1289_v13 = vld [vmem:[%s2036_s0 + $0x88] sm:$0xff]   ;;  %v1296_v47 = vld [vmem:[%s2036_s0 + $0xc0] sm:$0xff]  }
   0x9   :  { %v164_v38 = vmul.f32 %v1404_v7, %v1023_v34  ;;  %v165_v39 = vmul.f32 %v1404_v7, %v1024_v35  ;;  %v214_v40 = vadd.f32 %v1417_v14, %v148_v36  ;;  %v215_v41 = vadd.f32 %v1417_v14, %v149_v37 }
   0xa   :  { %438 = vmatpush.bf16.msra.mxu0 %v982_v2  ;;  %1341 = vmatpush.bf16.msra.mxu1 %v982_v2  ;;  %v228_v20 = vadd.f32 %v1417_v14, %v162_v15  ;;  %v229_v21 = vadd.f32 %v1417_v14, %v163_v16  ;;  %v276_v23 = vmax.f32 %v212_v18, 0.0  ;;  %v277_v24 = vmax.f32 %v213_v19, 0.0  ;;  %v1275_v15 = vld [vmem:[%s2036_s0 + $0x18] sm:$0xff]  }
   0xb   :  { %1342 = vmatpush.bf16.msra.mxu2 %v982_v2  ;;  %1343 = vmatpush.bf16.msra.mxu3 %v982_v2  ;;  %v230_v42 = vadd.f32 %v1417_v14, %v164_v38  ;;  %v231_v43 = vadd.f32 %v1417_v14, %v165_v39  ;;  %v278_v44 = vmax.f32 %v214_v40, 0.0  ;;  %v279_v45 = vmax.f32 %v215_v41, 0.0 }
   0xc   :  { %v292_v26 = vmax.f32 %v228_v20, 0.0  ;;  %v293_v27 = vmax.f32 %v229_v21, 0.0  ;;  %v340_v31 = vpack.c.bf16 %v277_v24, %v276_v23  ;;  %v1051_v50 = vunpack.c.l.bf16 %v1288_v46 }
   0xd   :  { %v294_v48 = vmax.f32 %v230_v42, 0.0  ;;  %v295_v49 = vmax.f32 %v231_v43, 0.0  ;;  %v1052_v51 = vunpack.c.h.bf16 %v1288_v46  ;;  %v341_v56 = vpack.c.bf16 %v279_v45, %v278_v44  ;;  %v1290_v46 = vld [vmem:[%s2036_s0 + $0x90] sm:$0xff]  }
   0xe   :  { %439 = vmatpush.bf16.msra.mxu0 %v981_v3  ;;  %1344 = vmatpush.bf16.msra.mxu1 %v981_v3  ;;  %v348_v32 = vpack.c.bf16 %v293_v27, %v292_v26  ;;  %v178_v52 = vmul.f32 %v1404_v7, %v1051_v50  ;;  %v1027_v63 = vunpack.c.l.bf16 %v1282_v60  ;;  %v1028_v0 = vunpack.c.h.bf16 %v1282_v60 }
   0xf   :  { %1345 = vmatpush.bf16.msra.mxu2 %v981_v3  ;;  %1346 = vmatpush.bf16.msra.mxu3 %v981_v3  ;;  %v179_v53 = vmul.f32 %v1404_v7, %v1052_v51  ;;  %v349_v57 = vpack.c.bf16 %v295_v49, %v294_v48  ;;  %v150_v1 = vmul.f32 %v1404_v7, %v995_v54  ;;  %v1055_v18 = vunpack.c.l.bf16 %v1289_v13  ;;  %v1276_v48 = vld [vmem:[%s2036_s0 + $0x20] sm:$0xff]  }
  0x10   :  { %v244_v58 = vadd.f32 %v1417_v14, %v178_v52  ;;  %v151_v2 = vmul.f32 %v1404_v7, %v996_v55  ;;  %v166_v4 = vmul.f32 %v1404_v7, %v1027_v63  ;;  %v167_v5 = vmul.f32 %v1404_v7, %v1028_v0 }
  0x11   :  { %v245_v59 = vadd.f32 %v1417_v14, %v179_v53  ;;  %v216_v6 = vadd.f32 %v1417_v14, %v150_v1  ;;  %v1056_v19 = vunpack.c.h.bf16 %v1289_v13  ;;  %v180_v20 = vmul.f32 %v1404_v7, %v1055_v18  ;;  %v1284_v1 = vld [vmem:[%s2036_s0 + $0x60] sm:$0xff]  }
  0x12   :  { %440 = vmatpush.bf16.msra.mxu0 %v980_v8  ;;  %1347 = vmatpush.bf16.msra.mxu1 %v980_v8  ;;  %v308_v61 = vmax.f32 %v244_v58, 0.0  ;;  %v232_v9 = vadd.f32 %v1417_v14, %v166_v4  ;;  %v233_v10 = vadd.f32 %v1417_v14, %v167_v5  ;;  %v1000_v23 = vunpack.c.h.bf16 %v1275_v15 }
  0x13   :  { %1348 = vmatpush.bf16.msra.mxu2 %v980_v8  ;;  %1349 = vmatpush.bf16.msra.mxu3 %v980_v8  ;;  %v309_v62 = vmax.f32 %v245_v59, 0.0  ;;  %v217_v8 = vadd.f32 %v1417_v14, %v151_v2  ;;  %v280_v11 = vmax.f32 %v216_v6, 0.0  ;;  %v181_v21 = vmul.f32 %v1404_v7, %v1056_v19 }
  0x14   :  { %v296_v16 = vmax.f32 %v232_v9, 0.0  ;;  %v246_v26 = vadd.f32 %v1417_v14, %v180_v20  ;;  %v153_v34 = vmul.f32 %v1404_v7, %v1000_v23  ;;  %v1059_v49 = vunpack.c.l.bf16 %v1290_v46 }
  0x15   :  { %v356_v3 = vpack.c.bf16 %v309_v62, %v308_v61  ;;  %v281_v12 = vmax.f32 %v217_v8, 0.0  ;;  %v247_v27 = vadd.f32 %v1417_v14, %v181_v21  ;;  %v1060_v50 = vunpack.c.h.bf16 %v1290_v46 }
  0x16   :  { %441 = vmatpush.bf16.msra.mxu0 %v979_v17  ;;  %1350 = vmatpush.bf16.msra.mxu1 %v979_v17  ;;  %v310_v29 = vmax.f32 %v246_v26, 0.0  ;;  %v219_v39 = vadd.f32 %v1417_v14, %v153_v34  ;;  %v1083_v51 = vunpack.c.l.bf16 %v1296_v47  ;;  %v1084_v52 = vunpack.c.h.bf16 %v1296_v47  ;;  %v1277_v26 = vld [vmem:[%s2036_s0 + $0x28] sm:$0xff]  }
  0x17   :  { %1351 = vmatpush.bf16.msra.mxu2 %v979_v17  ;;  %1352 = vmatpush.bf16.msra.mxu3 %v979_v17  ;;  %v297_v17 = vmax.f32 %v233_v10, 0.0  ;;  %v342_v24 = vpack.c.bf16 %v281_v12, %v280_v11  ;;  %v311_v30 = vmax.f32 %v247_v27, 0.0  ;;  %v182_v53 = vmul.f32 %v1404_v7, %v1059_v49 }
  0x18   :  { %v283_v43 = vmax.f32 %v219_v39, 0.0  ;;  %v183_v54 = vmul.f32 %v1404_v7, %v1060_v50  ;;  %v194_v55 = vmul.f32 %v1404_v7, %v1083_v51  ;;  %v1003_v58 = vunpack.c.l.bf16 %v1276_v48 }
  0x19   :  { %v350_v25 = vpack.c.bf16 %v297_v17, %v296_v16  ;;  %v357_v35 = vpack.c.bf16 %v311_v30, %v310_v29  ;;  %v1004_v59 = vunpack.c.h.bf16 %v1276_v48  ;;  %v248_v61 = vadd.f32 %v1417_v14, %v182_v53 }
  0x1a   :  { %442 = vmatpush.bf16.msra.mxu0 %v978_v22  ;;  %1353 = vmatpush.bf16.msra.mxu1 %v978_v22  ;;  %v249_v62 = vadd.f32 %v1417_v14, %v183_v54  ;;  %v260_v63 = vadd.f32 %v1417_v14, %v194_v55  ;;  %v154_v6 = vmul.f32 %v1404_v7, %v1003_v58  ;;  %v1035_v9 = vunpack.c.l.bf16 %v1284_v1 }
  0x1b   :  { %1354 = vmatpush.bf16.msra.mxu2 %v978_v22  ;;  %1355 = vmatpush.bf16.msra.mxu3 %v978_v22  ;;  %v999_v22 = vunpack.c.l.bf16 %v1275_v15  ;;  %v312_v2 = vmax.f32 %v248_v61, 0.0  ;;  %v155_v8 = vmul.f32 %v1404_v7, %v1004_v59  ;;  %v1036_v10 = vunpack.c.h.bf16 %v1284_v1  ;;  %v1298_v1 = vld [vmem:[%s2036_s0 + $0xd0] sm:$0xff]  }
  0x1c   :  { %v324_v4 = vmax.f32 %v260_v63, 0.0  ;;  %v170_v13 = vmul.f32 %v1404_v7, %v1035_v9  ;;  %v220_v16 = vadd.f32 %v1417_v14, %v154_v6  ;;  %v1092_v6 = vunpack.c.h.bf16 %v1298_v1 }
  0x1d   :  { %v152_v33 = vmul.f32 %v1404_v7, %v999_v22  ;;  %v171_v15 = vmul.f32 %v1404_v7, %v1036_v10  ;;  %v221_v17 = vadd.f32 %v1417_v14, %v155_v8 }
  0x1e   :  { %443 = vmatpush.bf16.msra.mxu0 %v977_v28  ;;  %1356 = vmatpush.bf16.msra.mxu1 %v977_v28  ;;  %v236_v18 = vadd.f32 %v1417_v14, %v170_v13  ;;  %v284_v20 = vmax.f32 %v220_v16, 0.0 }
  0x1f   :  { %1357 = vmatpush.bf16.msra.mxu2 %v977_v28  ;;  %1358 = vmatpush.bf16.msra.mxu3 %v977_v28  ;;  %v1283_v28 = vld [vmem:[%s2036_s0 + $0x58] sm:$0xff]   ;;  %v218_v38 = vadd.f32 %v1417_v14, %v152_v33  ;;  %v237_v19 = vadd.f32 %v1417_v14, %v171_v15  ;;  %v285_v21 = vmax.f32 %v221_v17, 0.0 }
  0x20   :  { %v300_v22 = vmax.f32 %v236_v18, 0.0 }
  0x21   :  { %444 = vmatmul.bf16.vlgmr.msra.gmra.mxu0 %v340_v31  ;;  %484 = vmatmul.bf16.vlgmr.msra.gmra.mxu1 %v348_v32  ;;  %v1031_v31 = vunpack.c.l.bf16 %v1283_v28  ;;  %v1032_v32 = vunpack.c.h.bf16 %v1283_v28  ;;  %v282_v42 = vmax.f32 %v218_v38, 0.0  ;;  %v301_v23 = vmax.f32 %v237_v19, 0.0 }
  0x22   :  { %524 = vmatmul.bf16.vlgmr.msra.gmra.mxu2 %v356_v3  ;;  %v313_v3 = vmax.f32 %v249_v62, 0.0 }
  0x23   :  { %v168_v36 = vmul.f32 %v1404_v7, %v1031_v31  ;;  %v169_v37 = vmul.f32 %v1404_v7, %v1032_v32  ;;  %v352_v38 = vpack.c.bf16 %v301_v23, %v300_v22 }
  0x24   :  { %v358_v11 = vpack.c.bf16 %v313_v3, %v312_v2  ;;  %v1278_v2 = vld [vmem:[%s2036_s0 + $0x30] sm:$0xff]  }
  0x25   :  { %v234_v40 = vadd.f32 %v1417_v14, %v168_v36  ;;  %v235_v41 = vadd.f32 %v1417_v14, %v169_v37  ;;  %v1007_v36 = vunpack.c.l.bf16 %v1277_v26  ;;  %v1008_v37 = vunpack.c.h.bf16 %v1277_v26 }
  0x26   :  { %v1011_v13 = vunpack.c.l.bf16 %v1278_v2  ;;  %v1012_v15 = vunpack.c.h.bf16 %v1278_v2 }
  0x27   :  { %v298_v44 = vmax.f32 %v234_v40, 0.0  ;;  %v299_v45 = vmax.f32 %v235_v41, 0.0  ;;  %v156_v48 = vmul.f32 %v1404_v7, %v1007_v36  ;;  %v157_v49 = vmul.f32 %v1404_v7, %v1008_v37 }
  0x28   :  { %v158_v26 = vmul.f32 %v1404_v7, %v1011_v13 }
  0x29   :  { %v351_v60 = vpack.c.bf16 %v299_v45, %v298_v44 }
  0x31   :  { %449 = vmatmul.bf16.gmra.mxu0 %v341_v56  ;;  %489 = vmatmul.bf16.gmra.mxu1 %v349_v57  ;;  %v195_v56 = vmul.f32 %v1404_v7, %v1084_v52  ;;  %v343_v57 = vpack.c.bf16 %v283_v43, %v282_v42  ;;  %v1285_v43 = vld [vmem:[%s2036_s0 + $0x68] sm:$0xff]  }
  0x32   :  { %529 = vmatmul.bf16.gmra.mxu2 %v357_v35  ;;  %v344_v35 = vpack.c.bf16 %v285_v21, %v284_v20  ;;  %v1039_v50 = vunpack.c.l.bf16 %v1285_v43  ;;  %v1040_v51 = vunpack.c.h.bf16 %v1285_v43  ;;  %v1286_v21 = vld [vmem:[%s2036_s0 + $0x70] sm:$0xff]   ;;  %v1299_v43 = vld [vmem:[%s2036_s0 + $0xd8] sm:$0xff]  }
  0x33   :  { %v261_v0 = vadd.f32 %v1417_v14, %v195_v56  ;;  %v222_v56 = vadd.f32 %v1417_v14, %v156_v48  ;;  %v1096_v48 = vunpack.c.h.bf16 %v1299_v43 }
  0x34   :  { %v172_v54 = vmul.f32 %v1404_v7, %v1039_v50  ;;  %v173_v55 = vmul.f32 %v1404_v7, %v1040_v51 }
  0x35   :  { %v325_v5 = vmax.f32 %v261_v0, 0.0  ;;  %v1292_v0 = vld [vmem:[%s2036_s0 + $0xa0] sm:$0xff]  }
  0x36   :  { %v238_v58 = vadd.f32 %v1417_v14, %v172_v54  ;;  %v239_v59 = vadd.f32 %v1417_v14, %v173_v55  ;;  %v1067_v3 = vunpack.c.l.bf16 %v1292_v0 }
  0x37   :  { %v364_v12 = vpack.c.bf16 %v325_v5, %v324_v4  ;;  %v1068_v4 = vunpack.c.h.bf16 %v1292_v0  ;;  %v1091_v5 = vunpack.c.l.bf16 %v1298_v1 }
  0x38   :  { %v302_v62 = vmax.f32 %v238_v58, 0.0  ;;  %v303_v63 = vmax.f32 %v239_v59, 0.0  ;;  %v186_v8 = vmul.f32 %v1404_v7, %v1067_v3 }
  0x39   :  { %564 = vmatmul.bf16.vlgmr.msra.gmra.mxu3 %v364_v12  ;;  %v187_v9 = vmul.f32 %v1404_v7, %v1068_v4  ;;  %v198_v10 = vmul.f32 %v1404_v7, %v1091_v5 }
  0x3a   :  { %v353_v16 = vpack.c.bf16 %v303_v63, %v302_v62  ;;  %v252_v17 = vadd.f32 %v1417_v14, %v186_v8 }
  0x3b   :  { %v253_v18 = vadd.f32 %v1417_v14, %v187_v9  ;;  %v264_v19 = vadd.f32 %v1417_v14, %v198_v10 }
  0x3c   :  { %v316_v22 = vmax.f32 %v252_v17, 0.0 }
  0x3d   :  { %v317_v23 = vmax.f32 %v253_v18, 0.0 }
  0x41   :  { %454 = vmatmul.bf16.gmra.mxu0 %v342_v24  ;;  %494 = vmatmul.bf16.gmra.mxu1 %v350_v25  ;;  %v1291_v24 = vld [vmem:[%s2036_s0 + $0x98] sm:$0xff]   ;;  %v1297_v25 = vld [vmem:[%s2036_s0 + $0xc8] sm:$0xff]  }
  0x42   :  { %534 = vmatmul.bf16.gmra.mxu2 %v358_v11  ;;  %v1063_v27 = vunpack.c.l.bf16 %v1291_v24  ;;  %v1064_v28 = vunpack.c.h.bf16 %v1291_v24  ;;  %v1087_v29 = vunpack.c.l.bf16 %v1297_v25  ;;  %v1088_v30 = vunpack.c.h.bf16 %v1297_v25 }
  0x43   :  { %v199_v11 = vmul.f32 %v1404_v7, %v1092_v6  ;;  %v328_v24 = vmax.f32 %v264_v19, 0.0 }
  0x44   :  { %v184_v31 = vmul.f32 %v1404_v7, %v1063_v27  ;;  %v185_v32 = vmul.f32 %v1404_v7, %v1064_v28  ;;  %v196_v33 = vmul.f32 %v1404_v7, %v1087_v29  ;;  %v197_v34 = vmul.f32 %v1404_v7, %v1088_v30 }
  0x45   :  { %v265_v20 = vadd.f32 %v1417_v14, %v199_v11  ;;  %v159_v27 = vmul.f32 %v1404_v7, %v1012_v15  ;;  %v1043_v28 = vunpack.c.l.bf16 %v1286_v21  ;;  %v1044_v29 = vunpack.c.h.bf16 %v1286_v21  ;;  %v1300_v21 = vld [vmem:[%s2036_s0 + $0xe0] sm:$0xff]  }
  0x46   :  { %v250_v39 = vadd.f32 %v1417_v14, %v184_v31  ;;  %v251_v40 = vadd.f32 %v1417_v14, %v185_v32  ;;  %v262_v41 = vadd.f32 %v1417_v14, %v196_v33  ;;  %v263_v42 = vadd.f32 %v1417_v14, %v197_v34 }
  0x47   :  { %v329_v25 = vmax.f32 %v265_v20, 0.0  ;;  %v360_v30 = vpack.c.bf16 %v317_v23, %v316_v22  ;;  %v174_v32 = vmul.f32 %v1404_v7, %v1043_v28  ;;  %v175_v33 = vmul.f32 %v1404_v7, %v1044_v29  ;;  %v1294_v20 = vld [vmem:[%s2036_s0 + $0xb0] sm:$0xff]  }
  0x48   :  { %v314_v44 = vmax.f32 %v250_v39, 0.0  ;;  %v315_v45 = vmax.f32 %v251_v40, 0.0  ;;  %v326_v46 = vmax.f32 %v262_v41, 0.0  ;;  %v327_v47 = vmax.f32 %v263_v42, 0.0  ;;  %v1293_v42 = vld [vmem:[%s2036_s0 + $0xa8] sm:$0xff]  }
  0x49   :  { %v366_v31 = vpack.c.bf16 %v329_v25, %v328_v24  ;;  %v224_v34 = vadd.f32 %v1417_v14, %v158_v26  ;;  %v240_v36 = vadd.f32 %v1417_v14, %v174_v32  ;;  %v241_v37 = vadd.f32 %v1417_v14, %v175_v33 }
  0x4a   :  { %v359_v52 = vpack.c.bf16 %v315_v45, %v314_v44  ;;  %v365_v53 = vpack.c.bf16 %v327_v47, %v326_v46  ;;  %v1279_v44 = vld [vmem:[%s2036_s0 + $0x38] sm:$0xff]   ;;  %v1071_v45 = vunpack.c.l.bf16 %v1293_v42  ;;  %v1072_v46 = vunpack.c.h.bf16 %v1293_v42 }
  0x4b   :  { %v304_v40 = vmax.f32 %v240_v36, 0.0  ;;  %v305_v41 = vmax.f32 %v241_v37, 0.0  ;;  %v1095_v47 = vunpack.c.l.bf16 %v1299_v43  ;;  %v1015_v54 = vunpack.c.l.bf16 %v1279_v44  ;;  %v1295_v42 = vld [vmem:[%s2036_s0 + $0xb8] sm:$0xff]   ;;  %v1301_v43 = vld [vmem:[%s2036_s0 + $0xe8] sm:$0xff]  }
  0x4c   :  { %569 = vmatmul.bf16.gmra.mxu3 %v365_v53  ;;  %v189_v50 = vmul.f32 %v1404_v7, %v1072_v46  ;;  %v1016_v55 = vunpack.c.h.bf16 %v1279_v44  ;;  %v1075_v22 = vunpack.c.l.bf16 %v1294_v20  ;;  %v1076_v23 = vunpack.c.h.bf16 %v1294_v20 }
  0x4d   :  { %v200_v51 = vmul.f32 %v1404_v7, %v1095_v47  ;;  %v160_v2 = vmul.f32 %v1404_v7, %v1015_v54  ;;  %v1099_v24 = vunpack.c.l.bf16 %v1300_v21  ;;  %v1100_v25 = vunpack.c.h.bf16 %v1300_v21 }
  0x4e   :  { %v255_v58 = vadd.f32 %v1417_v14, %v189_v50  ;;  %v161_v3 = vmul.f32 %v1404_v7, %v1016_v55  ;;  %v190_v26 = vmul.f32 %v1404_v7, %v1075_v22  ;;  %v1079_v44 = vunpack.c.l.bf16 %v1295_v42 }
  0x4f   :  { %v266_v59 = vadd.f32 %v1417_v14, %v200_v51  ;;  %v226_v11 = vadd.f32 %v1417_v14, %v160_v2  ;;  %v202_v28 = vmul.f32 %v1404_v7, %v1099_v24  ;;  %v203_v29 = vmul.f32 %v1404_v7, %v1100_v25 }
  0x50   :  { %v319_v63 = vmax.f32 %v255_v58, 0.0  ;;  %v256_v32 = vadd.f32 %v1417_v14, %v190_v26  ;;  %v1103_v46 = vunpack.c.l.bf16 %v1301_v43  ;;  %v1104_v47 = vunpack.c.h.bf16 %v1301_v43 }
  0x51   :  { %459 = vmatmul.bf16.gmra.mxu0 %v343_v57  ;;  %499 = vmatmul.bf16.gmra.mxu1 %v351_v60  ;;  %v223_v57 = vadd.f32 %v1417_v14, %v157_v49  ;;  %v286_v60 = vmax.f32 %v222_v56, 0.0  ;;  %v188_v49 = vmul.f32 %v1404_v7, %v1071_v45  ;;  %v354_v56 = vpack.c.bf16 %v305_v41, %v304_v40 }
  0x52   :  { %539 = vmatmul.bf16.gmra.mxu2 %v359_v52  ;;  %v201_v52 = vmul.f32 %v1404_v7, %v1096_v48  ;;  %v330_v0 = vmax.f32 %v266_v59, 0.0  ;;  %v320_v36 = vmax.f32 %v256_v32, 0.0  ;;  %v1080_v45 = vunpack.c.h.bf16 %v1295_v42  ;;  %v1303_v32 = vld [vmem:[%s2036_s0 + $0xf8] sm:$0xff]  }
  0x53   :  { %v287_v61 = vmax.f32 %v223_v57, 0.0  ;;  %v254_v57 = vadd.f32 %v1417_v14, %v188_v49  ;;  %v192_v48 = vmul.f32 %v1404_v7, %v1079_v44  ;;  %v204_v50 = vmul.f32 %v1404_v7, %v1103_v46 }
  0x54   :  { %v193_v49 = vmul.f32 %v1404_v7, %v1080_v45  ;;  %v205_v51 = vmul.f32 %v1404_v7, %v1104_v47 }
  0x55   :  { %v345_v12 = vpack.c.bf16 %v287_v61, %v286_v60  ;;  %v267_v60 = vadd.f32 %v1417_v14, %v201_v52  ;;  %v1287_v61 = vld [vmem:[%s2036_s0 + $0x78] sm:$0xff]   ;;  %v318_v62 = vmax.f32 %v254_v57, 0.0  ;;  %v258_v52 = vadd.f32 %v1417_v14, %v192_v48 }
  0x56   :  { %v1047_v4 = vunpack.c.l.bf16 %v1287_v61  ;;  %v1048_v5 = vunpack.c.h.bf16 %v1287_v61  ;;  %v270_v54 = vadd.f32 %v1417_v14, %v204_v50  ;;  %v271_v55 = vadd.f32 %v1417_v14, %v205_v51 }
  0x57   :  { %v331_v1 = vmax.f32 %v267_v60, 0.0  ;;  %v361_v6 = vpack.c.bf16 %v319_v63, %v318_v62  ;;  %v322_v58 = vmax.f32 %v258_v52, 0.0 }
  0x58   :  { %v176_v9 = vmul.f32 %v1404_v7, %v1047_v4  ;;  %v177_v10 = vmul.f32 %v1404_v7, %v1048_v5  ;;  %v334_v60 = vmax.f32 %v270_v54, 0.0  ;;  %v335_v61 = vmax.f32 %v271_v55, 0.0 }
  0x59   :  { %v367_v8 = vpack.c.bf16 %v331_v1, %v330_v0 }
  0x5a   :  { %v242_v13 = vadd.f32 %v1417_v14, %v176_v9  ;;  %v243_v15 = vadd.f32 %v1417_v14, %v177_v10  ;;  %v369_v63 = vpack.c.bf16 %v335_v61, %v334_v60 }
  0x5c   :  { %574 = vmatmul.bf16.gmra.mxu3 %v366_v31  ;;  %v306_v18 = vmax.f32 %v242_v13, 0.0  ;;  %v307_v19 = vmax.f32 %v243_v15, 0.0 }
  0x5e   :  { %v355_v31 = vpack.c.bf16 %v307_v19, %v306_v18 }
  0x61   :  { %464 = vmatmul.bf16.gmra.mxu0 %v344_v35  ;;  %504 = vmatmul.bf16.gmra.mxu1 %v352_v38  ;;  %v225_v35 = vadd.f32 %v1417_v14, %v159_v27  ;;  %v288_v38 = vmax.f32 %v224_v34, 0.0  ;;  %v191_v27 = vmul.f32 %v1404_v7, %v1076_v23  ;;  %v268_v34 = vadd.f32 %v1417_v14, %v202_v28 }
  0x62   :  { %544 = vmatmul.bf16.gmra.mxu2 %v360_v30 }
  0x63   :  { %v289_v39 = vmax.f32 %v225_v35, 0.0  ;;  %v257_v33 = vadd.f32 %v1417_v14, %v191_v27  ;;  %v269_v35 = vadd.f32 %v1417_v14, %v203_v29 }
  0x65   :  { %v346_v53 = vpack.c.bf16 %v289_v39, %v288_v38  ;;  %v321_v37 = vmax.f32 %v257_v33, 0.0  ;;  %v332_v38 = vmax.f32 %v268_v34, 0.0  ;;  %v333_v39 = vmax.f32 %v269_v35, 0.0 }
  0x66   :  { %v1111_v34 = vunpack.c.l.bf16 %v1303_v32  ;;  %v1112_v35 = vunpack.c.h.bf16 %v1303_v32 }
  0x67   :  { %v362_v40 = vpack.c.bf16 %v321_v37, %v320_v36  ;;  %v368_v41 = vpack.c.bf16 %v333_v39, %v332_v38 }
  0x68   :  { %v208_v36 = vmul.f32 %v1404_v7, %v1111_v34  ;;  %v209_v37 = vmul.f32 %v1404_v7, %v1112_v35 }
  0x6a   :  { %v274_v38 = vadd.f32 %v1417_v14, %v208_v36  ;;  %v275_v39 = vadd.f32 %v1417_v14, %v209_v37 }
  0x6c   :  { %579 = vmatmul.bf16.gmra.mxu3 %v367_v8  ;;  %v1302_v8 = vld [vmem:[%s2036_s0 + $0xf0] sm:$0xff]   ;;  %v338_v45 = vmax.f32 %v274_v38, 0.0  ;;  %v339_v47 = vmax.f32 %v275_v39, 0.0 }
  0x6d   :  { %v1107_v10 = vunpack.c.l.bf16 %v1302_v8 }
  0x71   :  { %469 = vmatmul.bf16.gmra.mxu0 %v345_v12  ;;  %509 = vmatmul.bf16.gmra.mxu1 %v353_v16  ;;  %v227_v12 = vadd.f32 %v1417_v14, %v161_v3  ;;  %v290_v16 = vmax.f32 %v226_v11, 0.0  ;;  %v1108_v11 = vunpack.c.h.bf16 %v1302_v8 }
  0x72   :  { %549 = vmatmul.bf16.gmra.mxu2 %v361_v6 }
  0x73   :  { %v291_v17 = vmax.f32 %v227_v12, 0.0  ;;  %v206_v12 = vmul.f32 %v1404_v7, %v1107_v10  ;;  %v207_v13 = vmul.f32 %v1404_v7, %v1108_v11  ;;  %v371_v7 = vpack.c.bf16 %v339_v47, %v338_v45 }
  0x75   :  { %v347_v30 = vpack.c.bf16 %v291_v17, %v290_v16  ;;  %v272_v15 = vadd.f32 %v1417_v14, %v206_v12  ;;  %v273_v16 = vadd.f32 %v1417_v14, %v207_v13 }
  0x77   :  { %v336_v21 = vmax.f32 %v272_v15, 0.0  ;;  %v337_v22 = vmax.f32 %v273_v16, 0.0 }
  0x79   :  { %v370_v24 = vpack.c.bf16 %v337_v22, %v336_v21 }
  0x7c   :  { %584 = vmatmul.bf16.gmra.mxu3 %v368_v41 }
  0x81   :  { %474 = vmatmul.bf16.gmra.mxu0 %v346_v53  ;;  %514 = vmatmul.bf16.gmra.mxu1 %v354_v56  ;;  %v259_v53 = vadd.f32 %v1417_v14, %v193_v49 }
  0x82   :  { %554 = vmatmul.bf16.gmra.mxu2 %v362_v40 }
  0x83   :  { %v323_v59 = vmax.f32 %v259_v53, 0.0 }
  0x85   :  { %v363_v62 = vpack.c.bf16 %v323_v59, %v322_v58 }
  0x8c   :  { %589 = vmatmul.bf16.gmra.mxu3 %v369_v63 }
  0x91   :  { %479 = vmatmul.bf16.gmra.mxu0 %v347_v30  ;;  %519 = vmatmul.bf16.gmra.mxu1 %v355_v31 }
  0x92   :  { %559 = vmatmul.bf16.gmra.mxu2 %v363_v62 }
  0x9c   :  { %594 = vmatmul.bf16.gmra.mxu3 %v370_v24 }
  0x9e   :  { %v445_v56 = vpop.f32.mrf.mxu0  ;;  %v1630_v57 = vpop.f32.mrf.mxu1 }
  0x9f   :  { %v803_v0 = vmul.f32 %v445_v56, %v445_v56 }
  0xa5   :  { %v1655_v31 = vpop.f32.mrf.mxu2 }
  0xa6   :  { %v447_v1 = vpop.f32.mrf.mxu0  ;;  %v1632_v2 = vpop.f32.mrf.mxu1 }
  0xa7   :  { %v1116_v3 = vpack.c.bf16 %v447_v1, %v445_v56  ;;  %v733_v4 = vadd.f32 %v447_v1, %v445_v56  ;;  %v804_v5 = vmul.f32 %v447_v1, %v447_v1  ;;  %v1156_v6 = vpack.c.bf16 %v1632_v2, %v1630_v57 }
  0xa9   :  { %1117 = vst [vmem:[%s2037_s3] sm:$0xff] %v1116_v3   ;;  %v867_v9 = vadd.f32 %v804_v5, %v803_v0 }
  0xaa   :  { %1311 = vst [vmem:[%s2037_s3 + $0x40] sm:$0xff] %v1156_v6  }
  0xac   :  { %599 = vmatmul.bf16.gmra.mxu3 %v371_v7 }
  0xad   :  { %v1674_v44 = vpop.f32.mrf.mxu2 }
  0xae   :  { %v450_v17 = vpop.f32.mrf.mxu0  ;;  %v1649_v18 = vpop.f32.mrf.mxu1  ;;  %v1196_v46 = vpack.c.bf16 %v1674_v44, %v1655_v31 }
  0xaf   :  { %v734_v19 = vadd.f32 %v733_v4, %v450_v17  ;;  %v805_v20 = vmul.f32 %v450_v17, %v450_v17 }
  0xb0   :  { %1319 = vst [vmem:[%s2037_s3 + $0x80] sm:$0xff] %v1196_v46  }
  0xb1   :  { %v868_v23 = vadd.f32 %v867_v9, %v805_v20 }
  0xb5   :  { %v1687_v52 = vpop.f32.mrf.mxu2 }
  0xb6   :  { %v452_v25 = vpop.f32.mrf.mxu0  ;;  %v1651_v26 = vpop.f32.mrf.mxu1 }
  0xb7   :  { %v1121_v27 = vpack.c.bf16 %v452_v25, %v450_v17  ;;  %v735_v28 = vadd.f32 %v734_v19, %v452_v25  ;;  %v806_v29 = vmul.f32 %v452_v25, %v452_v25  ;;  %v1161_v30 = vpack.c.bf16 %v1651_v26, %v1649_v18 }
  0xb9   :  { %1304 = vst [vmem:[%s2037_s3 + $0x8] sm:$0xff] %v1121_v27   ;;  %v869_v33 = vadd.f32 %v868_v23, %v806_v29 }
  0xba   :  { %1312 = vst [vmem:[%s2037_s3 + $0x48] sm:$0xff] %v1161_v30  }
  0xbc   :  { %v1710_v63 = vpop.f32.mrf.mxu3 }
  0xbd   :  { %v1697_v55 = vpop.f32.mrf.mxu2 }
  0xbe   :  { %v455_v40 = vpop.f32.mrf.mxu0  ;;  %v1670_v41 = vpop.f32.mrf.mxu1  ;;  %v1201_v56 = vpack.c.bf16 %v1697_v55, %v1687_v52 }
  0xbf   :  { %v1672_v42 = vadd.f32 %v735_v28, %v455_v40  ;;  %v807_v43 = vmul.f32 %v455_v40, %v455_v40 }
  0xc0   :  { %1320 = vst [vmem:[%s2037_s3 + $0x88] sm:$0xff] %v1201_v56  }
  0xc1   :  { %v1678_v48 = vadd.f32 %v869_v33, %v807_v43 }
  0xc4   :  { %v1722_v4 = vpop.f32.mrf.mxu3 }
  0xc5   :  { %v1708_v62 = vpop.f32.mrf.mxu2  ;;  %v1236_v6 = vpack.c.bf16 %v1722_v4, %v1710_v63 }
  0xc6   :  { %v457_v14 = vpop.f32.mrf.mxu0  ;;  %v1683_v49 = vpop.f32.mrf.mxu1 }
  0xc7   :  { %v1126_v50 = vpack.c.bf16 %v457_v14, %v455_v40  ;;  %v1166_v51 = vpack.c.bf16 %v1683_v49, %v1670_v41  ;;  %1327 = vst [vmem:[%s2037_s3 + $0xc0] sm:$0xff] %v1236_v6   ;;  %v808_v34 = vmul.f32 %v457_v14, %v457_v14  ;;  %v737_v38 = vadd.f32 %v1672_v42, %v457_v14 }
  0xc9   :  { %1305 = vst [vmem:[%s2037_s3 + $0x10] sm:$0xff] %v1126_v50   ;;  %v871_v39 = vadd.f32 %v1678_v48, %v808_v34 }
  0xca   :  { %1313 = vst [vmem:[%s2037_s3 + $0x50] sm:$0xff] %v1166_v51  }
  0xcd   :  { %v1720_v3 = vpop.f32.mrf.mxu2 }
  0xce   :  { %v460_v53 = vpop.f32.mrf.mxu0  ;;  %v1695_v54 = vpop.f32.mrf.mxu1  ;;  %v1206_v5 = vpack.c.bf16 %v1720_v3, %v1708_v62 }
  0xcf   :  { %v1740_v13 = vpop.f32.mrf.mxu3  ;;  %v809_v37 = vmul.f32 %v460_v53, %v460_v53  ;;  %v738_v43 = vadd.f32 %v737_v38, %v460_v53 }
  0xd0   :  { %1321 = vst [vmem:[%s2037_s3 + $0x90] sm:$0xff] %v1206_v5  }
  0xd1   :  { %v872_v45 = vadd.f32 %v871_v39, %v809_v37 }
  0xd5   :  { %v1738_v12 = vpop.f32.mrf.mxu2 }
  0xd6   :  { %v462_v58 = vpop.f32.mrf.mxu0  ;;  %v1704_v59 = vpop.f32.mrf.mxu1 }
  0xd7   :  { %v1131_v60 = vpack.c.bf16 %v462_v58, %v460_v53  ;;  %v1171_v61 = vpack.c.bf16 %v1704_v59, %v1695_v54  ;;  %v1752_v19 = vpop.f32.mrf.mxu3  ;;  %v810_v40 = vmul.f32 %v462_v58, %v462_v58  ;;  %v739_v50 = vadd.f32 %v738_v43, %v462_v58 }
  0xd8   :  { %v1241_v21 = vpack.c.bf16 %v1752_v19, %v1740_v13 }
  0xd9   :  { %1306 = vst [vmem:[%s2037_s3 + $0x18] sm:$0xff] %v1131_v60   ;;  %v873_v14 = vadd.f32 %v872_v45, %v810_v40 }
  0xda   :  { %1314 = vst [vmem:[%s2037_s3 + $0x58] sm:$0xff] %v1171_v61  }
  0xdb   :  { %1328 = vst [vmem:[%s2037_s3 + $0xc8] sm:$0xff] %v1241_v21  }
  0xdd   :  { %v1750_v17 = vpop.f32.mrf.mxu2 }
  0xde   :  { %v465_v0 = vpop.f32.mrf.mxu0  ;;  %v1718_v1 = vpop.f32.mrf.mxu1  ;;  %v1211_v20 = vpack.c.bf16 %v1750_v17, %v1738_v12 }
  0xdf   :  { %v1770_v28 = vpop.f32.mrf.mxu3  ;;  %v811_v46 = vmul.f32 %v465_v0, %v465_v0  ;;  %v740_v5 = vadd.f32 %v739_v50, %v465_v0 }
  0xe0   :  { %1322 = vst [vmem:[%s2037_s3 + $0x98] sm:$0xff] %v1211_v20  }
  0xe1   :  { %v874_v48 = vadd.f32 %v873_v14, %v811_v46 }
  0xe5   :  { %v1768_v27 = vpop.f32.mrf.mxu2 }
  0xe6   :  { %v467_v8 = vpop.f32.mrf.mxu0  ;;  %v1734_v9 = vpop.f32.mrf.mxu1 }
  0xe7   :  { %v1136_v10 = vpack.c.bf16 %v467_v8, %v465_v0  ;;  %v1176_v11 = vpack.c.bf16 %v1734_v9, %v1718_v1  ;;  %v1782_v33 = vpop.f32.mrf.mxu3  ;;  %v812_v61 = vmul.f32 %v467_v8, %v467_v8  ;;  %v741_v58 = vadd.f32 %v740_v5, %v467_v8 }
  0xe8   :  { %v1246_v36 = vpack.c.bf16 %v1782_v33, %v1770_v28 }
  0xe9   :  { %1307 = vst [vmem:[%s2037_s3 + $0x20] sm:$0xff] %v1136_v10   ;;  %v875_v6 = vadd.f32 %v874_v48, %v812_v61 }
  0xea   :  { %1315 = vst [vmem:[%s2037_s3 + $0x60] sm:$0xff] %v1176_v11  }
  0xeb   :  { %1329 = vst [vmem:[%s2037_s3 + $0xd0] sm:$0xff] %v1246_v36  }
  0xed   :  { %v1780_v32 = vpop.f32.mrf.mxu2 }
  0xee   :  { %v470_v15 = vpop.f32.mrf.mxu0  ;;  %v1748_v16 = vpop.f32.mrf.mxu1  ;;  %v1216_v35 = vpack.c.bf16 %v1780_v32, %v1768_v27 }
  0xef   :  { %v1802_v42 = vpop.f32.mrf.mxu3  ;;  %v813_v53 = vmul.f32 %v470_v15, %v470_v15  ;;  %v742_v11 = vadd.f32 %v741_v58, %v470_v15 }
  0xf0   :  { %1323 = vst [vmem:[%s2037_s3 + $0xa0] sm:$0xff] %v1216_v35  }
  0xf1   :  { %v876_v20 = vadd.f32 %v875_v6, %v813_v53  ;;  %v820_v6 = vmul.f32 %v1632_v2, %v1632_v2 }
  0xf5   :  { %v1800_v60 = vpop.f32.mrf.mxu2 }
  0xf6   :  { %v472_v22 = vpop.f32.mrf.mxu0  ;;  %v1764_v23 = vpop.f32.mrf.mxu1 }
  0xf7   :  { %v1141_v24 = vpack.c.bf16 %v472_v22, %v470_v15  ;;  %v1181_v25 = vpack.c.bf16 %v1764_v23, %v1748_v16  ;;  %v814_v10 = vmul.f32 %v472_v22, %v472_v22  ;;  %v743_v0 = vadd.f32 %v742_v11, %v472_v22  ;;  %v1814_v35 = vpop.f32.mrf.mxu3 }
  0xf8   :  { %v1251_v8 = vpack.c.bf16 %v1814_v35, %v1802_v42 }
  0xf9   :  { %1308 = vst [vmem:[%s2037_s3 + $0x28] sm:$0xff] %v1141_v24   ;;  %v877_v36 = vadd.f32 %v876_v20, %v814_v10  ;;  %v821_v20 = vmul.f32 %v1649_v18, %v1649_v18 }
  0xfa   :  { %1316 = vst [vmem:[%s2037_s3 + $0x68] sm:$0xff] %v1181_v25  }
  0xfb   :  { %1330 = vst [vmem:[%s2037_s3 + $0xd8] sm:$0xff] %v1251_v8  }
  0xfd   :  { %v1812_v34 = vpop.f32.mrf.mxu2 }
  0xfe   :  { %v475_v29 = vpop.f32.mrf.mxu0  ;;  %v1778_v30 = vpop.f32.mrf.mxu1  ;;  %v1221_v38 = vpack.c.bf16 %v1812_v34, %v1800_v60 }
  0xff   :  { %v815_v21 = vmul.f32 %v475_v29, %v475_v29  ;;  %v744_v39 = vadd.f32 %v743_v0, %v475_v29  ;;  %v1832_v48 = vpop.f32.mrf.mxu3 }
 0x100   :  { %1324 = vst [vmem:[%s2037_s3 + $0xa8] sm:$0xff] %v1221_v38  }
 0x101   :  { %v878_v15 = vadd.f32 %v877_v36, %v815_v21 }
 0x105   :  { %v1830_v5 = vpop.f32.mrf.mxu2 }
 0x106   :  { %v477_v47 = vpop.f32.mrf.mxu0  ;;  %v1796_v7 = vpop.f32.mrf.mxu1 }
 0x107   :  { %v1146_v51 = vpack.c.bf16 %v477_v47, %v475_v29  ;;  %v1186_v56 = vpack.c.bf16 %v1796_v7, %v1778_v30  ;;  %v816_v37 = vmul.f32 %v477_v47, %v477_v47  ;;  %v745_v22 = vadd.f32 %v744_v39, %v477_v47  ;;  %v1854_v38 = vpop.f32.mrf.mxu3 }
 0x108   :  { %v819_v47 = vmul.f32 %v1630_v57, %v1630_v57  ;;  %v1256_v8 = vpack.c.bf16 %v1854_v38, %v1832_v48 }
 0x109   :  { %1309 = vst [vmem:[%s2037_s3 + $0x30] sm:$0xff] %v1146_v51   ;;  %v879_v43 = vadd.f32 %v878_v15, %v816_v37 }
 0x10a   :  { %1317 = vst [vmem:[%s2037_s3 + $0x70] sm:$0xff] %v1186_v56  }
 0x10b   :  { %1331 = vst [vmem:[%s2037_s3 + $0xe0] sm:$0xff] %v1256_v8   ;;  %v832_v8 = vmul.f32 %v1796_v7, %v1796_v7 }
 0x10d   :  { %v1852_v37 = vpop.f32.mrf.mxu2 }
 0x10e   :  { %v480_v24 = vpop.f32.mrf.mxu0  ;;  %v1810_v25 = vpop.f32.mrf.mxu1 }
 0x10f   :  { %v817_v40 = vmul.f32 %v480_v24, %v480_v24  ;;  %v746_v45 = vadd.f32 %v745_v22, %v480_v24 }
 0x111   :  { %v880_v46 = vadd.f32 %v879_v43, %v817_v40  ;;  %v825_v43 = vmul.f32 %v1695_v54, %v1695_v54 }
 0x116   :  { %v482_v50 = vpop.f32.mrf.mxu0  ;;  %v1826_v51 = vpop.f32.mrf.mxu1 }
 0x117   :  { %v1151_v56 = vpack.c.bf16 %v482_v50, %v480_v24  ;;  %v747_v14 = vadd.f32 %v746_v45, %v482_v50  ;;  %v818_v29 = vmul.f32 %v482_v50, %v482_v50  ;;  %v1191_v61 = vpack.c.bf16 %v1826_v51, %v1810_v25 }
 0x119   :  { %1310 = vst [vmem:[%s2037_s3 + $0x38] sm:$0xff] %v1151_v56   ;;  %v748_v53 = vadd.f32 %v747_v14, %v1630_v57  ;;  %v881_v58 = vadd.f32 %v880_v46, %v818_v29  ;;  %v822_v57 = vmul.f32 %v1651_v26, %v1651_v26  ;;  %v826_v46 = vmul.f32 %v1704_v59, %v1704_v59  ;;  %v1878_v14 = vpop.f32.mrf.mxu2 }
 0x11a   :  { %1318 = vst [vmem:[%s2037_s3 + $0x78] sm:$0xff] %v1191_v61   ;;  %v827_v29 = vmul.f32 %v1718_v1, %v1718_v1 }
 0x11b   :  { %v749_v10 = vadd.f32 %v748_v53, %v1632_v2  ;;  %v882_v11 = vadd.f32 %v881_v58, %v819_v47  ;;  %v1226_v2 = vpack.c.bf16 %v1852_v37, %v1830_v5  ;;  %v828_v53 = vmul.f32 %v1734_v9, %v1734_v9 }
 0x11d   :  { %v750_v21 = vadd.f32 %v749_v10, %v1649_v18  ;;  %v883_v24 = vadd.f32 %v882_v11, %v820_v6  ;;  %v823_v18 = vmul.f32 %v1670_v41, %v1670_v41  ;;  %1325 = vst [vmem:[%s2037_s3 + $0xb0] sm:$0xff] %v1226_v2   ;;  %v830_v11 = vmul.f32 %v1764_v23, %v1764_v23 }
 0x11f   :  { %v751_v0 = vadd.f32 %v750_v21, %v1651_v26  ;;  %v884_v36 = vadd.f32 %v883_v24, %v821_v20  ;;  %v824_v26 = vmul.f32 %v1683_v49, %v1683_v49 }
 0x121   :  { %v752_v39 = vadd.f32 %v751_v0, %v1670_v41  ;;  %v885_v15 = vadd.f32 %v884_v36, %v822_v57 }
 0x123   :  { %v753_v40 = vadd.f32 %v752_v39, %v1683_v49  ;;  %v886_v22 = vadd.f32 %v885_v15, %v823_v18  ;;  %v1880_v49 = vpop.f32.mrf.mxu3 }
 0x125   :  { %v887_v45 = vadd.f32 %v886_v22, %v824_v26  ;;  %v754_v41 = vadd.f32 %v753_v40, %v1695_v54  ;;  %v834_v40 = vmul.f32 %v1826_v51, %v1826_v51 }
 0x127   :  { %v755_v50 = vadd.f32 %v754_v41, %v1704_v59  ;;  %v888_v56 = vadd.f32 %v887_v45, %v825_v43  ;;  %v829_v59 = vmul.f32 %v1748_v16, %v1748_v16  ;;  %v836_v41 = vmul.f32 %v1674_v44, %v1674_v44 }
 0x129   :  { %v756_v61 = vadd.f32 %v755_v50, %v1718_v1  ;;  %v889_v47 = vadd.f32 %v888_v56, %v826_v46  ;;  %v1894_v1 = vpop.f32.mrf.mxu2  ;;  %v837_v50 = vmul.f32 %v1687_v52, %v1687_v52 }
 0x12b   :  { %v757_v54 = vadd.f32 %v756_v61, %v1734_v9  ;;  %v890_v58 = vadd.f32 %v889_v47, %v827_v29  ;;  %v1896_v24 = vpop.f32.mrf.mxu3  ;;  %v1231_v9 = vpack.c.bf16 %v1894_v1, %v1878_v14  ;;  %v838_v29 = vmul.f32 %v1697_v55, %v1697_v55 }
 0x12c   :  { %v1261_v57 = vpack.c.bf16 %v1896_v24, %v1880_v49 }
 0x12d   :  { %v758_v6 = vadd.f32 %v757_v54, %v1748_v16  ;;  %v891_v10 = vadd.f32 %v890_v58, %v828_v53  ;;  %v831_v16 = vmul.f32 %v1778_v30, %v1778_v30  ;;  %1326 = vst [vmem:[%s2037_s3 + $0xb8] sm:$0xff] %v1231_v9  }
 0x12e   :  { %1332 = vst [vmem:[%s2037_s3 + $0xe8] sm:$0xff] %v1261_v57   ;;  %v843_v57 = vmul.f32 %v1768_v27, %v1768_v27 }
 0x12f   :  { %v759_v20 = vadd.f32 %v758_v6, %v1764_v23  ;;  %v892_v21 = vadd.f32 %v891_v10, %v829_v59  ;;  %v841_v6 = vmul.f32 %v1738_v12, %v1738_v12 }
 0x131   :  { %v760_v0 = vadd.f32 %v759_v20, %v1778_v30  ;;  %v893_v36 = vadd.f32 %v892_v21, %v830_v11  ;;  %v833_v30 = vmul.f32 %v1810_v25, %v1810_v25 }
 0x133   :  { %v894_v23 = vadd.f32 %v893_v36, %v831_v16  ;;  %v761_v2 = vadd.f32 %v760_v0, %v1796_v7  ;;  %v1920_v22 = vpop.f32.mrf.mxu3  ;;  %v835_v7 = vmul.f32 %v1655_v31, %v1655_v31  ;;  %v844_v16 = vmul.f32 %v1780_v32, %v1780_v32 }
 0x135   :  { %v895_v18 = vadd.f32 %v894_v23, %v832_v8  ;;  %v762_v39 = vadd.f32 %v761_v2, %v1810_v25  ;;  %v845_v23 = vmul.f32 %v1800_v60, %v1800_v60 }
 0x137   :  { %v896_v15 = vadd.f32 %v895_v18, %v833_v30  ;;  %v763_v26 = vadd.f32 %v762_v39, %v1826_v51  ;;  %v846_v18 = vmul.f32 %v1812_v34, %v1812_v34 }
 0x139   :  { %v764_v43 = vadd.f32 %v763_v26, %v1655_v31  ;;  %v897_v45 = vadd.f32 %v896_v15, %v834_v40 }
 0x13b   :  { %v765_v46 = vadd.f32 %v764_v43, %v1674_v44  ;;  %v898_v25 = vadd.f32 %v897_v45, %v835_v7  ;;  %v1934_v31 = vpop.f32.mrf.mxu3  ;;  %v839_v44 = vmul.f32 %v1708_v62, %v1708_v62  ;;  %v849_v45 = vmul.f32 %v1878_v14, %v1878_v14 }
 0x13c   :  { %v1266_v53 = vpack.c.bf16 %v1934_v31, %v1920_v22 }
 0x13d   :  { %v766_v56 = vadd.f32 %v765_v46, %v1687_v52  ;;  %v899_v51 = vadd.f32 %v898_v25, %v836_v41  ;;  %v840_v52 = vmul.f32 %v1720_v3, %v1720_v3  ;;  %v851_v25 = vmul.f32 %v1710_v63, %v1710_v63 }
 0x13e   :  { %1333 = vst [vmem:[%s2037_s3 + $0xf0] sm:$0xff] %v1266_v53  }
 0x13f   :  { %v767_v61 = vadd.f32 %v766_v56, %v1697_v55  ;;  %v900_v47 = vadd.f32 %v899_v51, %v837_v50 }
 0x141   :  { %v768_v54 = vadd.f32 %v767_v61, %v1708_v62  ;;  %v901_v58 = vadd.f32 %v900_v47, %v838_v29  ;;  %v842_v62 = vmul.f32 %v1750_v17, %v1750_v17 }
 0x143   :  { %v769_v55 = vadd.f32 %v768_v54, %v1720_v3  ;;  %v902_v59 = vadd.f32 %v901_v58, %v839_v44  ;;  %v1953_v9 = vpop.f32.mrf.mxu3 }
 0x145   :  { %v903_v10 = vadd.f32 %v902_v59, %v840_v52  ;;  %v770_v11 = vadd.f32 %v769_v55, %v1738_v12 }
 0x147   :  { %v771_v20 = vadd.f32 %v770_v11, %v1750_v17  ;;  %v904_v21 = vadd.f32 %v903_v10, %v841_v6 }
 0x149   :  { %v772_v3 = vadd.f32 %v771_v20, %v1768_v27  ;;  %v905_v0 = vadd.f32 %v904_v21, %v842_v62 }
 0x14b   :  { %v773_v36 = vadd.f32 %v772_v3, %v1780_v32  ;;  %v906_v12 = vadd.f32 %v905_v0, %v843_v57  ;;  %v602_v27 = vpop.f32.mrf.mxu3  ;;  %v847_v32 = vmul.f32 %v1830_v5, %v1830_v5 }
 0x14c   :  { %v1271_v30 = vpack.c.bf16 %v602_v27, %v1953_v9 }
 0x14d   :  { %v774_v17 = vadd.f32 %v773_v36, %v1800_v60  ;;  %v907_v2 = vadd.f32 %v906_v12, %v844_v16  ;;  %v862_v16 = vmul.f32 %v1896_v24, %v1896_v24 }
 0x14e   :  { %1334 = vst [vmem:[%s2037_s3 + $0xf8] sm:$0xff] %v1271_v30   ;;  %v866_v30 = vmul.f32 %v602_v27, %v602_v27 }
 0x14f   :  { %v775_v8 = vadd.f32 %v774_v17, %v1812_v34  ;;  %v908_v39 = vadd.f32 %v907_v2, %v845_v23  ;;  %v848_v34 = vmul.f32 %v1852_v37, %v1852_v37  ;;  %v863_v23 = vmul.f32 %v1920_v22, %v1920_v22 }
 0x150   :  { %v864_v2 = vmul.f32 %v1934_v31, %v1934_v31 }
 0x151   :  { %v909_v15 = vadd.f32 %v908_v39, %v846_v18  ;;  %v776_v26 = vadd.f32 %v775_v8, %v1830_v5  ;;  %v850_v5 = vmul.f32 %v1894_v1, %v1894_v1  ;;  %v865_v18 = vmul.f32 %v1953_v9, %v1953_v9 }
 0x153   :  { %v910_v60 = vadd.f32 %v909_v15, %v847_v32  ;;  %v777_v40 = vadd.f32 %v776_v26, %v1852_v37  ;;  %v852_v37 = vmul.f32 %v1722_v4, %v1722_v4 }
 0x155   :  { %v911_v7 = vadd.f32 %v910_v60, %v848_v34  ;;  %v778_v43 = vadd.f32 %v777_v40, %v1878_v14  ;;  %v853_v14 = vmul.f32 %v1740_v13, %v1740_v13 }
 0x157   :  { %v912_v41 = vadd.f32 %v911_v7, %v849_v45  ;;  %v779_v46 = vadd.f32 %v778_v43, %v1894_v1  ;;  %v854_v1 = vmul.f32 %v1752_v19, %v1752_v19 }
 0x159   :  { %v780_v50 = vadd.f32 %v779_v46, %v1710_v63  ;;  %v913_v56 = vadd.f32 %v912_v41, %v850_v5  ;;  %v855_v63 = vmul.f32 %v1770_v28, %v1770_v28 }
 0x15b   :  { %v781_v51 = vadd.f32 %v780_v50, %v1722_v4  ;;  %v914_v29 = vadd.f32 %v913_v56, %v851_v25  ;;  %v856_v4 = vmul.f32 %v1782_v33, %v1782_v33 }
 0x15d   :  { %v782_v61 = vadd.f32 %v781_v51, %v1740_v13  ;;  %v915_v47 = vadd.f32 %v914_v29, %v852_v37  ;;  %v857_v13 = vmul.f32 %v1802_v42, %v1802_v42 }
 0x15f   :  { %v783_v53 = vadd.f32 %v782_v61, %v1752_v19  ;;  %v916_v44 = vadd.f32 %v915_v47, %v853_v14  ;;  %v858_v19 = vmul.f32 %v1814_v35, %v1814_v35 }
 0x161   :  { %v784_v54 = vadd.f32 %v783_v53, %v1770_v28  ;;  %v917_v58 = vadd.f32 %v916_v44, %v854_v1  ;;  %v859_v28 = vmul.f32 %v1832_v48, %v1832_v48 }
 0x163   :  { %v785_v52 = vadd.f32 %v784_v54, %v1782_v33  ;;  %v918_v55 = vadd.f32 %v917_v58, %v855_v63  ;;  %v860_v33 = vmul.f32 %v1854_v38, %v1854_v38 }
 0x165   :  { %v919_v59 = vadd.f32 %v918_v55, %v856_v4  ;;  %v786_v6 = vadd.f32 %v785_v52, %v1802_v42  ;;  %v861_v42 = vmul.f32 %v1880_v49, %v1880_v49 }
 0x167   :  { %v787_v10 = vadd.f32 %v786_v6, %v1814_v35  ;;  %v920_v11 = vadd.f32 %v919_v59, %v857_v13 }
 0x169   :  { %v788_v62 = vadd.f32 %v787_v10, %v1832_v48  ;;  %v921_v20 = vadd.f32 %v920_v11, %v858_v19 }
 0x16b   :  { %v789_v21 = vadd.f32 %v788_v62, %v1854_v38  ;;  %v922_v57 = vadd.f32 %v921_v20, %v859_v28 }
 0x16d   :  { %v790_v3 = vadd.f32 %v789_v21, %v1880_v49  ;;  %v923_v0 = vadd.f32 %v922_v57, %v860_v33 }
 0x16f   :  { %v791_v35 = vadd.f32 %v790_v3, %v1896_v24  ;;  %v924_v36 = vadd.f32 %v923_v0, %v861_v42 }
 0x171   :  { %v925_v48 = vadd.f32 %v924_v36, %v862_v16  ;;  %v792_v12 = vadd.f32 %v791_v35, %v1920_v22 }
 0x173   :  { %v926_v38 = vadd.f32 %v925_v48, %v863_v23  ;;  %v793_v17 = vadd.f32 %v792_v12, %v1934_v31 }
 0x175   :  { %v927_v49 = vadd.f32 %v926_v38, %v864_v2  ;;  %v794_v8 = vadd.f32 %v793_v17, %v1953_v9 }
 0x177   :  { %v928_v24 = vadd.f32 %v927_v49, %v865_v18  ;;  %v795_v39 = vadd.f32 %v794_v8, %v602_v27 }
 0x179   :  { %v796_v15 = vrot.slane %v795_v39, 4  ;;  %v929_v26 = vadd.f32 %v928_v24, %v866_v30 }
 0x17b   :  { %v797_v32 = vadd.f32 %v796_v15, %v795_v39  ;;  %v930_v60 = vrot.slane %v929_v26, 4 }
 0x17d   :  { %v798_v22 = vrot.slane %v797_v32, 2  ;;  %v931_v40 = vadd.f32 %v930_v60, %v929_v26 }
 0x17f   :  { %v799_v34 = vadd.f32 %v798_v22, %v797_v32  ;;  %v932_v7 = vrot.slane %v931_v40, 2 }
 0x181   :  { %v800_v43 = vrot.slane %v799_v34, 1  ;;  %v933_v45 = vadd.f32 %v932_v7, %v931_v40 }
 0x183   :  { %v801_v31 = vadd.f32 %v800_v43, %v799_v34  ;;  %v934_v41 = vrot.slane %v933_v45, 1 }
 0x185   :  { %802 = vst [vmem:[%s2038_s4] sm:$0x1] %v801_v31  ;;  %v935_v9 = vadd.f32 %v934_v41, %v933_v45 }
 0x187   :  { %936 = vst [vmem:[%s2038_s4 + $0x1] sm:$0x1] %v935_v9 }

// kernel: bottleneck_forward.5
= control target key start
LH: loop header
LB: loop body
LE: loop exit
PB: predicated region body
PF: predicated region fallthrough
CT: control target
= control target key end

     0   :  { %s7108_s15 = smov 0   ;;  %s8255_s0 = inlined_call_operand.vmem [shape: bf16[2,16,16,128], index: 0, kind: input, shape index: {}]   ;;  %s8256_s1 = inlined_call_operand.vmem [shape: f32[2,128], index: 1, kind: input, shape index: {}]   ;;  %s8257_s2 = inlined_call_operand.vmem [shape: bf16[1152,128], index: 2, kind: input, shape index: {}]   ;;  %s8258_s3 = inlined_call_operand.vmem [shape: bf16[2,256,128], index: 3, kind: output, shape index: {0}]   ;;  %s8259_s4 = inlined_call_operand.vmem [shape: f32[2,2,128], index: 4, kind: output, shape index: {1}]  }
   0x1 LB: > { %s5673_s16 = sadd.s32 4294967295, %s7080_s15   ;;  %p5677_p0 = scmp.ge.s32.totalorder %s7080_s15, 1  ;;  %s7080_s15 = sphi %s7108_s15, %s15_s15  }
   0x2   : > { %p165_p1 = scmp.lt.s32.totalorder %s7080_s15, 3 }
   0x4   : > { %p166_p2 = pnand %p5677_p0, %p165_p1 }
   0x6   : > { %169 = sbr.rel (%p166_p2) target bundleno = 776 (0x308), region = 32 }
   0xb   : > { %v6750_v0 = vld [vmem:[%s8257_s2 + $0x38] sm:$0xff]  ;;  %p195_p3 = scmp.lt.s32.totalorder %s5673_s16, 1  ;;  %v7082_v1 = vmov 0   ;;  %v6749_v2 = vld [vmem:[%s8257_s2 + $0x30] sm:$0xff]  ;;  %v6748_v3 = vld [vmem:[%s8257_s2 + $0x28] sm:$0xff]  ;;  %vm413_vm0 = vcmask 1040384  }
   0xc   : > { %374 = vst [vmem:[#allocation2] sm:$0xf] %v7082_v1  ;;  %7037 = vmatpush.bf16.msra.mxu1 %v6750_v0  ;;  %7038 = vmatpush.bf16.msra.mxu2 %v6750_v0  ;;  %v7138_v4 = vld [vmem:[%s8256_s1] ss:$0 sm:$0xff]  ;;  %v7146_v10 = vld [vmem:[%s8256_s1 + $0x1] ss:$0 sm:$0xff] }
   0xd   : > { %s8279_s16 = smov (!%p195_p3, %s5673_s16), 1  ;;  %7039 = vmatpush.bf16.msra.mxu3 %v6750_v0  ;;  %4614 = vmatpush.bf16.msra.mxu0 %v6750_v0  ;;  %375 = vst [vmem:[#allocation2 + $0x4] sm:$0xf] %v7082_v1  ;;  %v6747_v24 = vld [vmem:[%s8257_s2 + $0x20] sm:$0xff]  ;;  %v6746_v42 = vld [vmem:[%s8257_s2 + $0x18] sm:$0xff]  ;;  %v6745_v60 = vld [vmem:[%s8257_s2 + $0x10] sm:$0xff] }
   0xe   : > { %s6597_s21 = sshll.u32 %s8279_s16, 7  ;;  %376 = vst [vmem:[#allocation2 + $0x8] sm:$0x1] %v7082_v1  ;;  %vm1298_vm1 = vcmask 1042432   ;;  %vm751_vm2 = vsmask.f32 3328 }
   0xf   : > { %s7133_s26 = scalar_lea.vmem %s8255_s0, %s6597_s21  ;;  %378 = vst [vmem:[#allocation2 + $0xcc] sm:$0xf] %v7082_v1  ;;  %vm752_vm3 = vsmask.f32 7440  ;;  %vm1299_vm4 = vcmask 1046532   ;;  %s8124_s18 = scalar_lea.vmem %s8258_s3, %s6597_s21 }
  0x10   : > { %7040 = vmatpush.bf16.msra.mxu1 %v6749_v2  ;;  %7041 = vmatpush.bf16.msra.mxu2 %v6749_v2  ;;  %v7001_v5 = vld [vmem:[%s7133_s26 + $0x18] sm:$0xff]   ;;  %379 = vst [vmem:[#allocation2 + $0xd0] sm:$0xf] %v7082_v1  ;;  %v7002_v13 = vld [vmem:[%s7133_s26 + $0x20] sm:$0xff]   ;;  %vm7446_vm5 = vmor %vm751_vm2, %vm752_vm3  ;;  %s5682_s21 = sshll.u32 %s8279_s16, 1 }
  0x11   : > { %v7005_v6 = vld [vmem:[%s7133_s26 + $0x38] sm:$0xff]   ;;  %7042 = vmatpush.bf16.msra.mxu3 %v6749_v2  ;;  %4615 = vmatpush.bf16.msra.mxu0 %v6749_v2  ;;  %v6829_v8 = vunpack.c.l.bf16 %v7001_v5  ;;  %v6830_v9 = vunpack.c.h.bf16 %v7001_v5  ;;  %v7150_v14 = vld [vmem:[%s7133_s26 + $0x40] sm:$0xff]   ;;  %380 = vst [vmem:[#allocation2 + $0xd4] sm:$0x1] %v7082_v1  ;;  %v6833_v18 = vunpack.c.l.bf16 %v7002_v13  ;;  %v6834_v19 = vunpack.c.h.bf16 %v7002_v13  ;;  %vm7452_vm6 = vmor %vm1298_vm1, %vm1299_vm4  ;;  %s208_s22 = scalar_lea.vmem %s8259_s4, %s5682_s21 }
  0x12   : > { %v7009_v7 = vld [vmem:[%s7133_s26 + $0x58] sm:$0xff]   ;;  %v6845_v11 = vunpack.c.l.bf16 %v7005_v6  ;;  %v6846_v12 = vunpack.c.h.bf16 %v7005_v6  ;;  %v6849_v28 = vunpack.c.l.bf16 %v7150_v14  ;;  %v6850_v33 = vunpack.c.h.bf16 %v7150_v14  ;;  %v7010_v1 = vld [vmem:[%s7133_s26 + $0x60] sm:$0xff]  }
  0x13   : > { %v6861_v15 = vunpack.c.l.bf16 %v7009_v7  ;;  %v6862_v16 = vunpack.c.h.bf16 %v7009_v7  ;;  %v639_v17 = vld [vmem:[#allocation2] sm:$0xf]  ;;  %v282_v20 = vmul.f32 %v7138_v4, %v6829_v8  ;;  %v283_v21 = vmul.f32 %v7138_v4, %v6830_v9 }
  0x14   : > { %v290_v22 = vmul.f32 %v7138_v4, %v6845_v11  ;;  %v291_v23 = vmul.f32 %v7138_v4, %v6846_v12  ;;  %671 = vst [vmem:[#allocation3] sm:$0xf] %v639_v17  ;;  %7043 = vmatpush.bf16.msra.mxu1 %v6748_v3  ;;  %7044 = vmatpush.bf16.msra.mxu2 %v6748_v3  ;;  %v640_v32 = vld [vmem:[#allocation2 + $0x4] sm:$0xf]  ;;  %v7003_v17 = vld [vmem:[%s7133_s26 + $0x28] sm:$0xff]  }
  0x15   : > { %v298_v25 = vmul.f32 %v7138_v4, %v6861_v15  ;;  %v299_v26 = vmul.f32 %v7138_v4, %v6862_v16  ;;  %v284_v27 = vmul.f32 %v7138_v4, %v6833_v18  ;;  %7045 = vmatpush.bf16.msra.mxu3 %v6748_v3  ;;  %4616 = vmatpush.bf16.msra.mxu0 %v6748_v3  ;;  %v6816_v12 = vld [vmem:[%s7133_s26] sm:$0xff]   ;;  %v6865_v15 = vunpack.c.l.bf16 %v7010_v1  ;;  %v6744_v18 = vld [vmem:[%s8257_s2 + $0x8] sm:$0xff] }
  0x16   : > { %v316_v29 = vadd.f32 %v7146_v10, %v282_v20  ;;  %v317_v30 = vadd.f32 %v7146_v10, %v283_v21  ;;  %v324_v31 = vadd.f32 %v7146_v10, %v290_v22  ;;  %v325_v34 = vadd.f32 %v7146_v10, %v291_v23  ;;  %672 = vst [vmem:[#allocation3 + $0x24] sm:$0xf] %v640_v32 }
  0x17   : > { %v332_v35 = vadd.f32 %v7146_v10, %v298_v25  ;;  %v333_v36 = vadd.f32 %v7146_v10, %v299_v26  ;;  %v285_v37 = vmul.f32 %v7138_v4, %v6834_v19  ;;  %v318_v41 = vadd.f32 %v7146_v10, %v284_v27 }
  0x18   : > { %v348_v38 = vmax.f32 %v316_v29, 0.0  ;;  %v349_v39 = vmax.f32 %v317_v30, 0.0  ;;  %v356_v40 = vmax.f32 %v324_v31, 0.0  ;;  %7046 = vmatpush.bf16.msra.mxu1 %v6747_v24  ;;  %7047 = vmatpush.bf16.msra.mxu2 %v6747_v24  ;;  %v357_v43 = vmax.f32 %v325_v34, 0.0  ;;  %v6743_v30 = vld [vmem:[%s8257_s2] sm:$0xff] }
  0x19   : > { %v364_v44 = vmax.f32 %v332_v35, 0.0  ;;  %v365_v45 = vmax.f32 %v333_v36, 0.0  ;;  %v319_v46 = vadd.f32 %v7146_v10, %v285_v37  ;;  %7048 = vmatpush.bf16.msra.mxu3 %v6747_v24  ;;  %4617 = vmatpush.bf16.msra.mxu0 %v6747_v24  ;;  %v350_v50 = vmax.f32 %v318_v41, 0.0  ;;  %v7007_v35 = vld [vmem:[%s7133_s26 + $0x48] sm:$0xff]   ;;  %v6766_v36 = vld [vmem:[%s8257_s2 + $0xb8] sm:$0xff] }
  0x1a   : > { %v423_v47 = vrot.slane %v348_v38, 7  ;;  %v7176_v48 = vrot.slane %v349_v39, 7  ;;  %v435_v49 = vrot.slane %v356_v40, 7  ;;  %v7178_v51 = vrot.slane %v357_v43, 7  ;;  %v6774_v37 = vld [vmem:[%s8257_s2 + $0xf8] sm:$0xff]  ;;  %v7237_v43 = vld [vmem:[%s7133_s26 + $0x8] sm:$0xff]  }
  0x1b   : > { %v447_v52 = vrot.slane %v364_v44, 7  ;;  %v7180_v53 = vrot.slane %v365_v45, 7  ;;  %v351_v54 = vmax.f32 %v319_v46, 0.0  ;;  %v7186_v58 = vld [vmem:[#allocation3] sm:$0xf]  ;;  %v426_v59 = vrot.slane %v350_v50, 7 }
  0x1c   : > { %v425_v55 = vsel %vm413_vm0, %v423_v47, %v7176_v48  ;;  %v513_v56 = vsel %vm413_vm0, 0.0, %v423_v47  ;;  %v517_v57 = vsel %vm413_vm0, 0.0, %v435_v49  ;;  %7049 = vmatpush.bf16.msra.mxu1 %v6746_v42  ;;  %7050 = vmatpush.bf16.msra.mxu2 %v6746_v42  ;;  %v437_v62 = vsel %vm413_vm0, %v435_v49, %v7178_v51 }
  0x1d   : > { %v6887_v61 = vpack.c.bf16 %v425_v55, %v513_v56  ;;  %v449_v63 = vsel %vm413_vm0, %v447_v52, %v7180_v53  ;;  %v521_v0 = vsel %vm413_vm0, 0.0, %v447_v52  ;;  %7051 = vmatpush.bf16.msra.mxu3 %v6746_v42  ;;  %4618 = vmatpush.bf16.msra.mxu0 %v6746_v42  ;;  %v6897_v2 = vpack.c.bf16 %v437_v62, %v517_v57  ;;  %v7197_v5 = vld [vmem:[#allocation3 + $0x20] sm:$0xf0]  ;;  %v7234_v42 = vld [vmem:[%s7133_s26 + $0x68] sm:$0xff]  }
  0x1e   : > { %v6907_v3 = vpack.c.bf16 %v449_v63, %v521_v0  ;;  %v7199_v6 = vrot.slane %v351_v54, 7  ;;  %v5734_v7 = vor.u32 %v7197_v5, %v7186_v58  ;;  %v514_v8 = vsel %vm413_vm0, 0.0, %v426_v59  ;;  %v6782_v62 = vld [vmem:[%s8257_s2 + $0x138] sm:$0xff]  ;;  %v6756_v5 = vld [vmem:[%s8257_s2 + $0x68] sm:$0xff] }
  0x1f   : > { %7015 = vst [vmem:[#allocation2 + $0x30] sm:$0xff] %v6887_v61   ;;  %v292_v9 = vmul.f32 %v7138_v4, %v6849_v28  ;;  %v293_v11 = vmul.f32 %v7138_v4, %v6850_v33  ;;  %v554_v14 = vpack.c.bf16 %v514_v8, %v514_v8  ;;  %v6866_v16 = vunpack.c.h.bf16 %v7010_v1  ;;  %v6758_v61 = vld [vmem:[%s8257_s2 + $0x78] sm:$0xff]  ;;  %v6765_v8 = vld [vmem:[%s8257_s2 + $0xb0] sm:$0xff] }
  0x20   : > { %7017 = vst [vmem:[#allocation2 + $0x60] sm:$0xff] %v6897_v2   ;;  %v428_v13 = vsel %vm413_vm0, %v426_v59, %v7199_v6  ;;  %7052 = vmatpush.bf16.msra.mxu1 %v6745_v60  ;;  %7053 = vmatpush.bf16.msra.mxu2 %v6745_v60  ;;  %v300_v22 = vmul.f32 %v7138_v4, %v6865_v15  ;;  %v6817_v24 = vunpack.c.l.bf16 %v6816_v12  ;;  %v6818_v25 = vunpack.c.h.bf16 %v6816_v12 }
  0x21   : > { %7019 = vst [vmem:[#allocation2 + $0x90] sm:$0xff] %v6907_v3   ;;  %v555_v19 = vpack.c.bf16 %v428_v13, %v428_v13  ;;  %v326_v20 = vadd.f32 %v7146_v10, %v292_v9  ;;  %v327_v21 = vadd.f32 %v7146_v10, %v293_v11  ;;  %7054 = vmatpush.bf16.msra.mxu3 %v6745_v60  ;;  %v6837_v28 = vunpack.c.l.bf16 %v7003_v17  ;;  %v6773_v9 = vld [vmem:[%s8257_s2 + $0xf0] sm:$0xff] }
  0x22   : > { %4619 = vmatpush.bf16.msra.mxu0 %v6745_v60  ;;  %603 = vst [vmem:[#allocation2 + $0x3c] sm:$0xf] %v554_v14  ;;  %v301_v23 = vmul.f32 %v7138_v4, %v6866_v16  ;;  %v6838_v29 = vunpack.c.h.bf16 %v7003_v17  ;;  %v334_v31 = vadd.f32 %v7146_v10, %v300_v22  ;;  %v276_v33 = vmul.f32 %v7138_v4, %v6817_v24 }
  0x23   : > { %604 = vst [vmem:[#allocation2 + $0x40] sm:$0xf] %v555_v19  ;;  %v358_v26 = vmax.f32 %v326_v20, 0.0  ;;  %v359_v27 = vmax.f32 %v327_v21, 0.0  ;;  %v277_v34 = vmul.f32 %v7138_v4, %v6818_v25  ;;  %v286_v40 = vmul.f32 %v7138_v4, %v6837_v28  ;;  %v6757_v25 = vld [vmem:[%s8257_s2 + $0x70] sm:$0xff] }
  0x24   : > { %v335_v32 = vadd.f32 %v7146_v10, %v301_v23  ;;  %7055 = vmatpush.bf16.msra.mxu1 %v6744_v18  ;;  %7056 = vmatpush.bf16.msra.mxu2 %v6744_v18  ;;  %v287_v41 = vmul.f32 %v7138_v4, %v6838_v29  ;;  %v366_v46 = vmax.f32 %v334_v31, 0.0  ;;  %v310_v49 = vadd.f32 %v7146_v10, %v276_v33  ;;  %v6764_v33 = vld [vmem:[%s8257_s2 + $0xa8] sm:$0xff] }
  0x25   : > { %v438_v38 = vrot.slane %v358_v26, 7  ;;  %v439_v39 = vrot.slane %v359_v27, 7  ;;  %7057 = vmatpush.bf16.msra.mxu3 %v6744_v18  ;;  %v311_v50 = vadd.f32 %v7146_v10, %v277_v34  ;;  %v7245_v56 = vadd.f32 %v7146_v10, %v286_v40 }
  0x26   : > { %4620 = vmatpush.bf16.msra.mxu0 %v6744_v18  ;;  %v647_v44 = vld [vmem:[#allocation2 + $0x30] sm:$0xf]  ;;  %v648_v45 = vld [vmem:[#allocation2 + $0x34] sm:$0xf]  ;;  %v367_v47 = vmax.f32 %v335_v32, 0.0  ;;  %v7248_v57 = vadd.f32 %v7146_v10, %v287_v41  ;;  %v6853_v59 = vunpack.c.l.bf16 %v7007_v35  ;;  %v6854_v0 = vunpack.c.h.bf16 %v7007_v35  ;;  %v6772_v35 = vld [vmem:[%s8257_s2 + $0xe8] sm:$0xff] }
  0x27   : > { %679 = vst [vmem:[#allocation3 + $0x120] sm:$0xf] %v647_v44  ;;  %v655_v52 = vld [vmem:[#allocation2 + $0x60] sm:$0xf]  ;;  %v656_v54 = vld [vmem:[#allocation2 + $0x64] sm:$0xf]  ;;  %v7242_v55 = vsel %vm413_vm0, %v438_v38, %v439_v39  ;;  %v6869_v1 = vunpack.c.l.bf16 %v7234_v42  ;;  %v6870_v2 = vunpack.c.h.bf16 %v7234_v42  ;;  %v6821_v14 = vunpack.c.l.bf16 %v7237_v43 }
  0x28   : > { %680 = vst [vmem:[#allocation3 + $0x144] sm:$0xf] %v648_v45  ;;  %v663_v60 = vld [vmem:[#allocation2 + $0x90] sm:$0xf]  ;;  %v567_v63 = vpack.c.bf16 %v7242_v55, %v7242_v55  ;;  %7058 = vmatpush.bf16.msra.mxu1 %v6743_v30  ;;  %7059 = vmatpush.bf16.msra.mxu2 %v6743_v30  ;;  %v664_v3 = vld [vmem:[#allocation2 + $0x94] sm:$0xf]  ;;  %v294_v13 = vmul.f32 %v7138_v4, %v6853_v59  ;;  %v6822_v45 = vunpack.c.h.bf16 %v7237_v43 }
  0x29   : > { %687 = vst [vmem:[#allocation3 + $0x240] sm:$0xf] %v655_v52  ;;  %v518_v11 = vsel %vm413_vm0, 0.0, %v438_v38  ;;  %v534_v12 = vsel %vm413_vm0, %v439_v39, 0.0  ;;  %7060 = vmatpush.bf16.msra.mxu3 %v6743_v30  ;;  %v649_v15 = vld [vmem:[#allocation2 + $0x3c] sm:$0xf]  ;;  %v295_v23 = vmul.f32 %v7138_v4, %v6854_v0  ;;  %v302_v29 = vmul.f32 %v7138_v4, %v6869_v1 }
  0x2a   : > { %4621 = vmatpush.bf16.msra.mxu0 %v6743_v30  ;;  %688 = vst [vmem:[#allocation3 + $0x264] sm:$0xf] %v656_v54  ;;  %v566_v16 = vpack.c.bf16 %v518_v11, %v518_v11  ;;  %v568_v17 = vpack.c.bf16 %v534_v12, %v534_v12  ;;  %v450_v18 = vrot.slane %v366_v46, 7  ;;  %v451_v19 = vrot.slane %v367_v47, 7  ;;  %v650_v20 = vld [vmem:[#allocation2 + $0x40] sm:$0xf] }
  0x2b   : > { %695 = vst [vmem:[#allocation3 + $0x360] sm:$0xf] %v663_v60  ;;  %v342_v21 = vmax.f32 %v310_v49, 0.0  ;;  %v343_v22 = vmax.f32 %v311_v50, 0.0  ;;  %v7272_v24 = vadd.f32 %v7146_v10, %v294_v13  ;;  %v303_v38 = vmul.f32 %v7138_v4, %v6870_v2  ;;  %v6780_v42 = vld [vmem:[%s8257_s2 + $0x128] sm:$0xff]  ;;  %v7316_v59 = vld [vmem:[%s7133_s26 + $0x30] sm:$0xff]  }
  0x2c   : > { %4792 = vmatpush.bf16.msrb.mxu2 %v6766_v36  ;;  %696 = vst [vmem:[#allocation3 + $0x384] sm:$0xf] %v664_v3  ;;  %4703 = vmatpush.bf16.msrb.mxu1 %v6758_v61  ;;  %v452_v26 = vsel %vm413_vm0, %v450_v18, %v451_v19  ;;  %v522_v27 = vsel %vm413_vm0, 0.0, %v450_v18  ;;  %v538_v28 = vsel %vm413_vm0, %v451_v19, 0.0  ;;  %v6781_v36 = vld [vmem:[%s8257_s2 + $0x130] sm:$0xff]  ;;  %v7299_v39 = vadd.f32 %v7146_v10, %v302_v29  ;;  %v6763_v55 = vld [vmem:[%s8257_s2 + $0xa0] sm:$0xff] }
  0x2d   : > { %4881 = vmatpush.bf16.msrb.mxu3 %v6774_v37  ;;  %4622 = vmatmul.bf16.vlgmr.msra.gmra.mxu0 %v5734_v7  ;;  %681 = vst [vmem:[#allocation3 + $0x168] sm:$0xf] %v649_v15  ;;  %v578_v30 = vpack.c.bf16 %v522_v27, %v522_v27  ;;  %v579_v31 = vpack.c.bf16 %v452_v26, %v452_v26  ;;  %v414_v34 = vrot.slane %v342_v21, 7  ;;  %v415_v58 = vrot.slane %v343_v22, 7  ;;  %v6771_v61 = vld [vmem:[%s8257_s2 + $0xe0] sm:$0xff]  ;;  %v6762_v29 = vld [vmem:[%s8257_s2 + $0x98] sm:$0xff] }
  0x2e   : > { %4970 = vmatpush.bf16.msrb.mxu0 %v6782_v62  ;;  %v580_v32 = vpack.c.bf16 %v538_v28, %v538_v28  ;;  %v5877_v37 = vld [vmem:[#allocation3 + $0x120] sm:$0xf]  ;;  %682 = vst [vmem:[#allocation3 + $0x18c] sm:$0xf] %v650_v20  ;;  %v329_v7 = vadd.f32 %v7146_v10, %v295_v23  ;;  %v352_v44 = vmax.f32 %v7245_v56, 0.0  ;;  %v278_v46 = vmul.f32 %v7138_v4, %v6821_v14  ;;  %v6755_v15 = vld [vmem:[%s8257_s2 + $0x60] sm:$0xff] }
  0x2f   : > { %v6639_v40 = vld [vmem:[#allocation3 + $0x140] sm:$0xf0]  ;;  %615 = vst [vmem:[#allocation2 + $0x6c] sm:$0xf] %v566_v16  ;;  %v510_v41 = vsel %vm413_vm0, 0.0, %v414_v34  ;;  %v416_v50 = vsel %vm413_vm0, %v414_v34, %v415_v58  ;;  %v7313_v52 = vsel %vm413_vm0, %v415_v58, 0.0  ;;  %v6841_v18 = vunpack.c.l.bf16 %v7316_v59 }
  0x30   : > { %4793 = vmatpush.bf16.msrb.mxu2 %v6765_v8  ;;  %v5878_v47 = vor.u32 %v6639_v40, %v5877_v37  ;;  %v6021_v49 = vld [vmem:[#allocation3 + $0x240] sm:$0xf]  ;;  %4704 = vmatpush.bf16.msrb.mxu1 %v6757_v25  ;;  %616 = vst [vmem:[#allocation2 + $0x70] sm:$0xf] %v567_v63  ;;  %v542_v54 = vpack.c.bf16 %v510_v41, %v510_v41  ;;  %v353_v62 = vmax.f32 %v7248_v57, 0.0  ;;  %v429_v63 = vrot.slane %v352_v44, 7 }
  0x31   : > { %4882 = vmatpush.bf16.msrb.mxu3 %v6773_v9  ;;  %v6675_v56 = vld [vmem:[#allocation3 + $0x260] sm:$0xf0]  ;;  %617 = vst [vmem:[#allocation2 + $0x74] sm:$0x1] %v568_v17  ;;  %v543_v43 = vpack.c.bf16 %v416_v50, %v416_v50  ;;  %v544_v60 = vpack.c.bf16 %v7313_v52, %v7313_v52  ;;  %v360_v2 = vmax.f32 %v7272_v24, 0.0  ;;  %v361_v3 = vmax.f32 %v329_v7, 0.0 }
  0x32   : > { %4971 = vmatpush.bf16.msrb.mxu0 %v6781_v36  ;;  %4642 = vmatmul.bf16.vlgmr.msra.gmra.mxu1 %v5878_v47  ;;  %v6022_v0 = vor.u32 %v6675_v56, %v6021_v49  ;;  %v6165_v1 = vld [vmem:[#allocation3 + $0x360] sm:$0xf]  ;;  %627 = vst [vmem:[#allocation2 + $0x9c] sm:$0xf] %v578_v30  ;;  %v337_v8 = vadd.f32 %v7146_v10, %v303_v38  ;;  %v7329_v11 = vrot.slane %v353_v62, 7  ;;  %v515_v12 = vsel %vm413_vm0, 0.0, %v429_v63 }
  0x33   : > { %v6711_v9 = vld [vmem:[#allocation3 + $0x380] sm:$0xf0]  ;;  %628 = vst [vmem:[#allocation2 + $0xa0] sm:$0xf] %v579_v31  ;;  %v279_v57 = vmul.f32 %v7138_v4, %v6822_v45  ;;  %v312_v13 = vadd.f32 %v7146_v10, %v278_v46  ;;  %v441_v16 = vrot.slane %v360_v2, 7  ;;  %v7337_v17 = vrot.slane %v361_v3, 7 }
  0x34   : > { %4794 = vmatpush.bf16.msrb.mxu2 %v6764_v33  ;;  %v6166_v14 = vor.u32 %v6711_v9, %v6165_v1  ;;  %629 = vst [vmem:[#allocation2 + $0xa4] sm:$0x1] %v580_v32  ;;  %4705 = vmatpush.bf16.msrb.mxu1 %v6756_v5  ;;  %v431_v19 = vsel %vm413_vm0, %v429_v63, %v7329_v11  ;;  %v368_v20 = vmax.f32 %v7299_v39, 0.0  ;;  %v369_v21 = vmax.f32 %v337_v8, 0.0  ;;  %v6770_v34 = vld [vmem:[%s8257_s2 + $0xd8] sm:$0xff]  ;;  %v6779_v7 = vld [vmem:[%s8257_s2 + $0x120] sm:$0xff] }
  0x35   : > { %4883 = vmatpush.bf16.msrb.mxu3 %v6772_v35  ;;  %4662 = vmatmul.bf16.vlgmr.msra.gmra.mxu2 %v6022_v0  ;;  %591 = vst [vmem:[#allocation2 + $0xc] sm:$0xf] %v542_v54  ;;  %v313_v22 = vadd.f32 %v7146_v10, %v279_v57  ;;  %v519_v24 = vsel %vm413_vm0, 0.0, %v441_v16  ;;  %v6892_v26 = vpack.c.bf16 %v431_v19, %v515_v12  ;;  %v6842_v30 = vunpack.c.h.bf16 %v7316_v59  ;;  %v5913_v36 = vld [vmem:[#allocation3 + $0x168] sm:$0xf]  ;;  %v6754_v46 = vld [vmem:[%s8257_s2 + $0x58] sm:$0xff] }
  0x36   : > { %4972 = vmatpush.bf16.msrb.mxu0 %v6780_v42  ;;  %4682 = vmatmul.bf16.vlgmr.msra.gmra.mxu3 %v6166_v14  ;;  %v657_v23 = vld [vmem:[#allocation2 + $0x6c] sm:$0xf]  ;;  %592 = vst [vmem:[#allocation2 + $0x10] sm:$0xf] %v543_v43  ;;  %v443_v27 = vsel %vm413_vm0, %v441_v16, %v7337_v17  ;;  %v453_v28 = vrot.slane %v368_v20, 7  ;;  %v7351_v31 = vrot.slane %v369_v21, 7  ;;  %v288_v35 = vmul.f32 %v7138_v4, %v6841_v18 }
  0x37   : > { %v658_v25 = vld [vmem:[#allocation2 + $0x70] sm:$0xf]  ;;  %689 = vst [vmem:[#allocation3 + $0x288] sm:$0xf] %v657_v23  ;;  %v344_v32 = vmax.f32 %v312_v13, 0.0  ;;  %v345_v33 = vmax.f32 %v313_v22, 0.0  ;;  %v289_v38 = vmul.f32 %v7138_v4, %v6842_v30  ;;  %v6902_v44 = vpack.c.bf16 %v443_v27, %v519_v24 }
  0x38   : > { %4795 = vmatpush.bf16.msrb.mxu2 %v6763_v55  ;;  %690 = vst [vmem:[#allocation3 + $0x2ac] sm:$0xf] %v658_v25  ;;  %4706 = vmatpush.bf16.msrb.mxu1 %v6755_v15  ;;  %v6648_v37 = vld [vmem:[#allocation3 + $0x188] sm:$0xf0]  ;;  %v523_v5 = vsel %vm413_vm0, 0.0, %v453_v28  ;;  %v455_v40 = vsel %vm413_vm0, %v453_v28, %v7351_v31  ;;  %v322_v42 = vadd.f32 %v7146_v10, %v288_v35  ;;  %v6761_v47 = vld [vmem:[%s8257_s2 + $0x90] sm:$0xff] }
  0x39   : > { %4884 = vmatpush.bf16.msrb.mxu3 %v6771_v61  ;;  %v665_v58 = vld [vmem:[#allocation2 + $0x9c] sm:$0xf]  ;;  %593 = vst [vmem:[#allocation2 + $0x14] sm:$0x1] %v544_v60  ;;  %v417_v41 = vrot.slane %v344_v32, 7  ;;  %v7365_v45 = vrot.slane %v345_v33, 7  ;;  %v323_v50 = vadd.f32 %v7146_v10, %v289_v38  ;;  %v6912_v54 = vpack.c.bf16 %v455_v40, %v523_v5 }
  0x3a   : > { %v666_v39 = vld [vmem:[#allocation2 + $0xa0] sm:$0xf]  ;;  %697 = vst [vmem:[#allocation3 + $0x3a8] sm:$0xf] %v665_v58  ;;  %v6769_v49 = vld [vmem:[%s8257_s2 + $0xd0] sm:$0xff]  ;;  %4973 = vmatpush.bf16.msrb.mxu0 %v6779_v7  ;;  %v6778_v56 = vld [vmem:[%s8257_s2 + $0x118] sm:$0xff]  ;;  %v5914_v63 = vor.u32 %v6648_v37, %v5913_v36 }
  0x3b   : > { %698 = vst [vmem:[#allocation3 + $0x3cc] sm:$0xf] %v666_v39  ;;  %v511_v59 = vsel %vm413_vm0, 0.0, %v417_v41  ;;  %v6753_v43 = vld [vmem:[%s8257_s2 + $0x50] sm:$0xff]  ;;  %v419_v55 = vsel %vm413_vm0, %v417_v41, %v7365_v45  ;;  %v354_v61 = vmax.f32 %v322_v42, 0.0  ;;  %v355_v62 = vmax.f32 %v323_v50, 0.0 }
  0x3c   : > { %4796 = vmatpush.bf16.msrb.mxu2 %v6762_v29  ;;  %v641_v52 = vld [vmem:[#allocation2 + $0xc] sm:$0xf]  ;;  %7016 = vst [vmem:[#allocation2 + $0x48] sm:$0xff] %v6892_v26   ;;  %4707 = vmatpush.bf16.msrb.mxu1 %v6754_v46  ;;  %v6882_v1 = vpack.c.bf16 %v419_v55, %v511_v59  ;;  %v7008_v2 = vld [vmem:[%s7133_s26 + $0x50] sm:$0xff]  }
  0x3d   : > { %4885 = vmatpush.bf16.msrb.mxu3 %v6770_v34  ;;  %v642_v60 = vld [vmem:[#allocation2 + $0x10] sm:$0xf]  ;;  %673 = vst [vmem:[#allocation3 + $0x48] sm:$0xf] %v641_v52  ;;  %v432_v9 = vrot.slane %v354_v61, 7  ;;  %v7388_v12 = vrot.slane %v355_v62, 7  ;;  %v6857_v57 = vunpack.c.l.bf16 %v7008_v2  ;;  %v6858_v13 = vunpack.c.h.bf16 %v7008_v2 }
  0x3e   : > { %v6057_v0 = vld [vmem:[#allocation3 + $0x288] sm:$0xf]  ;;  %674 = vst [vmem:[#allocation3 + $0x6c] sm:$0xf] %v642_v60  ;;  %v7012_v3 = vld [vmem:[%s7133_s26 + $0x70] sm:$0xff]   ;;  %4974 = vmatpush.bf16.msrb.mxu0 %v6778_v56  ;;  %v6760_v55 = vld [vmem:[%s8257_s2 + $0x88] sm:$0xff] }
  0x3f   : > { %v6684_v8 = vld [vmem:[#allocation3 + $0x2a8] sm:$0xf0]  ;;  %7018 = vst [vmem:[#allocation2 + $0x78] sm:$0xff] %v6902_v44   ;;  %v7000_v14 = vld [vmem:[%s7133_s26 + $0x10] sm:$0xff]   ;;  %v6873_v16 = vunpack.c.l.bf16 %v7012_v3  ;;  %v6874_v18 = vunpack.c.h.bf16 %v7012_v3  ;;  %v516_v21 = vsel %vm413_vm0, 0.0, %v432_v9  ;;  %v296_v22 = vmul.f32 %v7138_v4, %v6857_v57  ;;  %v6768_v57 = vld [vmem:[%s8257_s2 + $0xc8] sm:$0xff] }
  0x40   : > { %4797 = vmatpush.bf16.msrb.mxu2 %v6761_v47  ;;  %v6058_v15 = vor.u32 %v6684_v8, %v6057_v0  ;;  %7020 = vst [vmem:[#allocation2 + $0xa8] sm:$0xff] %v6912_v54   ;;  %v6825_v19 = vunpack.c.l.bf16 %v7000_v14  ;;  %4708 = vmatpush.bf16.msrb.mxu1 %v6753_v43  ;;  %v297_v23 = vmul.f32 %v7138_v4, %v6858_v13  ;;  %v6826_v34 = vunpack.c.h.bf16 %v7000_v14 }
  0x41   : > { %4886 = vmatpush.bf16.msrb.mxu3 %v6769_v49  ;;  %v6201_v20 = vld [vmem:[#allocation3 + $0x3a8] sm:$0xf]  ;;  %7014 = vst [vmem:[#allocation2 + $0x18] sm:$0xff] %v6882_v1   ;;  %v560_v25 = vpack.c.bf16 %v516_v21, %v516_v21  ;;  %v304_v26 = vmul.f32 %v7138_v4, %v6873_v16  ;;  %v305_v27 = vmul.f32 %v7138_v4, %v6874_v18 }
  0x42   : > { %4647 = vmatmul.bf16.gmra.mxu1 %v5914_v63  ;;  %v6720_v24 = vld [vmem:[#allocation3 + $0x3c8] sm:$0xf0]  ;;  %v330_v32 = vadd.f32 %v7146_v10, %v296_v22  ;;  %v331_v33 = vadd.f32 %v7146_v10, %v297_v23  ;;  %v434_v36 = vsel %vm413_vm0, %v432_v9, %v7388_v12  ;;  %v280_v58 = vmul.f32 %v7138_v4, %v6825_v19 }
  0x43   : > { %v6202_v28 = vor.u32 %v6720_v24, %v6201_v20  ;;  %v651_v29 = vld [vmem:[#allocation2 + $0x48] sm:$0xf]  ;;  %v652_v30 = vld [vmem:[#allocation2 + $0x4c] sm:$0xf]  ;;  %v338_v37 = vadd.f32 %v7146_v10, %v304_v26  ;;  %v339_v39 = vadd.f32 %v7146_v10, %v305_v27  ;;  %v281_v40 = vmul.f32 %v7138_v4, %v6826_v34  ;;  %609 = vst [vmem:[#allocation2 + $0x54] sm:$0xf] %v560_v25 }
  0x44   : > { %v5769_v35 = vld [vmem:[#allocation3 + $0x48] sm:$0xf]  ;;  %683 = vst [vmem:[#allocation3 + $0x1b0] sm:$0xf] %v651_v29  ;;  %v362_v7 = vmax.f32 %v330_v32, 0.0  ;;  %v363_v38 = vmax.f32 %v331_v33, 0.0  ;;  %v314_v46 = vadd.f32 %v7146_v10, %v280_v58  ;;  %v561_v59 = vpack.c.bf16 %v434_v36, %v434_v36  ;;  %4798 = vmatpush.bf16.msrb.mxu2 %v6760_v55 }
  0x45   : > { %4667 = vmatmul.bf16.gmra.mxu2 %v6058_v15  ;;  %v6612_v5 = vld [vmem:[#allocation3 + $0x68] sm:$0xf0]  ;;  %684 = vst [vmem:[#allocation3 + $0x1d4] sm:$0xf] %v652_v30  ;;  %v315_v50 = vadd.f32 %v7146_v10, %v281_v40  ;;  %v370_v43 = vmax.f32 %v338_v37, 0.0  ;;  %v371_v60 = vmax.f32 %v339_v39, 0.0  ;;  %4887 = vmatpush.bf16.msrb.mxu3 %v6768_v57 }
  0x46   : > { %4687 = vmatmul.bf16.gmra.mxu3 %v6202_v28  ;;  %v5770_v41 = vor.u32 %v6612_v5, %v5769_v35  ;;  %v659_v42 = vld [vmem:[#allocation2 + $0x78] sm:$0xf]  ;;  %v660_v44 = vld [vmem:[#allocation2 + $0x7c] sm:$0xf]  ;;  %v444_v56 = vrot.slane %v362_v7, 7  ;;  %v445_v4 = vrot.slane %v363_v38, 7 }
  0x47   : > { %691 = vst [vmem:[#allocation3 + $0x2d0] sm:$0xf] %v659_v42  ;;  %v667_v47 = vld [vmem:[#allocation2 + $0xa8] sm:$0xf]  ;;  %v668_v49 = vld [vmem:[#allocation2 + $0xac] sm:$0xf] }
  0x48   : > { %4627 = vmatmul.bf16.gmra.mxu0 %v5770_v41  ;;  %692 = vst [vmem:[#allocation3 + $0x2f4] sm:$0xf] %v660_v44  ;;  %v643_v52 = vld [vmem:[#allocation2 + $0x18] sm:$0xf]  ;;  %v644_v54 = vld [vmem:[#allocation2 + $0x1c] sm:$0xf]  ;;  %v446_v10 = vsel %vm413_vm0, %v444_v56, %v445_v4 }
  0x49   : > { %699 = vst [vmem:[#allocation3 + $0x3f0] sm:$0xf] %v667_v47  ;;  %v346_v61 = vmax.f32 %v314_v46, 0.0  ;;  %v347_v62 = vmax.f32 %v315_v50, 0.0  ;;  %v520_v0 = vsel %vm413_vm0, 0.0, %v444_v56  ;;  %v536_v1 = vsel %vm413_vm0, %v445_v4, 0.0 }
  0x4a   : > { %700 = vst [vmem:[#allocation3 + $0x414] sm:$0xf] %v668_v49  ;;  %v572_v3 = vpack.c.bf16 %v520_v0, %v520_v0  ;;  %v573_v8 = vpack.c.bf16 %v446_v10, %v446_v10  ;;  %v456_v9 = vrot.slane %v370_v43, 7  ;;  %v653_v13 = vld [vmem:[#allocation2 + $0x54] sm:$0xf]  ;;  %v574_v14 = vpack.c.bf16 %v536_v1, %v536_v1  ;;  %v6752_v33 = vld [vmem:[%s8257_s2 + $0x48] sm:$0xff] }
  0x4b   : > { %v5949_v63 = vld [vmem:[#allocation3 + $0x1b0] sm:$0xf]  ;;  %675 = vst [vmem:[#allocation3 + $0x90] sm:$0xf] %v643_v52  ;;  %v457_v15 = vrot.slane %v371_v60, 7  ;;  %v420_v16 = vrot.slane %v346_v61, 7  ;;  %4709 = vmatpush.bf16.msrb.mxu1 %v6752_v33 }
  0x4c   : > { %v6657_v2 = vld [vmem:[#allocation3 + $0x1d0] sm:$0xf0]  ;;  %676 = vst [vmem:[#allocation3 + $0xb4] sm:$0xf] %v644_v54  ;;  %v524_v20 = vsel %vm413_vm0, 0.0, %v456_v9  ;;  %v7416_v21 = vrot.slane %v347_v62, 7 }
  0x4d   : > { %610 = vst [vmem:[#allocation2 + $0x58] sm:$0xf] %v561_v59  ;;  %v5950_v18 = vor.u32 %v6657_v2, %v5949_v63  ;;  %v458_v23 = vsel %vm413_vm0, %v456_v9, %v457_v15  ;;  %v540_v24 = vsel %vm413_vm0, %v457_v15, 0.0  ;;  %v584_v25 = vpack.c.bf16 %v524_v20, %v524_v20  ;;  %v6777_v32 = vld [vmem:[%s8257_s2 + $0x110] sm:$0xff]  ;;  %v6759_v35 = vld [vmem:[%s8257_s2 + $0x80] sm:$0xff]  ;;  %v6776_v38 = vld [vmem:[%s8257_s2 + $0x108] sm:$0xff] }
  0x4e   : > { %v6093_v19 = vld [vmem:[#allocation3 + $0x2d0] sm:$0xf]  ;;  %685 = vst [vmem:[#allocation3 + $0x1f8] sm:$0xf] %v653_v13  ;;  %v512_v26 = vsel %vm413_vm0, 0.0, %v420_v16  ;;  %v585_v29 = vpack.c.bf16 %v458_v23, %v458_v23  ;;  %v586_v30 = vpack.c.bf16 %v540_v24, %v540_v24  ;;  %v6767_v36 = vld [vmem:[%s8257_s2 + $0xc0] sm:$0xff]  ;;  %v422_v5 = vsel %vm413_vm0, %v420_v16, %v7416_v21  ;;  %4975 = vmatpush.bf16.msrb.mxu0 %v6777_v32 }
  0x4f   : > { %v6693_v22 = vld [vmem:[#allocation3 + $0x2f0] sm:$0xf0]  ;;  %621 = vst [vmem:[#allocation2 + $0x84] sm:$0xf] %v572_v3  ;;  %v548_v7 = vpack.c.bf16 %v512_v26, %v512_v26  ;;  %4799 = vmatpush.bf16.msrb.mxu2 %v6759_v35  ;;  %v6751_v40 = vld [vmem:[%s8257_s2 + $0x40] sm:$0xff]  ;;  %4888 = vmatpush.bf16.msrb.mxu3 %v6767_v36  ;;  %v549_v46 = vpack.c.bf16 %v422_v5, %v422_v5  ;;  %v6798_v33 = vld [vmem:[%s8257_s2 + $0x1b8] sm:$0xff] }
  0x50   : > { %v6094_v27 = vor.u32 %v6693_v22, %v6093_v19  ;;  %v6237_v28 = vld [vmem:[#allocation3 + $0x3f0] sm:$0xf]  ;;  %622 = vst [vmem:[#allocation2 + $0x88] sm:$0xf] %v573_v8  ;;  %v6775_v44 = vld [vmem:[%s8257_s2 + $0x100] sm:$0xff]  ;;  %4710 = vmatpush.bf16.msrb.mxu1 %v6751_v40 }
  0x51   : > { %v6729_v34 = vld [vmem:[#allocation3 + $0x410] sm:$0xf0]  ;;  %623 = vst [vmem:[#allocation2 + $0x8c] sm:$0x1] %v574_v14  ;;  %v703_v47 = vld [vmem:[#allocation2] sm:$0xf] }
  0x52   : > { %4652 = vmatmul.bf16.gmra.mxu1 %v5950_v18  ;;  %v6238_v37 = vor.u32 %v6729_v34, %v6237_v28  ;;  %v5805_v58 = vld [vmem:[#allocation3 + $0x90] sm:$0xf]  ;;  %633 = vst [vmem:[#allocation2 + $0xb4] sm:$0xf] %v584_v25  ;;  %v704_v49 = vld [vmem:[#allocation2 + $0x4] sm:$0xf]  ;;  %4976 = vmatpush.bf16.msrb.mxu0 %v6776_v38 }
  0x53   : > { %v6621_v39 = vld [vmem:[#allocation3 + $0xb0] sm:$0xf0]  ;;  %634 = vst [vmem:[#allocation2 + $0xb8] sm:$0xf] %v585_v29  ;;  %v705_v52 = vld [vmem:[#allocation2 + $0x8] sm:$0x1]  ;;  %5148 = vmatpush.bf16.msra.mxu2 %v6798_v33 }
  0x54   : > { %v5806_v41 = vor.u32 %v6621_v39, %v5805_v58  ;;  %v654_v42 = vld [vmem:[#allocation2 + $0x58] sm:$0xf]  ;;  %635 = vst [vmem:[#allocation2 + $0xbc] sm:$0x1] %v586_v30  ;;  %v755_v59 = vshrl.u32 %v703_v47, 16  ;;  %v758_v56 = vshll.u32 %v703_v47, 16 }
  0x55   : > { %4672 = vmatmul.bf16.gmra.mxu2 %v6094_v27  ;;  %686 = vst [vmem:[#allocation3 + $0x21c] sm:$0xf] %v654_v42  ;;  %v5985_v4 = vld [vmem:[#allocation3 + $0x1f8] sm:$0xf]  ;;  %v764_v60 = vshll.u32 %v704_v49, 16  ;;  %v768_v55 = vshrl.u32 %v704_v49, 16 }
  0x56   : > { %4692 = vmatmul.bf16.gmra.mxu3 %v6238_v37  ;;  %v661_v50 = vld [vmem:[#allocation2 + $0x84] sm:$0xf]  ;;  %597 = vst [vmem:[#allocation2 + $0x24] sm:$0xf] %v548_v7  ;;  %4977 = vmatpush.bf16.msrb.mxu0 %v6775_v44  ;;  %v757_v62 = vrot.slane %v755_v59, 4  ;;  %v760_v63 = vrot.slane %v758_v56, 5 }
  0x57   : > { %v662_v54 = vld [vmem:[#allocation2 + $0x88] sm:$0xf]  ;;  %693 = vst [vmem:[#allocation3 + $0x318] sm:$0xf] %v661_v50  ;;  %v766_v10 = vrot.slane %v764_v60, 5  ;;  %v770_v0 = vrot.slane %v768_v55, 4 }
  0x58   : > { %4632 = vmatmul.bf16.gmra.mxu0 %v5806_v41  ;;  %694 = vst [vmem:[#allocation3 + $0x33c] sm:$0xf] %v662_v54  ;;  %v774_v1 = vshll.u32 %v705_v52, 16  ;;  %v761_v3 = vor.u32 %v760_v63, %v757_v62  ;;  %v1202_v8 = vld [vmem:[#allocation2] sm:$0xe]  ;;  %v6806_v50 = vld [vmem:[%s8257_s2 + $0x1f8] sm:$0xff] }
  0x59   : > { %v669_v43 = vld [vmem:[#allocation2 + $0xb4] sm:$0xf]  ;;  %598 = vst [vmem:[#allocation2 + $0x28] sm:$0xf] %v549_v46  ;;  %v1203_v9 = vld [vmem:[#allocation2 + $0x4] sm:$0xf]  ;;  %v771_v14 = vor.u32 %v770_v0, %v766_v10  ;;  %5237 = vmatpush.bf16.msra.mxu3 %v6806_v50 }
  0x5a   : > { %v670_v61 = vld [vmem:[#allocation2 + $0xb8] sm:$0xf]  ;;  %701 = vst [vmem:[#allocation3 + $0x438] sm:$0xf] %v669_v43  ;;  %v776_v15 = vrot.slane %v774_v1, 5  ;;  %v5683_v18 = vrot.slane %v1202_v8, 9 }
  0x5b   : > { %702 = vst [vmem:[#allocation3 + $0x45c] sm:$0xf] %v670_v61  ;;  %v1204_v16 = vld [vmem:[#allocation2 + $0x8] sm:$0x1]  ;;  %v762_v22 = vrot.slane %v761_v3, 4  ;;  %v1303_v24 = vrot.slane %v1203_v9, 5 }
  0x5c   : > { %v6666_v2 = vld [vmem:[#allocation3 + $0x218] sm:$0xf0]  ;;  %v772_v26 = vrot.slane %v771_v14, 4  ;;  %v1306_v27 = vrot.slane %v1204_v16, 5  ;;  %v1477_v37 = vld [vmem:[#allocation2 + $0xc] sm:$0xf] }
  0x5d   : > { %v645_v57 = vld [vmem:[#allocation2 + $0x24] sm:$0xf]  ;;  %v5986_v19 = vor.u32 %v6666_v2, %v5985_v4  ;;  %v767_v30 = vsel %vm7446_vm5, %v762_v22, %v766_v10  ;;  %v1305_v32 = vrot.slane %v1303_v24, 4  ;;  %v1304_v36 = vsel %vm7452_vm6, %v5683_v18, %v1303_v24  ;;  %v1541_v58 = vld [vmem:[#allocation2 + $0xc] sm:$0xf]  ;;  %v6790_v60 = vld [vmem:[%s8257_s2 + $0x178] sm:$0xff] }
  0x5e   : > { %v6129_v20 = vld [vmem:[#allocation3 + $0x318] sm:$0xf]  ;;  %677 = vst [vmem:[#allocation3 + $0xd8] sm:$0xf] %v645_v57  ;;  %v777_v35 = vsel %vm7446_vm5, %v772_v26, %v776_v15  ;;  %v1543_v41 = vld [vmem:[#allocation2 + $0x14] sm:$0x1]  ;;  %5059 = vmatpush.bf16.msra.mxu1 %v6790_v60 }
  0x5f   : > { %v6702_v25 = vld [vmem:[#allocation3 + $0x338] sm:$0xf0]  ;;  %1170 = vst [vmem:[#allocation3 + $0x4] sm:$0xf] %v767_v30  ;;  %v1307_v7 = vsel %vm7452_vm6, %v1305_v32, %v1306_v27  ;;  %v1478_v38 = vld [vmem:[#allocation2 + $0x10] sm:$0xf] }
  0x60   : > { %v6130_v28 = vor.u32 %v6702_v25, %v6129_v20  ;;  %v646_v29 = vld [vmem:[#allocation2 + $0x28] sm:$0xf]  ;;  %v1542_v39 = vld [vmem:[#allocation2 + $0x10] sm:$0xf]  ;;  %1171 = vst [vmem:[#allocation3 + $0x28] sm:$0xf] %v777_v35 }
  0x61   : > { %v6273_v34 = vld [vmem:[#allocation3 + $0x438] sm:$0xf]  ;;  %678 = vst [vmem:[#allocation3 + $0xfc] sm:$0xf] %v646_v29  ;;  %v1590_v42 = vshrl.u32 %v1541_v58, 16  ;;  %v1593_v44 = vshll.u32 %v1541_v58, 16 }
  0x62   : > { %4657 = vmatmul.bf16.gmra.mxu1 %v5986_v19  ;;  %v6738_v5 = vld [vmem:[#allocation3 + $0x458] sm:$0xf0]  ;;  %1445 = vst [vmem:[#allocation3 + $0x8] sm:$0xf] %v1304_v36  ;;  %v1599_v46 = vshll.u32 %v1542_v39, 16  ;;  %v1603_v47 = vshrl.u32 %v1542_v39, 16 }
  0x63   : > { %v6274_v40 = vor.u32 %v6738_v5, %v6273_v34  ;;  %v1609_v49 = vshll.u32 %v1543_v41, 16  ;;  %1446 = vst [vmem:[#allocation3 + $0x2c] sm:$0xf] %v1307_v7  ;;  %v1592_v54 = vrot.slane %v1590_v42, 4  ;;  %v1595_v59 = vrot.slane %v1593_v44, 5  ;;  %v6814_v61 = vld [vmem:[%s8257_s2 + $0x238] sm:$0xff] }
  0x64   : > { %1509 = vst [vmem:[#allocation3 + $0xc] sm:$0xf] %v1477_v37  ;;  %v1601_v56 = vrot.slane %v1599_v46, 5  ;;  %v1605_v4 = vrot.slane %v1603_v47, 4  ;;  %v706_v62 = vld [vmem:[#allocation2 + $0xc] sm:$0xf]  ;;  %5326 = vmatpush.bf16.msra.mxu0 %v6814_v61 }
  0x65   : > { %4677 = vmatmul.bf16.gmra.mxu2 %v6130_v28  ;;  %v5841_v52 = vld [vmem:[#allocation3 + $0xd8] sm:$0xf]  ;;  %v1611_v43 = vrot.slane %v1609_v49, 5  ;;  %1510 = vst [vmem:[#allocation3 + $0x30] sm:$0xf] %v1478_v38  ;;  %v1596_v55 = vor.u32 %v1595_v59, %v1592_v54  ;;  %v7478_v63 = vsel %vm413_vm0, %v7365_v45, 0.0 }
  0x66   : > { %4697 = vmatmul.bf16.gmra.mxu3 %v6274_v40  ;;  %v1606_v0 = vor.u32 %v1605_v4, %v1601_v56  ;;  %v707_v1 = vld [vmem:[#allocation2 + $0x10] sm:$0xf]  ;;  %v708_v2 = vld [vmem:[#allocation2 + $0x14] sm:$0x1]  ;;  %v6599_v8 = vld [vmem:[#allocation3 + $0x4] sm:$0xf] }
  0x67   : > { %v1597_v9 = vrot.slane %v1596_v55, 4  ;;  %v779_v57 = vshrl.u32 %v706_v62, 16  ;;  %v782_v14 = vshll.u32 %v706_v62, 16  ;;  %v5735_v15 = vld [vmem:[#allocation3 + $0x24] sm:$0xf0]  ;;  %v788_v18 = vshll.u32 %v707_v1, 16 }
  0x68   : > { %v6630_v10 = vld [vmem:[#allocation3 + $0xf8] sm:$0xf0]  ;;  %v1607_v16 = vrot.slane %v1606_v0, 4  ;;  %v792_v19 = vshrl.u32 %v707_v1, 16  ;;  %v798_v20 = vshll.u32 %v708_v2, 16  ;;  %v5738_v36 = vor.u32 %v6599_v8, %v5735_v15 }
  0x69   : > { %v5842_v3 = vor.u32 %v6630_v10, %v5841_v52  ;;  %v5741_v22 = vld [vmem:[#allocation3 + $0x8] sm:$0xf]  ;;  %v1602_v45 = vsel %vm7446_vm5, %v1597_v9, %v1601_v56  ;;  %v781_v24 = vrot.slane %v779_v57, 4  ;;  %v784_v25 = vrot.slane %v782_v14, 5  ;;  %v1205_v26 = vld [vmem:[#allocation2 + $0xc] sm:$0xe] }
  0x6a   : > { %v6604_v27 = vld [vmem:[#allocation3 + $0x28] sm:$0xf0]  ;;  %v1612_v28 = vsel %vm7446_vm5, %v1607_v16, %v1611_v43  ;;  %2005 = vst [vmem:[#allocation3 + $0x10] sm:$0xf] %v1602_v45  ;;  %v790_v29 = vrot.slane %v788_v18, 5  ;;  %v794_v30 = vrot.slane %v792_v19, 4  ;;  %v547_v52 = vpack.c.bf16 %v7478_v63, %v7478_v63 }
  0x6b   : > { %4637 = vmatmul.bf16.gmra.mxu0 %v5842_v3  ;;  %v6600_v32 = vld [vmem:[#allocation3 + $0xc] sm:$0xf]  ;;  %2006 = vst [vmem:[#allocation3 + $0x34] sm:$0xf] %v1612_v28  ;;  %v785_v33 = vor.u32 %v784_v25, %v781_v24  ;;  %v800_v34 = vrot.slane %v798_v20, 5  ;;  %v5684_v35 = vrot.slane %v1205_v26, 9  ;;  %v5742_v42 = vor.u32 %v6604_v27, %v5741_v22 }
  0x6c   : > { %v5743_v37 = vld [vmem:[#allocation3 + $0x2c] sm:$0xf0]  ;;  %v795_v58 = vor.u32 %v794_v30, %v790_v29  ;;  %v1206_v5 = vld [vmem:[#allocation2 + $0x10] sm:$0xf]  ;;  %v1207_v7 = vld [vmem:[#allocation2 + $0x14] sm:$0x1] }
  0x6d   : > { %v786_v38 = vrot.slane %v785_v33, 4  ;;  %v1310_v39 = vrot.slane %v1206_v5, 5  ;;  %v1313_v40 = vrot.slane %v1207_v7, 5  ;;  %v1479_v41 = vld [vmem:[#allocation2 + $0x18] sm:$0xf]  ;;  %v5746_v59 = vor.u32 %v6600_v32, %v5743_v37 }
  0x6e   : > { %v796_v44 = vrot.slane %v795_v58, 4  ;;  %v1480_v46 = vld [vmem:[#allocation2 + $0x1c] sm:$0xf]  ;;  %1511 = vst [vmem:[#allocation3 + $0x54] sm:$0xf] %v1479_v41  ;;  %v528_v7 = vsel %vm413_vm0, %v7416_v21, 0.0 }
  0x6f   : > { %v791_v47 = vsel %vm7446_vm5, %v786_v38, %v790_v29  ;;  %v1311_v49 = vsel %vm7452_vm6, %v5684_v35, %v1310_v39  ;;  %v1312_v50 = vrot.slane %v1310_v39, 4  ;;  %1512 = vst [vmem:[#allocation3 + $0x78] sm:$0xf] %v1480_v46  ;;  %v1544_v54 = vld [vmem:[#allocation2 + $0x18] sm:$0xf]  ;;  %v6797_v29 = vld [vmem:[%s8257_s2 + $0x1b0] sm:$0xff] }
  0x70   : > { %v801_v56 = vsel %vm7446_vm5, %v796_v44, %v800_v34  ;;  %1172 = vst [vmem:[#allocation3 + $0x4c] sm:$0xf] %v791_v47  ;;  %v1545_v4 = vld [vmem:[#allocation2 + $0x1c] sm:$0xf]  ;;  %v1614_v43 = vshrl.u32 %v1544_v54, 16  ;;  %v1617_v60 = vshll.u32 %v1544_v54, 16  ;;  %5149 = vmatpush.bf16.msra.mxu2 %v6797_v29 }
  0x71   : > { %v5749_v55 = vld [vmem:[#allocation3 + $0x10] sm:$0xf]  ;;  %1173 = vst [vmem:[#allocation3 + $0x70] sm:$0xf] %v801_v56  ;;  %v1314_v61 = vsel %vm7452_vm6, %v1312_v50, %v1313_v40  ;;  %v1623_v62 = vshll.u32 %v1545_v4, 16  ;;  %v1627_v10 = vshrl.u32 %v1545_v4, 16 }
  0x72   : > { %4711 = vmatmul.bf16.vlgmr.msrb.gmra.mxu1 %v5738_v36  ;;  %v6605_v0 = vld [vmem:[#allocation3 + $0x30] sm:$0xf0]  ;;  %1447 = vst [vmem:[#allocation3 + $0x50] sm:$0xf] %v1311_v49  ;;  %v1616_v63 = vrot.slane %v1614_v43, 4  ;;  %v1619_v1 = vrot.slane %v1617_v60, 5 }
  0x73   : > { %1448 = vst [vmem:[#allocation3 + $0x74] sm:$0xf] %v1314_v61  ;;  %v1625_v2 = vrot.slane %v1623_v62, 5  ;;  %v1629_v3 = vrot.slane %v1627_v10, 4  ;;  %v709_v8 = vld [vmem:[#allocation2 + $0x18] sm:$0xf]  ;;  %v5750_v16 = vor.u32 %v6605_v0, %v5749_v55  ;;  %v550_v0 = vpack.c.bf16 %v528_v7, %v528_v7 }
  0x74   : > { %596 = vst [vmem:[#allocation2 + $0x20] sm:$0x1] %v547_v52  ;;  %v1620_v9 = vor.u32 %v1619_v1, %v1616_v63  ;;  %v710_v57 = vld [vmem:[#allocation2 + $0x1c] sm:$0xf]  ;;  %v803_v14 = vshrl.u32 %v709_v8, 16  ;;  %v806_v15 = vshll.u32 %v709_v8, 16 }
  0x75   : > { %4800 = vmatmul.bf16.vlgmr.msrb.gmra.mxu2 %v5742_v42  ;;  %v812_v18 = vshll.u32 %v710_v57, 16  ;;  %v816_v19 = vshrl.u32 %v710_v57, 16  ;;  %v1208_v20 = vld [vmem:[#allocation2 + $0x18] sm:$0xe]  ;;  %v1630_v45 = vor.u32 %v1629_v3, %v1625_v2  ;;  %v1209_v35 = vld [vmem:[#allocation2 + $0x1c] sm:$0xf] }
  0x76   : > { %4889 = vmatmul.bf16.vlgmr.msrb.gmra.mxu3 %v5746_v59  ;;  %v1621_v22 = vrot.slane %v1620_v9, 4  ;;  %v805_v24 = vrot.slane %v803_v14, 4  ;;  %v808_v25 = vrot.slane %v806_v15, 5  ;;  %v5685_v28 = vrot.slane %v1208_v20, 9  ;;  %v1481_v5 = vld [vmem:[#allocation2 + $0x24] sm:$0xf] }
  0x77   : > { %v814_v26 = vrot.slane %v812_v18, 5  ;;  %v818_v27 = vrot.slane %v816_v19, 4  ;;  %v6608_v30 = vld [vmem:[#allocation3 + $0x4c] sm:$0xf]  ;;  %v1317_v58 = vrot.slane %v1209_v35, 5  ;;  %v1631_v39 = vrot.slane %v1630_v45, 4 }
  0x78   : > { %v5771_v32 = vld [vmem:[#allocation3 + $0x6c] sm:$0xf0]  ;;  %v1626_v33 = vsel %vm7446_vm5, %v1621_v22, %v1625_v2  ;;  %v809_v34 = vor.u32 %v808_v25, %v805_v24  ;;  %v6609_v42 = vld [vmem:[#allocation3 + $0x54] sm:$0xf]  ;;  %v5779_v44 = vld [vmem:[#allocation3 + $0x74] sm:$0xf0] }
  0x79   : > { %v5777_v36 = vld [vmem:[#allocation3 + $0x50] sm:$0xf]  ;;  %2007 = vst [vmem:[#allocation3 + $0x58] sm:$0xf] %v1626_v33  ;;  %v819_v37 = vor.u32 %v818_v27, %v814_v26  ;;  %v1318_v50 = vsel %vm7452_vm6, %v5685_v28, %v1317_v58  ;;  %v1319_v52 = vrot.slane %v1317_v58, 4  ;;  %v5774_v54 = vor.u32 %v6608_v30, %v5771_v32  ;;  %v6805_v55 = vld [vmem:[%s8257_s2 + $0x1f0] sm:$0xff] }
  0x7a   : > { %v6613_v38 = vld [vmem:[#allocation3 + $0x70] sm:$0xf0]  ;;  %v810_v40 = vrot.slane %v809_v34, 4  ;;  %v1482_v41 = vld [vmem:[#allocation2 + $0x28] sm:$0xf]  ;;  %5238 = vmatpush.bf16.msra.mxu3 %v6805_v55  ;;  %v6789_v9 = vld [vmem:[%s8257_s2 + $0x170] sm:$0xff]  ;;  %v5782_v57 = vor.u32 %v6609_v42, %v5779_v44 }
  0x7b   : > { %4978 = vmatmul.bf16.vlgmr.msrb.gmra.mxu0 %v5750_v16  ;;  %v1546_v46 = vld [vmem:[#allocation2 + $0x20] sm:$0x1]  ;;  %v820_v49 = vrot.slane %v819_v37, 4  ;;  %1449 = vst [vmem:[#allocation3 + $0x98] sm:$0xf] %v1318_v50  ;;  %v5778_v61 = vor.u32 %v6613_v38, %v5777_v36  ;;  %v6813_v18 = vld [vmem:[%s8257_s2 + $0x230] sm:$0xff]  ;;  %5060 = vmatpush.bf16.msra.mxu1 %v6789_v9 }
  0x7c   : > { %v711_v47 = vld [vmem:[#allocation2 + $0x20] sm:$0x1]  ;;  %v1633_v59 = vshll.u32 %v1546_v46, 16  ;;  %v815_v56 = vsel %vm7446_vm5, %v810_v40, %v814_v26  ;;  %v1547_v60 = vld [vmem:[#allocation2 + $0x24] sm:$0xf]  ;;  %5327 = vmatpush.bf16.msra.mxu0 %v6813_v18 }
  0x7d   : > { %v822_v4 = vshll.u32 %v711_v47, 16  ;;  %v1210_v21 = vld [vmem:[#allocation2 + $0x20] sm:$0x1]  ;;  %1174 = vst [vmem:[#allocation3 + $0x94] sm:$0xf] %v815_v56  ;;  %v1638_v2 = vshrl.u32 %v1547_v60, 16 }
  0x7e   : > { %v1320_v43 = vrot.slane %v1210_v21, 5  ;;  %v1635_v62 = vrot.slane %v1633_v59, 5  ;;  %1513 = vst [vmem:[#allocation3 + $0x9c] sm:$0xf] %v1481_v5  ;;  %v1548_v63 = vld [vmem:[#allocation2 + $0x28] sm:$0xf] }
  0x7f   : > { %v824_v10 = vrot.slane %v822_v4, 5  ;;  %1514 = vst [vmem:[#allocation3 + $0xc0] sm:$0xf] %v1482_v41  ;;  %v1641_v3 = vshll.u32 %v1547_v60, 16  ;;  %v1647_v8 = vshll.u32 %v1548_v63, 16  ;;  %v1651_v16 = vshrl.u32 %v1548_v63, 16 }
  0x80   : > { %v1321_v1 = vsel %vm7452_vm6, %v1319_v52, %v1320_v43  ;;  %v1636_v14 = vsel %vm7446_vm5, %v1631_v39, %v1635_v62  ;;  %v1640_v19 = vrot.slane %v1638_v2, 4  ;;  %v712_v22 = vld [vmem:[#allocation2 + $0x24] sm:$0xf]  ;;  %599 = vst [vmem:[#allocation2 + $0x2c] sm:$0x1] %v550_v0 }
  0x81   : > { %v825_v15 = vsel %vm7446_vm5, %v820_v49, %v824_v10  ;;  %1450 = vst [vmem:[#allocation3 + $0xbc] sm:$0xf] %v1321_v1  ;;  %v1643_v20 = vrot.slane %v1641_v3, 5  ;;  %v1649_v24 = vrot.slane %v1647_v8, 5  ;;  %v1653_v25 = vrot.slane %v1651_v16, 4 }
  0x82   : > { %4716 = vmatmul.bf16.gmra.mxu1 %v5774_v54  ;;  %2008 = vst [vmem:[#allocation3 + $0x7c] sm:$0xf] %v1636_v14  ;;  %v713_v26 = vld [vmem:[#allocation2 + $0x28] sm:$0xf]  ;;  %v827_v27 = vshrl.u32 %v712_v22, 16  ;;  %v830_v28 = vshll.u32 %v712_v22, 16 }
  0x83   : > { %1175 = vst [vmem:[#allocation3 + $0xb8] sm:$0xf] %v825_v15  ;;  %v1644_v45 = vor.u32 %v1643_v20, %v1640_v19  ;;  %v836_v29 = vshll.u32 %v713_v26, 16  ;;  %v840_v32 = vshrl.u32 %v713_v26, 16  ;;  %v1211_v33 = vld [vmem:[#allocation2 + $0x24] sm:$0xe]  ;;  %v1654_v7 = vor.u32 %v1653_v25, %v1649_v24 }
  0x84   : > { %v5785_v34 = vld [vmem:[#allocation3 + $0x58] sm:$0xf]  ;;  %v829_v35 = vrot.slane %v827_v27, 4  ;;  %v832_v36 = vrot.slane %v830_v28, 5  ;;  %v6617_v58 = vld [vmem:[#allocation3 + $0x94] sm:$0xf] }
  0x85   : > { %4805 = vmatmul.bf16.gmra.mxu2 %v5778_v61  ;;  %v1645_v30 = vrot.slane %v1644_v45, 4  ;;  %v838_v37 = vrot.slane %v836_v29, 5  ;;  %v842_v38 = vrot.slane %v840_v32, 4  ;;  %v1212_v39 = vld [vmem:[#allocation2 + $0x28] sm:$0xf]  ;;  %v5686_v40 = vrot.slane %v1211_v33, 9 }
  0x86   : > { %4894 = vmatmul.bf16.gmra.mxu3 %v5782_v57  ;;  %v5813_v42 = vld [vmem:[#allocation3 + $0x98] sm:$0xf]  ;;  %v833_v44 = vor.u32 %v832_v36, %v829_v35  ;;  %v1324_v46 = vrot.slane %v1212_v39, 5  ;;  %v6618_v60 = vld [vmem:[#allocation3 + $0x9c] sm:$0xf]  ;;  %v1655_v61 = vrot.slane %v1654_v7, 4 }
  0x87   : > { %v1650_v5 = vsel %vm7446_vm5, %v1645_v30, %v1649_v24  ;;  %v843_v52 = vor.u32 %v842_v38, %v838_v37  ;;  %v1483_v54 = vld [vmem:[#allocation2 + $0x30] sm:$0xf]  ;;  %v1549_v59 = vld [vmem:[#allocation2 + $0x2c] sm:$0x1]  ;;  %v5815_v55 = vld [vmem:[#allocation3 + $0xbc] sm:$0xf0] }
  0x88   : > { %2009 = vst [vmem:[#allocation3 + $0xa0] sm:$0xf] %v1650_v5  ;;  %v6622_v50 = vld [vmem:[#allocation3 + $0xb8] sm:$0xf0]  ;;  %v714_v56 = vld [vmem:[#allocation2 + $0x2c] sm:$0x1]  ;;  %v1325_v21 = vsel %vm7452_vm6, %v5686_v40, %v1324_v46  ;;  %v5818_v27 = vor.u32 %v6618_v60, %v5815_v55 }
  0x89   : > { %v6614_v41 = vld [vmem:[#allocation3 + $0x78] sm:$0xf0]  ;;  %v834_v4 = vrot.slane %v833_v44, 4  ;;  %v1326_v43 = vrot.slane %v1324_v46, 4  ;;  %v1657_v62 = vshll.u32 %v1549_v59, 16  ;;  %v844_v10 = vrot.slane %v843_v52, 4 }
  0x8a   : > { %v5786_v47 = vor.u32 %v6614_v41, %v5785_v34  ;;  %v5807_v49 = vld [vmem:[#allocation3 + $0xb4] sm:$0xf0]  ;;  %v846_v0 = vshll.u32 %v714_v56, 16  ;;  %v1213_v63 = vld [vmem:[#allocation2 + $0x2c] sm:$0x1]  ;;  %v529_v8 = vsel %vm413_vm0, %v7176_v48, 0.0  ;;  %v5814_v57 = vor.u32 %v6622_v50, %v5813_v42 }
  0x8b   : > { %v5810_v1 = vor.u32 %v6617_v58, %v5807_v49  ;;  %v839_v2 = vsel %vm7446_vm5, %v834_v4, %v838_v37  ;;  %v1327_v3 = vrot.slane %v1213_v63, 5  ;;  %1451 = vst [vmem:[#allocation3 + $0xe0] sm:$0xf] %v1325_v21  ;;  %v1550_v9 = vld [vmem:[#allocation2 + $0x30] sm:$0xf]  ;;  %v1659_v14 = vrot.slane %v1657_v62, 5 }
  0x8c   : > { %4983 = vmatmul.bf16.gmra.mxu0 %v5786_v47  ;;  %v848_v15 = vrot.slane %v846_v0, 5  ;;  %1176 = vst [vmem:[#allocation3 + $0xdc] sm:$0xf] %v839_v2  ;;  %v1551_v16 = vld [vmem:[#allocation2 + $0x34] sm:$0xf]  ;;  %v1662_v19 = vshrl.u32 %v1550_v9, 16  ;;  %v553_v25 = vpack.c.bf16 %v529_v8, %v529_v8 }
  0x8d   : > { %v1328_v18 = vsel %vm7452_vm6, %v1326_v43, %v1327_v3  ;;  %1515 = vst [vmem:[#allocation3 + $0xe4] sm:$0xf] %v1483_v54  ;;  %v1665_v20 = vshll.u32 %v1550_v9, 16  ;;  %v1671_v22 = vshll.u32 %v1551_v16, 16  ;;  %v1660_v45 = vsel %vm7446_vm5, %v1655_v61, %v1659_v14  ;;  %v1484_v48 = vld [vmem:[#allocation2 + $0x34] sm:$0xf] }
  0x8e   : > { %v849_v24 = vsel %vm7446_vm5, %v844_v10, %v848_v15  ;;  %1452 = vst [vmem:[#allocation3 + $0x104] sm:$0xf] %v1328_v18  ;;  %v1675_v26 = vshrl.u32 %v1551_v16, 16  ;;  %v1664_v28 = vrot.slane %v1662_v19, 4  ;;  %v715_v33 = vld [vmem:[#allocation2 + $0x30] sm:$0xf] }
  0x8f   : > { %2010 = vst [vmem:[#allocation3 + $0xc4] sm:$0xf] %v1660_v45  ;;  %v1667_v29 = vrot.slane %v1665_v20, 5  ;;  %v1673_v30 = vrot.slane %v1671_v22, 5  ;;  %v716_v35 = vld [vmem:[#allocation2 + $0x34] sm:$0xf] }
  0x90   : > { %1177 = vst [vmem:[#allocation3 + $0x100] sm:$0xf] %v849_v24  ;;  %v1677_v32 = vrot.slane %v1675_v26, 4  ;;  %v851_v36 = vshrl.u32 %v715_v33, 16  ;;  %v854_v37 = vshll.u32 %v715_v33, 16  ;;  %v860_v58 = vshll.u32 %v716_v35, 16 }
  0x91   : > { %1516 = vst [vmem:[#allocation3 + $0x108] sm:$0xf] %v1484_v48  ;;  %v1668_v34 = vor.u32 %v1667_v29, %v1664_v28  ;;  %v864_v5 = vshrl.u32 %v716_v35, 16  ;;  %v6796_v41 = vld [vmem:[%s8257_s2 + $0x1a8] sm:$0xff]  ;;  %v5821_v42 = vld [vmem:[#allocation3 + $0xa0] sm:$0xf] }
  0x92   : > { %4721 = vmatmul.bf16.gmra.mxu1 %v5810_v1  ;;  %602 = vst [vmem:[#allocation2 + $0x38] sm:$0x1] %v553_v25  ;;  %v1678_v38 = vor.u32 %v1677_v32, %v1673_v30  ;;  %v853_v39 = vrot.slane %v851_v36, 4  ;;  %v856_v40 = vrot.slane %v854_v37, 5  ;;  %v862_v44 = vrot.slane %v860_v58, 5  ;;  %5150 = vmatpush.bf16.msra.mxu2 %v6796_v41  ;;  %v6804_v22 = vld [vmem:[%s8257_s2 + $0x1e8] sm:$0xff] }
  0x93   : > { %v1669_v7 = vrot.slane %v1668_v34, 4  ;;  %v866_v46 = vrot.slane %v864_v5, 4  ;;  %v1214_v50 = vld [vmem:[#allocation2 + $0x30] sm:$0xe]  ;;  %v1215_v52 = vld [vmem:[#allocation2 + $0x34] sm:$0xf]  ;;  %5239 = vmatpush.bf16.msra.mxu3 %v6804_v22 }
  0x94   : > { %v857_v49 = vor.u32 %v856_v40, %v853_v39  ;;  %v5687_v56 = vrot.slane %v1214_v50, 9  ;;  %v1331_v4 = vrot.slane %v1215_v52, 5  ;;  %v6626_v43 = vld [vmem:[#allocation3 + $0xdc] sm:$0xf]  ;;  %v1679_v60 = vrot.slane %v1678_v38, 4  ;;  %v6788_v29 = vld [vmem:[%s8257_s2 + $0x168] sm:$0xff] }
  0x95   : > { %4810 = vmatmul.bf16.gmra.mxu2 %v5814_v57  ;;  %v1674_v47 = vsel %vm7446_vm5, %v1669_v7, %v1673_v30  ;;  %v867_v59 = vor.u32 %v866_v46, %v862_v44  ;;  %v530_v61 = vsel %vm413_vm0, %v7199_v6, 0.0  ;;  %v5849_v10 = vld [vmem:[#allocation3 + $0xe0] sm:$0xf]  ;;  %v6631_v0 = vld [vmem:[#allocation3 + $0x100] sm:$0xf0]  ;;  %5061 = vmatpush.bf16.msra.mxu1 %v6788_v29  ;;  %v6812_v5 = vld [vmem:[%s8257_s2 + $0x228] sm:$0xff] }
  0x96   : > { %4899 = vmatmul.bf16.gmra.mxu3 %v5818_v27  ;;  %v6623_v54 = vld [vmem:[#allocation3 + $0xc0] sm:$0xf0]  ;;  %2011 = vst [vmem:[#allocation3 + $0xe8] sm:$0xf] %v1674_v47  ;;  %v858_v55 = vrot.slane %v857_v49, 4  ;;  %v1332_v1 = vsel %vm7452_vm6, %v5687_v56, %v1331_v4  ;;  %v1333_v2 = vrot.slane %v1331_v4, 4  ;;  %v5850_v30 = vor.u32 %v6631_v0, %v5849_v10  ;;  %5328 = vmatpush.bf16.msra.mxu0 %v6812_v5 }
  0x97   : > { %v5822_v21 = vor.u32 %v6623_v54, %v5821_v42  ;;  %v5843_v62 = vld [vmem:[#allocation3 + $0xfc] sm:$0xf0]  ;;  %v868_v63 = vrot.slane %v867_v59, 4  ;;  %v1485_v3 = vld [vmem:[#allocation2 + $0x3c] sm:$0xf]  ;;  %v556_v32 = vpack.c.bf16 %v530_v61, %v530_v61 }
  0x98   : > { %v863_v57 = vsel %vm7446_vm5, %v858_v55, %v862_v44  ;;  %v1486_v15 = vld [vmem:[#allocation2 + $0x40] sm:$0xf]  ;;  %v6627_v16 = vld [vmem:[#allocation3 + $0xe4] sm:$0xf]  ;;  %v5846_v45 = vor.u32 %v6626_v43, %v5843_v62  ;;  %1453 = vst [vmem:[#allocation3 + $0x128] sm:$0xf] %v1332_v1 }
  0x99   : > { %v1552_v8 = vld [vmem:[#allocation2 + $0x38] sm:$0x1]  ;;  %v5851_v18 = vld [vmem:[#allocation3 + $0x104] sm:$0xf0]  ;;  %1178 = vst [vmem:[#allocation3 + $0x124] sm:$0xf] %v863_v57 }
  0x9a   : > { %v717_v9 = vld [vmem:[#allocation2 + $0x38] sm:$0x1]  ;;  %v1681_v6 = vshll.u32 %v1552_v8, 16  ;;  %v1553_v24 = vld [vmem:[#allocation2 + $0x3c] sm:$0xf]  ;;  %v5854_v7 = vor.u32 %v6627_v16, %v5851_v18  ;;  %v531_v1 = vsel %vm413_vm0, %v7329_v11, 0.0 }
  0x9b   : > { %v1216_v14 = vld [vmem:[#allocation2 + $0x38] sm:$0x1]  ;;  %v870_v19 = vshll.u32 %v717_v9, 16  ;;  %v1554_v48 = vld [vmem:[#allocation2 + $0x40] sm:$0xf]  ;;  %v1686_v28 = vshrl.u32 %v1553_v24, 16  ;;  %v559_v11 = vpack.c.bf16 %v531_v1, %v531_v1 }
  0x9c   : > { %4988 = vmatmul.bf16.gmra.mxu0 %v5822_v21  ;;  %v1334_v20 = vrot.slane %v1216_v14, 5  ;;  %v1683_v25 = vrot.slane %v1681_v6, 5  ;;  %1517 = vst [vmem:[#allocation3 + $0x12c] sm:$0xf] %v1485_v3  ;;  %v1689_v33 = vshll.u32 %v1553_v24, 16  ;;  %v1695_v34 = vshll.u32 %v1554_v48, 16 }
  0x9d   : > { %v872_v26 = vrot.slane %v870_v19, 5  ;;  %1518 = vst [vmem:[#allocation3 + $0x150] sm:$0xf] %v1486_v15  ;;  %v1688_v37 = vrot.slane %v1686_v28, 4  ;;  %v1699_v58 = vshrl.u32 %v1554_v48, 16 }
  0x9e   : > { %v1335_v27 = vsel %vm7452_vm6, %v1333_v2, %v1334_v20  ;;  %v1684_v35 = vsel %vm7446_vm5, %v1679_v60, %v1683_v25  ;;  %v1691_v38 = vrot.slane %v1689_v33, 5  ;;  %v1697_v39 = vrot.slane %v1695_v34, 5  ;;  %v718_v40 = vld [vmem:[#allocation2 + $0x3c] sm:$0xf]  ;;  %v719_v42 = vld [vmem:[#allocation2 + $0x40] sm:$0xf] }
  0x9f   : > { %1454 = vst [vmem:[#allocation3 + $0x14c] sm:$0xf] %v1335_v27  ;;  %v873_v36 = vsel %vm7446_vm5, %v868_v63, %v872_v26  ;;  %v1701_v41 = vrot.slane %v1699_v58, 4  ;;  %v875_v44 = vshrl.u32 %v718_v40, 16  ;;  %v878_v47 = vshll.u32 %v718_v40, 16 }
  0xa0   : > { %2012 = vst [vmem:[#allocation3 + $0x10c] sm:$0xf] %v1684_v35  ;;  %v1692_v46 = vor.u32 %v1691_v38, %v1688_v37  ;;  %v884_v49 = vshll.u32 %v719_v42, 16  ;;  %v888_v54 = vshrl.u32 %v719_v42, 16  ;;  %v1217_v59 = vld [vmem:[#allocation2 + $0x3c] sm:$0xe] }
  0xa1   : > { %1179 = vst [vmem:[#allocation3 + $0x148] sm:$0xf] %v873_v36  ;;  %v1702_v50 = vor.u32 %v1701_v41, %v1697_v39  ;;  %v877_v52 = vrot.slane %v875_v44, 4  ;;  %v880_v4 = vrot.slane %v878_v47, 5  ;;  %v5688_v43 = vrot.slane %v1217_v59, 9 }
  0xa2   : > { %4726 = vmatmul.bf16.gmra.mxu1 %v5846_v45  ;;  %605 = vst [vmem:[#allocation2 + $0x44] sm:$0x1] %v556_v32  ;;  %v1693_v56 = vrot.slane %v1692_v46, 4  ;;  %v886_v21 = vrot.slane %v884_v49, 5  ;;  %v5857_v60 = vld [vmem:[#allocation3 + $0xe8] sm:$0xf] }
  0xa3   : > { %v890_v55 = vrot.slane %v888_v54, 4  ;;  %v1218_v61 = vld [vmem:[#allocation2 + $0x40] sm:$0xf]  ;;  %v881_v10 = vor.u32 %v880_v4, %v877_v52  ;;  %v1487_v63 = vld [vmem:[#allocation2 + $0x48] sm:$0xf]  ;;  %v1703_v15 = vrot.slane %v1702_v50, 4 }
  0xa4   : > { %v1698_v62 = vsel %vm7446_vm5, %v1693_v56, %v1697_v39  ;;  %v1338_v0 = vrot.slane %v1218_v61, 5  ;;  %v6635_v3 = vld [vmem:[#allocation3 + $0x124] sm:$0xf]  ;;  %v1488_v9 = vld [vmem:[#allocation2 + $0x4c] sm:$0xf] }
  0xa5   : > { %4815 = vmatmul.bf16.gmra.mxu2 %v5850_v30  ;;  %2013 = vst [vmem:[#allocation3 + $0x130] sm:$0xf] %v1698_v62  ;;  %v891_v8 = vor.u32 %v890_v55, %v886_v21  ;;  %v882_v16 = vrot.slane %v881_v10, 4  ;;  %v5885_v6 = vld [vmem:[#allocation3 + $0x128] sm:$0xf]  ;;  %v7580_v62 = vsel %vm413_vm0, %v7388_v12, 0.0 }
  0xa6   : > { %4904 = vmatmul.bf16.gmra.mxu3 %v5854_v7  ;;  %v1339_v18 = vsel %vm7452_vm6, %v5688_v43, %v1338_v0  ;;  %1519 = vst [vmem:[#allocation3 + $0x174] sm:$0xf] %v1487_v63  ;;  %v6640_v19 = vld [vmem:[#allocation3 + $0x148] sm:$0xf0]  ;;  %v1340_v24 = vrot.slane %v1338_v0, 4 }
  0xa7   : > { %v6632_v2 = vld [vmem:[#allocation3 + $0x108] sm:$0xf0]  ;;  %v892_v45 = vrot.slane %v891_v8, 4  ;;  %v887_v25 = vsel %vm7446_vm5, %v882_v16, %v886_v21  ;;  %1455 = vst [vmem:[#allocation3 + $0x170] sm:$0xf] %v1339_v18  ;;  %v5886_v39 = vor.u32 %v6640_v19, %v5885_v6 }
  0xa8   : > { %v5858_v57 = vor.u32 %v6632_v2, %v5857_v60  ;;  %v5879_v14 = vld [vmem:[#allocation3 + $0x144] sm:$0xf0]  ;;  %v6636_v28 = vld [vmem:[#allocation3 + $0x12c] sm:$0xf]  ;;  %v5887_v29 = vld [vmem:[#allocation3 + $0x14c] sm:$0xf0] }
  0xa9   : > { %v1555_v20 = vld [vmem:[#allocation2 + $0x44] sm:$0x1]  ;;  %1180 = vst [vmem:[#allocation3 + $0x16c] sm:$0xf] %v887_v25  ;;  %v1556_v32 = vld [vmem:[#allocation2 + $0x48] sm:$0xf]  ;;  %v5882_v33 = vor.u32 %v6635_v3, %v5879_v14  ;;  %v5890_v49 = vor.u32 %v6636_v28, %v5887_v29 }
  0xaa   : > { %v720_v22 = vld [vmem:[#allocation2 + $0x44] sm:$0x1]  ;;  %v1705_v48 = vshll.u32 %v1555_v20, 16  ;;  %1520 = vst [vmem:[#allocation3 + $0x198] sm:$0xf] %v1488_v9  ;;  %v1710_v5 = vshrl.u32 %v1556_v32, 16  ;;  %v7576_v44 = vpop.f32.mrf.mxu0 }
  0xab   : > { %v894_v26 = vshll.u32 %v720_v22, 16  ;;  %v1219_v27 = vld [vmem:[#allocation2 + $0x44] sm:$0x1]  ;;  %v1557_v36 = vld [vmem:[#allocation2 + $0x4c] sm:$0xf]  ;;  %v1713_v7 = vshll.u32 %v1556_v32, 16 }
  0xac   : > { %4993 = vmatmul.bf16.gmra.mxu0 %v5858_v57  ;;  %v1341_v30 = vrot.slane %v1219_v27, 5  ;;  %v1707_v34 = vrot.slane %v1705_v48, 5  ;;  %608 = vst [vmem:[#allocation2 + $0x50] sm:$0x1] %v559_v11  ;;  %v1719_v38 = vshll.u32 %v1557_v36, 16  ;;  %v1723_v42 = vshrl.u32 %v1557_v36, 16 }
  0xad   : > { %v896_v35 = vrot.slane %v894_v26, 5  ;;  %v1712_v46 = vrot.slane %v1710_v5, 4  ;;  %v1715_v47 = vrot.slane %v1713_v7, 5  ;;  %v721_v54 = vld [vmem:[#allocation2 + $0x48] sm:$0xf] }
  0xae   : > { %v1342_v58 = vsel %vm7452_vm6, %v1340_v24, %v1341_v30  ;;  %v1708_v40 = vsel %vm7446_vm5, %v1703_v15, %v1707_v34  ;;  %v1721_v50 = vrot.slane %v1719_v38, 5  ;;  %v1725_v52 = vrot.slane %v1723_v42, 4  ;;  %v722_v56 = vld [vmem:[#allocation2 + $0x4c] sm:$0xf]  ;;  %v1220_v61 = vld [vmem:[#allocation2 + $0x48] sm:$0xe] }
  0xaf   : > { %v7568_v37 = vpop.f32.mrf.mxu1  ;;  %v897_v41 = vsel %vm7446_vm5, %v892_v45, %v896_v35  ;;  %1456 = vst [vmem:[#allocation3 + $0x194] sm:$0xf] %v1342_v58  ;;  %v1716_v59 = vor.u32 %v1715_v47, %v1712_v46  ;;  %v899_v4 = vshrl.u32 %v721_v54, 16  ;;  %v902_v21 = vshll.u32 %v721_v54, 16  ;;  %v5893_v10 = vld [vmem:[#allocation3 + $0x130] sm:$0xf] }
  0xb0   : > { %2014 = vst [vmem:[#allocation3 + $0x154] sm:$0xf] %v1708_v40  ;;  %v1726_v43 = vor.u32 %v1725_v52, %v1721_v50  ;;  %v908_v60 = vshll.u32 %v722_v56, 16  ;;  %v912_v55 = vshrl.u32 %v722_v56, 16  ;;  %v5689_v2 = vrot.slane %v1220_v61, 9  ;;  %v6795_v40 = vld [vmem:[%s8257_s2 + $0x1a0] sm:$0xff] }
  0xb1   : > { %1181 = vst [vmem:[#allocation3 + $0x190] sm:$0xf] %v897_v41  ;;  %v1717_v0 = vrot.slane %v1716_v59, 4  ;;  %v901_v63 = vrot.slane %v899_v4, 4  ;;  %v904_v1 = vrot.slane %v902_v21, 5  ;;  %5151 = vmatpush.bf16.msra.mxu2 %v6795_v40  ;;  %v6803_v59 = vld [vmem:[%s8257_s2 + $0x1e0] sm:$0xff]  ;;  %v562_v21 = vpack.c.bf16 %v7580_v62, %v7580_v62 }
  0xb2   : > { %4731 = vmatmul.bf16.gmra.mxu1 %v5882_v33  ;;  %v1727_v8 = vrot.slane %v1726_v43, 4  ;;  %v910_v57 = vrot.slane %v908_v60, 5  ;;  %v914_v6 = vrot.slane %v912_v55, 4  ;;  %v1221_v19 = vld [vmem:[#allocation2 + $0x4c] sm:$0xf]  ;;  %v7592_v34 = vpop.f32.mrf.mxu0  ;;  %v6787_v56 = vld [vmem:[%s8257_s2 + $0x160] sm:$0xff]  ;;  %5240 = vmatpush.bf16.msra.mxu3 %v6803_v59 }
  0xb3   : > { %v1558_v3 = vld [vmem:[#allocation2 + $0x50] sm:$0x1]  ;;  %v1722_v16 = vsel %vm7446_vm5, %v1717_v0, %v1721_v50  ;;  %v905_v12 = vor.u32 %v904_v1, %v901_v63  ;;  %v1345_v45 = vrot.slane %v1221_v19, 5  ;;  %v6644_v28 = vld [vmem:[#allocation3 + $0x16c] sm:$0xf]  ;;  %5062 = vmatpush.bf16.msra.mxu1 %v6787_v56  ;;  %v533_v40 = vsel %vm413_vm0, %v7178_v51, 0.0 }
  0xb4   : > { %v723_v9 = vld [vmem:[#allocation2 + $0x50] sm:$0x1]  ;;  %v1729_v18 = vshll.u32 %v1558_v3, 16  ;;  %2015 = vst [vmem:[#allocation3 + $0x178] sm:$0xf] %v1722_v16  ;;  %v915_v26 = vor.u32 %v914_v6, %v910_v57  ;;  %v6811_v55 = vld [vmem:[%s8257_s2 + $0x220] sm:$0xff] }
  0xb5   : > { %4820 = vmatmul.bf16.gmra.mxu2 %v5886_v39  ;;  %v918_v22 = vshll.u32 %v723_v9, 16  ;;  %v906_v25 = vrot.slane %v905_v12, 4  ;;  %v1222_v27 = vld [vmem:[#allocation2 + $0x50] sm:$0x1]  ;;  %v1346_v32 = vsel %vm7452_vm6, %v5689_v2, %v1345_v45  ;;  %v1347_v33 = vrot.slane %v1345_v45, 4  ;;  %5329 = vmatpush.bf16.msra.mxu0 %v6811_v55 }
  0xb6   : > { %4909 = vmatmul.bf16.gmra.mxu3 %v5890_v49  ;;  %v1731_v48 = vrot.slane %v1729_v18, 5  ;;  %v5921_v35 = vld [vmem:[#allocation3 + $0x170] sm:$0xf]  ;;  %v6649_v36 = vld [vmem:[#allocation3 + $0x190] sm:$0xf0]  ;;  %v916_v7 = vrot.slane %v915_v26, 4 }
  0xb7   : > { %v7584_v15 = vpop.f32.mrf.mxu1  ;;  %v6641_v20 = vld [vmem:[#allocation3 + $0x150] sm:$0xf0]  ;;  %v920_v30 = vrot.slane %v918_v22, 5  ;;  %v911_v5 = vsel %vm7446_vm5, %v906_v25, %v910_v57  ;;  %v1348_v38 = vrot.slane %v1222_v27, 5  ;;  %1457 = vst [vmem:[#allocation3 + $0x1b8] sm:$0xf] %v1346_v32  ;;  %v5922_v2 = vor.u32 %v6649_v36, %v5921_v35 }
  0xb8   : > { %v7582_v14 = vpop.f32.mrf.mxu2  ;;  %v5894_v24 = vor.u32 %v6641_v20, %v5893_v10  ;;  %v5915_v29 = vld [vmem:[#allocation3 + $0x18c] sm:$0xf0]  ;;  %v1732_v58 = vsel %vm7446_vm5, %v1727_v8, %v1731_v48  ;;  %v1489_v39 = vld [vmem:[#allocation2 + $0x54] sm:$0xf]  ;;  %v1490_v41 = vld [vmem:[#allocation2 + $0x58] sm:$0xf] }
  0xb9   : > { %v7588_v11 = vpop.f32.mrf.mxu3  ;;  %2016 = vst [vmem:[#allocation3 + $0x19c] sm:$0xf] %v1732_v58  ;;  %v1559_v42 = vld [vmem:[#allocation2 + $0x54] sm:$0xf]  ;;  %v1560_v46 = vld [vmem:[#allocation2 + $0x58] sm:$0xf]  ;;  %v921_v49 = vsel %vm7446_vm5, %v916_v7, %v920_v30  ;;  %v1349_v50 = vsel %vm7452_vm6, %v1347_v33, %v1348_v38  ;;  %v5918_v4 = vor.u32 %v6644_v28, %v5915_v29 }
  0xba   : > { %v6645_v47 = vld [vmem:[#allocation3 + $0x174] sm:$0xf]  ;;  %1182 = vst [vmem:[#allocation3 + $0x1b4] sm:$0xf] %v911_v5  ;;  %v1734_v52 = vshrl.u32 %v1559_v42, 16  ;;  %v1737_v54 = vshll.u32 %v1559_v42, 16 }
  0xbb   : > { %1183 = vst [vmem:[#allocation3 + $0x1d8] sm:$0xf] %v921_v49  ;;  %v1743_v43 = vshll.u32 %v1560_v46, 16  ;;  %v1747_v60 = vshrl.u32 %v1560_v46, 16  ;;  %v5923_v0 = vld [vmem:[#allocation3 + $0x194] sm:$0xf0] }
  0xbc   : > { %4998 = vmatmul.bf16.gmra.mxu0 %v5894_v24  ;;  %1458 = vst [vmem:[#allocation3 + $0x1dc] sm:$0xf] %v1349_v50  ;;  %v1736_v63 = vrot.slane %v1734_v52, 4  ;;  %v1739_v1 = vrot.slane %v1737_v54, 5  ;;  %v724_v8 = vld [vmem:[#allocation2 + $0x54] sm:$0xf]  ;;  %v5926_v6 = vor.u32 %v6645_v47, %v5923_v0 }
  0xbd   : > { %1521 = vst [vmem:[#allocation3 + $0x1bc] sm:$0xf] %v1489_v39  ;;  %v1745_v3 = vrot.slane %v1743_v43, 5  ;;  %v1749_v62 = vrot.slane %v1747_v60, 4  ;;  %v725_v16 = vld [vmem:[#allocation2 + $0x58] sm:$0xf] }
  0xbe   : > { %1522 = vst [vmem:[#allocation3 + $0x1e0] sm:$0xf] %v1490_v41  ;;  %v1740_v57 = vor.u32 %v1739_v1, %v1736_v63  ;;  %v923_v18 = vshrl.u32 %v724_v8, 16  ;;  %v926_v12 = vshll.u32 %v724_v8, 16  ;;  %v932_v19 = vshll.u32 %v725_v16, 16 }
  0xbf   : > { %v7618_v10 = vpop.f32.mrf.mxu1  ;;  %611 = vst [vmem:[#allocation2 + $0x5c] sm:$0x1] %v562_v21  ;;  %v936_v20 = vshrl.u32 %v725_v16, 16  ;;  %v1750_v48 = vor.u32 %v1749_v62, %v1745_v3  ;;  %v5929_v28 = vld [vmem:[#allocation3 + $0x178] sm:$0xf] }
  0xc0   : > { %v7616_v61 = vpop.f32.mrf.mxu2  ;;  %v1741_v22 = vrot.slane %v1740_v57, 4  ;;  %v925_v45 = vrot.slane %v923_v18, 4  ;;  %v928_v24 = vrot.slane %v926_v12, 5  ;;  %v934_v25 = vrot.slane %v932_v19, 5  ;;  %v1223_v32 = vld [vmem:[#allocation2 + $0x54] sm:$0xe] }
  0xc1   : > { %v7620_v9 = vpop.f32.mrf.mxu3  ;;  %v938_v26 = vrot.slane %v936_v20, 4  ;;  %v1224_v33 = vld [vmem:[#allocation2 + $0x58] sm:$0xf]  ;;  %v6650_v35 = vld [vmem:[#allocation3 + $0x198] sm:$0xf0]  ;;  %v5690_v58 = vrot.slane %v1223_v32, 9  ;;  %v565_v20 = vpack.c.bf16 %v533_v40, %v533_v40 }
  0xc2   : > { %4736 = vmatmul.bf16.gmra.mxu1 %v5918_v4  ;;  %v1746_v29 = vsel %vm7446_vm5, %v1741_v22, %v1745_v3  ;;  %v929_v30 = vor.u32 %v928_v24, %v925_v45  ;;  %v1352_v5 = vrot.slane %v1224_v33, 5  ;;  %v6653_v41 = vld [vmem:[#allocation3 + $0x1b4] sm:$0xf]  ;;  %v5951_v42 = vld [vmem:[#allocation3 + $0x1d4] sm:$0xf0]  ;;  %v1751_v46 = vrot.slane %v1750_v48, 4 }
  0xc3   : > { %2017 = vst [vmem:[#allocation3 + $0x1c0] sm:$0xf] %v1746_v29  ;;  %v939_v36 = vor.u32 %v938_v26, %v934_v25  ;;  %v1491_v50 = vld [vmem:[#allocation2 + $0x60] sm:$0xf]  ;;  %v5930_v52 = vor.u32 %v6650_v35, %v5929_v28  ;;  %v1492_v43 = vld [vmem:[#allocation2 + $0x64] sm:$0xf]  ;;  %v5954_v12 = vor.u32 %v6653_v41, %v5951_v42 }
  0xc4   : > { %v930_v39 = vrot.slane %v929_v30, 4  ;;  %v1353_v47 = vsel %vm7452_vm6, %v5690_v58, %v1352_v5  ;;  %v1354_v49 = vrot.slane %v1352_v5, 4  ;;  %v5957_v60 = vld [vmem:[#allocation3 + $0x1b8] sm:$0xf]  ;;  %v6658_v51 = vld [vmem:[#allocation3 + $0x1d8] sm:$0xf0] }
  0xc5   : > { %4825 = vmatmul.bf16.gmra.mxu2 %v5922_v2  ;;  %v7622_v27 = vpop.f32.mrf.mxu0  ;;  %v940_v0 = vrot.slane %v939_v36, 4  ;;  %1459 = vst [vmem:[#allocation3 + $0x200] sm:$0xf] %v1353_v47  ;;  %v1562_v2 = vld [vmem:[#allocation2 + $0x60] sm:$0xf]  ;;  %v5958_v32 = vor.u32 %v6658_v51, %v5957_v60 }
  0xc6   : > { %4914 = vmatmul.bf16.gmra.mxu3 %v5926_v6  ;;  %v1561_v59 = vld [vmem:[#allocation2 + $0x5c] sm:$0x1]  ;;  %v935_v4 = vsel %vm7446_vm5, %v930_v39, %v934_v25  ;;  %v1563_v3 = vld [vmem:[#allocation2 + $0x64] sm:$0xf]  ;;  %1523 = vst [vmem:[#allocation3 + $0x204] sm:$0xf] %v1491_v50 }
  0xc7   : > { %v7628_v38 = vpop.f32.mrf.mxu1  ;;  %v726_v56 = vld [vmem:[#allocation2 + $0x5c] sm:$0x1]  ;;  %v1753_v55 = vshll.u32 %v1561_v59, 16  ;;  %1184 = vst [vmem:[#allocation3 + $0x1fc] sm:$0xf] %v935_v4  ;;  %v1758_v16 = vshrl.u32 %v1562_v2, 16 }
  0xc8   : > { %v7626_v7 = vpop.f32.mrf.mxu2  ;;  %v1225_v21 = vld [vmem:[#allocation2 + $0x5c] sm:$0x1]  ;;  %v942_v63 = vshll.u32 %v726_v56, 16  ;;  %v6654_v6 = vld [vmem:[#allocation3 + $0x1bc] sm:$0xf]  ;;  %v1761_v22 = vshll.u32 %v1562_v2, 16 }
  0xc9   : > { %v7634_v54 = vpop.f32.mrf.mxu3  ;;  %v1355_v1 = vrot.slane %v1225_v21, 5  ;;  %v1755_v62 = vrot.slane %v1753_v55, 5  ;;  %v5959_v19 = vld [vmem:[#allocation3 + $0x1dc] sm:$0xf0]  ;;  %v1767_v45 = vshll.u32 %v1563_v3, 16  ;;  %v1760_v25 = vrot.slane %v1758_v16, 4 }
  0xca   : > { %v944_v8 = vrot.slane %v942_v63, 5  ;;  %1524 = vst [vmem:[#allocation3 + $0x228] sm:$0xf] %v1492_v43  ;;  %v1771_v26 = vshrl.u32 %v1563_v3, 16  ;;  %v727_v28 = vld [vmem:[#allocation2 + $0x60] sm:$0xf]  ;;  %v5962_v47 = vor.u32 %v6654_v6, %v5959_v19 }
  0xcb   : > { %v1356_v57 = vsel %vm7452_vm6, %v1354_v49, %v1355_v1  ;;  %v1756_v24 = vsel %vm7446_vm5, %v1751_v46, %v1755_v62  ;;  %v1763_v33 = vrot.slane %v1761_v22, 5  ;;  %v1769_v35 = vrot.slane %v1767_v45, 5  ;;  %v728_v36 = vld [vmem:[#allocation2 + $0x64] sm:$0xf]  ;;  %614 = vst [vmem:[#allocation2 + $0x68] sm:$0x1] %v565_v20 }
  0xcc   : > { %5003 = vmatmul.bf16.gmra.mxu0 %v5930_v52  ;;  %1460 = vst [vmem:[#allocation3 + $0x224] sm:$0xf] %v1356_v57  ;;  %v945_v48 = vsel %vm7446_vm5, %v940_v0, %v944_v8  ;;  %v1773_v58 = vrot.slane %v1771_v26, 4  ;;  %v947_v5 = vshrl.u32 %v727_v28, 16  ;;  %v950_v39 = vshll.u32 %v727_v28, 16 }
  0xcd   : > { %v7640_v18 = vpop.f32.mrf.mxu0  ;;  %2018 = vst [vmem:[#allocation3 + $0x1e4] sm:$0xf] %v1756_v24  ;;  %v956_v40 = vshll.u32 %v728_v36, 16  ;;  %v1764_v42 = vor.u32 %v1763_v33, %v1760_v25  ;;  %v960_v46 = vshrl.u32 %v728_v36, 16  ;;  %v1226_v21 = vld [vmem:[#allocation2 + $0x60] sm:$0xe] }
  0xce   : > { %1185 = vst [vmem:[#allocation3 + $0x220] sm:$0xf] %v945_v48  ;;  %v949_v49 = vrot.slane %v947_v5, 4  ;;  %v952_v50 = vrot.slane %v950_v39, 5  ;;  %v1774_v56 = vor.u32 %v1773_v58, %v1769_v35  ;;  %v1227_v60 = vld [vmem:[#allocation2 + $0x64] sm:$0xf] }
  0xcf   : > { %v7648_v30 = vpop.f32.mrf.mxu1  ;;  %v958_v52 = vrot.slane %v956_v40, 5  ;;  %v1765_v59 = vrot.slane %v1764_v42, 4  ;;  %v962_v4 = vrot.slane %v960_v46, 4  ;;  %v5691_v51 = vrot.slane %v1226_v21, 9  ;;  %v5965_v0 = vld [vmem:[#allocation3 + $0x1c0] sm:$0xf] }
  0xd0   : > { %v7646_v29 = vpop.f32.mrf.mxu2  ;;  %v953_v43 = vor.u32 %v952_v50, %v949_v49  ;;  %v1359_v2 = vrot.slane %v1227_v60, 5  ;;  %v1775_v16 = vrot.slane %v1774_v56, 4  ;;  %v1493_v20 = vld [vmem:[#allocation2 + $0x6c] sm:$0xf]  ;;  %v7662_v22 = vld [vmem:[#allocation3 + $0x1fc] sm:$0xf] }
  0xd1   : > { %v7650_v41 = vpop.f32.mrf.mxu3  ;;  %v1770_v63 = vsel %vm7446_vm5, %v1765_v59, %v1769_v35  ;;  %v963_v1 = vor.u32 %v962_v4, %v958_v52  ;;  %v1494_v28 = vld [vmem:[#allocation2 + $0x70] sm:$0xf]  ;;  %v6794_v5 = vld [vmem:[%s8257_s2 + $0x198] sm:$0xff]  ;;  %v1565_v42 = vld [vmem:[#allocation2 + $0x6c] sm:$0xf] }
  0xd2   : > { %4741 = vmatmul.bf16.gmra.mxu1 %v5954_v12  ;;  %2019 = vst [vmem:[#allocation3 + $0x208] sm:$0xf] %v1770_v63  ;;  %v954_v62 = vrot.slane %v953_v43, 4  ;;  %v1360_v6 = vsel %vm7452_vm6, %v5691_v51, %v1359_v2  ;;  %v1361_v19 = vrot.slane %v1359_v2, 4  ;;  %v1564_v24 = vld [vmem:[#allocation2 + $0x68] sm:$0x1]  ;;  %5152 = vmatpush.bf16.msra.mxu2 %v6794_v5 }
  0xd3   : > { %v964_v12 = vrot.slane %v963_v1, 4  ;;  %v729_v48 = vld [vmem:[#allocation2 + $0x68] sm:$0x1]  ;;  %v1777_v35 = vshll.u32 %v1564_v24, 16  ;;  %v5993_v39 = vld [vmem:[#allocation3 + $0x200] sm:$0xf] }
  0xd4   : > { %v6659_v3 = vld [vmem:[#allocation3 + $0x1e0] sm:$0xf0]  ;;  %v959_v25 = vsel %vm7446_vm5, %v954_v62, %v958_v52  ;;  %v1228_v26 = vld [vmem:[#allocation2 + $0x68] sm:$0x1]  ;;  %v966_v36 = vshll.u32 %v729_v48, 16  ;;  %v1782_v56 = vshrl.u32 %v1565_v42, 16 }
  0xd5   : > { %4830 = vmatmul.bf16.gmra.mxu2 %v5958_v32  ;;  %v7652_v55 = vpop.f32.mrf.mxu0  ;;  %v7664_v45 = vld [vmem:[#allocation3 + $0x21c] sm:$0xf0]  ;;  %v5966_v32 = vor.u32 %v6659_v3, %v5965_v0  ;;  %1186 = vst [vmem:[#allocation3 + $0x244] sm:$0xf] %v959_v25  ;;  %v1362_v58 = vrot.slane %v1228_v26, 5  ;;  %v1785_v4 = vshll.u32 %v1565_v42, 16 }
  0xd6   : > { %4919 = vmatmul.bf16.gmra.mxu3 %v5962_v47  ;;  %v6667_v40 = vld [vmem:[#allocation3 + $0x220] sm:$0xf0]  ;;  %1461 = vst [vmem:[#allocation3 + $0x248] sm:$0xf] %v1360_v6  ;;  %v1566_v46 = vld [vmem:[#allocation2 + $0x70] sm:$0xf]  ;;  %v5990_v60 = vor.u32 %v7662_v22, %v7664_v45 }
  0xd7   : > { %v7658_v57 = vpop.f32.mrf.mxu1  ;;  %v1779_v47 = vrot.slane %v1777_v35, 5  ;;  %v968_v49 = vrot.slane %v966_v36, 5  ;;  %v1363_v50 = vsel %vm7452_vm6, %v1361_v19, %v1362_v58  ;;  %1525 = vst [vmem:[#allocation3 + $0x24c] sm:$0xf] %v1493_v20  ;;  %v1567_v52 = vld [vmem:[#allocation2 + $0x74] sm:$0x1] }
  0xd8   : > { %v7656_v8 = vpop.f32.mrf.mxu2  ;;  %v6663_v59 = vld [vmem:[#allocation3 + $0x204] sm:$0xf]  ;;  %1462 = vst [vmem:[#allocation3 + $0x26c] sm:$0xf] %v1363_v50  ;;  %v1791_v21 = vshll.u32 %v1566_v46, 16  ;;  %v1795_v43 = vshrl.u32 %v1566_v46, 16 }
  0xd9   : > { %v7668_v33 = vpop.f32.mrf.mxu3  ;;  %v5995_v51 = vld [vmem:[#allocation3 + $0x224] sm:$0xf0]  ;;  %v1780_v0 = vsel %vm7446_vm5, %v1775_v16, %v1779_v47  ;;  %v969_v63 = vsel %vm7446_vm5, %v964_v12, %v968_v49  ;;  %1526 = vst [vmem:[#allocation3 + $0x270] sm:$0xf] %v1494_v28  ;;  %v1801_v1 = vshll.u32 %v1567_v52, 16  ;;  %v6802_v2 = vld [vmem:[%s8257_s2 + $0x1d8] sm:$0xff]  ;;  %v5994_v16 = vor.u32 %v6667_v40, %v5993_v39 }
  0xda   : > { %2020 = vst [vmem:[#allocation3 + $0x22c] sm:$0xf] %v1780_v0  ;;  %v1784_v62 = vrot.slane %v1782_v56, 4  ;;  %v1787_v6 = vrot.slane %v1785_v4, 5  ;;  %v1793_v19 = vrot.slane %v1791_v21, 5  ;;  %v1797_v20 = vrot.slane %v1795_v43, 4  ;;  %5241 = vmatpush.bf16.msra.mxu3 %v6802_v2 }
  0xdb   : > { %1187 = vst [vmem:[#allocation3 + $0x268] sm:$0xf] %v969_v63  ;;  %v6786_v12 = vld [vmem:[%s8257_s2 + $0x158] sm:$0xff]  ;;  %v730_v24 = vld [vmem:[#allocation2 + $0x6c] sm:$0xf]  ;;  %v1803_v26 = vrot.slane %v1801_v1, 5  ;;  %v5998_v58 = vor.u32 %v6663_v59, %v5995_v51 }
  0xdc   : > { %5008 = vmatmul.bf16.gmra.mxu0 %v5966_v32  ;;  %v1788_v48 = vor.u32 %v1787_v6, %v1784_v62  ;;  %v1798_v25 = vor.u32 %v1797_v20, %v1793_v19  ;;  %v6810_v28 = vld [vmem:[%s8257_s2 + $0x218] sm:$0xff]  ;;  %v731_v32 = vld [vmem:[#allocation2 + $0x70] sm:$0xf]  ;;  %v971_v35 = vshrl.u32 %v730_v24, 16  ;;  %5063 = vmatpush.bf16.msra.mxu1 %v6786_v12  ;;  %v732_v5 = vld [vmem:[#allocation2 + $0x74] sm:$0x1] }
  0xdd   : > { %v7684_v3 = vpop.f32.mrf.mxu0  ;;  %v974_v39 = vshll.u32 %v730_v24, 16  ;;  %v980_v40 = vshll.u32 %v731_v32, 16  ;;  %5330 = vmatpush.bf16.msra.mxu0 %v6810_v28  ;;  %v984_v49 = vshrl.u32 %v731_v32, 16  ;;  %v990_v56 = vshll.u32 %v732_v5, 16  ;;  %v6001_v4 = vld [vmem:[#allocation3 + $0x208] sm:$0xf] }
  0xde   : > { %v1789_v42 = vrot.slane %v1788_v48, 4  ;;  %v1799_v46 = vrot.slane %v1798_v25, 4  ;;  %v973_v47 = vrot.slane %v971_v35, 4  ;;  %v1229_v51 = vld [vmem:[#allocation2 + $0x6c] sm:$0xe]  ;;  %v535_v1 = vsel %vm413_vm0, %v7337_v17, 0.0 }
  0xdf   : > { %v7688_v45 = vpop.f32.mrf.mxu1  ;;  %v976_v50 = vrot.slane %v974_v39, 5  ;;  %v982_v52 = vrot.slane %v980_v40, 5  ;;  %v986_v43 = vrot.slane %v984_v49, 4  ;;  %v5692_v63 = vrot.slane %v1229_v51, 9  ;;  %v1230_v6 = vld [vmem:[#allocation2 + $0x70] sm:$0xf] }
  0xe0   : > { %v7686_v22 = vpop.f32.mrf.mxu2  ;;  %v1794_v21 = vsel %vm7446_vm5, %v1789_v42, %v1793_v19  ;;  %v1804_v59 = vsel %vm7446_vm5, %v1799_v46, %v1803_v26  ;;  %v992_v62 = vrot.slane %v990_v56, 5  ;;  %v1231_v12 = vld [vmem:[#allocation2 + $0x74] sm:$0x1]  ;;  %v1366_v24 = vrot.slane %v1230_v6, 5  ;;  %v1495_v48 = vld [vmem:[#allocation2 + $0x78] sm:$0xf] }
  0xe1   : > { %v7696_v36 = vpop.f32.mrf.mxu3  ;;  %v6668_v0 = vld [vmem:[#allocation3 + $0x228] sm:$0xf0]  ;;  %2021 = vst [vmem:[#allocation3 + $0x250] sm:$0xf] %v1794_v21  ;;  %v987_v2 = vor.u32 %v986_v43, %v982_v52  ;;  %v1369_v28 = vrot.slane %v1231_v12, 5 }
  0xe2   : > { %8264 = vst [vmem:[#allocation4_spill] sm:$0xff] %v7696_v36  ;;  %4746 = vmatmul.bf16.gmra.mxu1 %v5990_v60  ;;  %v977_v60 = vor.u32 %v976_v50, %v973_v47  ;;  %v1496_v32 = vld [vmem:[#allocation2 + $0x7c] sm:$0xf]  ;;  %v6002_v17 = vor.u32 %v6668_v0, %v6001_v4  ;;  %v6023_v5 = vld [vmem:[#allocation3 + $0x264] sm:$0xf0]  ;;  %v1367_v40 = vsel %vm7452_vm6, %v5692_v63, %v1366_v24  ;;  %v1368_v42 = vrot.slane %v1366_v24, 4 }
  0xe3   : > { %2022 = vst [vmem:[#allocation3 + $0x274] sm:$0xf] %v1804_v59  ;;  %v988_v26 = vrot.slane %v987_v2, 4  ;;  %v1568_v46 = vld [vmem:[#allocation2 + $0x78] sm:$0xf]  ;;  %v571_v50 = vpack.c.bf16 %v535_v1, %v535_v1 }
  0xe4   : > { %1527 = vst [vmem:[#allocation3 + $0x294] sm:$0xf] %v1495_v48  ;;  %v6029_v47 = vld [vmem:[#allocation3 + $0x248] sm:$0xf]  ;;  %v1569_v56 = vld [vmem:[#allocation2 + $0x7c] sm:$0xf]  ;;  %v1370_v59 = vsel %vm7452_vm6, %v1368_v42, %v1369_v28 }
  0xe5   : > { %4835 = vmatmul.bf16.gmra.mxu2 %v5994_v16  ;;  %v978_v16 = vrot.slane %v977_v60, 4  ;;  %1528 = vst [vmem:[#allocation3 + $0x2b8] sm:$0xf] %v1496_v32  ;;  %v993_v49 = vsel %vm7446_vm5, %v988_v26, %v992_v62  ;;  %v1806_v4 = vshrl.u32 %v1568_v46, 16  ;;  %v1809_v21 = vshll.u32 %v1568_v46, 16 }
  0xe6   : > { %4924 = vmatmul.bf16.gmra.mxu3 %v5998_v58  ;;  %v6671_v58 = vld [vmem:[#allocation3 + $0x244] sm:$0xf]  ;;  %1189 = vst [vmem:[#allocation3 + $0x2b0] sm:$0xf] %v993_v49  ;;  %v1819_v43 = vshrl.u32 %v1569_v56, 16 }
  0xe7   : > { %v7706_v19 = vpop.f32.mrf.mxu1  ;;  %v983_v39 = vsel %vm7446_vm5, %v978_v16, %v982_v52  ;;  %v1815_v52 = vshll.u32 %v1569_v56, 16  ;;  %v733_v51 = vld [vmem:[#allocation2 + $0x78] sm:$0xf]  ;;  %v6676_v0 = vld [vmem:[#allocation3 + $0x268] sm:$0xf0]  ;;  %v1808_v60 = vrot.slane %v1806_v4, 4  ;;  %v6026_v1 = vor.u32 %v6671_v58, %v6023_v5 }
  0xe8   : > { %v7704_v20 = vpop.f32.mrf.mxu2  ;;  %v7708_v25 = vpop.f32.mrf.mxu0  ;;  %1188 = vst [vmem:[#allocation3 + $0x28c] sm:$0xf] %v983_v39  ;;  %v1811_v63 = vrot.slane %v1809_v21, 5  ;;  %v6672_v2 = vld [vmem:[#allocation3 + $0x24c] sm:$0xf]  ;;  %v1821_v6 = vrot.slane %v1819_v43, 4  ;;  %v6030_v32 = vor.u32 %v6676_v0, %v6029_v47 }
  0xe9   : > { %v7710_v35 = vpop.f32.mrf.mxu3  ;;  %1463 = vst [vmem:[#allocation3 + $0x290] sm:$0xf] %v1367_v40  ;;  %v1817_v62 = vrot.slane %v1815_v52, 5  ;;  %v734_v12 = vld [vmem:[#allocation2 + $0x7c] sm:$0xf]  ;;  %v995_v24 = vshrl.u32 %v733_v51, 16 }
  0xea   : > { %8265 = vst [vmem:[#allocation5_spill] sm:$0xff] %v7710_v35  ;;  %v1812_v16 = vor.u32 %v1811_v63, %v1808_v60  ;;  %v998_v48 = vshll.u32 %v733_v51, 16  ;;  %v6031_v39 = vld [vmem:[#allocation3 + $0x26c] sm:$0xf0]  ;;  %v1004_v40 = vshll.u32 %v734_v12, 16  ;;  %v1008_v46 = vshrl.u32 %v734_v12, 16 }
  0xeb   : > { %1464 = vst [vmem:[#allocation3 + $0x2b4] sm:$0xf] %v1370_v59  ;;  %v1822_v42 = vor.u32 %v1821_v6, %v1817_v62  ;;  %v1232_v49 = vld [vmem:[#allocation2 + $0x78] sm:$0xe]  ;;  %v997_v58 = vrot.slane %v995_v24, 4  ;;  %v6034_v52 = vor.u32 %v6672_v2, %v6031_v39 }
  0xec   : > { %5013 = vmatmul.bf16.gmra.mxu0 %v6002_v17  ;;  %620 = vst [vmem:[#allocation2 + $0x80] sm:$0x1] %v571_v50  ;;  %v1813_v4 = vrot.slane %v1812_v16, 4  ;;  %v1000_v5 = vrot.slane %v998_v48, 5  ;;  %v1006_v21 = vrot.slane %v1004_v40, 5  ;;  %v1010_v59 = vrot.slane %v1008_v46, 4 }
  0xed   : > { %v1233_v51 = vld [vmem:[#allocation2 + $0x7c] sm:$0xf]  ;;  %v5693_v0 = vrot.slane %v1232_v49, 9  ;;  %v6677_v6 = vld [vmem:[#allocation3 + $0x270] sm:$0xf0]  ;;  %v1823_v16 = vrot.slane %v1822_v42, 4 }
  0xee   : > { %v1818_v47 = vsel %vm7446_vm5, %v1813_v4, %v1817_v62  ;;  %v1001_v43 = vor.u32 %v1000_v5, %v997_v58  ;;  %v1011_v60 = vor.u32 %v1010_v59, %v1006_v21  ;;  %v1373_v63 = vrot.slane %v1233_v51, 5  ;;  %v1497_v24 = vld [vmem:[#allocation2 + $0x84] sm:$0xf]  ;;  %v1498_v58 = vld [vmem:[#allocation2 + $0x88] sm:$0xf] }
  0xef   : > { %v4712_v28 = vpop.f32.mrf.mxu1  ;;  %2023 = vst [vmem:[#allocation3 + $0x298] sm:$0xf] %v1818_v47 }
  0xf0   : > { %v7720_v26 = vpop.f32.mrf.mxu2  ;;  %v7722_v17 = vpop.f32.mrf.mxu0  ;;  %v4713_v56 = vadd.f32 %v4712_v28, %v7576_v44  ;;  %v6037_v44 = vld [vmem:[#allocation3 + $0x250] sm:$0xf]  ;;  %v1002_v12 = vrot.slane %v1001_v43, 4  ;;  %v1012_v40 = vrot.slane %v1011_v60, 4  ;;  %v1374_v2 = vsel %vm7452_vm6, %v5693_v0, %v1373_v63  ;;  %1529 = vst [vmem:[#allocation3 + $0x2dc] sm:$0xf] %v1497_v24 }
  0xf1   : > { %v7725_v50 = vpop.f32.mrf.mxu3  ;;  %1465 = vst [vmem:[#allocation3 + $0x2d8] sm:$0xf] %v1374_v2  ;;  %v6038_v0 = vor.u32 %v6677_v6, %v6037_v44  ;;  %v6793_v44 = vld [vmem:[%s8257_s2 + $0x190] sm:$0xff] }
  0xf2   : > { %8266 = vst [vmem:[#allocation6_spill] sm:$0xff] %v7725_v50  ;;  %4751 = vmatmul.bf16.gmra.mxu1 %v6026_v1  ;;  %v1375_v1 = vrot.slane %v1373_v63, 4  ;;  %v1007_v39 = vsel %vm7446_vm5, %v1002_v12, %v1006_v21  ;;  %v6680_v63 = vld [vmem:[#allocation3 + $0x28c] sm:$0xf]  ;;  %v6059_v21 = vld [vmem:[#allocation3 + $0x2ac] sm:$0xf0]  ;;  %5153 = vmatpush.bf16.msra.mxu2 %v6793_v44 }
  0xf3   : > { %v1570_v48 = vld [vmem:[#allocation2 + $0x80] sm:$0x1]  ;;  %1190 = vst [vmem:[#allocation3 + $0x2d4] sm:$0xf] %v1007_v39  ;;  %v6065_v39 = vld [vmem:[#allocation3 + $0x290] sm:$0xf] }
  0xf4   : > { %v735_v28 = vld [vmem:[#allocation2 + $0x80] sm:$0x1]  ;;  %v1825_v62 = vshll.u32 %v1570_v48, 16  ;;  %1530 = vst [vmem:[#allocation3 + $0x300] sm:$0xf] %v1498_v58 }
  0xf5   : > { %4840 = vmatmul.bf16.gmra.mxu2 %v6030_v32  ;;  %v1014_v46 = vshll.u32 %v735_v28, 16  ;;  %v1234_v49 = vld [vmem:[#allocation2 + $0x80] sm:$0x1]  ;;  %v1572_v48 = vld [vmem:[#allocation2 + $0x88] sm:$0xf] }
  0xf6   : > { %4929 = vmatmul.bf16.gmra.mxu3 %v6034_v52  ;;  %v1376_v42 = vrot.slane %v1234_v49, 5  ;;  %v1827_v43 = vrot.slane %v1825_v62, 5  ;;  %v1571_v52 = vld [vmem:[#allocation2 + $0x84] sm:$0xf]  ;;  %v1573_v28 = vld [vmem:[#allocation2 + $0x8c] sm:$0x1] }
  0xf7   : > { %v4714_v4 = vpop.f32.mrf.mxu1  ;;  %v1016_v51 = vrot.slane %v1014_v46, 5  ;;  %v6685_v49 = vld [vmem:[#allocation3 + $0x2b0] sm:$0xf0]  ;;  %v1830_v6 = vshrl.u32 %v1571_v52, 16  ;;  %v1833_v24 = vshll.u32 %v1571_v52, 16  ;;  %v1843_v62 = vshrl.u32 %v1572_v48, 16 }
  0xf8   : > { %v4801_v32 = vpop.f32.mrf.mxu2  ;;  %v4979_v5 = vpop.f32.mrf.mxu0  ;;  %v4715_v47 = vadd.f32 %v4714_v4, %v7592_v34  ;;  %v1377_v12 = vsel %vm7452_vm6, %v1375_v1, %v1376_v42  ;;  %v1828_v34 = vsel %vm7446_vm5, %v1823_v16, %v1827_v43  ;;  %v1839_v1 = vshll.u32 %v1572_v48, 16  ;;  %v736_v4 = vld [vmem:[#allocation2 + $0x84] sm:$0xf]  ;;  %v6681_v43 = vld [vmem:[#allocation3 + $0x294] sm:$0xf]  ;;  %v6785_v52 = vld [vmem:[%s8257_s2 + $0x150] sm:$0xff] }
  0xf9   : > { %v4802_v59 = vadd.f32 %v4801_v32, %v4713_v56  ;;  %v4890_v60 = vpop.f32.mrf.mxu3  ;;  %v1017_v56 = vsel %vm7446_vm5, %v1012_v40, %v1016_v51  ;;  %1466 = vst [vmem:[#allocation3 + $0x2fc] sm:$0xf] %v1377_v12  ;;  %v1849_v46 = vshll.u32 %v1573_v28, 16  ;;  %v1832_v32 = vrot.slane %v1830_v6, 4  ;;  %v6801_v51 = vld [vmem:[%s8257_s2 + $0x1d0] sm:$0xff]  ;;  %5064 = vmatpush.bf16.msra.mxu1 %v6785_v52 }
  0xfa   : > { %2024 = vst [vmem:[#allocation3 + $0x2bc] sm:$0xf] %v1828_v34  ;;  %v1835_v16 = vrot.slane %v1833_v24, 5  ;;  %v1841_v40 = vrot.slane %v1839_v1, 5  ;;  %v1845_v58 = vrot.slane %v1843_v62, 4  ;;  %v1022_v12 = vshll.u32 %v736_v4, 16  ;;  %5242 = vmatpush.bf16.msra.mxu3 %v6801_v51 }
  0xfb   : > { %v4891_v2 = vadd.f32 %v4890_v60, %v4802_v59  ;;  %1191 = vst [vmem:[#allocation3 + $0x2f8] sm:$0xf] %v1017_v56  ;;  %v6062_v59 = vor.u32 %v6680_v63, %v6059_v21  ;;  %v1019_v60 = vshrl.u32 %v736_v4, 16  ;;  %v1851_v56 = vrot.slane %v1849_v46, 5  ;;  %v737_v44 = vld [vmem:[#allocation2 + $0x88] sm:$0xf] }
  0xfc   : > { %5018 = vmatmul.bf16.gmra.mxu0 %v6038_v0  ;;  %v1836_v0 = vor.u32 %v1835_v16, %v1832_v32  ;;  %v1846_v34 = vor.u32 %v1845_v58, %v1841_v40  ;;  %v1024_v1 = vrot.slane %v1022_v12, 5  ;;  %v738_v4 = vld [vmem:[#allocation2 + $0x8c] sm:$0x1]  ;;  %v1028_v35 = vshll.u32 %v737_v44, 16  ;;  %v1235_v32 = vld [vmem:[#allocation2 + $0x84] sm:$0xe] }
  0xfd   : > { %v7743_v42 = vadd.f32 %v4979_v5, %v4891_v2  ;;  %v6066_v5 = vor.u32 %v6685_v49, %v6065_v39  ;;  %v6067_v2 = vld [vmem:[#allocation3 + $0x2b4] sm:$0xf0]  ;;  %v1021_v24 = vrot.slane %v1019_v60, 4  ;;  %v1236_v16 = vld [vmem:[#allocation2 + $0x88] sm:$0xf] }
  0xfe   : > { %v1847_v50 = vrot.slane %v1846_v34, 4  ;;  %v6070_v39 = vor.u32 %v6681_v43, %v6067_v2  ;;  %v7752_v49 = vld [vmem:[#allocation3 + $0x298] sm:$0xf]  ;;  %v1030_v60 = vrot.slane %v1028_v35, 5  ;;  %v537_v43 = vsel %vm413_vm0, %v7180_v53, 0.0 }
  0xff   : > { %8267 = vst [vmem:[#allocation7_spill] sm:$0xff] %v7743_v42  ;;  %v4717_v28 = vpop.f32.mrf.mxu1  ;;  %v1837_v42 = vrot.slane %v1836_v0, 4  ;;  %v1025_v46 = vor.u32 %v1024_v1, %v1021_v24  ;;  %v5694_v2 = vrot.slane %v1235_v32, 9  ;;  %v1380_v0 = vrot.slane %v1236_v16, 5  ;;  %v1500_v1 = vld [vmem:[#allocation2 + $0x94] sm:$0xf] }
 0x100   : > { %v4803_v48 = vpop.f32.mrf.mxu2  ;;  %v4981_v63 = vpop.f32.mrf.mxu0  ;;  %v4718_v6 = vadd.f32 %v4717_v28, %v7622_v27  ;;  %v1032_v27 = vshrl.u32 %v737_v44, 16  ;;  %v1852_v52 = vsel %vm7446_vm5, %v1847_v50, %v1851_v56  ;;  %v1038_v28 = vshll.u32 %v738_v4, 16  ;;  %v6689_v32 = vld [vmem:[#allocation3 + $0x2d4] sm:$0xf]  ;;  %1532 = vst [vmem:[#allocation3 + $0x348] sm:$0xf] %v1500_v1 }
 0x101   : > { %v4804_v21 = vadd.f32 %v4803_v48, %v4715_v47  ;;  %v4892_v62 = vpop.f32.mrf.mxu3  ;;  %v6809_v47 = vld [vmem:[%s8257_s2 + $0x210] sm:$0xff]  ;;  %v1842_v51 = vsel %vm7446_vm5, %v1837_v42, %v1841_v40  ;;  %v1026_v12 = vrot.slane %v1025_v46, 4  ;;  %2026 = vst [vmem:[#allocation3 + $0x304] sm:$0xf] %v1852_v52  ;;  %v1382_v24 = vrot.slane %v1380_v0, 4 }
 0x102   : > { %4756 = vmatmul.bf16.gmra.mxu1 %v6062_v59  ;;  %v6686_v58 = vld [vmem:[#allocation3 + $0x2b8] sm:$0xf0]  ;;  %v1237_v59 = vld [vmem:[#allocation2 + $0x8c] sm:$0x1]  ;;  %2025 = vst [vmem:[#allocation3 + $0x2e0] sm:$0xf] %v1842_v51  ;;  %5331 = vmatpush.bf16.msra.mxu0 %v6809_v47 }
 0x103   : > { %v4893_v36 = vadd.f32 %v4892_v62, %v4804_v21  ;;  %v1034_v48 = vrot.slane %v1032_v27, 4  ;;  %v1383_v34 = vrot.slane %v1237_v59, 5  ;;  %v1031_v35 = vsel %vm7446_vm5, %v1026_v12, %v1030_v60  ;;  %v1499_v40 = vld [vmem:[#allocation2 + $0x90] sm:$0xf]  ;;  %v1575_v47 = vld [vmem:[#allocation2 + $0x94] sm:$0xf] }
 0x104   : > { %v1040_v42 = vrot.slane %v1038_v28, 5  ;;  %v6074_v53 = vor.u32 %v6686_v58, %v7752_v49  ;;  %1192 = vst [vmem:[#allocation3 + $0x31c] sm:$0xf] %v1031_v35  ;;  %v1381_v21 = vsel %vm7452_vm6, %v5694_v2, %v1380_v0  ;;  %v577_v62 = vpack.c.bf16 %v537_v43, %v537_v43  ;;  %v739_v59 = vld [vmem:[#allocation2 + $0x90] sm:$0xf] }
 0x105   : > { %4845 = vmatmul.bf16.gmra.mxu2 %v6066_v5  ;;  %v7763_v44 = vadd.f32 %v4981_v63, %v4893_v36  ;;  %v1035_v50 = vor.u32 %v1034_v48, %v1030_v60  ;;  %v1574_v36 = vld [vmem:[#allocation2 + $0x90] sm:$0xf]  ;;  %1467 = vst [vmem:[#allocation3 + $0x320] sm:$0xf] %v1381_v21  ;;  %v1384_v49 = vsel %vm7452_vm6, %v1382_v24, %v1383_v34  ;;  %v1863_v58 = vshll.u32 %v1575_v47, 16 }
 0x106   : > { %4934 = vmatmul.bf16.gmra.mxu3 %v6070_v39  ;;  %v1854_v46 = vshrl.u32 %v1574_v36, 16  ;;  %1531 = vst [vmem:[#allocation3 + $0x324] sm:$0xf] %v1499_v40  ;;  %v1857_v16 = vshll.u32 %v1574_v36, 16  ;;  %v1867_v51 = vshrl.u32 %v1575_v47, 16  ;;  %v1043_v34 = vshrl.u32 %v739_v59, 16 }
 0x107   : > { %v4719_v56 = vpop.f32.mrf.mxu1  ;;  %v1036_v39 = vrot.slane %v1035_v50, 4  ;;  %1468 = vst [vmem:[#allocation3 + $0x344] sm:$0xf] %v1384_v49  ;;  %v6095_v43 = vld [vmem:[#allocation3 + $0x2f4] sm:$0xf0]  ;;  %v1865_v28 = vrot.slane %v1863_v58, 5 }
 0x108   : > { %v4806_v5 = vpop.f32.mrf.mxu2  ;;  %v4720_v4 = vadd.f32 %v4719_v56, %v7640_v18  ;;  %v1856_v18 = vrot.slane %v1854_v46, 4  ;;  %v6101_v12 = vld [vmem:[#allocation3 + $0x2d8] sm:$0xf]  ;;  %v1859_v48 = vrot.slane %v1857_v16, 5  ;;  %v6694_v2 = vld [vmem:[#allocation3 + $0x2f8] sm:$0xf0] }
 0x109   : > { %v4807_v63 = vadd.f32 %v4806_v5, %v4718_v6  ;;  %v4895_v27 = vpop.f32.mrf.mxu3  ;;  %v4984_v52 = vpop.f32.mrf.mxu0  ;;  %v1041_v6 = vsel %vm7446_vm5, %v1036_v39, %v1040_v42  ;;  %v1869_v0 = vrot.slane %v1867_v51, 4  ;;  %626 = vst [vmem:[#allocation2 + $0x98] sm:$0x1] %v577_v62  ;;  %v740_v40 = vld [vmem:[#allocation2 + $0x94] sm:$0xf]  ;;  %v1046_v5 = vshll.u32 %v739_v59, 16 }
 0x10a   : > { %1193 = vst [vmem:[#allocation3 + $0x340] sm:$0xf] %v1041_v6  ;;  %v1860_v50 = vor.u32 %v1859_v48, %v1856_v18  ;;  %v6098_v42 = vor.u32 %v6689_v32, %v6095_v43  ;;  %v6690_v56 = vld [vmem:[#allocation3 + $0x2dc] sm:$0xf]  ;;  %v1045_v21 = vrot.slane %v1043_v34, 4  ;;  %v1052_v24 = vshll.u32 %v740_v40, 16 }
 0x10b   : > { %v4896_v60 = vadd.f32 %v4895_v27, %v4807_v63  ;;  %v1056_v36 = vshrl.u32 %v740_v40, 16  ;;  %v6103_v47 = vld [vmem:[#allocation3 + $0x2fc] sm:$0xf0]  ;;  %v1870_v27 = vor.u32 %v1869_v0, %v1865_v28  ;;  %v1048_v1 = vrot.slane %v1046_v5, 5  ;;  %v1238_v49 = vld [vmem:[#allocation2 + $0x90] sm:$0xe] }
 0x10c   : > { %5023 = vmatmul.bf16.gmra.mxu0 %v6074_v53  ;;  %v1861_v46 = vrot.slane %v1860_v50, 4  ;;  %v6102_v53 = vor.u32 %v6694_v2, %v6101_v12  ;;  %v1054_v62 = vrot.slane %v1052_v24, 5  ;;  %v1239_v51 = vld [vmem:[#allocation2 + $0x94] sm:$0xf]  ;;  %v5695_v18 = vrot.slane %v1238_v49, 9 }
 0x10d   : > { %v7775_v35 = vadd.f32 %v4984_v52, %v4896_v60  ;;  %v1049_v60 = vor.u32 %v1048_v1, %v1045_v21  ;;  %v1058_v6 = vrot.slane %v1056_v36, 4  ;;  %v6106_v48 = vor.u32 %v6690_v56, %v6103_v47  ;;  %v6109_v0 = vld [vmem:[#allocation3 + $0x2e0] sm:$0xf]  ;;  %v6695_v34 = vld [vmem:[#allocation3 + $0x300] sm:$0xf0] }
 0x10e   : > { %v1866_v32 = vsel %vm7446_vm5, %v1861_v46, %v1865_v28  ;;  %v1871_v50 = vrot.slane %v1870_v27, 4  ;;  %v1501_v2 = vld [vmem:[#allocation2 + $0x9c] sm:$0xf]  ;;  %v1502_v40 = vld [vmem:[#allocation2 + $0xa0] sm:$0xf]  ;;  %v6110_v1 = vor.u32 %v6695_v34, %v6109_v0 }
 0x10f   : > { %v4722_v39 = vpop.f32.mrf.mxu1  ;;  %2027 = vst [vmem:[#allocation3 + $0x328] sm:$0xf] %v1866_v32  ;;  %v1059_v12 = vor.u32 %v1058_v6, %v1054_v62  ;;  %v1577_v27 = vld [vmem:[#allocation2 + $0x9c] sm:$0xf]  ;;  %v7787_v6 = vld [vmem:[#allocation3 + $0x31c] sm:$0xf] }
 0x110   : > { %v4808_v63 = vpop.f32.mrf.mxu2  ;;  %v4723_v58 = vadd.f32 %v4722_v39, %v7652_v55  ;;  %v1050_v55 = vrot.slane %v1049_v60, 4  ;;  %v1576_v5 = vld [vmem:[#allocation2 + $0x98] sm:$0x1]  ;;  %1533 = vst [vmem:[#allocation3 + $0x36c] sm:$0xf] %v1501_v2 }
 0x111   : > { %v4809_v16 = vadd.f32 %v4808_v63, %v4720_v4  ;;  %v4897_v52 = vpop.f32.mrf.mxu3  ;;  %v4986_v59 = vpop.f32.mrf.mxu0  ;;  %v1387_v4 = vrot.slane %v1239_v51, 5  ;;  %v741_v24 = vld [vmem:[#allocation2 + $0x98] sm:$0x1]  ;;  %v1060_v63 = vrot.slane %v1059_v12, 4  ;;  %1534 = vst [vmem:[#allocation3 + $0x390] sm:$0xf] %v1502_v40 }
 0x112   : > { %4761 = vmatmul.bf16.gmra.mxu1 %v6098_v42  ;;  %v1240_v28 = vld [vmem:[#allocation2 + $0x98] sm:$0x1]  ;;  %v1873_v42 = vshll.u32 %v1576_v5, 16  ;;  %v1055_v56 = vsel %vm7446_vm5, %v1050_v55, %v1054_v62  ;;  %v1062_v39 = vshll.u32 %v741_v24, 16  ;;  %v6792_v12 = vld [vmem:[%s8257_s2 + $0x188] sm:$0xff] }
 0x113   : > { %v4898_v43 = vadd.f32 %v4897_v52, %v4809_v16  ;;  %v1388_v21 = vsel %vm7452_vm6, %v5695_v18, %v1387_v4  ;;  %1194 = vst [vmem:[#allocation3 + $0x364] sm:$0xf] %v1055_v56  ;;  %v1389_v47 = vrot.slane %v1387_v4, 4  ;;  %v1390_v46 = vrot.slane %v1240_v28, 5  ;;  %v1578_v52 = vld [vmem:[#allocation2 + $0xa0] sm:$0xf]  ;;  %5154 = vmatpush.bf16.msra.mxu2 %v6792_v12 }
 0x114   : > { %1469 = vst [vmem:[#allocation3 + $0x368] sm:$0xf] %v1388_v21  ;;  %v1064_v51 = vrot.slane %v1062_v39, 5  ;;  %v1579_v18 = vld [vmem:[#allocation2 + $0xa4] sm:$0x1]  ;;  %v1887_v4 = vshll.u32 %v1578_v52, 16 }
 0x115   : > { %4850 = vmatmul.bf16.gmra.mxu2 %v6102_v53  ;;  %v7782_v36 = vadd.f32 %v4986_v59, %v4898_v43  ;;  %v1875_v53 = vrot.slane %v1873_v42, 5  ;;  %v1391_v62 = vsel %vm7452_vm6, %v1389_v47, %v1390_v46  ;;  %v1878_v59 = vshrl.u32 %v1577_v27, 16  ;;  %v6137_v21 = vld [vmem:[#allocation3 + $0x320] sm:$0xf]  ;;  %v743_v56 = vld [vmem:[#allocation2 + $0xa0] sm:$0xf] }
 0x116   : > { %4939 = vmatmul.bf16.gmra.mxu3 %v6106_v48  ;;  %v6131_v48 = vld [vmem:[#allocation3 + $0x33c] sm:$0xf0]  ;;  %v1065_v34 = vsel %vm7446_vm5, %v1060_v63, %v1064_v51  ;;  %1470 = vst [vmem:[#allocation3 + $0x38c] sm:$0xf] %v1391_v62  ;;  %v1891_v40 = vshrl.u32 %v1578_v52, 16  ;;  %v1897_v5 = vshll.u32 %v1579_v18, 16 }
 0x117   : > { %v4724_v16 = vpop.f32.mrf.mxu1  ;;  %v1876_v0 = vsel %vm7446_vm5, %v1871_v50, %v1875_v53  ;;  %v1880_v2 = vrot.slane %v1878_v59, 4  ;;  %1195 = vst [vmem:[#allocation3 + $0x388] sm:$0xf] %v1065_v34  ;;  %v1889_v28 = vrot.slane %v1887_v4, 5  ;;  %v742_v50 = vld [vmem:[#allocation2 + $0x9c] sm:$0xf]  ;;  %v6134_v39 = vor.u32 %v7787_v6, %v6131_v48 }
 0x118   : > { %v4811_v49 = vpop.f32.mrf.mxu2  ;;  %v4725_v60 = vadd.f32 %v4724_v16, %v7684_v3  ;;  %2028 = vst [vmem:[#allocation3 + $0x34c] sm:$0xf] %v1876_v0  ;;  %v1893_v42 = vrot.slane %v1891_v40, 4  ;;  %v6703_v47 = vld [vmem:[#allocation3 + $0x340] sm:$0xf0]  ;;  %v6784_v16 = vld [vmem:[%s8257_s2 + $0x148] sm:$0xff] }
 0x119   : > { %v4812_v32 = vadd.f32 %v4811_v49, %v4723_v58  ;;  %v4900_v43 = vpop.f32.mrf.mxu3  ;;  %v1881_v58 = vshll.u32 %v1577_v27, 16  ;;  %v4989_v3 = vpop.f32.mrf.mxu0  ;;  %v6699_v46 = vld [vmem:[#allocation3 + $0x324] sm:$0xf]  ;;  %v6800_v49 = vld [vmem:[%s8257_s2 + $0x1c8] sm:$0xff]  ;;  %v1067_v53 = vshrl.u32 %v742_v50, 16  ;;  %v1070_v51 = vshll.u32 %v742_v50, 16  ;;  %5065 = vmatpush.bf16.msra.mxu1 %v6784_v16 }
 0x11a   : > { %v1894_v52 = vor.u32 %v1893_v42, %v1889_v28  ;;  %v744_v62 = vld [vmem:[#allocation2 + $0xa4] sm:$0x1]  ;;  %v1076_v18 = vshll.u32 %v743_v56, 16  ;;  %5243 = vmatpush.bf16.msra.mxu3 %v6800_v49  ;;  %v1241_v42 = vld [vmem:[#allocation2 + $0x9c] sm:$0xe] }
 0x11b   : > { %v4901_v55 = vadd.f32 %v4900_v43, %v4812_v32  ;;  %v1883_v24 = vrot.slane %v1881_v58, 5  ;;  %v1899_v32 = vrot.slane %v1897_v5, 5  ;;  %v6139_v43 = vld [vmem:[#allocation3 + $0x344] sm:$0xf0]  ;;  %v1069_v0 = vrot.slane %v1067_v53, 4 }
 0x11c   : > { %5028 = vmatmul.bf16.gmra.mxu0 %v6110_v1  ;;  %v1080_v1 = vshrl.u32 %v743_v56, 16  ;;  %v1072_v34 = vrot.slane %v1070_v51, 5  ;;  %v1086_v58 = vshll.u32 %v744_v62, 16  ;;  %v1895_v12 = vrot.slane %v1894_v52, 4  ;;  %v1242_v56 = vld [vmem:[#allocation2 + $0xa0] sm:$0xf] }
 0x11d   : > { %v7798_v63 = vadd.f32 %v4989_v3, %v4901_v55  ;;  %v1884_v27 = vor.u32 %v1883_v24, %v1880_v2  ;;  %v6138_v55 = vor.u32 %v6703_v47, %v6137_v21  ;;  %v7810_v2 = vsel %vm413_vm0, %v7351_v31, 0.0  ;;  %v6808_v31 = vld [vmem:[%s8257_s2 + $0x208] sm:$0xff]  ;;  %v1243_v16 = vld [vmem:[#allocation2 + $0xa4] sm:$0x1]  ;;  %v6145_v53 = vld [vmem:[#allocation3 + $0x328] sm:$0xf] }
 0x11e   : > { %v1073_v24 = vor.u32 %v1072_v34, %v1069_v0  ;;  %v1078_v50 = vrot.slane %v1076_v18, 5  ;;  %v1082_v21 = vrot.slane %v1080_v1, 4  ;;  %5332 = vmatpush.bf16.msra.mxu0 %v6808_v31  ;;  %v1397_v62 = vrot.slane %v1243_v16, 5  ;;  %v1503_v18 = vld [vmem:[#allocation2 + $0xa8] sm:$0xf] }
 0x11f   : > { %v4727_v6 = vpop.f32.mrf.mxu1  ;;  %v1885_v48 = vrot.slane %v1884_v27, 4  ;;  %v6704_v51 = vld [vmem:[#allocation3 + $0x348] sm:$0xf0]  ;;  %1535 = vst [vmem:[#allocation3 + $0x3b4] sm:$0xf] %v1503_v18  ;;  %v583_v34 = vpack.c.bf16 %v7810_v2, %v7810_v2 }
 0x120   : > { %v4813_v59 = vpop.f32.mrf.mxu2  ;;  %v4728_v3 = vadd.f32 %v4727_v6, %v7708_v25  ;;  %v1900_v25 = vsel %vm7446_vm5, %v1895_v12, %v1899_v32  ;;  %v1074_v47 = vrot.slane %v1073_v24, 4  ;;  %v1083_v52 = vor.u32 %v1082_v21, %v1078_v50  ;;  %v1580_v6 = vld [vmem:[#allocation2 + $0xa8] sm:$0xf]  ;;  %v1245_v18 = vld [vmem:[#allocation2 + $0xac] sm:$0xf] }
 0x121   : > { %v4814_v4 = vadd.f32 %v4813_v59, %v4725_v60  ;;  %v4902_v40 = vpop.f32.mrf.mxu3  ;;  %v1890_v5 = vsel %vm7446_vm5, %v1885_v48, %v1889_v28  ;;  %v4991_v27 = vpop.f32.mrf.mxu0  ;;  %v6142_v60 = vor.u32 %v6699_v46, %v6139_v43  ;;  %2030 = vst [vmem:[#allocation3 + $0x394] sm:$0xf] %v1900_v25  ;;  %v1088_v28 = vrot.slane %v1086_v58, 5  ;;  %v1504_v59 = vld [vmem:[#allocation2 + $0xac] sm:$0xf] }
 0x122   : > { %4766 = vmatmul.bf16.gmra.mxu1 %v6134_v39  ;;  %2029 = vst [vmem:[#allocation3 + $0x370] sm:$0xf] %v1890_v5  ;;  %v5696_v39 = vrot.slane %v1241_v42, 9  ;;  %v1394_v46 = vrot.slane %v1242_v56, 5  ;;  %v1079_v32 = vsel %vm7446_vm5, %v1074_v47, %v1078_v50  ;;  %v1084_v43 = vrot.slane %v1083_v52, 4 }
 0x123   : > { %v4903_v49 = vadd.f32 %v4902_v40, %v4814_v4  ;;  %1196 = vst [vmem:[#allocation3 + $0x3ac] sm:$0xf] %v1079_v32  ;;  %v1581_v58 = vld [vmem:[#allocation2 + $0xac] sm:$0xf]  ;;  %v1902_v12 = vshrl.u32 %v1580_v6, 16  ;;  %v1905_v40 = vshll.u32 %v1580_v6, 16  ;;  %v6146_v2 = vor.u32 %v6704_v51, %v6145_v53 }
 0x124   : > { %v1395_v48 = vsel %vm7452_vm6, %v5696_v39, %v1394_v46  ;;  %v1396_v0 = vrot.slane %v1394_v46, 4  ;;  %v1911_v5 = vshll.u32 %v1581_v58, 16  ;;  %v1915_v24 = vshrl.u32 %v1581_v58, 16  ;;  %1536 = vst [vmem:[#allocation3 + $0x3d8] sm:$0xf] %v1504_v59 }
 0x125   : > { %4855 = vmatmul.bf16.gmra.mxu2 %v6138_v55  ;;  %v7821_v1 = vadd.f32 %v4991_v27, %v4903_v49  ;;  %1471 = vst [vmem:[#allocation3 + $0x3b0] sm:$0xf] %v1395_v48  ;;  %v1089_v56 = vsel %vm7446_vm5, %v1084_v43, %v1088_v28  ;;  %v745_v49 = vld [vmem:[#allocation2 + $0xa8] sm:$0xf]  ;;  %v6707_v25 = vld [vmem:[#allocation3 + $0x364] sm:$0xf] }
 0x126   : > { %4944 = vmatmul.bf16.gmra.mxu3 %v6142_v60  ;;  %v1398_v27 = vsel %vm7452_vm6, %v1396_v0, %v1397_v62  ;;  %1197 = vst [vmem:[#allocation3 + $0x3d0] sm:$0xf] %v1089_v56  ;;  %v1904_v31 = vrot.slane %v1902_v12, 4  ;;  %v1907_v21 = vrot.slane %v1905_v40, 5  ;;  %v746_v47 = vld [vmem:[#allocation2 + $0xac] sm:$0xf] }
 0x127   : > { %v4729_v55 = vpop.f32.mrf.mxu1  ;;  %1472 = vst [vmem:[#allocation3 + $0x3d4] sm:$0xf] %v1398_v27  ;;  %v1917_v39 = vrot.slane %v1915_v24, 4  ;;  %v1091_v46 = vshrl.u32 %v745_v49, 16  ;;  %v1094_v62 = vshll.u32 %v745_v49, 16  ;;  %v1100_v59 = vshll.u32 %v746_v47, 16 }
 0x128   : > { %v4816_v4 = vpop.f32.mrf.mxu2  ;;  %v4730_v42 = vadd.f32 %v4729_v55, %v7722_v17  ;;  %v1913_v17 = vrot.slane %v1911_v5, 5  ;;  %632 = vst [vmem:[#allocation2 + $0xb0] sm:$0x1] %v583_v34  ;;  %v1908_v28 = vor.u32 %v1907_v21, %v1904_v31  ;;  %v6173_v32 = vld [vmem:[#allocation3 + $0x368] sm:$0xf]  ;;  %v1104_v6 = vshrl.u32 %v746_v47, 16 }
 0x129   : > { %v4817_v50 = vadd.f32 %v4816_v4, %v4728_v3  ;;  %v4905_v60 = vpop.f32.mrf.mxu3  ;;  %v4994_v16 = vpop.f32.mrf.mxu0  ;;  %v6167_v3 = vld [vmem:[#allocation3 + $0x384] sm:$0xf0]  ;;  %v6712_v53 = vld [vmem:[#allocation3 + $0x388] sm:$0xf0]  ;;  %v1093_v48 = vrot.slane %v1091_v46, 4  ;;  %v1096_v0 = vrot.slane %v1094_v62, 5 }
 0x12a   : > { %v1918_v51 = vor.u32 %v1917_v39, %v1913_v17  ;;  %v1909_v43 = vrot.slane %v1908_v28, 4  ;;  %v1401_v58 = vrot.slane %v1245_v18, 5  ;;  %v7013_v4 = vld [vmem:[%s7133_s26 + $0x78] sm:$0xff]   ;;  %v6170_v55 = vor.u32 %v6707_v25, %v6167_v3  ;;  %v6708_v12 = vld [vmem:[#allocation3 + $0x36c] sm:$0xf] }
 0x12b   : > { %v4906_v52 = vadd.f32 %v4905_v60, %v4817_v50  ;;  %v1102_v40 = vrot.slane %v1100_v59, 5  ;;  %v1106_v5 = vrot.slane %v1104_v6, 4  ;;  %v6174_v50 = vor.u32 %v6712_v53, %v6173_v32  ;;  %v6175_v56 = vld [vmem:[#allocation3 + $0x38c] sm:$0xf0]  ;;  %v1583_v31 = vld [vmem:[#allocation2 + $0xb4] sm:$0xf] }
 0x12c   : > { %5033 = vmatmul.bf16.gmra.mxu0 %v6146_v2  ;;  %v1914_v27 = vsel %vm7446_vm5, %v1909_v43, %v1913_v17  ;;  %v1097_v49 = vor.u32 %v1096_v0, %v1093_v48  ;;  %v1244_v60 = vld [vmem:[#allocation2 + $0xa8] sm:$0xe]  ;;  %v1505_v39 = vld [vmem:[#allocation2 + $0xb4] sm:$0xf]  ;;  %v6877_v25 = vunpack.c.l.bf16 %v7013_v4  ;;  %v6878_v3 = vunpack.c.h.bf16 %v7013_v4  ;;  %v1506_v53 = vld [vmem:[#allocation2 + $0xb8] sm:$0xf] }
 0x12d   : > { %v7835_v2 = vadd.f32 %v4994_v16, %v4906_v52  ;;  %2031 = vst [vmem:[#allocation3 + $0x3b8] sm:$0xf] %v1914_v27  ;;  %v1107_v47 = vor.u32 %v1106_v5, %v1102_v40  ;;  %v1919_v46 = vrot.slane %v1918_v51, 4  ;;  %v5697_v18 = vrot.slane %v1244_v60, 9  ;;  %v7839_v0 = vld [vmem:[#allocation3 + $0x390] sm:$0xf0] }
 0x12e   : > { %v1098_v62 = vrot.slane %v1097_v49, 4  ;;  %v1403_v32 = vrot.slane %v1401_v58, 4  ;;  %v6178_v17 = vor.u32 %v6708_v12, %v6175_v56  ;;  %v1926_v52 = vshrl.u32 %v1583_v31, 16  ;;  %1537 = vst [vmem:[#allocation3 + $0x3fc] sm:$0xf] %v1505_v39 }
 0x12f   : > { %v4732_v24 = vpop.f32.mrf.mxu1  ;;  %v1582_v43 = vld [vmem:[#allocation2 + $0xb0] sm:$0x1]  ;;  %v1108_v16 = vrot.slane %v1107_v47, 4  ;;  %v1402_v27 = vsel %vm7452_vm6, %v5697_v18, %v1401_v58  ;;  %v7847_v12 = vld [vmem:[#allocation3 + $0x3cc] sm:$0xf0] }
 0x130   : > { %v4818_v34 = vpop.f32.mrf.mxu2  ;;  %v747_v48 = vld [vmem:[#allocation2 + $0xb0] sm:$0x1]  ;;  %v1921_v5 = vshll.u32 %v1582_v43, 16  ;;  %v1103_v51 = vsel %vm7446_vm5, %v1098_v62, %v1102_v40  ;;  %v1584_v49 = vld [vmem:[#allocation2 + $0xb8] sm:$0xf]  ;;  %v1928_v60 = vrot.slane %v1926_v52, 4 }
 0x131   : > { %v4819_v21 = vadd.f32 %v4818_v34, %v4730_v42  ;;  %v4907_v28 = vpop.f32.mrf.mxu3  ;;  %v4996_v59 = vpop.f32.mrf.mxu0  ;;  %v7837_v42 = vld [vmem:[#allocation3 + $0x370] sm:$0xf]  ;;  %v1110_v4 = vshll.u32 %v747_v48, 16  ;;  %v1246_v34 = vld [vmem:[#allocation2 + $0xb0] sm:$0x1]  ;;  %v1929_v43 = vshll.u32 %v1583_v31, 16 }
 0x132   : > { %4771 = vmatmul.bf16.gmra.mxu1 %v6170_v55  ;;  %v7845_v55 = vld [vmem:[#allocation3 + $0x3ac] sm:$0xf]  ;;  %1198 = vst [vmem:[#allocation3 + $0x3f4] sm:$0xf] %v1103_v51  ;;  %v1404_v56 = vrot.slane %v1246_v34, 5  ;;  %v1923_v58 = vrot.slane %v1921_v5, 5 }
 0x133   : > { %v4908_v6 = vadd.f32 %v4907_v28, %v4819_v21  ;;  %v7072_v21 = vld [vmem:[%s8256_s1] ss:$0 sm:$0xff]  ;;  %v4733_v28 = vadd.f32 %v4732_v24, %v7568_v37  ;;  %v1112_v39 = vrot.slane %v1110_v4, 5  ;;  %1473 = vst [vmem:[#allocation3 + $0x3f8] sm:$0xf] %v1402_v27  ;;  %v1935_v48 = vshll.u32 %v1584_v49, 16 }
 0x134   : > { %v306_v40 = vmul.f32 %v7072_v21, %v6877_v25  ;;  %v307_v62 = vmul.f32 %v7072_v21, %v6878_v3  ;;  %v1405_v18 = vsel %vm7452_vm6, %v1403_v32, %v1404_v56  ;;  %1538 = vst [vmem:[#allocation3 + $0x420] sm:$0xf] %v1506_v53  ;;  %v1939_v52 = vshrl.u32 %v1584_v49, 16  ;;  %v748_v31 = vld [vmem:[#allocation2 + $0xb4] sm:$0xf]  ;;  %v6791_v49 = vld [vmem:[%s8257_s2 + $0x180] sm:$0xff] }
 0x135   : > { %4860 = vmatmul.bf16.gmra.mxu2 %v6174_v50  ;;  %v7852_v47 = vadd.f32 %v4996_v59, %v4908_v6  ;;  %v1585_v50 = vld [vmem:[#allocation2 + $0xbc] sm:$0x1]  ;;  %v1924_v25 = vsel %vm7446_vm5, %v1919_v46, %v1923_v58  ;;  %v1113_v37 = vsel %vm7446_vm5, %v1108_v16, %v1112_v39  ;;  %1474 = vst [vmem:[#allocation3 + $0x41c] sm:$0xf] %v1405_v18  ;;  %v1931_v32 = vrot.slane %v1929_v43, 5 }
 0x136   : > { %4949 = vmatmul.bf16.gmra.mxu3 %v6178_v17  ;;  %v1945_v24 = vshll.u32 %v1585_v50, 16  ;;  %v6182_v3 = vor.u32 %v7839_v0, %v7837_v42  ;;  %2032 = vst [vmem:[#allocation3 + $0x3dc] sm:$0xf] %v1924_v25  ;;  %v1937_v53 = vrot.slane %v1935_v48, 5  ;;  %v6206_v17 = vor.u32 %v7845_v55, %v7847_v12  ;;  %v749_v46 = vld [vmem:[#allocation2 + $0xb8] sm:$0xf]  ;;  %5155 = vmatpush.bf16.msra.mxu2 %v6791_v49 }
 0x137   : > { %v4734_v34 = vpop.f32.mrf.mxu1  ;;  %1199 = vst [vmem:[#allocation3 + $0x418] sm:$0xf] %v1113_v37  ;;  %v1941_v5 = vrot.slane %v1939_v52, 4  ;;  %v7073_v16 = vld [vmem:[%s8256_s1 + $0x1] ss:$0 sm:$0xff]  ;;  %v1932_v21 = vor.u32 %v1931_v32, %v1928_v60  ;;  %v1118_v58 = vshll.u32 %v748_v31, 16 }
 0x138   : > { %v4821_v51 = vpop.f32.mrf.mxu2  ;;  %v340_v4 = vadd.f32 %v7073_v16, %v306_v40  ;;  %v341_v27 = vadd.f32 %v7073_v16, %v307_v62  ;;  %v6209_v0 = vld [vmem:[#allocation3 + $0x3b0] sm:$0xf]  ;;  %v1947_v12 = vrot.slane %v1945_v24, 5  ;;  %v750_v39 = vld [vmem:[#allocation2 + $0xbc] sm:$0x1]  ;;  %v1124_v50 = vshll.u32 %v749_v46, 16 }
 0x139   : > { %v4822_v59 = vadd.f32 %v4821_v51, %v4733_v28  ;;  %v4910_v6 = vpop.f32.mrf.mxu3  ;;  %v4999_v56 = vpop.f32.mrf.mxu0  ;;  %v1115_v28 = vshrl.u32 %v748_v31, 16  ;;  %v1942_v55 = vor.u32 %v1941_v5, %v1937_v53  ;;  %v1128_v18 = vshrl.u32 %v749_v46, 16  ;;  %v6721_v43 = vld [vmem:[#allocation3 + $0x3d0] sm:$0xf0]  ;;  %v6799_v60 = vld [vmem:[%s8257_s2 + $0x1c0] sm:$0xff] }
 0x13a   : > { %v6717_v48 = vld [vmem:[#allocation3 + $0x3b4] sm:$0xf]  ;;  %v1933_v40 = vrot.slane %v1932_v21, 4  ;;  %v1120_v52 = vrot.slane %v1118_v58, 5  ;;  %v1134_v51 = vshll.u32 %v750_v39, 16  ;;  %v6783_v37 = vld [vmem:[%s8257_s2 + $0x140] sm:$0xff]  ;;  %v4735_v31 = vadd.f32 %v4734_v34, %v7584_v15  ;;  %5244 = vmatpush.bf16.msra.mxu3 %v6799_v60 }
 0x13b   : > { %v4911_v42 = vadd.f32 %v4910_v6, %v4822_v59  ;;  %v1117_v62 = vrot.slane %v1115_v28, 4  ;;  %v1943_v25 = vrot.slane %v1942_v55, 4  ;;  %v1126_v24 = vrot.slane %v1124_v50, 5  ;;  %v6211_v6 = vld [vmem:[#allocation3 + $0x3d4] sm:$0xf0]  ;;  %5066 = vmatpush.bf16.msra.mxu1 %v6783_v37 }
 0x13c   : > { %5038 = vmatmul.bf16.gmra.mxu0 %v6182_v3  ;;  %v372_v59 = vmax.f32 %v340_v4, 0.0  ;;  %v1938_v5 = vsel %vm7446_vm5, %v1933_v40, %v1937_v53  ;;  %v1130_v46 = vrot.slane %v1128_v18, 4  ;;  %v1247_v16 = vld [vmem:[#allocation2 + $0xb4] sm:$0xe]  ;;  %v6210_v28 = vor.u32 %v6721_v43, %v6209_v0  ;;  %v1248_v39 = vld [vmem:[#allocation2 + $0xb8] sm:$0xf] }
 0x13d   : > { %v7877_v32 = vadd.f32 %v4999_v56, %v4911_v42  ;;  %v1121_v3 = vor.u32 %v1120_v52, %v1117_v62  ;;  %v1948_v58 = vsel %vm7446_vm5, %v1943_v25, %v1947_v12  ;;  %2033 = vst [vmem:[#allocation3 + $0x400] sm:$0xf] %v1938_v5  ;;  %v1136_v15 = vrot.slane %v1134_v51, 5  ;;  %v1249_v50 = vld [vmem:[#allocation2 + $0xbc] sm:$0x1]  ;;  %v6807_v12 = vld [vmem:[%s8257_s2 + $0x200] sm:$0xff] }
 0x13e   : > { %2034 = vst [vmem:[#allocation3 + $0x424] sm:$0xf] %v1948_v58  ;;  %v5698_v34 = vrot.slane %v1247_v16, 9  ;;  %v6214_v55 = vor.u32 %v6717_v48, %v6211_v6  ;;  %v1131_v53 = vor.u32 %v1130_v46, %v1126_v24  ;;  %v373_v18 = vmax.f32 %v341_v27, 0.0  ;;  %5333 = vmatpush.bf16.msra.mxu0 %v6807_v12  ;;  %v6217_v5 = vld [vmem:[#allocation3 + $0x3b8] sm:$0xf] }
 0x13f   : > { %v4737_v21 = vpop.f32.mrf.mxu1  ;;  %v1122_v56 = vrot.slane %v1121_v3, 4  ;;  %v459_v40 = vrot.slane %v372_v59, 7  ;;  %v1408_v52 = vrot.slane %v1248_v39, 5  ;;  %v1411_v51 = vrot.slane %v1249_v50, 5  ;;  %v6722_v3 = vld [vmem:[#allocation3 + $0x3d8] sm:$0xf0] }
 0x140   : > { %v4823_v49 = vpop.f32.mrf.mxu2  ;;  %v1132_v25 = vrot.slane %v1131_v53, 4  ;;  %v460_v48 = vrot.slane %v373_v18, 7  ;;  %v4738_v59 = vadd.f32 %v4737_v21, %v7618_v10  ;;  %v2374_v10 = vld [vmem:[#allocation2 + $0x18] sm:$0xf]  ;;  %v2038_v12 = vld [vmem:[#allocation2 + $0x10] sm:$0xf] }
 0x141   : > { %v4824_v4 = vadd.f32 %v4823_v49, %v4735_v31  ;;  %v4912_v42 = vpop.f32.mrf.mxu3  ;;  %v5001_v62 = vpop.f32.mrf.mxu0  ;;  %v1127_v43 = vsel %vm7446_vm5, %v1122_v56, %v1126_v24  ;;  %v525_v60 = vsel %vm413_vm0, 0.0, %v459_v40  ;;  %v1409_v27 = vsel %vm7452_vm6, %v5698_v34, %v1408_v52  ;;  %v2375_v56 = vld [vmem:[#allocation2 + $0x1c] sm:$0xf] }
 0x142   : > { %4776 = vmatmul.bf16.gmra.mxu1 %v6206_v17  ;;  %1200 = vst [vmem:[#allocation3 + $0x43c] sm:$0xf] %v1127_v43  ;;  %v1410_v17 = vrot.slane %v1408_v52, 4  ;;  %v1137_v24 = vsel %vm7446_vm5, %v1132_v25, %v1136_v15  ;;  %v461_v31 = vsel %vm413_vm0, %v459_v40, %v460_v48  ;;  %v541_v6 = vsel %vm413_vm0, %v460_v48, 0.0  ;;  %v6239_v40 = vld [vmem:[#allocation3 + $0x414] sm:$0xf0] }
 0x143   : > { %v4913_v0 = vadd.f32 %v4912_v42, %v4824_v4  ;;  %1475 = vst [vmem:[#allocation3 + $0x440] sm:$0xf] %v1409_v27  ;;  %v6917_v16 = vpack.c.bf16 %v461_v31, %v525_v60  ;;  %v589_v49 = vpack.c.bf16 %v541_v6, %v541_v6  ;;  %v6725_v4 = vld [vmem:[#allocation3 + $0x3f4] sm:$0xf]  ;;  %v2423_v15 = vshrl.u32 %v2374_v10, 16 }
 0x144   : > { %1201 = vst [vmem:[#allocation3 + $0x460] sm:$0xf] %v1137_v24  ;;  %v1412_v46 = vsel %vm7452_vm6, %v1410_v17, %v1411_v51  ;;  %v6218_v34 = vor.u32 %v6722_v3, %v6217_v5  ;;  %v2432_v53 = vshll.u32 %v2375_v56, 16  ;;  %v2436_v39 = vshrl.u32 %v2375_v56, 16  ;;  %v7901_v43 = vld [vmem:[#allocation2 + $0x20] sm:$0x1] }
 0x145   : > { %4865 = vmatmul.bf16.gmra.mxu2 %v6210_v28  ;;  %v7892_v37 = vadd.f32 %v5001_v62, %v4913_v0  ;;  %1476 = vst [vmem:[#allocation3 + $0x464] sm:$0xf] %v1412_v46  ;;  %v6245_v62 = vld [vmem:[#allocation3 + $0x3f8] sm:$0xf]  ;;  %v2425_v0 = vrot.slane %v2423_v15, 4  ;;  %v2135_v25 = vrot.slane %v2038_v12, 5 }
 0x146   : > { %4954 = vmatmul.bf16.gmra.mxu3 %v6214_v55  ;;  %7021 = vst [vmem:[#allocation2 + $0xc0] sm:$0xff] %v6917_v16   ;;  %v2426_v55 = vshll.u32 %v2374_v10, 16  ;;  %v6730_v51 = vld [vmem:[#allocation3 + $0x418] sm:$0xf0]  ;;  %v7903_v48 = vrot.slane %v2432_v53, 5  ;;  %v2438_v60 = vrot.slane %v2436_v39, 4 }
 0x147   : > { %v4739_v58 = vpop.f32.mrf.mxu1  ;;  %638 = vst [vmem:[#allocation2 + $0xc8] sm:$0x1] %v589_v49  ;;  %v6726_v24 = vld [vmem:[#allocation3 + $0x3fc] sm:$0xf]  ;;  %v2037_v31 = vld [vmem:[#allocation2 + $0xc] sm:$0xe]  ;;  %v6246_v56 = vor.u32 %v6730_v51, %v6245_v62 }
 0x148   : > { %v4826_v28 = vpop.f32.mrf.mxu2  ;;  %v2428_v52 = vrot.slane %v2426_v55, 5  ;;  %v4740_v17 = vadd.f32 %v4739_v58, %v7628_v38  ;;  %v2039_v6 = vld [vmem:[#allocation2 + $0x14] sm:$0x1]  ;;  %v2442_v5 = vshll.u32 %v7901_v43, 16  ;;  %v6247_v3 = vld [vmem:[#allocation3 + $0x41c] sm:$0xf0]  ;;  %v2439_v39 = vor.u32 %v2438_v60, %v7903_v48 }
 0x149   : > { %v4827_v21 = vadd.f32 %v4826_v28, %v4738_v59  ;;  %v4915_v42 = vpop.f32.mrf.mxu3  ;;  %v5004_v50 = vpop.f32.mrf.mxu0  ;;  %v6242_v59 = vor.u32 %v6725_v4, %v6239_v40  ;;  %v5699_v46 = vrot.slane %v2037_v31, 9  ;;  %v2137_v16 = vrot.slane %v2135_v25, 4  ;;  %v6253_v60 = vld [vmem:[#allocation3 + $0x400] sm:$0xf] }
 0x14a   : > { %v2138_v49 = vrot.slane %v2039_v6, 5  ;;  %v2429_v28 = vor.u32 %v2428_v52, %v2425_v0  ;;  %v6250_v52 = vor.u32 %v6726_v24, %v6247_v3 }
 0x14b   : > { %v4916_v18 = vadd.f32 %v4915_v42, %v4827_v21  ;;  %v2136_v4 = vsel %vm7452_vm6, %v5699_v46, %v2135_v25 }
 0x14c   : > { %5043 = vmatmul.bf16.gmra.mxu0 %v6218_v34  ;;  %v2139_v53 = vsel %vm7452_vm6, %v2137_v16, %v2138_v49  ;;  %2277 = vst [vmem:[#allocation3 + $0x14] sm:$0xf] %v2136_v4  ;;  %v2430_v31 = vrot.slane %v2429_v28, 4  ;;  %v6731_v49 = vld [vmem:[#allocation3 + $0x420] sm:$0xf0] }
 0x14d   : > { %v7905_v27 = vadd.f32 %v5004_v50, %v4916_v18  ;;  %v1507_v15 = vld [vmem:[#allocation2 + $0xc0] sm:$0xf]  ;;  %v1508_v42 = vld [vmem:[#allocation2 + $0xc4] sm:$0xf]  ;;  %2278 = vst [vmem:[#allocation3 + $0x38] sm:$0xf] %v2139_v53 }
 0x14e   : > { %v1586_v55 = vld [vmem:[#allocation2 + $0xc0] sm:$0xf]  ;;  %1539 = vst [vmem:[#allocation3 + $0x444] sm:$0xf] %v1507_v15  ;;  %v1587_v38 = vld [vmem:[#allocation2 + $0xc4] sm:$0xf]  ;;  %v2435_v15 = vsel %vm7446_vm5, %v2430_v31, %v7903_v48 }
 0x14f   : > { %v4742_v21 = vpop.f32.mrf.mxu1  ;;  %v1588_v58 = vld [vmem:[#allocation2 + $0xc8] sm:$0x1]  ;;  %1540 = vst [vmem:[#allocation3 + $0x468] sm:$0xf] %v1508_v42  ;;  %v1950_v18 = vshrl.u32 %v1586_v55, 16  ;;  %v1953_v40 = vshll.u32 %v1586_v55, 16 }
 0x150   : > { %v4828_v10 = vpop.f32.mrf.mxu2  ;;  %v1959_v62 = vshll.u32 %v1587_v38, 16  ;;  %v1963_v0 = vshrl.u32 %v1587_v38, 16  ;;  %v1969_v51 = vshll.u32 %v1588_v58, 16  ;;  %v2444_v55 = vrot.slane %v2442_v5, 5  ;;  %2838 = vst [vmem:[#allocation3 + $0x1c] sm:$0xf] %v2435_v15 }
 0x151   : > { %v4829_v34 = vadd.f32 %v4828_v10, %v4740_v17  ;;  %v4917_v50 = vpop.f32.mrf.mxu3  ;;  %v5006_v12 = vpop.f32.mrf.mxu0  ;;  %v2310_v17 = vld [vmem:[#allocation2 + $0x18] sm:$0xf]  ;;  %v1952_v25 = vrot.slane %v1950_v18, 4  ;;  %v1955_v6 = vrot.slane %v1953_v40, 5  ;;  %v2311_v10 = vld [vmem:[#allocation2 + $0x1c] sm:$0xf]  ;;  %v4743_v38 = vadd.f32 %v4742_v21, %v7648_v30 }
 0x152   : > { %4781 = vmatmul.bf16.gmra.mxu1 %v6242_v59  ;;  %v1961_v46 = vrot.slane %v1959_v62, 5  ;;  %v1965_v16 = vrot.slane %v1963_v0, 4  ;;  %2342 = vst [vmem:[#allocation3 + $0x18] sm:$0xf] %v2310_v17  ;;  %v2440_v59 = vrot.slane %v2439_v39, 4  ;;  %v1971_v28 = vrot.slane %v1969_v51, 5 }
 0x153   : > { %v4918_v43 = vadd.f32 %v4917_v50, %v4829_v34  ;;  %v1956_v3 = vor.u32 %v1955_v6, %v1952_v25  ;;  %2343 = vst [vmem:[#allocation3 + $0x3c] sm:$0xf] %v2311_v10  ;;  %v2870_v34 = vld [vmem:[#allocation2 + $0x18] sm:$0xe]  ;;  %v2872_v58 = vld [vmem:[#allocation2 + $0x20] sm:$0x1]  ;;  %v6254_v5 = vor.u32 %v6731_v49, %v6253_v60 }
 0x154   : > { %v1966_v42 = vor.u32 %v1965_v16, %v1961_v46  ;;  %v2445_v48 = vsel %vm7446_vm5, %v2440_v59, %v2444_v55  ;;  %v5715_v39 = vrot.slane %v2870_v34, 9  ;;  %v2971_v0 = vrot.slane %v2872_v58, 5  ;;  %v6275_v31 = vld [vmem:[#allocation3 + $0x45c] sm:$0xf0]  ;;  %v6739_v60 = vld [vmem:[#allocation3 + $0x460] sm:$0xf0] }
 0x155   : > { %4870 = vmatmul.bf16.gmra.mxu2 %v6246_v56  ;;  %v7917_v24 = vadd.f32 %v5006_v12, %v4918_v43  ;;  %v2871_v56 = vld [vmem:[#allocation2 + $0x1c] sm:$0xf]  ;;  %v1957_v50 = vrot.slane %v1956_v3, 4  ;;  %2839 = vst [vmem:[#allocation3 + $0x40] sm:$0xf] %v2445_v48 }
 0x156   : > { %4959 = vmatmul.bf16.gmra.mxu3 %v6250_v52  ;;  %v1967_v18 = vrot.slane %v1966_v42, 4  ;;  %v2968_v62 = vrot.slane %v2871_v56, 5  ;;  %v6734_v43 = vld [vmem:[#allocation3 + $0x43c] sm:$0xf]  ;;  %v2377_v52 = vld [vmem:[#allocation2 + $0x24] sm:$0xf] }
 0x157   : > { %v4744_v53 = vpop.f32.mrf.mxu1  ;;  %v1962_v30 = vsel %vm7446_vm5, %v1957_v50, %v1961_v46  ;;  %v2447_v16 = vshrl.u32 %v2377_v52, 16  ;;  %v6281_v10 = vld [vmem:[#allocation3 + $0x440] sm:$0xf]  ;;  %v2041_v49 = vld [vmem:[#allocation2 + $0x1c] sm:$0xf]  ;;  %v6278_v42 = vor.u32 %v6734_v43, %v6275_v31 }
 0x158   : > { %v4831_v4 = vpop.f32.mrf.mxu2  ;;  %v1972_v21 = vsel %vm7446_vm5, %v1967_v18, %v1971_v28  ;;  %2035 = vst [vmem:[#allocation3 + $0x448] sm:$0xf] %v1962_v30  ;;  %v2969_v25 = vsel %vm7452_vm6, %v5715_v39, %v2968_v62  ;;  %v2970_v6 = vrot.slane %v2968_v62, 4  ;;  %v2142_v15 = vrot.slane %v2041_v49, 5  ;;  %v2378_v59 = vld [vmem:[#allocation2 + $0x28] sm:$0xf] }
 0x159   : > { %v4832_v40 = vadd.f32 %v4831_v4, %v4743_v38  ;;  %v4920_v12 = vpop.f32.mrf.mxu3  ;;  %v5009_v51 = vpop.f32.mrf.mxu0  ;;  %2036 = vst [vmem:[#allocation3 + $0x46c] sm:$0xf] %v1972_v21  ;;  %v6735_v28 = vld [vmem:[#allocation3 + $0x444] sm:$0xf]  ;;  %v6283_v55 = vld [vmem:[#allocation3 + $0x464] sm:$0xf0]  ;;  %v4745_v38 = vadd.f32 %v4744_v53, %v7658_v57 }
 0x15a   : > { %v2972_v46 = vsel %vm7452_vm6, %v2970_v6, %v2971_v0  ;;  %3110 = vst [vmem:[#allocation3 + $0x20] sm:$0xf] %v2969_v25  ;;  %v2040_v34 = vld [vmem:[#allocation2 + $0x18] sm:$0xe]  ;;  %v2042_v56 = vld [vmem:[#allocation2 + $0x20] sm:$0x1] }
 0x15b   : > { %v4921_v17 = vadd.f32 %v4920_v12, %v4832_v40  ;;  %3111 = vst [vmem:[#allocation3 + $0x44] sm:$0xf] %v2972_v46  ;;  %v5700_v58 = vrot.slane %v2040_v34, 9  ;;  %v2144_v4 = vrot.slane %v2142_v15, 4  ;;  %v2449_v50 = vrot.slane %v2447_v16, 4 }
 0x15c   : > { %5048 = vmatmul.bf16.gmra.mxu0 %v6254_v5  ;;  %v2145_v39 = vrot.slane %v2042_v56, 5  ;;  %v2379_v40 = vld [vmem:[#allocation2 + $0x2c] sm:$0x1]  ;;  %v2450_v62 = vshll.u32 %v2377_v52, 16  ;;  %v2456_v0 = vshll.u32 %v2378_v59, 16  ;;  %v2460_v12 = vshrl.u32 %v2378_v59, 16 }
 0x15d   : > { %v7930_v3 = vadd.f32 %v5009_v51, %v4921_v17  ;;  %v6282_v5 = vor.u32 %v6739_v60, %v6281_v10  ;;  %v2143_v43 = vsel %vm7452_vm6, %v5700_v58, %v2142_v15  ;;  %v2312_v21 = vld [vmem:[#allocation2 + $0x24] sm:$0xf]  ;;  %v2313_v51 = vld [vmem:[#allocation2 + $0x28] sm:$0xf]  ;;  %v6286_v52 = vor.u32 %v6735_v28, %v6283_v55  ;;  %v2875_v58 = vld [vmem:[#allocation2 + $0x2c] sm:$0x1] }
 0x15e   : > { %v2146_v57 = vsel %vm7452_vm6, %v2144_v4, %v2145_v39  ;;  %2279 = vst [vmem:[#allocation3 + $0x5c] sm:$0xf] %v2143_v43  ;;  %v2452_v53 = vrot.slane %v2450_v62, 5  ;;  %v2458_v31 = vrot.slane %v2456_v0, 5  ;;  %v2873_v25 = vld [vmem:[#allocation2 + $0x24] sm:$0xe] }
 0x15f   : > { %v4747_v48 = vpop.f32.mrf.mxu1  ;;  %2280 = vst [vmem:[#allocation3 + $0x80] sm:$0xf] %v2146_v57  ;;  %v2462_v49 = vrot.slane %v2460_v12, 4  ;;  %v2466_v10 = vshll.u32 %v2379_v40, 16  ;;  %v2874_v46 = vld [vmem:[#allocation2 + $0x28] sm:$0xf] }
 0x160   : > { %v4833_v18 = vpop.f32.mrf.mxu2  ;;  %2344 = vst [vmem:[#allocation3 + $0x60] sm:$0xf] %v2312_v21  ;;  %v2453_v60 = vor.u32 %v2452_v53, %v2449_v50  ;;  %v5716_v34 = vrot.slane %v2873_v25, 9  ;;  %v2975_v4 = vrot.slane %v2874_v46, 5  ;;  %v6740_v28 = vld [vmem:[#allocation3 + $0x468] sm:$0xf0] }
 0x161   : > { %v4834_v30 = vadd.f32 %v4833_v18, %v4745_v38  ;;  %v4922_v17 = vpop.f32.mrf.mxu3  ;;  %v5011_v6 = vpop.f32.mrf.mxu0  ;;  %2345 = vst [vmem:[#allocation3 + $0x84] sm:$0xf] %v2313_v51  ;;  %v2463_v15 = vor.u32 %v2462_v49, %v2458_v31  ;;  %v2468_v59 = vrot.slane %v2466_v10, 5  ;;  %v4748_v18 = vadd.f32 %v4747_v48, %v7688_v45  ;;  %v6601_v21 = vld [vmem:[#allocation3 + $0x14] sm:$0xf] }
 0x162   : > { %4786 = vmatmul.bf16.gmra.mxu1 %v6278_v42  ;;  %v2454_v56 = vrot.slane %v2453_v60, 4  ;;  %v6289_v42 = vld [vmem:[#allocation3 + $0x448] sm:$0xf]  ;;  %v2978_v39 = vrot.slane %v2875_v58, 5  ;;  %v2976_v0 = vsel %vm7452_vm6, %v5716_v34, %v2975_v4  ;;  %v2977_v12 = vrot.slane %v2975_v4, 4 }
 0x163   : > { %v4923_v16 = vadd.f32 %v4922_v17, %v4834_v30  ;;  %v2464_v55 = vrot.slane %v2463_v15, 4  ;;  %v2380_v30 = vld [vmem:[#allocation2 + $0x30] sm:$0xf]  ;;  %v6290_v51 = vor.u32 %v6740_v28, %v6289_v42  ;;  %3112 = vst [vmem:[#allocation3 + $0x68] sm:$0xf] %v2976_v0 }
 0x164   : > { %v2459_v62 = vsel %vm7446_vm5, %v2454_v56, %v2458_v31  ;;  %v2471_v48 = vshrl.u32 %v2380_v30, 16  ;;  %v5751_v57 = vld [vmem:[#allocation3 + $0x34] sm:$0xf0]  ;;  %v2979_v53 = vsel %vm7452_vm6, %v2977_v12, %v2978_v39  ;;  %v2474_v31 = vshll.u32 %v2380_v30, 16  ;;  %v6606_v60 = vld [vmem:[#allocation3 + $0x38] sm:$0xf0] }
 0x165   : > { %4875 = vmatmul.bf16.gmra.mxu2 %v6282_v5  ;;  %v7937_v38 = vadd.f32 %v5011_v6, %v4923_v16  ;;  %v2381_v5 = vld [vmem:[#allocation2 + $0x34] sm:$0xf]  ;;  %v2469_v45 = vsel %vm7446_vm5, %v2464_v55, %v2468_v59  ;;  %2840 = vst [vmem:[#allocation3 + $0x64] sm:$0xf] %v2459_v62  ;;  %v2044_v46 = vld [vmem:[#allocation2 + $0x28] sm:$0xf]  ;;  %v5754_v15 = vor.u32 %v6601_v21, %v5751_v57 }
 0x166   : > { %4964 = vmatmul.bf16.gmra.mxu3 %v6286_v52  ;;  %2841 = vst [vmem:[#allocation3 + $0x88] sm:$0xf] %v2469_v45  ;;  %v2480_v25 = vshll.u32 %v2381_v5, 16  ;;  %v5757_v52 = vld [vmem:[#allocation3 + $0x18] sm:$0xf]  ;;  %v2473_v49 = vrot.slane %v2471_v48, 4 }
 0x167   : > { %v4749_v50 = vpop.f32.mrf.mxu1  ;;  %v2484_v10 = vshrl.u32 %v2381_v5, 16  ;;  %3113 = vst [vmem:[#allocation3 + $0x8c] sm:$0xf] %v2979_v53  ;;  %v2149_v59 = vrot.slane %v2044_v46, 5  ;;  %v2382_v34 = vld [vmem:[#allocation2 + $0x38] sm:$0x1]  ;;  %v5758_v21 = vor.u32 %v6606_v60, %v5757_v52 }
 0x168   : > { %v4836_v40 = vpop.f32.mrf.mxu2  ;;  %v2476_v56 = vrot.slane %v2474_v31, 5  ;;  %v2482_v58 = vrot.slane %v2480_v25, 5  ;;  %v4750_v4 = vadd.f32 %v4749_v50, %v7706_v19  ;;  %v2045_v42 = vld [vmem:[#allocation2 + $0x2c] sm:$0x1]  ;;  %v2490_v55 = vshll.u32 %v2382_v34, 16 }
 0x169   : > { %v4837_v43 = vadd.f32 %v4836_v40, %v4748_v18  ;;  %v4925_v17 = vpop.f32.mrf.mxu3  ;;  %v5014_v6 = vpop.f32.mrf.mxu0  ;;  %v2043_v18 = vld [vmem:[#allocation2 + $0x24] sm:$0xe]  ;;  %v2486_v28 = vrot.slane %v2484_v10, 4  ;;  %v2151_v62 = vrot.slane %v2149_v59, 4  ;;  %v2152_v0 = vrot.slane %v2045_v42, 5 }
 0x16a   : > { %v5701_v40 = vrot.slane %v2043_v18, 9  ;;  %v2477_v12 = vor.u32 %v2476_v56, %v2473_v49  ;;  %v2877_v30 = vld [vmem:[#allocation2 + $0x34] sm:$0xf]  ;;  %v5759_v48 = vld [vmem:[#allocation3 + $0x3c] sm:$0xf0] }
 0x16b   : > { %v4926_v16 = vadd.f32 %v4925_v17, %v4837_v43  ;;  %v6602_v45 = vld [vmem:[#allocation3 + $0x1c] sm:$0xf]  ;;  %v2487_v17 = vor.u32 %v2486_v28, %v2482_v58  ;;  %v2153_v50 = vsel %vm7452_vm6, %v2151_v62, %v2152_v0  ;;  %v2314_v53 = vld [vmem:[#allocation2 + $0x30] sm:$0xf]  ;;  %v2982_v25 = vrot.slane %v2877_v30, 5 }
 0x16c   : > { %5053 = vmatmul.bf16.gmra.mxu0 %v6290_v51  ;;  %v2492_v51 = vrot.slane %v2490_v55, 5  ;;  %v2150_v19 = vsel %vm7452_vm6, %v5701_v40, %v2149_v59  ;;  %v2876_v31 = vld [vmem:[#allocation2 + $0x30] sm:$0xe]  ;;  %v2478_v49 = vrot.slane %v2477_v12, 4  ;;  %v5762_v46 = vor.u32 %v6602_v45, %v5759_v48  ;;  %2282 = vst [vmem:[#allocation3 + $0xc8] sm:$0xf] %v2153_v50 }
 0x16d   : > { %v7949_v39 = vadd.f32 %v5014_v6, %v4926_v16  ;;  %2281 = vst [vmem:[#allocation3 + $0xa4] sm:$0xf] %v2150_v19  ;;  %v2315_v16 = vld [vmem:[#allocation2 + $0x34] sm:$0xf]  ;;  %v2488_v10 = vrot.slane %v2487_v17, 4  ;;  %v2984_v18 = vrot.slane %v2982_v25, 4 }
 0x16e   : > { %v2878_v34 = vld [vmem:[#allocation2 + $0x38] sm:$0x1]  ;;  %2346 = vst [vmem:[#allocation3 + $0xa8] sm:$0xf] %v2314_v53  ;;  %v2483_v59 = vsel %vm7446_vm5, %v2478_v49, %v2482_v58  ;;  %v6607_v62 = vld [vmem:[#allocation3 + $0x40] sm:$0xf0] }
 0x16f   : > { %v4752_v43 = vpop.f32.mrf.mxu1  ;;  %v2493_v56 = vsel %vm7446_vm5, %v2488_v10, %v2492_v51  ;;  %2347 = vst [vmem:[#allocation3 + $0xcc] sm:$0xf] %v2315_v16  ;;  %v2985_v42 = vrot.slane %v2878_v34, 5  ;;  %v5765_v40 = vld [vmem:[#allocation3 + $0x20] sm:$0xf] }
 0x170   : > { %v4838_v5 = vpop.f32.mrf.mxu2  ;;  %2842 = vst [vmem:[#allocation3 + $0xac] sm:$0xf] %v2483_v59  ;;  %v4753_v55 = vadd.f32 %v4752_v43, %v7582_v14  ;;  %v2383_v30 = vld [vmem:[#allocation2 + $0x3c] sm:$0xf]  ;;  %v5766_v17 = vor.u32 %v6607_v62, %v5765_v40  ;;  %v6610_v19 = vld [vmem:[#allocation3 + $0x5c] sm:$0xf] }
 0x171   : > { %v4839_v57 = vadd.f32 %v4838_v5, %v4750_v4  ;;  %v4927_v6 = vpop.f32.mrf.mxu3  ;;  %v5016_v52 = vpop.f32.mrf.mxu0  ;;  %v5717_v4 = vrot.slane %v2876_v31, 9  ;;  %2843 = vst [vmem:[#allocation3 + $0xd0] sm:$0xf] %v2493_v56  ;;  %v2986_v58 = vsel %vm7452_vm6, %v2984_v18, %v2985_v42  ;;  %v2384_v5 = vld [vmem:[#allocation2 + $0x40] sm:$0xf]  ;;  %v2495_v45 = vshrl.u32 %v2383_v30, 16 }
 0x172   : > { %5067 = vmatmul.bf16.vlgmr.msra.gmra.mxu1 %v5754_v15  ;;  %3115 = vst [vmem:[#allocation3 + $0xd4] sm:$0xf] %v2986_v58  ;;  %v2498_v48 = vshll.u32 %v2383_v30, 16  ;;  %v5787_v50 = vld [vmem:[#allocation3 + $0x7c] sm:$0xf0]  ;;  %v2508_v49 = vshrl.u32 %v2384_v5, 16 }
 0x173   : > { %v4928_v60 = vadd.f32 %v4927_v6, %v4839_v57  ;;  %v2983_v15 = vsel %vm7452_vm6, %v5717_v4, %v2982_v25  ;;  %v2504_v57 = vshll.u32 %v2384_v5, 16  ;;  %v2497_v53 = vrot.slane %v2495_v45, 4  ;;  %v5793_v25 = vld [vmem:[#allocation3 + $0x60] sm:$0xf]  ;;  %v6615_v6 = vld [vmem:[#allocation3 + $0x80] sm:$0xf0] }
 0x174   : > { %3114 = vst [vmem:[#allocation3 + $0xb0] sm:$0xf] %v2983_v15  ;;  %v2500_v31 = vrot.slane %v2498_v48, 5  ;;  %v2047_v16 = vld [vmem:[#allocation2 + $0x34] sm:$0xf]  ;;  %v5790_v34 = vor.u32 %v6610_v19, %v5787_v50  ;;  %v2510_v5 = vrot.slane %v2508_v49, 4  ;;  %v5794_v48 = vor.u32 %v6615_v6, %v5793_v25 }
 0x175   : > { %5156 = vmatmul.bf16.vlgmr.msra.gmra.mxu2 %v5758_v21  ;;  %v7959_v28 = vadd.f32 %v5016_v52, %v4928_v60  ;;  %v6611_v10 = vld [vmem:[#allocation3 + $0x64] sm:$0xf]  ;;  %v2156_v52 = vrot.slane %v2047_v16, 5  ;;  %v2385_v60 = vld [vmem:[#allocation2 + $0x44] sm:$0x1]  ;;  %v2506_v4 = vrot.slane %v2504_v57, 5 }
 0x176   : > { %5245 = vmatmul.bf16.vlgmr.msra.gmra.mxu3 %v5762_v46  ;;  %v2501_v46 = vor.u32 %v2500_v31, %v2497_v53  ;;  %v2046_v59 = vld [vmem:[#allocation2 + $0x30] sm:$0xe]  ;;  %v2048_v56 = vld [vmem:[#allocation2 + $0x38] sm:$0x1]  ;;  %v5795_v15 = vld [vmem:[#allocation3 + $0x84] sm:$0xf0] }
 0x177   : > { %v4754_v12 = vpop.f32.mrf.mxu1  ;;  %v2158_v40 = vrot.slane %v2156_v52, 4  ;;  %v2159_v62 = vrot.slane %v2048_v56, 5  ;;  %v2317_v57 = vld [vmem:[#allocation2 + $0x40] sm:$0xf]  ;;  %v5798_v19 = vor.u32 %v6611_v10, %v5795_v15  ;;  %v2881_v6 = vld [vmem:[#allocation2 + $0x44] sm:$0x1] }
 0x178   : > { %v4841_v0 = vpop.f32.mrf.mxu2  ;;  %v4755_v42 = vadd.f32 %v4754_v12, %v7616_v61  ;;  %v2502_v30 = vrot.slane %v2501_v46, 4  ;;  %v2511_v12 = vor.u32 %v2510_v5, %v2506_v4  ;;  %v2880_v53 = vld [vmem:[#allocation2 + $0x40] sm:$0xf]  ;;  %v2992_v10 = vrot.slane %v2881_v6, 5  ;;  %2349 = vst [vmem:[#allocation3 + $0x114] sm:$0xf] %v2317_v57 }
 0x179   : > { %v4842_v21 = vadd.f32 %v4841_v0, %v4753_v55  ;;  %v4930_v51 = vpop.f32.mrf.mxu3  ;;  %v5019_v14 = vpop.f32.mrf.mxu0  ;;  %v5702_v55 = vrot.slane %v2046_v59, 9  ;;  %v2160_v61 = vsel %vm7452_vm6, %v2158_v40, %v2159_v62  ;;  %v6616_v15 = vld [vmem:[#allocation3 + $0x88] sm:$0xf0]  ;;  %v6619_v57 = vld [vmem:[#allocation3 + $0xa4] sm:$0xf] }
 0x17a   : > { %2284 = vst [vmem:[#allocation3 + $0x110] sm:$0xf] %v2160_v61  ;;  %v2507_v25 = vsel %vm7446_vm5, %v2502_v30, %v2506_v4  ;;  %v2387_v30 = vld [vmem:[#allocation2 + $0x4c] sm:$0xf]  ;;  %v5829_v61 = vld [vmem:[#allocation3 + $0xa8] sm:$0xf] }
 0x17b   : > { %v4931_v43 = vadd.f32 %v4930_v51, %v4842_v21  ;;  %v2514_v21 = vshll.u32 %v2385_v60, 16  ;;  %v2316_v51 = vld [vmem:[#allocation2 + $0x3c] sm:$0xf]  ;;  %v2512_v60 = vrot.slane %v2511_v12, 4  ;;  %2844 = vst [vmem:[#allocation3 + $0xf4] sm:$0xf] %v2507_v25 }
 0x17c   : > { %5334 = vmatmul.bf16.vlgmr.msra.gmra.mxu0 %v5766_v17  ;;  %v2157_v17 = vsel %vm7452_vm6, %v5702_v55, %v2156_v52  ;;  %v2989_v52 = vrot.slane %v2880_v53, 5  ;;  %2348 = vst [vmem:[#allocation3 + $0xf0] sm:$0xf] %v2316_v51  ;;  %v2528_v51 = vshll.u32 %v2387_v30, 16  ;;  %v6624_v12 = vld [vmem:[#allocation3 + $0xc8] sm:$0xf0] }
 0x17d   : > { %v7966_v18 = vadd.f32 %v5019_v14, %v4931_v43  ;;  %v2879_v14 = vld [vmem:[#allocation2 + $0x3c] sm:$0xe]  ;;  %2283 = vst [vmem:[#allocation3 + $0xec] sm:$0xf] %v2157_v17  ;;  %v2516_v50 = vrot.slane %v2514_v21, 5  ;;  %v2532_v53 = vshrl.u32 %v2387_v30, 16 }
 0x17e   : > { %v5718_v49 = vrot.slane %v2879_v14, 9  ;;  %v2991_v59 = vrot.slane %v2989_v52, 4  ;;  %v5823_v14 = vld [vmem:[#allocation3 + $0xc4] sm:$0xf0]  ;;  %v2388_v25 = vld [vmem:[#allocation2 + $0x50] sm:$0x1] }
 0x17f   : > { %v4757_v0 = vpop.f32.mrf.mxu1  ;;  %v2534_v30 = vrot.slane %v2532_v53, 4 }
 0x180   : > { %v4843_v58 = vpop.f32.mrf.mxu2  ;;  %v2990_v46 = vsel %vm7452_vm6, %v5718_v49, %v2989_v52  ;;  %v4758_v4 = vadd.f32 %v4757_v0, %v7626_v7  ;;  %v2993_v55 = vsel %vm7452_vm6, %v2991_v59, %v2992_v10  ;;  %v5826_v49 = vor.u32 %v6619_v57, %v5823_v14  ;;  %v2049_v52 = vld [vmem:[#allocation2 + $0x3c] sm:$0xe] }
 0x181   : > { %v4844_v45 = vadd.f32 %v4843_v58, %v4755_v42  ;;  %v4932_v43 = vpop.f32.mrf.mxu3  ;;  %v5021_v31 = vpop.f32.mrf.mxu0  ;;  %v5801_v42 = vld [vmem:[#allocation3 + $0x68] sm:$0xf]  ;;  %3116 = vst [vmem:[#allocation3 + $0xf8] sm:$0xf] %v2990_v46  ;;  %v2386_v58 = vld [vmem:[#allocation2 + $0x48] sm:$0xf] }
 0x182   : > { %5072 = vmatmul.bf16.gmra.mxu1 %v5790_v34  ;;  %v2517_v34 = vsel %vm7446_vm5, %v2512_v60, %v2516_v50  ;;  %3117 = vst [vmem:[#allocation3 + $0x11c] sm:$0xf] %v2993_v55  ;;  %v2519_v21 = vshrl.u32 %v2386_v58, 16  ;;  %v2050_v50 = vld [vmem:[#allocation2 + $0x40] sm:$0xf]  ;;  %v2530_v10 = vrot.slane %v2528_v51, 5 }
 0x183   : > { %v4933_v16 = vadd.f32 %v4932_v43, %v4844_v45  ;;  %2845 = vst [vmem:[#allocation3 + $0x118] sm:$0xf] %v2517_v34  ;;  %v2522_v45 = vshll.u32 %v2386_v58, 16  ;;  %v2051_v60 = vld [vmem:[#allocation2 + $0x44] sm:$0x1] }
 0x184   : > { %v2521_v43 = vrot.slane %v2519_v21, 4  ;;  %v5831_v34 = vld [vmem:[#allocation3 + $0xcc] sm:$0xf0]  ;;  %v2319_v51 = vld [vmem:[#allocation2 + $0x4c] sm:$0xf] }
 0x185   : > { %5161 = vmatmul.bf16.gmra.mxu2 %v5794_v48  ;;  %v7977_v56 = vadd.f32 %v5021_v31, %v4933_v16  ;;  %v5802_v48 = vor.u32 %v6616_v15, %v5801_v42  ;;  %v6620_v31 = vld [vmem:[#allocation3 + $0xac] sm:$0xf]  ;;  %v2163_v16 = vrot.slane %v2050_v50, 5  ;;  %v2166_v15 = vrot.slane %v2051_v60, 5  ;;  %2351 = vst [vmem:[#allocation3 + $0x15c] sm:$0xf] %v2319_v51 }
 0x186   : > { %5250 = vmatmul.bf16.gmra.mxu3 %v5798_v19  ;;  %v2524_v19 = vrot.slane %v2522_v45, 5  ;;  %v5830_v45 = vor.u32 %v6624_v12, %v5829_v61  ;;  %v5834_v57 = vor.u32 %v6620_v31, %v5831_v34  ;;  %v2884_v12 = vld [vmem:[#allocation2 + $0x50] sm:$0x1]  ;;  %v6625_v34 = vld [vmem:[#allocation3 + $0xd0] sm:$0xf0] }
 0x187   : > { %v4759_v62 = vpop.f32.mrf.mxu1  ;;  %v2165_v42 = vrot.slane %v2163_v16, 4  ;;  %v2999_v31 = vrot.slane %v2884_v12, 5  ;;  %v6628_v51 = vld [vmem:[#allocation3 + $0xec] sm:$0xf] }
 0x188   : > { %v4846_v40 = vpop.f32.mrf.mxu2  ;;  %v2525_v6 = vor.u32 %v2524_v19, %v2521_v43  ;;  %v4760_v59 = vadd.f32 %v4759_v62, %v7646_v29  ;;  %v2535_v62 = vor.u32 %v2534_v30, %v2530_v10  ;;  %v2883_v43 = vld [vmem:[#allocation2 + $0x4c] sm:$0xf] }
 0x189   : > { %v4847_v5 = vadd.f32 %v4846_v40, %v4758_v4  ;;  %v4935_v17 = vpop.f32.mrf.mxu3  ;;  %v5024_v7 = vpop.f32.mrf.mxu0  ;;  %v5703_v4 = vrot.slane %v2049_v52, 9  ;;  %v2167_v29 = vsel %vm7452_vm6, %v2165_v42, %v2166_v15 }
 0x18a   : > { %v2526_v58 = vrot.slane %v2525_v6, 4  ;;  %2286 = vst [vmem:[#allocation3 + $0x158] sm:$0xf] %v2167_v29  ;;  %v5865_v29 = vld [vmem:[#allocation3 + $0xf0] sm:$0xf] }
 0x18b   : > { %v4936_v0 = vadd.f32 %v4935_v17, %v4847_v5  ;;  %v2538_v5 = vshll.u32 %v2388_v25, 16  ;;  %v2318_v17 = vld [vmem:[#allocation2 + $0x48] sm:$0xf]  ;;  %v2536_v25 = vrot.slane %v2535_v62, 4  ;;  %v6633_v62 = vld [vmem:[#allocation3 + $0x110] sm:$0xf0] }
 0x18c   : > { %5339 = vmatmul.bf16.gmra.mxu0 %v5802_v48  ;;  %v2164_v48 = vsel %vm7452_vm6, %v5703_v4, %v2163_v16  ;;  %v2531_v61 = vsel %vm7446_vm5, %v2526_v58, %v2530_v10  ;;  %v2996_v16 = vrot.slane %v2883_v43, 5  ;;  %2350 = vst [vmem:[#allocation3 + $0x138] sm:$0xf] %v2318_v17  ;;  %v2390_v58 = vld [vmem:[#allocation2 + $0x58] sm:$0xf] }
 0x18d   : > { %v7984_v46 = vadd.f32 %v5024_v7, %v4936_v0  ;;  %v2882_v7 = vld [vmem:[#allocation2 + $0x48] sm:$0xe]  ;;  %2285 = vst [vmem:[#allocation3 + $0x134] sm:$0xf] %v2164_v48  ;;  %v2540_v14 = vrot.slane %v2538_v5, 5  ;;  %v2552_v17 = vshll.u32 %v2390_v58, 16 }
 0x18e   : > { %v5719_v53 = vrot.slane %v2882_v7, 9  ;;  %v2998_v52 = vrot.slane %v2996_v16, 4  ;;  %2846 = vst [vmem:[#allocation3 + $0x13c] sm:$0xf] %v2531_v61  ;;  %v5859_v7 = vld [vmem:[#allocation3 + $0x10c] sm:$0xf0] }
 0x18f   : > { %v4762_v40 = vpop.f32.mrf.mxu1  ;;  %v2556_v43 = vshrl.u32 %v2390_v58, 16  ;;  %v2391_v61 = vld [vmem:[#allocation2 + $0x5c] sm:$0x1] }
 0x190   : > { %v4848_v55 = vpop.f32.mrf.mxu2  ;;  %v2997_v6 = vsel %vm7452_vm6, %v5719_v53, %v2996_v16  ;;  %v4763_v10 = vadd.f32 %v4762_v40, %v7656_v8  ;;  %v3000_v4 = vsel %vm7452_vm6, %v2998_v52, %v2999_v31  ;;  %v5862_v53 = vor.u32 %v6628_v51, %v5859_v7  ;;  %v2052_v16 = vld [vmem:[#allocation2 + $0x48] sm:$0xe] }
 0x191   : > { %v4849_v21 = vadd.f32 %v4848_v55, %v4760_v59  ;;  %v4937_v0 = vpop.f32.mrf.mxu3  ;;  %v5026_v19 = vpop.f32.mrf.mxu0  ;;  %v5837_v59 = vld [vmem:[#allocation3 + $0xb0] sm:$0xf]  ;;  %3118 = vst [vmem:[#allocation3 + $0x140] sm:$0xf] %v2997_v6  ;;  %v2389_v55 = vld [vmem:[#allocation2 + $0x54] sm:$0xf] }
 0x192   : > { %5077 = vmatmul.bf16.gmra.mxu1 %v5826_v49  ;;  %v2541_v49 = vsel %vm7446_vm5, %v2536_v25, %v2540_v14  ;;  %3119 = vst [vmem:[#allocation3 + $0x164] sm:$0xf] %v3000_v4  ;;  %v2543_v5 = vshrl.u32 %v2389_v55, 16  ;;  %v2053_v14 = vld [vmem:[#allocation2 + $0x4c] sm:$0xf]  ;;  %v2554_v31 = vrot.slane %v2552_v17, 5 }
 0x193   : > { %v4938_v50 = vadd.f32 %v4937_v0, %v4849_v21  ;;  %2847 = vst [vmem:[#allocation3 + $0x160] sm:$0xf] %v2541_v49  ;;  %v2546_v21 = vshll.u32 %v2389_v55, 16  ;;  %v2054_v25 = vld [vmem:[#allocation2 + $0x50] sm:$0x1]  ;;  %v2558_v58 = vrot.slane %v2556_v43, 4 }
 0x194   : > { %v2545_v0 = vrot.slane %v2543_v5, 4  ;;  %v5867_v49 = vld [vmem:[#allocation3 + $0x114] sm:$0xf0]  ;;  %v2321_v17 = vld [vmem:[#allocation2 + $0x58] sm:$0xf] }
 0x195   : > { %5166 = vmatmul.bf16.gmra.mxu2 %v5830_v45  ;;  %v7995_v60 = vadd.f32 %v5026_v19, %v4938_v50  ;;  %v5838_v45 = vor.u32 %v6625_v34, %v5837_v59  ;;  %v6629_v19 = vld [vmem:[#allocation3 + $0xf4] sm:$0xf]  ;;  %v2170_v50 = vrot.slane %v2053_v14, 5  ;;  %v2173_v34 = vrot.slane %v2054_v25, 5  ;;  %2353 = vst [vmem:[#allocation3 + $0x1a4] sm:$0xf] %v2321_v17 }
 0x196   : > { %5255 = vmatmul.bf16.gmra.mxu3 %v5834_v57  ;;  %v2548_v57 = vrot.slane %v2546_v21, 5  ;;  %v5866_v21 = vor.u32 %v6633_v62, %v5865_v29  ;;  %v5870_v51 = vor.u32 %v6629_v19, %v5867_v49  ;;  %v2887_v62 = vld [vmem:[#allocation2 + $0x5c] sm:$0x1]  ;;  %v6634_v49 = vld [vmem:[#allocation3 + $0x118] sm:$0xf0] }
 0x197   : > { %v4764_v15 = vpop.f32.mrf.mxu1  ;;  %v2172_v59 = vrot.slane %v2170_v50, 4  ;;  %v3006_v19 = vrot.slane %v2887_v62, 5  ;;  %v6637_v17 = vld [vmem:[#allocation3 + $0x134] sm:$0xf] }
 0x198   : > { %v4851_v42 = vpop.f32.mrf.mxu2  ;;  %v2549_v12 = vor.u32 %v2548_v57, %v2545_v0  ;;  %v4765_v52 = vadd.f32 %v4764_v15, %v7686_v22  ;;  %v2559_v15 = vor.u32 %v2558_v58, %v2554_v31  ;;  %v2886_v0 = vld [vmem:[#allocation2 + $0x58] sm:$0xf] }
 0x199   : > { %v4852_v30 = vadd.f32 %v4851_v42, %v4763_v10  ;;  %v4940_v48 = vpop.f32.mrf.mxu3  ;;  %v5029_v8 = vpop.f32.mrf.mxu0  ;;  %v5704_v10 = vrot.slane %v2052_v16, 9  ;;  %v2174_v22 = vsel %vm7452_vm6, %v2172_v59, %v2173_v34 }
 0x19a   : > { %v2550_v55 = vrot.slane %v2549_v12, 4  ;;  %2288 = vst [vmem:[#allocation3 + $0x1a0] sm:$0xf] %v2174_v22  ;;  %v5901_v22 = vld [vmem:[#allocation3 + $0x138] sm:$0xf] }
 0x19b   : > { %v4941_v40 = vadd.f32 %v4940_v48, %v4852_v30  ;;  %v2562_v30 = vshll.u32 %v2391_v61, 16  ;;  %v2320_v48 = vld [vmem:[#allocation2 + $0x54] sm:$0xf]  ;;  %v2560_v61 = vrot.slane %v2559_v15, 4 }
 0x19c   : > { %5344 = vmatmul.bf16.gmra.mxu0 %v5838_v45  ;;  %v2171_v45 = vsel %vm7452_vm6, %v5704_v10, %v2170_v50  ;;  %v2555_v29 = vsel %vm7446_vm5, %v2550_v55, %v2554_v31  ;;  %v3003_v50 = vrot.slane %v2886_v0, 5  ;;  %2352 = vst [vmem:[#allocation3 + $0x180] sm:$0xf] %v2320_v48  ;;  %v2393_v55 = vld [vmem:[#allocation2 + $0x64] sm:$0xf] }
 0x19d   : > { %v8002_v6 = vadd.f32 %v5029_v8, %v4941_v40  ;;  %v2885_v8 = vld [vmem:[#allocation2 + $0x54] sm:$0xe]  ;;  %2287 = vst [vmem:[#allocation3 + $0x17c] sm:$0xf] %v2171_v45  ;;  %v2564_v7 = vrot.slane %v2562_v30, 5  ;;  %v2576_v48 = vshll.u32 %v2393_v55, 16 }
 0x19e   : > { %v5720_v43 = vrot.slane %v2885_v8, 9  ;;  %v3005_v16 = vrot.slane %v3003_v50, 4  ;;  %2848 = vst [vmem:[#allocation3 + $0x184] sm:$0xf] %v2555_v29  ;;  %v5895_v8 = vld [vmem:[#allocation3 + $0x154] sm:$0xf0] }
 0x19f   : > { %v4767_v42 = vpop.f32.mrf.mxu1  ;;  %v6642_v15 = vld [vmem:[#allocation3 + $0x158] sm:$0xf0]  ;;  %v2580_v0 = vshrl.u32 %v2393_v55, 16  ;;  %v2394_v29 = vld [vmem:[#allocation2 + $0x68] sm:$0x1] }
 0x1a0   : > { %v4853_v4 = vpop.f32.mrf.mxu2  ;;  %v3004_v12 = vsel %vm7452_vm6, %v5720_v43, %v3003_v50  ;;  %v4768_v31 = vadd.f32 %v4767_v42, %v7704_v20  ;;  %v3007_v10 = vsel %vm7452_vm6, %v3005_v16, %v3006_v19  ;;  %v5898_v43 = vor.u32 %v6637_v17, %v5895_v8  ;;  %v2055_v50 = vld [vmem:[#allocation2 + $0x54] sm:$0xe] }
 0x1a1   : > { %v4854_v5 = vadd.f32 %v4853_v4, %v4765_v52  ;;  %v4942_v40 = vpop.f32.mrf.mxu3  ;;  %v5031_v57 = vpop.f32.mrf.mxu0  ;;  %v5873_v52 = vld [vmem:[#allocation3 + $0xf8] sm:$0xf]  ;;  %3120 = vst [vmem:[#allocation3 + $0x188] sm:$0xf] %v3004_v12  ;;  %v2392_v4 = vld [vmem:[#allocation2 + $0x60] sm:$0xf] }
 0x1a2   : > { %5082 = vmatmul.bf16.gmra.mxu1 %v5862_v53  ;;  %v2565_v53 = vsel %vm7446_vm5, %v2560_v61, %v2564_v7  ;;  %3121 = vst [vmem:[#allocation3 + $0x1ac] sm:$0xf] %v3007_v10  ;;  %v2567_v30 = vshrl.u32 %v2392_v4, 16  ;;  %v2056_v7 = vld [vmem:[#allocation2 + $0x58] sm:$0xf]  ;;  %v2578_v19 = vrot.slane %v2576_v48, 5 }
 0x1a3   : > { %v4943_v14 = vadd.f32 %v4942_v40, %v4854_v5  ;;  %2849 = vst [vmem:[#allocation3 + $0x1a8] sm:$0xf] %v2565_v53  ;;  %v2570_v5 = vshll.u32 %v2392_v4, 16  ;;  %v2057_v61 = vld [vmem:[#allocation2 + $0x5c] sm:$0x1]  ;;  %v2582_v55 = vrot.slane %v2580_v0, 4 }
 0x1a4   : > { %v2569_v40 = vrot.slane %v2567_v30, 4  ;;  %v5903_v53 = vld [vmem:[#allocation3 + $0x15c] sm:$0xf0]  ;;  %v2323_v48 = vld [vmem:[#allocation2 + $0x64] sm:$0xf] }
 0x1a5   : > { %5171 = vmatmul.bf16.gmra.mxu2 %v5866_v21  ;;  %v8013_v25 = vadd.f32 %v5031_v57, %v4943_v14  ;;  %v5874_v21 = vor.u32 %v6634_v49, %v5873_v52  ;;  %v6638_v57 = vld [vmem:[#allocation3 + $0x13c] sm:$0xf]  ;;  %v2177_v14 = vrot.slane %v2056_v7, 5  ;;  %v2180_v49 = vrot.slane %v2057_v61, 5  ;;  %2355 = vst [vmem:[#allocation3 + $0x1ec] sm:$0xf] %v2323_v48 }
 0x1a6   : > { %5260 = vmatmul.bf16.gmra.mxu3 %v5870_v51  ;;  %v2572_v51 = vrot.slane %v2570_v5, 5  ;;  %v5902_v5 = vor.u32 %v6642_v15, %v5901_v22  ;;  %v5906_v17 = vor.u32 %v6638_v57, %v5903_v53  ;;  %v2890_v15 = vld [vmem:[#allocation2 + $0x68] sm:$0x1]  ;;  %v6643_v53 = vld [vmem:[#allocation3 + $0x160] sm:$0xf0] }
 0x1a7   : > { %v4769_v34 = vpop.f32.mrf.mxu1  ;;  %v2179_v52 = vrot.slane %v2177_v14, 4  ;;  %v3013_v57 = vrot.slane %v2890_v15, 5  ;;  %v6646_v48 = vld [vmem:[#allocation3 + $0x17c] sm:$0xf] }
 0x1a8   : > { %v4856_v59 = vpop.f32.mrf.mxu2  ;;  %v2573_v62 = vor.u32 %v2572_v51, %v2569_v40  ;;  %v4770_v16 = vadd.f32 %v4769_v34, %v7720_v26  ;;  %v2583_v34 = vor.u32 %v2582_v55, %v2578_v19  ;;  %v2889_v40 = vld [vmem:[#allocation2 + $0x64] sm:$0xf] }
 0x1a9   : > { %v4857_v58 = vadd.f32 %v4856_v59, %v4768_v31  ;;  %v4945_v45 = vpop.f32.mrf.mxu3  ;;  %v5034_v20 = vpop.f32.mrf.mxu0  ;;  %v5705_v31 = vrot.slane %v2055_v50, 9  ;;  %v2181_v26 = vsel %vm7452_vm6, %v2179_v52, %v2180_v49 }
 0x1aa   : > { %v2574_v4 = vrot.slane %v2573_v62, 4  ;;  %2290 = vst [vmem:[#allocation3 + $0x1e8] sm:$0xf] %v2181_v26  ;;  %v5937_v26 = vld [vmem:[#allocation3 + $0x180] sm:$0xf] }
 0x1ab   : > { %v4946_v42 = vadd.f32 %v4945_v45, %v4857_v58  ;;  %v2586_v58 = vshll.u32 %v2394_v29, 16  ;;  %v2322_v45 = vld [vmem:[#allocation2 + $0x60] sm:$0xf]  ;;  %v2584_v29 = vrot.slane %v2583_v34, 4  ;;  %v6651_v34 = vld [vmem:[#allocation3 + $0x1a0] sm:$0xf0] }
 0x1ac   : > { %5349 = vmatmul.bf16.gmra.mxu0 %v5874_v21  ;;  %v2178_v21 = vsel %vm7452_vm6, %v5705_v31, %v2177_v14  ;;  %v2579_v22 = vsel %vm7446_vm5, %v2574_v4, %v2578_v19  ;;  %v3010_v14 = vrot.slane %v2889_v40, 5  ;;  %2354 = vst [vmem:[#allocation3 + $0x1c8] sm:$0xf] %v2322_v45  ;;  %v2396_v4 = vld [vmem:[#allocation2 + $0x70] sm:$0xf] }
 0x1ad   : > { %v8020_v12 = vadd.f32 %v5034_v20, %v4946_v42  ;;  %v2888_v20 = vld [vmem:[#allocation2 + $0x60] sm:$0xe]  ;;  %2289 = vst [vmem:[#allocation3 + $0x1c4] sm:$0xf] %v2178_v21  ;;  %v2588_v8 = vrot.slane %v2586_v58, 5  ;;  %v2600_v45 = vshll.u32 %v2396_v4, 16 }
 0x1ae   : > { %v5721_v0 = vrot.slane %v2888_v20, 9  ;;  %v3012_v50 = vrot.slane %v3010_v14, 4  ;;  %2850 = vst [vmem:[#allocation3 + $0x1cc] sm:$0xf] %v2579_v22  ;;  %v5931_v20 = vld [vmem:[#allocation3 + $0x19c] sm:$0xf0] }
 0x1af   : > { %v4772_v59 = vpop.f32.mrf.mxu1  ;;  %v2604_v40 = vshrl.u32 %v2396_v4, 16  ;;  %v2397_v22 = vld [vmem:[#allocation2 + $0x74] sm:$0x1] }
 0x1b0   : > { %v4858_v10 = vpop.f32.mrf.mxu2  ;;  %v3011_v62 = vsel %vm7452_vm6, %v5721_v0, %v3010_v14  ;;  %v4773_v19 = vadd.f32 %v4772_v59, %v7588_v11  ;;  %v3014_v31 = vsel %vm7452_vm6, %v3012_v50, %v3013_v57  ;;  %v5934_v0 = vor.u32 %v6646_v48, %v5931_v20  ;;  %v2058_v14 = vld [vmem:[#allocation2 + $0x60] sm:$0xe] }
 0x1b1   : > { %v4859_v30 = vadd.f32 %v4858_v10, %v4770_v16  ;;  %v4947_v42 = vpop.f32.mrf.mxu3  ;;  %v5036_v51 = vpop.f32.mrf.mxu0  ;;  %v5909_v16 = vld [vmem:[#allocation3 + $0x140] sm:$0xf]  ;;  %3122 = vst [vmem:[#allocation3 + $0x1d0] sm:$0xf] %v3011_v62  ;;  %v2395_v10 = vld [vmem:[#allocation2 + $0x6c] sm:$0xf] }
 0x1b2   : > { %5087 = vmatmul.bf16.gmra.mxu1 %v5898_v43  ;;  %v2589_v43 = vsel %vm7446_vm5, %v2584_v29, %v2588_v8  ;;  %3123 = vst [vmem:[#allocation3 + $0x1f4] sm:$0xf] %v3014_v31  ;;  %v2591_v58 = vshrl.u32 %v2395_v10, 16  ;;  %v2059_v8 = vld [vmem:[#allocation2 + $0x64] sm:$0xf]  ;;  %v2602_v57 = vrot.slane %v2600_v45, 5 }
 0x1b3   : > { %v4948_v7 = vadd.f32 %v4947_v42, %v4859_v30  ;;  %2851 = vst [vmem:[#allocation3 + $0x1f0] sm:$0xf] %v2589_v43  ;;  %v2594_v30 = vshll.u32 %v2395_v10, 16  ;;  %v2060_v29 = vld [vmem:[#allocation2 + $0x68] sm:$0x1]  ;;  %v2606_v4 = vrot.slane %v2604_v40, 4 }
 0x1b4   : > { %v2593_v42 = vrot.slane %v2591_v58, 4  ;;  %v5939_v43 = vld [vmem:[#allocation3 + $0x1a4] sm:$0xf0]  ;;  %v2325_v45 = vld [vmem:[#allocation2 + $0x70] sm:$0xf] }
 0x1b5   : > { %5176 = vmatmul.bf16.gmra.mxu2 %v5902_v5  ;;  %v8031_v61 = vadd.f32 %v5036_v51, %v4948_v7  ;;  %v5910_v5 = vor.u32 %v6643_v53, %v5909_v16  ;;  %v6647_v51 = vld [vmem:[#allocation3 + $0x184] sm:$0xf]  ;;  %v2184_v7 = vrot.slane %v2059_v8, 5  ;;  %v2187_v53 = vrot.slane %v2060_v29, 5  ;;  %2357 = vst [vmem:[#allocation3 + $0x234] sm:$0xf] %v2325_v45 }
 0x1b6   : > { %5265 = vmatmul.bf16.gmra.mxu3 %v5906_v17  ;;  %v2596_v17 = vrot.slane %v2594_v30, 5  ;;  %v5938_v30 = vor.u32 %v6651_v34, %v5937_v26  ;;  %v5942_v48 = vor.u32 %v6647_v51, %v5939_v43  ;;  %v2893_v34 = vld [vmem:[#allocation2 + $0x74] sm:$0x1]  ;;  %v6652_v43 = vld [vmem:[#allocation3 + $0x1a8] sm:$0xf0] }
 0x1b7   : > { %v4774_v49 = vpop.f32.mrf.mxu1  ;;  %v2186_v16 = vrot.slane %v2184_v7, 4  ;;  %v3020_v51 = vrot.slane %v2893_v34, 5  ;;  %v6655_v45 = vld [vmem:[#allocation3 + $0x1c4] sm:$0xf] }
 0x1b8   : > { %v4861_v52 = vpop.f32.mrf.mxu2  ;;  %v2597_v15 = vor.u32 %v2596_v17, %v2593_v42  ;;  %v4775_v50 = vadd.f32 %v4774_v49, %v7620_v9  ;;  %v2607_v49 = vor.u32 %v2606_v4, %v2602_v57  ;;  %v2892_v42 = vld [vmem:[#allocation2 + $0x70] sm:$0xf] }
 0x1b9   : > { %v4862_v55 = vadd.f32 %v4861_v52, %v4773_v19  ;;  %v4950_v21 = vpop.f32.mrf.mxu3  ;;  %v5039_v11 = vpop.f32.mrf.mxu0  ;;  %v5706_v19 = vrot.slane %v2058_v14, 9  ;;  %v2188_v9 = vsel %vm7452_vm6, %v2186_v16, %v2187_v53 }
 0x1ba   : > { %v2598_v10 = vrot.slane %v2597_v15, 4  ;;  %2292 = vst [vmem:[#allocation3 + $0x230] sm:$0xf] %v2188_v9  ;;  %v5973_v9 = vld [vmem:[#allocation3 + $0x1c8] sm:$0xf] }
 0x1bb   : > { %v4951_v59 = vadd.f32 %v4950_v21, %v4862_v55  ;;  %v2610_v55 = vshll.u32 %v2397_v22, 16  ;;  %v2324_v21 = vld [vmem:[#allocation2 + $0x6c] sm:$0xf]  ;;  %v2608_v22 = vrot.slane %v2607_v49, 4  ;;  %v6660_v49 = vld [vmem:[#allocation3 + $0x1e8] sm:$0xf0] }
 0x1bc   : > { %5354 = vmatmul.bf16.gmra.mxu0 %v5910_v5  ;;  %v2185_v5 = vsel %vm7452_vm6, %v5706_v19, %v2184_v7  ;;  %v2603_v26 = vsel %vm7446_vm5, %v2598_v10, %v2602_v57  ;;  %v3017_v7 = vrot.slane %v2892_v42, 5  ;;  %2356 = vst [vmem:[#allocation3 + $0x210] sm:$0xf] %v2324_v21  ;;  %v2399_v10 = vld [vmem:[#allocation2 + $0x7c] sm:$0xf] }
 0x1bd   : > { %v8038_v62 = vadd.f32 %v5039_v11, %v4951_v59  ;;  %v2891_v11 = vld [vmem:[#allocation2 + $0x6c] sm:$0xe]  ;;  %2291 = vst [vmem:[#allocation3 + $0x20c] sm:$0xf] %v2185_v5  ;;  %v2612_v20 = vrot.slane %v2610_v55, 5  ;;  %v2624_v21 = vshll.u32 %v2399_v10, 16 }
 0x1be   : > { %v5722_v40 = vrot.slane %v2891_v11, 9  ;;  %v3019_v14 = vrot.slane %v3017_v7, 4  ;;  %2852 = vst [vmem:[#allocation3 + $0x214] sm:$0xf] %v2603_v26  ;;  %v5967_v11 = vld [vmem:[#allocation3 + $0x1e4] sm:$0xf0] }
 0x1bf   : > { %v4777_v52 = vpop.f32.mrf.mxu1  ;;  %v2628_v42 = vshrl.u32 %v2399_v10, 16  ;;  %v2400_v26 = vld [vmem:[#allocation2 + $0x80] sm:$0x1] }
 0x1c0   : > { %v4863_v31 = vpop.f32.mrf.mxu2  ;;  %v3018_v15 = vsel %vm7452_vm6, %v5722_v40, %v3017_v7  ;;  %v4778_v57 = vadd.f32 %v4777_v52, %v7634_v54  ;;  %v3021_v19 = vsel %vm7452_vm6, %v3019_v14, %v3020_v51  ;;  %v5970_v40 = vor.u32 %v6655_v45, %v5967_v11  ;;  %v2061_v7 = vld [vmem:[#allocation2 + $0x6c] sm:$0xe] }
 0x1c1   : > { %v4864_v58 = vadd.f32 %v4863_v31, %v4775_v50  ;;  %v4952_v59 = vpop.f32.mrf.mxu3  ;;  %v5041_v17 = vpop.f32.mrf.mxu0  ;;  %v5945_v50 = vld [vmem:[#allocation3 + $0x188] sm:$0xf]  ;;  %3124 = vst [vmem:[#allocation3 + $0x218] sm:$0xf] %v3018_v15  ;;  %v2398_v31 = vld [vmem:[#allocation2 + $0x78] sm:$0xf] }
 0x1c2   : > { %5092 = vmatmul.bf16.gmra.mxu1 %v5934_v0  ;;  %v2613_v0 = vsel %vm7446_vm5, %v2608_v22, %v2612_v20  ;;  %3125 = vst [vmem:[#allocation3 + $0x23c] sm:$0xf] %v3021_v19  ;;  %v2615_v55 = vshrl.u32 %v2398_v31, 16  ;;  %v2062_v20 = vld [vmem:[#allocation2 + $0x70] sm:$0xf]  ;;  %v2626_v51 = vrot.slane %v2624_v21, 5 }
 0x1c3   : > { %v4953_v8 = vadd.f32 %v4952_v59, %v4864_v58  ;;  %2853 = vst [vmem:[#allocation3 + $0x238] sm:$0xf] %v2613_v0  ;;  %v2618_v58 = vshll.u32 %v2398_v31, 16  ;;  %v2063_v22 = vld [vmem:[#allocation2 + $0x74] sm:$0x1]  ;;  %v2630_v10 = vrot.slane %v2628_v42, 4 }
 0x1c4   : > { %v2617_v59 = vrot.slane %v2615_v55, 4  ;;  %v5975_v0 = vld [vmem:[#allocation3 + $0x1ec] sm:$0xf0]  ;;  %v2327_v21 = vld [vmem:[#allocation2 + $0x7c] sm:$0xf] }
 0x1c5   : > { %5181 = vmatmul.bf16.gmra.mxu2 %v5938_v30  ;;  %v8049_v29 = vadd.f32 %v5041_v17, %v4953_v8  ;;  %v5946_v30 = vor.u32 %v6652_v43, %v5945_v50  ;;  %v6656_v17 = vld [vmem:[#allocation3 + $0x1cc] sm:$0xf]  ;;  %v2191_v8 = vrot.slane %v2062_v20, 5  ;;  %v2194_v43 = vrot.slane %v2063_v22, 5  ;;  %2359 = vst [vmem:[#allocation3 + $0x27c] sm:$0xf] %v2327_v21 }
 0x1c6   : > { %5270 = vmatmul.bf16.gmra.mxu3 %v5942_v48  ;;  %v2620_v48 = vrot.slane %v2618_v58, 5  ;;  %v5974_v58 = vor.u32 %v6660_v49, %v5973_v9  ;;  %v5978_v45 = vor.u32 %v6656_v17, %v5975_v0  ;;  %v2896_v49 = vld [vmem:[#allocation2 + $0x80] sm:$0x1]  ;;  %v6661_v0 = vld [vmem:[#allocation3 + $0x1f0] sm:$0xf0] }
 0x1c7   : > { %v4779_v53 = vpop.f32.mrf.mxu1  ;;  %v2193_v50 = vrot.slane %v2191_v8, 4  ;;  %v3027_v17 = vrot.slane %v2896_v49, 5  ;;  %v6664_v21 = vld [vmem:[#allocation3 + $0x20c] sm:$0xf] }
 0x1c8   : > { %v4866_v16 = vpop.f32.mrf.mxu2  ;;  %v2621_v34 = vor.u32 %v2620_v48, %v2617_v59  ;;  %v4780_v14 = vadd.f32 %v4779_v53, %v7650_v41  ;;  %v2631_v53 = vor.u32 %v2630_v10, %v2626_v51  ;;  %v2895_v59 = vld [vmem:[#allocation2 + $0x7c] sm:$0xf] }
 0x1c9   : > { %v4867_v4 = vadd.f32 %v4866_v16, %v4778_v57  ;;  %v4955_v5 = vpop.f32.mrf.mxu3  ;;  %v5044_v54 = vpop.f32.mrf.mxu0  ;;  %v5707_v57 = vrot.slane %v2061_v7, 9  ;;  %v2195_v41 = vsel %vm7452_vm6, %v2193_v50, %v2194_v43 }
 0x1ca   : > { %v2622_v31 = vrot.slane %v2621_v34, 4  ;;  %2294 = vst [vmem:[#allocation3 + $0x278] sm:$0xf] %v2195_v41  ;;  %v6009_v41 = vld [vmem:[#allocation3 + $0x210] sm:$0xf] }
 0x1cb   : > { %v4956_v52 = vadd.f32 %v4955_v5, %v4867_v4  ;;  %v2634_v4 = vshll.u32 %v2400_v26, 16  ;;  %v2326_v5 = vld [vmem:[#allocation2 + $0x78] sm:$0xf]  ;;  %v2632_v26 = vrot.slane %v2631_v53, 4  ;;  %v6669_v53 = vld [vmem:[#allocation3 + $0x230] sm:$0xf0] }
 0x1cc   : > { %5359 = vmatmul.bf16.gmra.mxu0 %v5946_v30  ;;  %v2192_v30 = vsel %vm7452_vm6, %v5707_v57, %v2191_v8  ;;  %v2627_v9 = vsel %vm7446_vm5, %v2622_v31, %v2626_v51  ;;  %v3024_v8 = vrot.slane %v2895_v59, 5  ;;  %2358 = vst [vmem:[#allocation3 + $0x258] sm:$0xf] %v2326_v5  ;;  %v2402_v31 = vld [vmem:[#allocation2 + $0x88] sm:$0xf] }
 0x1cd   : > { %v8056_v15 = vadd.f32 %v5044_v54, %v4956_v52  ;;  %v2894_v54 = vld [vmem:[#allocation2 + $0x78] sm:$0xe]  ;;  %2293 = vst [vmem:[#allocation3 + $0x254] sm:$0xf] %v2192_v30  ;;  %v2636_v11 = vrot.slane %v2634_v4, 5  ;;  %v2648_v5 = vshll.u32 %v2402_v31, 16 }
 0x1ce   : > { %v5723_v42 = vrot.slane %v2894_v54, 9  ;;  %v3026_v7 = vrot.slane %v3024_v8, 4  ;;  %2854 = vst [vmem:[#allocation3 + $0x25c] sm:$0xf] %v2627_v9  ;;  %v6003_v54 = vld [vmem:[#allocation3 + $0x22c] sm:$0xf0] }
 0x1cf   : > { %v4782_v16 = vpop.f32.mrf.mxu1  ;;  %v2652_v59 = vshrl.u32 %v2402_v31, 16  ;;  %v2403_v9 = vld [vmem:[#allocation2 + $0x8c] sm:$0x1] }
 0x1d0   : > { %v4868_v19 = vpop.f32.mrf.mxu2  ;;  %v3025_v34 = vsel %vm7452_vm6, %v5723_v42, %v3024_v8  ;;  %v4783_v51 = vadd.f32 %v4782_v16, %v7668_v33  ;;  %v3028_v57 = vsel %vm7452_vm6, %v3026_v7, %v3027_v17  ;;  %v6006_v42 = vor.u32 %v6664_v21, %v6003_v54  ;;  %v2064_v8 = vld [vmem:[#allocation2 + $0x78] sm:$0xe]  ;;  %v2328_v21 = vld [vmem:[#allocation2 + $0x84] sm:$0xf] }
 0x1d1   : > { %v4869_v55 = vadd.f32 %v4868_v19, %v4780_v14  ;;  %v4957_v52 = vpop.f32.mrf.mxu3  ;;  %v5046_v48 = vpop.f32.mrf.mxu0  ;;  %v5981_v14 = vld [vmem:[#allocation3 + $0x1d0] sm:$0xf]  ;;  %3126 = vst [vmem:[#allocation3 + $0x260] sm:$0xf] %v3025_v34  ;;  %v2401_v19 = vld [vmem:[#allocation2 + $0x84] sm:$0xf] }
 0x1d2   : > { %5097 = vmatmul.bf16.gmra.mxu1 %v5970_v40  ;;  %v2637_v40 = vsel %vm7446_vm5, %v2632_v26, %v2636_v11  ;;  %3127 = vst [vmem:[#allocation3 + $0x284] sm:$0xf] %v3028_v57  ;;  %v2639_v4 = vshrl.u32 %v2401_v19, 16  ;;  %v2065_v11 = vld [vmem:[#allocation2 + $0x7c] sm:$0xf]  ;;  %v2650_v17 = vrot.slane %v2648_v5, 5 }
 0x1d3   : > { %v4958_v20 = vadd.f32 %v4957_v52, %v4869_v55  ;;  %2855 = vst [vmem:[#allocation3 + $0x280] sm:$0xf] %v2637_v40  ;;  %v2642_v55 = vshll.u32 %v2401_v19, 16  ;;  %v2066_v26 = vld [vmem:[#allocation2 + $0x80] sm:$0x1]  ;;  %v8268_v7 = vld [vmem:[#allocation4_spill] sm:$0xff] }
 0x1d4   : > { %v2641_v52 = vrot.slane %v2639_v4, 4  ;;  %v2201_v57 = vrot.slane %v2066_v26, 5  ;;  %v2658_v4 = vshll.u32 %v2403_v9, 16  ;;  %v2329_v5 = vld [vmem:[#allocation2 + $0x88] sm:$0xf] }
 0x1d5   : > { %5186 = vmatmul.bf16.gmra.mxu2 %v5974_v58  ;;  %v8067_v22 = vadd.f32 %v5046_v48, %v4958_v20  ;;  %v5982_v58 = vor.u32 %v6661_v0, %v5981_v14  ;;  %v6665_v48 = vld [vmem:[#allocation3 + $0x214] sm:$0xf]  ;;  %v2198_v20 = vrot.slane %v2065_v11, 5  ;;  %v5708_v14 = vrot.slane %v2064_v8, 9  ;;  %v2898_v11 = vld [vmem:[#allocation2 + $0x88] sm:$0xf] }
 0x1d6   : > { %5275 = vmatmul.bf16.gmra.mxu3 %v5978_v45  ;;  %v2644_v45 = vrot.slane %v2642_v55, 5  ;;  %v3031_v9 = vrot.slane %v2898_v11, 5  ;;  %2360 = vst [vmem:[#allocation3 + $0x2a0] sm:$0xf] %v2328_v21  ;;  %v6045_v11 = vld [vmem:[#allocation3 + $0x258] sm:$0xf] }
 0x1d7   : > { %v4784_v43 = vpop.f32.mrf.mxu1  ;;  %v2200_v0 = vrot.slane %v2198_v20, 4  ;;  %2361 = vst [vmem:[#allocation3 + $0x2c4] sm:$0xf] %v2329_v5 }
 0x1d8   : > { %v4871_v50 = vpop.f32.mrf.mxu2  ;;  %v2645_v49 = vor.u32 %v2644_v45, %v2641_v52  ;;  %v4785_v40 = vadd.f32 %v4784_v43, %v8268_v7  ;;  %v2660_v45 = vrot.slane %v2658_v4, 5  ;;  %v3033_v7 = vrot.slane %v3031_v9, 4  ;;  %v2405_v4 = vld [vmem:[#allocation2 + $0x94] sm:$0xf] }
 0x1d9   : > { %v4872_v10 = vadd.f32 %v4871_v50, %v4783_v51  ;;  %v4960_v30 = vpop.f32.mrf.mxu3  ;;  %v5049_v33 = vpop.f32.mrf.mxu0  ;;  %v6011_v51 = vld [vmem:[#allocation3 + $0x234] sm:$0xf0]  ;;  %v2202_v43 = vsel %vm7452_vm6, %v2200_v0, %v2201_v57  ;;  %v6670_v0 = vld [vmem:[#allocation3 + $0x238] sm:$0xf0] }
 0x1da   : > { %v2646_v31 = vrot.slane %v2645_v49, 4  ;;  %v6014_v54 = vor.u32 %v6665_v48, %v6011_v51  ;;  %2296 = vst [vmem:[#allocation3 + $0x2c0] sm:$0xf] %v2202_v43  ;;  %v8270_v51 = vld [vmem:[#allocation5_spill] sm:$0xff]  ;;  %v6039_v43 = vld [vmem:[#allocation3 + $0x274] sm:$0xf0] }
 0x1db   : > { %v4961_v16 = vadd.f32 %v4960_v30, %v4872_v10  ;;  %v2654_v10 = vrot.slane %v2652_v59, 4  ;;  %v6010_v30 = vor.u32 %v6669_v53, %v6009_v41  ;;  %v2899_v53 = vld [vmem:[#allocation2 + $0x8c] sm:$0x1] }
 0x1dc   : > { %5364 = vmatmul.bf16.gmra.mxu0 %v5982_v58  ;;  %v2199_v58 = vsel %vm7452_vm6, %v5708_v14, %v2198_v20  ;;  %v2651_v41 = vsel %vm7446_vm5, %v2646_v31, %v2650_v17  ;;  %v3034_v48 = vrot.slane %v2899_v53, 5  ;;  %v6017_v14 = vld [vmem:[#allocation3 + $0x218] sm:$0xf]  ;;  %v6674_v53 = vld [vmem:[#allocation3 + $0x25c] sm:$0xf] }
 0x1dd   : > { %v8074_v34 = vadd.f32 %v5049_v33, %v4961_v16  ;;  %v2897_v33 = vld [vmem:[#allocation2 + $0x84] sm:$0xe]  ;;  %2295 = vst [vmem:[#allocation3 + $0x29c] sm:$0xf] %v2199_v58  ;;  %v2655_v52 = vor.u32 %v2654_v10, %v2650_v17  ;;  %v2404_v10 = vld [vmem:[#allocation2 + $0x90] sm:$0xf]  ;;  %v6018_v21 = vor.u32 %v6670_v0, %v6017_v14 }
 0x1de   : > { %v5724_v20 = vrot.slane %v2897_v33, 9  ;;  %2856 = vst [vmem:[#allocation3 + $0x2a4] sm:$0xf] %v2651_v41  ;;  %v3035_v57 = vsel %vm7452_vm6, %v3033_v7, %v3034_v48  ;;  %v2666_v58 = vshll.u32 %v2404_v10, 16  ;;  %v2672_v33 = vshll.u32 %v2405_v4, 16 }
 0x1df   : > { %v4787_v19 = vpop.f32.mrf.mxu1  ;;  %v2656_v8 = vrot.slane %v2655_v52, 4  ;;  %3129 = vst [vmem:[#allocation3 + $0x2cc] sm:$0xf] %v3035_v57  ;;  %v2676_v41 = vshrl.u32 %v2405_v4, 16  ;;  %v2069_v7 = vld [vmem:[#allocation2 + $0x8c] sm:$0x1] }
 0x1e0   : > { %v4873_v50 = vpop.f32.mrf.mxu2  ;;  %v3032_v26 = vsel %vm7452_vm6, %v5724_v20, %v3031_v9  ;;  %v4788_v17 = vadd.f32 %v4787_v19, %v8270_v51  ;;  %v2406_v9 = vld [vmem:[#allocation2 + $0x98] sm:$0x1] }
 0x1e1   : > { %v4874_v55 = vadd.f32 %v4873_v50, %v4785_v40  ;;  %v4962_v16 = vpop.f32.mrf.mxu3  ;;  %v5051_v49 = vpop.f32.mrf.mxu0  ;;  %3128 = vst [vmem:[#allocation3 + $0x2a8] sm:$0xf] %v3032_v26  ;;  %v2067_v26 = vld [vmem:[#allocation2 + $0x84] sm:$0xe]  ;;  %v6047_v0 = vld [vmem:[#allocation3 + $0x27c] sm:$0xf0] }
 0x1e2   : > { %5102 = vmatmul.bf16.gmra.mxu1 %v6006_v42  ;;  %v2661_v42 = vsel %vm7446_vm5, %v2656_v8, %v2660_v45  ;;  %v2668_v45 = vrot.slane %v2666_v58, 5  ;;  %v5709_v57 = vrot.slane %v2067_v26, 9  ;;  %v2678_v58 = vrot.slane %v2676_v41, 4 }
 0x1e3   : > { %v4963_v59 = vadd.f32 %v4962_v16, %v4874_v55  ;;  %2857 = vst [vmem:[#allocation3 + $0x2c8] sm:$0xf] %v2661_v42  ;;  %v2674_v42 = vrot.slane %v2672_v33, 5  ;;  %v2331_v33 = vld [vmem:[#allocation2 + $0x94] sm:$0xf] }
 0x1e4   : > { %2363 = vst [vmem:[#allocation3 + $0x30c] sm:$0xf] %v2331_v33 }
 0x1e5   : > { %5191 = vmatmul.bf16.gmra.mxu2 %v6010_v30  ;;  %v8085_v40 = vadd.f32 %v5051_v49, %v4963_v59  ;;  %v2663_v30 = vshrl.u32 %v2404_v10, 16  ;;  %v6678_v49 = vld [vmem:[#allocation3 + $0x278] sm:$0xf0]  ;;  %v2068_v59 = vld [vmem:[#allocation2 + $0x88] sm:$0xf]  ;;  %v2208_v10 = vrot.slane %v2069_v7, 5 }
 0x1e6   : > { %5280 = vmatmul.bf16.gmra.mxu3 %v6014_v54  ;;  %v6673_v54 = vld [vmem:[#allocation3 + $0x254] sm:$0xf]  ;;  %v2205_v20 = vrot.slane %v2068_v59, 5  ;;  %v2901_v7 = vld [vmem:[#allocation2 + $0x94] sm:$0xf] }
 0x1e7   : > { %8269 = vst [vmem:[#allocation4_spill] sm:$0xff] %v8085_v40  ;;  %v4789_v31 = vpop.f32.mrf.mxu1  ;;  %v2665_v52 = vrot.slane %v2663_v30, 4  ;;  %v6042_v48 = vor.u32 %v6673_v54, %v6039_v43  ;;  %v2330_v54 = vld [vmem:[#allocation2 + $0x90] sm:$0xf]  ;;  %v6050_v43 = vor.u32 %v6674_v53, %v6047_v0 }
 0x1e8   : > { %v4876_v50 = vpop.f32.mrf.mxu2  ;;  %2362 = vst [vmem:[#allocation3 + $0x2e8] sm:$0xf] %v2330_v54 }
 0x1e9   : > { %v4877_v55 = vadd.f32 %v4876_v50, %v4788_v17  ;;  %v4965_v5 = vpop.f32.mrf.mxu3  ;;  %v5054_v19 = vpop.f32.mrf.mxu0  ;;  %v2669_v8 = vor.u32 %v2668_v45, %v2665_v52  ;;  %v8272_v17 = vld [vmem:[#allocation6_spill] sm:$0xff]  ;;  %v2207_v50 = vrot.slane %v2205_v20, 4  ;;  %v6046_v52 = vor.u32 %v6678_v49, %v6045_v11  ;;  %v2902_v49 = vld [vmem:[#allocation2 + $0x98] sm:$0x1] }
 0x1ea   : > { %v4790_v14 = vadd.f32 %v4789_v31, %v8272_v17  ;;  %v2679_v45 = vor.u32 %v2678_v58, %v2674_v42  ;;  %v3041_v53 = vrot.slane %v2902_v49, 5  ;;  %v6687_v49 = vld [vmem:[#allocation3 + $0x2c0] sm:$0xf0] }
 0x1eb   : > { %v4966_v16 = vadd.f32 %v4965_v5, %v4877_v55  ;;  %v2670_v4 = vrot.slane %v2669_v8, 4  ;;  %v2682_v5 = vshll.u32 %v2406_v9, 16  ;;  %v2209_v31 = vsel %vm7452_vm6, %v2207_v50, %v2208_v10  ;;  %v6679_v50 = vld [vmem:[#allocation3 + $0x280] sm:$0xf0] }
 0x1ec   : > { %5369 = vmatmul.bf16.gmra.mxu0 %v6018_v21  ;;  %v2206_v21 = vsel %vm7452_vm6, %v5709_v57, %v2205_v20  ;;  %2298 = vst [vmem:[#allocation3 + $0x308] sm:$0xf] %v2209_v31  ;;  %v3038_v9 = vrot.slane %v2901_v7, 5  ;;  %v2680_v17 = vrot.slane %v2679_v45, 4  ;;  %v6682_v31 = vld [vmem:[#allocation3 + $0x29c] sm:$0xf] }
 0x1ed   : > { %v8092_v51 = vadd.f32 %v5054_v19, %v4966_v16  ;;  %v2900_v19 = vld [vmem:[#allocation2 + $0x90] sm:$0xe]  ;;  %2297 = vst [vmem:[#allocation3 + $0x2e4] sm:$0xf] %v2206_v21  ;;  %v2684_v26 = vrot.slane %v2682_v5, 5  ;;  %v2675_v11 = vsel %vm7446_vm5, %v2670_v4, %v2674_v42 }
 0x1ee   : > { %v5725_v20 = vrot.slane %v2900_v19, 9  ;;  %v3040_v0 = vrot.slane %v3038_v9, 4  ;;  %2858 = vst [vmem:[#allocation3 + $0x2ec] sm:$0xf] %v2675_v11  ;;  %v6053_v42 = vld [vmem:[#allocation3 + $0x260] sm:$0xf] }
 0x1ef   : > { %8271 = vst [vmem:[#allocation5_spill] sm:$0xff] %v8092_v51  ;;  %v5068_v30 = vpop.f32.mrf.mxu1  ;;  %v6054_v33 = vor.u32 %v6679_v50, %v6053_v42  ;;  %v6075_v45 = vld [vmem:[#allocation3 + $0x2bc] sm:$0xf0]  ;;  %v2904_v51 = vld [vmem:[#allocation2 + $0xa0] sm:$0xf] }
 0x1f0   : > { %v4878_v55 = vpop.f32.mrf.mxu2  ;;  %v3042_v10 = vsel %vm7452_vm6, %v3040_v0, %v3041_v53  ;;  %v2070_v0 = vld [vmem:[#allocation2 + $0x90] sm:$0xe]  ;;  %v6078_v50 = vor.u32 %v6682_v31, %v6075_v45 }
 0x1f1   : > { %v4879_v59 = vadd.f32 %v4878_v55, %v4790_v14  ;;  %v4967_v16 = vpop.f32.mrf.mxu3  ;;  %v5056_v8 = vpop.f32.mrf.mxu0  ;;  %v3039_v14 = vsel %vm7452_vm6, %v5725_v20, %v3038_v9  ;;  %v8274_v55 = vld [vmem:[#allocation7_spill] sm:$0xff]  ;;  %3131 = vst [vmem:[#allocation3 + $0x314] sm:$0xf] %v3042_v10  ;;  %v6683_v20 = vld [vmem:[#allocation3 + $0x2a4] sm:$0xf]  ;;  %v5710_v10 = vrot.slane %v2070_v0, 9 }
 0x1f2   : > { %5107 = vmatmul.bf16.gmra.mxu1 %v6042_v48  ;;  %v2685_v48 = vsel %vm7446_vm5, %v2680_v17, %v2684_v26  ;;  %v5069_v4 = vadd.f32 %v5068_v30, %v8274_v55  ;;  %3130 = vst [vmem:[#allocation3 + $0x2f0] sm:$0xf] %v3039_v14  ;;  %v6083_v14 = vld [vmem:[#allocation3 + $0x2c4] sm:$0xf0] }
 0x1f3   : > { %v4968_v41 = vadd.f32 %v4967_v16, %v4879_v59  ;;  %2859 = vst [vmem:[#allocation3 + $0x310] sm:$0xf] %v2685_v48  ;;  %v2407_v59 = vld [vmem:[#allocation2 + $0x9c] sm:$0xf]  ;;  %v2072_v48 = vld [vmem:[#allocation2 + $0x98] sm:$0x1] }
 0x1f4   : > { %v2687_v21 = vshrl.u32 %v2407_v59, 16  ;;  %v2690_v54 = vshll.u32 %v2407_v59, 16 }
 0x1f5   : > { %5196 = vmatmul.bf16.gmra.mxu2 %v6046_v52  ;;  %v8103_v57 = vadd.f32 %v5056_v8, %v4968_v41  ;;  %v2408_v52 = vld [vmem:[#allocation2 + $0xa0] sm:$0xf]  ;;  %v6081_v8 = vld [vmem:[#allocation3 + $0x2a0] sm:$0xf]  ;;  %v2071_v41 = vld [vmem:[#allocation2 + $0x94] sm:$0xf] }
 0x1f6   : > { %5285 = vmatmul.bf16.gmra.mxu3 %v6050_v43  ;;  %v2689_v26 = vrot.slane %v2687_v21, 4  ;;  %v2692_v7 = vrot.slane %v2690_v54, 5  ;;  %v2696_v11 = vshll.u32 %v2408_v52, 16  ;;  %v2700_v30 = vshrl.u32 %v2408_v52, 16 }
 0x1f7   : > { %8273 = vst [vmem:[#allocation6_spill] sm:$0xff] %v8103_v57  ;;  %v5070_v5 = vpop.f32.mrf.mxu1  ;;  %v2212_v9 = vrot.slane %v2071_v41, 5  ;;  %v2215_v21 = vrot.slane %v2072_v48, 5 }
 0x1f8   : > { %v5157_v58 = vpop.f32.mrf.mxu2  ;;  %v2693_v17 = vor.u32 %v2692_v7, %v2689_v26  ;;  %v5071_v42 = vadd.f32 %v5070_v5, %v7763_v44  ;;  %v2698_v52 = vrot.slane %v2696_v11, 5  ;;  %v2702_v57 = vrot.slane %v2700_v30, 4  ;;  %v2333_v7 = vld [vmem:[#allocation2 + $0xa0] sm:$0xf]  ;;  %v2903_v44 = vld [vmem:[#allocation2 + $0x9c] sm:$0xe] }
 0x1f9   : > { %v5158_v19 = vadd.f32 %v5157_v58, %v5069_v4  ;;  %v5246_v16 = vpop.f32.mrf.mxu3  ;;  %v5335_v43 = vpop.f32.mrf.mxu0  ;;  %v2214_v55 = vrot.slane %v2212_v9, 4  ;;  %v2409_v4 = vld [vmem:[#allocation2 + $0xa4] sm:$0x1]  ;;  %v6082_v26 = vor.u32 %v6687_v49, %v6081_v8  ;;  %v5726_v49 = vrot.slane %v2903_v44, 9  ;;  %2365 = vst [vmem:[#allocation3 + $0x354] sm:$0xf] %v2333_v7 }
 0x1fa   : > { %v2694_v54 = vrot.slane %v2693_v17, 4  ;;  %v2703_v0 = vor.u32 %v2702_v57, %v2698_v52  ;;  %v2706_v17 = vshll.u32 %v2409_v4, 16  ;;  %v2905_v11 = vld [vmem:[#allocation2 + $0xa4] sm:$0x1] }
 0x1fb   : > { %v5247_v53 = vadd.f32 %v5246_v16, %v5158_v19  ;;  %v2213_v19 = vsel %vm7452_vm6, %v5710_v10, %v2212_v9  ;;  %v2332_v16 = vld [vmem:[#allocation2 + $0x9c] sm:$0xf]  ;;  %v2216_v45 = vsel %vm7452_vm6, %v2214_v55, %v2215_v21  ;;  %v6089_v21 = vld [vmem:[#allocation3 + $0x2a8] sm:$0xf] }
 0x1fc   : > { %5374 = vmatmul.bf16.gmra.mxu0 %v6054_v33  ;;  %v6086_v33 = vor.u32 %v6683_v20, %v6083_v14  ;;  %2299 = vst [vmem:[#allocation3 + $0x32c] sm:$0xf] %v2213_v19  ;;  %v2699_v8 = vsel %vm7446_vm5, %v2694_v54, %v2698_v52  ;;  %v3045_v20 = vrot.slane %v2904_v51, 5  ;;  %v2708_v9 = vrot.slane %v2706_v17, 5  ;;  %v6688_v54 = vld [vmem:[#allocation3 + $0x2c8] sm:$0xf0] }
 0x1fd   : > { %v5336_v5 = vadd.f32 %v5335_v43, %v5247_v53  ;;  %2300 = vst [vmem:[#allocation3 + $0x350] sm:$0xf] %v2216_v45  ;;  %v2704_v43 = vrot.slane %v2703_v0, 4  ;;  %v3048_v53 = vrot.slane %v2905_v11, 5  ;;  %v2410_v19 = vld [vmem:[#allocation2 + $0xa8] sm:$0xf]  ;;  %v6090_v44 = vor.u32 %v6688_v54, %v6089_v21 }
 0x1fe   : > { %2364 = vst [vmem:[#allocation3 + $0x330] sm:$0xf] %v2332_v16  ;;  %v3046_v57 = vsel %vm7452_vm6, %v5726_v49, %v3045_v20  ;;  %v2411_v16 = vld [vmem:[#allocation2 + $0xac] sm:$0xf]  ;;  %v2711_v7 = vshrl.u32 %v2410_v19, 16 }
 0x1ff   : > { %v5073_v59 = vpop.f32.mrf.mxu1  ;;  %v5517_v10 = vmul.f32 %v5336_v5, %v5336_v5  ;;  %2860 = vst [vmem:[#allocation3 + $0x334] sm:$0xf] %v2699_v8  ;;  %v6691_v0 = vld [vmem:[#allocation3 + $0x2e4] sm:$0xf]  ;;  %v6111_v17 = vld [vmem:[#allocation3 + $0x304] sm:$0xf0] }
 0x200   : > { %v5159_v58 = vpop.f32.mrf.mxu2  ;;  %v5074_v51 = vadd.f32 %v5073_v59, %v7775_v35  ;;  %3132 = vst [vmem:[#allocation3 + $0x338] sm:$0xf] %v3046_v57  ;;  %v6117_v11 = vld [vmem:[#allocation3 + $0x2e8] sm:$0xf]  ;;  %v2713_v8 = vrot.slane %v2711_v7, 4  ;;  %v2720_v49 = vshll.u32 %v2411_v16, 16  ;;  %v6114_v57 = vor.u32 %v6691_v0, %v6111_v17 }
 0x201   : > { %v5160_v41 = vadd.f32 %v5159_v58, %v5071_v42  ;;  %v5248_v31 = vpop.f32.mrf.mxu3  ;;  %v5337_v30 = vpop.f32.mrf.mxu0  ;;  %v3047_v42 = vrot.slane %v3045_v20, 4  ;;  %v2412_v54 = vld [vmem:[#allocation2 + $0xb0] sm:$0x1]  ;;  %v2334_v0 = vld [vmem:[#allocation2 + $0xa8] sm:$0xf] }
 0x202   : > { %5112 = vmatmul.bf16.gmra.mxu1 %v6078_v50  ;;  %v2709_v50 = vsel %vm7446_vm5, %v2704_v43, %v2708_v9  ;;  %v6692_v43 = vld [vmem:[#allocation3 + $0x2ec] sm:$0xf]  ;;  %v6119_v9 = vld [vmem:[#allocation3 + $0x30c] sm:$0xf0]  ;;  %v2335_v17 = vld [vmem:[#allocation2 + $0xac] sm:$0xf] }
 0x203   : > { %v5249_v48 = vadd.f32 %v5248_v31, %v5160_v41  ;;  %2861 = vst [vmem:[#allocation3 + $0x358] sm:$0xf] %v2709_v50 }
 0x204   : > { %2366 = vst [vmem:[#allocation3 + $0x378] sm:$0xf] %v2334_v0 }
 0x205   : > { %v5338_v14 = vadd.f32 %v5337_v30, %v5249_v48  ;;  %5201 = vmatmul.bf16.gmra.mxu2 %v6082_v26  ;;  %v3049_v26 = vsel %vm7452_vm6, %v3047_v42, %v3048_v53  ;;  %v6696_v30 = vld [vmem:[#allocation3 + $0x308] sm:$0xf0]  ;;  %v2074_v48 = vld [vmem:[#allocation2 + $0xa0] sm:$0xf]  ;;  %v2073_v42 = vld [vmem:[#allocation2 + $0x9c] sm:$0xe] }
 0x206   : > { %5290 = vmatmul.bf16.gmra.mxu3 %v6086_v33  ;;  %3133 = vst [vmem:[#allocation3 + $0x35c] sm:$0xf] %v3049_v26  ;;  %v2219_v53 = vrot.slane %v2074_v48, 5  ;;  %v5711_v21 = vrot.slane %v2073_v42, 9 }
 0x207   : > { %v6922_v55 = vpack.c.bf16 %v5338_v14, %v5336_v5  ;;  %v5479_v4 = vadd.f32 %v5338_v14, %v5336_v5  ;;  %v5518_v58 = vmul.f32 %v5338_v14, %v5338_v14  ;;  %v5075_v41 = vpop.f32.mrf.mxu1  ;;  %v2714_v5 = vshll.u32 %v2410_v19, 16  ;;  %2367 = vst [vmem:[#allocation3 + $0x39c] sm:$0xf] %v2335_v17 }
 0x208   : > { %v5162_v52 = vpop.f32.mrf.mxu2 }
 0x209   : > { %6923 = vst [vmem:[%s8124_s18] sm:$0xff] %v6922_v55   ;;  %v5549_v35 = vadd.f32 %v5518_v58, %v5517_v10  ;;  %v5163_v59 = vadd.f32 %v5162_v52, %v5074_v51  ;;  %v5251_v31 = vpop.f32.mrf.mxu3  ;;  %v5340_v33 = vpop.f32.mrf.mxu0  ;;  %v2716_v14 = vrot.slane %v2714_v5, 5  ;;  %v2075_v10 = vld [vmem:[#allocation2 + $0xa4] sm:$0x1]  ;;  %v2724_v51 = vshrl.u32 %v2411_v16, 16  ;;  %v2907_v52 = vld [vmem:[#allocation2 + $0xac] sm:$0xf] }
 0x20a   : > { %v5076_v58 = vadd.f32 %v5075_v41, %v7782_v36  ;;  %v2222_v7 = vrot.slane %v2075_v10, 5  ;;  %v2906_v5 = vld [vmem:[#allocation2 + $0xa8] sm:$0xe]  ;;  %v6118_v16 = vor.u32 %v6696_v30, %v6117_v11  ;;  %v6122_v36 = vor.u32 %v6692_v43, %v6119_v9  ;;  %v2908_v10 = vld [vmem:[#allocation2 + $0xb0] sm:$0x1] }
 0x20b   : > { %v5252_v45 = vadd.f32 %v5251_v31, %v5163_v59  ;;  %v2221_v59 = vrot.slane %v2219_v53, 4  ;;  %v2717_v31 = vor.u32 %v2716_v14, %v2713_v8  ;;  %v2726_v40 = vrot.slane %v2724_v51, 4 }
 0x20c   : > { %5379 = vmatmul.bf16.gmra.mxu0 %v6090_v44  ;;  %v2722_v44 = vrot.slane %v2720_v49, 5  ;;  %v5727_v11 = vrot.slane %v2906_v5, 9  ;;  %v3052_v30 = vrot.slane %v2907_v52, 5  ;;  %v3055_v43 = vrot.slane %v2908_v10, 5 }
 0x20d   : > { %v8132_v20 = vadd.f32 %v5340_v33, %v5252_v45  ;;  %v2223_v41 = vsel %vm7452_vm6, %v2221_v59, %v2222_v7  ;;  %v2718_v42 = vrot.slane %v2717_v31, 4  ;;  %v6697_v59 = vld [vmem:[#allocation3 + $0x310] sm:$0xf0] }
 0x20e   : > { %2302 = vst [vmem:[#allocation3 + $0x398] sm:$0xf] %v2223_v41  ;;  %v2727_v14 = vor.u32 %v2726_v40, %v2722_v44  ;;  %v3053_v51 = vsel %vm7452_vm6, %v5727_v11, %v3052_v30  ;;  %v6125_v40 = vld [vmem:[#allocation3 + $0x2f0] sm:$0xf] }
 0x20f   : > { %v5480_v50 = vadd.f32 %v5479_v4, %v8132_v20  ;;  %v5519_v55 = vmul.f32 %v8132_v20, %v8132_v20  ;;  %v5078_v19 = vpop.f32.mrf.mxu1  ;;  %v2220_v4 = vsel %vm7452_vm6, %v5711_v21, %v2219_v53  ;;  %v2723_v53 = vsel %vm7446_vm5, %v2718_v42, %v2722_v44  ;;  %3134 = vst [vmem:[#allocation3 + $0x380] sm:$0xf] %v3053_v51  ;;  %v6147_v42 = vld [vmem:[#allocation3 + $0x34c] sm:$0xf0]  ;;  %v2078_v51 = vld [vmem:[#allocation2 + $0xb0] sm:$0x1] }
 0x210   : > { %v5164_v26 = vpop.f32.mrf.mxu2  ;;  %2301 = vst [vmem:[#allocation3 + $0x374] sm:$0xf] %v2220_v4  ;;  %v2728_v21 = vrot.slane %v2727_v14, 4  ;;  %v6126_v0 = vor.u32 %v6697_v59, %v6125_v40 }
 0x211   : > { %v5550_v33 = vadd.f32 %v5549_v35, %v5519_v55  ;;  %v5165_v45 = vadd.f32 %v5164_v26, %v5076_v58  ;;  %v5253_v48 = vpop.f32.mrf.mxu3  ;;  %v5342_v8 = vpop.f32.mrf.mxu0  ;;  %v2730_v35 = vshll.u32 %v2412_v54, 16  ;;  %v3054_v58 = vrot.slane %v3052_v30, 4  ;;  %2862 = vst [vmem:[#allocation3 + $0x37c] sm:$0xf] %v2723_v53  ;;  %v6705_v30 = vld [vmem:[#allocation3 + $0x350] sm:$0xf0] }
 0x212   : > { %5117 = vmatmul.bf16.gmra.mxu1 %v6114_v57  ;;  %v5079_v26 = vadd.f32 %v5078_v19, %v7798_v63  ;;  %v6700_v19 = vld [vmem:[#allocation3 + $0x32c] sm:$0xf]  ;;  %v2415_v53 = vld [vmem:[#allocation2 + $0xbc] sm:$0x1] }
 0x213   : > { %v5254_v49 = vadd.f32 %v5253_v48, %v5165_v45  ;;  %v2732_v55 = vrot.slane %v2730_v35, 5  ;;  %v3056_v5 = vsel %vm7452_vm6, %v3054_v58, %v3055_v43  ;;  %v2413_v45 = vld [vmem:[#allocation2 + $0xb4] sm:$0xf] }
 0x214   : > { %v2735_v4 = vshrl.u32 %v2413_v45, 16  ;;  %v2738_v17 = vshll.u32 %v2413_v45, 16  ;;  %3135 = vst [vmem:[#allocation3 + $0x3a4] sm:$0xf] %v3056_v5  ;;  %v6155_v5 = vld [vmem:[#allocation3 + $0x354] sm:$0xf0] }
 0x215   : > { %v5343_v9 = vadd.f32 %v5342_v8, %v5254_v49  ;;  %5206 = vmatmul.bf16.gmra.mxu2 %v6118_v16  ;;  %v2733_v44 = vsel %vm7446_vm5, %v2728_v21, %v2732_v55  ;;  %v2414_v16 = vld [vmem:[#allocation2 + $0xb8] sm:$0xf]  ;;  %v6153_v8 = vld [vmem:[#allocation3 + $0x330] sm:$0xf]  ;;  %v2077_v49 = vld [vmem:[#allocation2 + $0xac] sm:$0xf] }
 0x216   : > { %5295 = vmatmul.bf16.gmra.mxu3 %v6122_v36  ;;  %2863 = vst [vmem:[#allocation3 + $0x3a0] sm:$0xf] %v2733_v44  ;;  %v2744_v48 = vshll.u32 %v2414_v16, 16  ;;  %v2748_v10 = vshrl.u32 %v2414_v16, 16  ;;  %v2737_v35 = vrot.slane %v2735_v4, 4  ;;  %v2740_v14 = vrot.slane %v2738_v17, 5 }
 0x217   : > { %v6927_v57 = vpack.c.bf16 %v5343_v9, %v8132_v20  ;;  %v5481_v54 = vadd.f32 %v5480_v50, %v5343_v9  ;;  %v5520_v52 = vmul.f32 %v5343_v9, %v5343_v9  ;;  %v5080_v31 = vpop.f32.mrf.mxu1  ;;  %v6150_v9 = vor.u32 %v6700_v19, %v6147_v42  ;;  %v2076_v55 = vld [vmem:[#allocation2 + $0xa8] sm:$0xe]  ;;  %v2336_v19 = vld [vmem:[#allocation2 + $0xb4] sm:$0xf]  ;;  %v2910_v17 = vld [vmem:[#allocation2 + $0xb8] sm:$0xf] }
 0x218   : > { %v5167_v7 = vpop.f32.mrf.mxu2  ;;  %v5081_v43 = vadd.f32 %v5080_v31, %v7821_v1  ;;  %v2746_v58 = vrot.slane %v2744_v48, 5  ;;  %v2750_v21 = vrot.slane %v2748_v10, 4  ;;  %v5712_v40 = vrot.slane %v2076_v55, 9  ;;  %v2909_v31 = vld [vmem:[#allocation2 + $0xb4] sm:$0xe] }
 0x219   : > { %7022 = vst [vmem:[%s8124_s18 + $0x8] sm:$0xff] %v6927_v57   ;;  %v5551_v20 = vadd.f32 %v5550_v33, %v5520_v52  ;;  %v5168_v50 = vadd.f32 %v5167_v7, %v5079_v26  ;;  %v5256_v63 = vpop.f32.mrf.mxu3  ;;  %v5345_v36 = vpop.f32.mrf.mxu0  ;;  %v2226_v33 = vrot.slane %v2077_v49, 5  ;;  %v6701_v26 = vld [vmem:[#allocation3 + $0x334] sm:$0xf]  ;;  %v2229_v45 = vrot.slane %v2078_v51, 5 }
 0x21a   : > { %v2741_v16 = vor.u32 %v2740_v14, %v2737_v35  ;;  %v2754_v1 = vshll.u32 %v2415_v53, 16  ;;  %v2911_v48 = vld [vmem:[#allocation2 + $0xbc] sm:$0x1]  ;;  %v2337_v42 = vld [vmem:[#allocation2 + $0xb8] sm:$0xf]  ;;  %v3059_v14 = vrot.slane %v2910_v17, 5 }
 0x21b   : > { %v5257_v41 = vadd.f32 %v5256_v63, %v5168_v50  ;;  %v2228_v59 = vrot.slane %v2226_v33, 4  ;;  %v2751_v50 = vor.u32 %v2750_v21, %v2746_v58  ;;  %v6154_v63 = vor.u32 %v6705_v30, %v6153_v8  ;;  %2368 = vst [vmem:[#allocation3 + $0x3c0] sm:$0xf] %v2336_v19  ;;  %v6709_v19 = vld [vmem:[#allocation3 + $0x374] sm:$0xf] }
 0x21c   : > { %5384 = vmatmul.bf16.gmra.mxu0 %v6126_v0  ;;  %v2742_v10 = vrot.slane %v2741_v16, 4  ;;  %v2756_v8 = vrot.slane %v2754_v1, 5  ;;  %v5728_v30 = vrot.slane %v2909_v31, 9  ;;  %2369 = vst [vmem:[#allocation3 + $0x3e4] sm:$0xf] %v2337_v42 }
 0x21d   : > { %v8153_v11 = vadd.f32 %v5345_v36, %v5257_v41  ;;  %v2230_v41 = vsel %vm7452_vm6, %v2228_v59, %v2229_v45  ;;  %v2752_v49 = vrot.slane %v2751_v50, 4  ;;  %v6161_v59 = vld [vmem:[#allocation3 + $0x338] sm:$0xf]  ;;  %v2417_v1 = vld [vmem:[#allocation2 + $0xc4] sm:$0xf] }
 0x21e   : > { %2304 = vst [vmem:[#allocation3 + $0x3e0] sm:$0xf] %v2230_v41  ;;  %v6183_v17 = vld [vmem:[#allocation3 + $0x394] sm:$0xf0]  ;;  %v2080_v41 = vld [vmem:[#allocation2 + $0xb8] sm:$0xf] }
 0x21f   : > { %v5482_v57 = vadd.f32 %v5481_v54, %v8153_v11  ;;  %v5521_v52 = vmul.f32 %v8153_v11, %v8153_v11  ;;  %v5083_v44 = vpop.f32.mrf.mxu1  ;;  %v2227_v54 = vsel %vm7452_vm6, %v5712_v40, %v2226_v33  ;;  %v2747_v33 = vsel %vm7446_vm5, %v2742_v10, %v2746_v58 }
 0x220   : > { %v5169_v7 = vpop.f32.mrf.mxu2  ;;  %2303 = vst [vmem:[#allocation3 + $0x3bc] sm:$0xf] %v2227_v54  ;;  %v2757_v51 = vsel %vm7446_vm5, %v2752_v49, %v2756_v8  ;;  %v5084_v21 = vadd.f32 %v5083_v44, %v7835_v2  ;;  %v2416_v2 = vld [vmem:[#allocation2 + $0xc0] sm:$0xf]  ;;  %v2768_v10 = vshll.u32 %v2417_v1, 16  ;;  %v6186_v8 = vor.u32 %v6709_v19, %v6183_v17 }
 0x221   : > { %v5552_v4 = vadd.f32 %v5551_v20, %v5521_v52  ;;  %v5170_v0 = vadd.f32 %v5169_v7, %v5081_v43  ;;  %v5258_v36 = vpop.f32.mrf.mxu3  ;;  %v5347_v35 = vpop.f32.mrf.mxu0  ;;  %v6158_v20 = vor.u32 %v6701_v26, %v6155_v5  ;;  %v3062_v43 = vrot.slane %v2911_v48, 5  ;;  %2864 = vst [vmem:[#allocation3 + $0x3c4] sm:$0xf] %v2747_v33  ;;  %v6706_v7 = vld [vmem:[#allocation3 + $0x358] sm:$0xf0] }
 0x222   : > { %5122 = vmatmul.bf16.gmra.mxu1 %v6150_v9  ;;  %v3060_v9 = vsel %vm7452_vm6, %v5728_v30, %v3059_v14  ;;  %v3061_v52 = vrot.slane %v3059_v14, 4  ;;  %2865 = vst [vmem:[#allocation3 + $0x3e8] sm:$0xf] %v2757_v51  ;;  %v2759_v31 = vshrl.u32 %v2416_v2, 16  ;;  %v6189_v48 = vld [vmem:[#allocation3 + $0x378] sm:$0xf] }
 0x223   : > { %v5259_v53 = vadd.f32 %v5258_v36, %v5170_v0  ;;  %3136 = vst [vmem:[#allocation3 + $0x3c8] sm:$0xf] %v3060_v9  ;;  %v6162_v0 = vor.u32 %v6706_v7, %v6161_v59  ;;  %v6714_v36 = vld [vmem:[#allocation3 + $0x398] sm:$0xf0]  ;;  %v2081_v33 = vld [vmem:[#allocation2 + $0xbc] sm:$0x1] }
 0x224   : > { %v3063_v16 = vsel %vm7452_vm6, %v3061_v52, %v3062_v43  ;;  %v2761_v42 = vrot.slane %v2759_v31, 4  ;;  %v2079_v30 = vld [vmem:[#allocation2 + $0xb4] sm:$0xe]  ;;  %v2772_v14 = vshrl.u32 %v2417_v1, 16  ;;  %v2418_v9 = vld [vmem:[#allocation2 + $0xc8] sm:$0x1]  ;;  %v6190_v1 = vor.u32 %v6714_v36, %v6189_v48 }
 0x225   : > { %v5348_v55 = vadd.f32 %v5347_v35, %v5259_v53  ;;  %5211 = vmatmul.bf16.gmra.mxu2 %v6154_v63  ;;  %3137 = vst [vmem:[#allocation3 + $0x3ec] sm:$0xf] %v3063_v16  ;;  %v6710_v35 = vld [vmem:[#allocation3 + $0x37c] sm:$0xf]  ;;  %v2233_v53 = vrot.slane %v2080_v41, 5  ;;  %v2236_v7 = vrot.slane %v2081_v33, 5 }
 0x226   : > { %5300 = vmatmul.bf16.gmra.mxu3 %v6158_v20  ;;  %v2913_v52 = vld [vmem:[#allocation2 + $0xc4] sm:$0xf]  ;;  %v2770_v16 = vrot.slane %v2768_v10, 5  ;;  %v2914_v19 = vld [vmem:[#allocation2 + $0xc8] sm:$0x1] }
 0x227   : > { %v6932_v26 = vpack.c.bf16 %v5348_v55, %v8153_v11  ;;  %v5483_v40 = vadd.f32 %v5482_v57, %v5348_v55  ;;  %v5522_v58 = vmul.f32 %v5348_v55, %v5348_v55  ;;  %v5085_v45 = vpop.f32.mrf.mxu1  ;;  %v2762_v57 = vshll.u32 %v2416_v2, 16  ;;  %v2912_v2 = vld [vmem:[#allocation2 + $0xc0] sm:$0xe] }
 0x228   : > { %v5172_v5 = vpop.f32.mrf.mxu2  ;;  %v5086_v51 = vadd.f32 %v5085_v45, %v7852_v47  ;;  %v2235_v59 = vrot.slane %v2233_v53, 4  ;;  %v5729_v48 = vrot.slane %v2912_v2, 9  ;;  %v3066_v36 = vrot.slane %v2913_v52, 5 }
 0x229   : > { %7023 = vst [vmem:[%s8124_s18 + $0x10] sm:$0xff] %v6932_v26   ;;  %v5553_v44 = vadd.f32 %v5552_v4, %v5522_v58  ;;  %v5173_v50 = vadd.f32 %v5172_v5, %v5084_v21  ;;  %v5261_v11 = vpop.f32.mrf.mxu3  ;;  %v5350_v63 = vpop.f32.mrf.mxu0  ;;  %v6191_v4 = vld [vmem:[#allocation3 + $0x39c] sm:$0xf0]  ;;  %v2764_v20 = vrot.slane %v2762_v57, 5  ;;  %v5713_v21 = vrot.slane %v2079_v30, 9 }
 0x22a   : > { %v6194_v47 = vor.u32 %v6710_v35, %v6191_v4  ;;  %v2237_v45 = vsel %vm7452_vm6, %v2235_v59, %v2236_v7  ;;  %v3069_v35 = vrot.slane %v2914_v19, 5  ;;  %v3068_v30 = vrot.slane %v3066_v36, 4 }
 0x22b   : > { %v5262_v54 = vadd.f32 %v5261_v11, %v5173_v50  ;;  %v2765_v5 = vor.u32 %v2764_v20, %v2761_v42  ;;  %v2339_v11 = vld [vmem:[#allocation2 + $0xc4] sm:$0xf]  ;;  %2306 = vst [vmem:[#allocation3 + $0x428] sm:$0xf] %v2237_v45  ;;  %v3067_v20 = vsel %vm7452_vm6, %v5729_v48, %v3066_v36  ;;  %v6225_v45 = vld [vmem:[#allocation3 + $0x3c0] sm:$0xf] }
 0x22c   : > { %5389 = vmatmul.bf16.gmra.mxu0 %v6162_v0  ;;  %v2338_v0 = vld [vmem:[#allocation2 + $0xc0] sm:$0xf]  ;;  %2371 = vst [vmem:[#allocation3 + $0x42c] sm:$0xf] %v2339_v11  ;;  %v3070_v7 = vsel %vm7452_vm6, %v3068_v30, %v3069_v35  ;;  %v6719_v30 = vld [vmem:[#allocation3 + $0x3c4] sm:$0xf] }
 0x22d   : > { %v8174_v49 = vadd.f32 %v5350_v63, %v5262_v54  ;;  %v2766_v63 = vrot.slane %v2765_v5, 4  ;;  %v2774_v54 = vrot.slane %v2772_v14, 4  ;;  %2370 = vst [vmem:[#allocation3 + $0x408] sm:$0xf] %v2338_v0  ;;  %v2419_v5 = vld [vmem:[#allocation2 + $0xcc] sm:$0xf] }
 0x22e   : > { %3138 = vst [vmem:[#allocation3 + $0x410] sm:$0xf] %v3067_v20  ;;  %v2783_v2 = vshrl.u32 %v2419_v5, 16 }
 0x22f   : > { %v5484_v43 = vadd.f32 %v5483_v40, %v8174_v49  ;;  %v5523_v55 = vmul.f32 %v8174_v49, %v8174_v49  ;;  %v5088_v58 = vpop.f32.mrf.mxu1  ;;  %v2234_v40 = vsel %vm7452_vm6, %v5713_v21, %v2233_v53  ;;  %v2771_v42 = vsel %vm7446_vm5, %v2766_v63, %v2770_v16  ;;  %v6197_v21 = vld [vmem:[#allocation3 + $0x380] sm:$0xf]  ;;  %3139 = vst [vmem:[#allocation3 + $0x434] sm:$0xf] %v3070_v7  ;;  %v2083_v63 = vld [vmem:[#allocation2 + $0xc4] sm:$0xf] }
 0x230   : > { %v5174_v26 = vpop.f32.mrf.mxu2  ;;  %2305 = vst [vmem:[#allocation3 + $0x404] sm:$0xf] %v2234_v40  ;;  %v2775_v10 = vor.u32 %v2774_v54, %v2770_v16  ;;  %v2420_v16 = vld [vmem:[#allocation2 + $0xd0] sm:$0xf]  ;;  %v2785_v54 = vrot.slane %v2783_v2, 4 }
 0x231   : > { %v5554_v50 = vadd.f32 %v5553_v44, %v5523_v55  ;;  %v5175_v31 = vadd.f32 %v5174_v26, %v5086_v51  ;;  %v5263_v57 = vpop.f32.mrf.mxu3  ;;  %v5352_v17 = vpop.f32.mrf.mxu0  ;;  %v2778_v44 = vshll.u32 %v2418_v9, 16  ;;  %2866 = vst [vmem:[#allocation3 + $0x40c] sm:$0xf] %v2771_v42  ;;  %v5089_v51 = vadd.f32 %v5088_v58, %v7877_v32  ;;  %v6715_v9 = vld [vmem:[#allocation3 + $0x3a0] sm:$0xf0] }
 0x232   : > { %5127 = vmatmul.bf16.gmra.mxu1 %v6186_v8  ;;  %v2776_v33 = vrot.slane %v2775_v10, 4  ;;  %v6718_v58 = vld [vmem:[#allocation3 + $0x3bc] sm:$0xf]  ;;  %v2792_v40 = vshll.u32 %v2420_v16, 16  ;;  %v2082_v42 = vld [vmem:[#allocation2 + $0xc0] sm:$0xe] }
 0x233   : > { %v5264_v41 = vadd.f32 %v5263_v57, %v5175_v31  ;;  %v2780_v53 = vrot.slane %v2778_v44, 5  ;;  %v6198_v31 = vor.u32 %v6715_v9, %v6197_v21  ;;  %v6219_v57 = vld [vmem:[#allocation3 + $0x3dc] sm:$0xf0]  ;;  %v2084_v10 = vld [vmem:[#allocation2 + $0xc8] sm:$0x1] }
 0x234   : > { %v6222_v36 = vor.u32 %v6718_v58, %v6219_v57  ;;  %v2794_v35 = vrot.slane %v2792_v40, 5  ;;  %v6227_v21 = vld [vmem:[#allocation3 + $0x3e4] sm:$0xf0]  ;;  %v2243_v9 = vrot.slane %v2084_v10, 5  ;;  %v2916_v2 = vld [vmem:[#allocation2 + $0xd0] sm:$0xf] }
 0x235   : > { %v5353_v4 = vadd.f32 %v5352_v17, %v5264_v41  ;;  %5216 = vmatmul.bf16.gmra.mxu2 %v6190_v1  ;;  %v2781_v59 = vsel %vm7446_vm5, %v2776_v33, %v2780_v53  ;;  %v2786_v1 = vshll.u32 %v2419_v5, 16  ;;  %v6723_v17 = vld [vmem:[#allocation3 + $0x3e0] sm:$0xf0]  ;;  %v2421_v41 = vld [vmem:[#allocation2 + $0xd4] sm:$0x1]  ;;  %v5714_v33 = vrot.slane %v2082_v42, 9 }
 0x236   : > { %5305 = vmatmul.bf16.gmra.mxu3 %v6194_v47  ;;  %2867 = vst [vmem:[#allocation3 + $0x430] sm:$0xf] %v2781_v59  ;;  %v2796_v47 = vshrl.u32 %v2420_v16, 16  ;;  %v6226_v16 = vor.u32 %v6723_v17, %v6225_v45 }
 0x237   : > { %v6937_v8 = vpack.c.bf16 %v5353_v4, %v8174_v49  ;;  %v5485_v14 = vadd.f32 %v5484_v43, %v5353_v4  ;;  %v5524_v55 = vmul.f32 %v5353_v4, %v5353_v4  ;;  %v5090_v26 = vpop.f32.mrf.mxu1  ;;  %v2788_v44 = vrot.slane %v2786_v1, 5  ;;  %v2341_v1 = vld [vmem:[#allocation2 + $0xd0] sm:$0xf] }
 0x238   : > { %v5177_v52 = vpop.f32.mrf.mxu2  ;;  %v5091_v48 = vadd.f32 %v5090_v26, %v7892_v37  ;;  %v2798_v4 = vrot.slane %v2796_v47, 4  ;;  %v2802_v37 = vshll.u32 %v2421_v41, 16  ;;  %v2915_v26 = vld [vmem:[#allocation2 + $0xcc] sm:$0xe]  ;;  %2373 = vst [vmem:[#allocation3 + $0x474] sm:$0xf] %v2341_v1 }
 0x239   : > { %7024 = vst [vmem:[%s8124_s18 + $0x18] sm:$0xff] %v6937_v8   ;;  %v5555_v49 = vadd.f32 %v5554_v50, %v5524_v55  ;;  %v5178_v43 = vadd.f32 %v5177_v52, %v5089_v51  ;;  %v5266_v32 = vpop.f32.mrf.mxu3  ;;  %v5355_v0 = vpop.f32.mrf.mxu0  ;;  %v2240_v50 = vrot.slane %v2083_v63, 5  ;;  %v2789_v52 = vor.u32 %v2788_v44, %v2785_v54 }
 0x23a   : > { %v2799_v59 = vor.u32 %v2798_v4, %v2794_v35  ;;  %v2804_v47 = vrot.slane %v2802_v37, 5  ;;  %v5730_v45 = vrot.slane %v2915_v26, 9  ;;  %v3073_v54 = vrot.slane %v2916_v2, 5  ;;  %v6233_v4 = vld [vmem:[#allocation3 + $0x3c8] sm:$0xf] }
 0x23b   : > { %v5267_v11 = vadd.f32 %v5266_v32, %v5178_v43  ;;  %v2242_v8 = vrot.slane %v2240_v50, 4  ;;  %v2340_v43 = vld [vmem:[#allocation2 + $0xcc] sm:$0xf]  ;;  %v2790_v40 = vrot.slane %v2789_v52, 4  ;;  %v6732_v37 = vld [vmem:[#allocation3 + $0x428] sm:$0xf0] }
 0x23c   : > { %5394 = vmatmul.bf16.gmra.mxu0 %v6198_v31  ;;  %v2917_v31 = vld [vmem:[#allocation2 + $0xd4] sm:$0x1]  ;;  %2372 = vst [vmem:[#allocation3 + $0x450] sm:$0xf] %v2340_v43 }
 0x23d   : > { %v8195_v19 = vadd.f32 %v5355_v0, %v5267_v11  ;;  %v2244_v58 = vsel %vm7452_vm6, %v2242_v8, %v2243_v9  ;;  %v2800_v0 = vrot.slane %v2799_v59, 4  ;;  %v2795_v63 = vsel %vm7446_vm5, %v2790_v40, %v2794_v35  ;;  %v6255_v9 = vld [vmem:[#allocation3 + $0x424] sm:$0xf0]  ;;  %v6263_v2 = vld [vmem:[#allocation3 + $0x42c] sm:$0xf0] }
 0x23e   : > { %2308 = vst [vmem:[#allocation3 + $0x470] sm:$0xf] %v2244_v58  ;;  %v3076_v17 = vrot.slane %v2917_v31, 5  ;;  %v6261_v59 = vld [vmem:[#allocation3 + $0x408] sm:$0xf] }
 0x23f   : > { %v5486_v53 = vadd.f32 %v5485_v14, %v8195_v19  ;;  %v5525_v20 = vmul.f32 %v8195_v19, %v8195_v19  ;;  %v5093_v51 = vpop.f32.mrf.mxu1  ;;  %v2241_v14 = vsel %vm7452_vm6, %v5714_v33, %v2240_v50  ;;  %v2805_v41 = vsel %vm7446_vm5, %v2800_v0, %v2804_v47  ;;  %2868 = vst [vmem:[#allocation3 + $0x454] sm:$0xf] %v2795_v63  ;;  %v6269_v63 = vld [vmem:[#allocation3 + $0x410] sm:$0xf] }
 0x240   : > { %v5179_v55 = vpop.f32.mrf.mxu2  ;;  %2307 = vst [vmem:[#allocation3 + $0x44c] sm:$0xf] %v2241_v14  ;;  %v5094_v44 = vadd.f32 %v5093_v51, %v7905_v27  ;;  %v6262_v58 = vor.u32 %v6732_v37, %v6261_v59 }
 0x241   : > { %v5556_v7 = vadd.f32 %v5555_v49, %v5525_v20  ;;  %v5180_v5 = vadd.f32 %v5179_v55, %v5091_v48  ;;  %v5268_v32 = vpop.f32.mrf.mxu3  ;;  %v5357_v11 = vpop.f32.mrf.mxu0  ;;  %v6230_v49 = vor.u32 %v6719_v30, %v6227_v21  ;;  %v3074_v48 = vsel %vm7452_vm6, %v5730_v45, %v3073_v54  ;;  %v6724_v20 = vld [vmem:[#allocation3 + $0x3e8] sm:$0xf0]  ;;  %2869 = vst [vmem:[#allocation3 + $0x478] sm:$0xf] %v2805_v41 }
 0x242   : > { %5132 = vmatmul.bf16.gmra.mxu1 %v6222_v36  ;;  %v3075_v36 = vrot.slane %v3073_v54, 4  ;;  %3140 = vst [vmem:[#allocation3 + $0x458] sm:$0xf] %v3074_v48  ;;  %v6234_v55 = vor.u32 %v6724_v20, %v6233_v4  ;;  %v6733_v54 = vld [vmem:[#allocation3 + $0x430] sm:$0xf0] }
 0x243   : > { %v5269_v57 = vadd.f32 %v5268_v32, %v5180_v5  ;;  %v6270_v48 = vor.u32 %v6733_v54, %v6269_v63 }
 0x244   : > { %v3077_v13 = vsel %vm7452_vm6, %v3075_v36, %v3076_v17 }
 0x245   : > { %v5358_v50 = vadd.f32 %v5357_v11, %v5269_v57  ;;  %5221 = vmatmul.bf16.gmra.mxu2 %v6226_v16  ;;  %3141 = vst [vmem:[#allocation3 + $0x47c] sm:$0xf] %v3077_v13  ;;  %v6291_v4 = vld [vmem:[#allocation3 + $0x46c] sm:$0xf0] }
 0x246   : > { %5310 = vmatmul.bf16.gmra.mxu3 %v6230_v49 }
 0x247   : > { %v6942_v42 = vpack.c.bf16 %v5358_v50, %v8195_v19  ;;  %v5487_v10 = vadd.f32 %v5486_v53, %v5358_v50  ;;  %v5526_v35 = vmul.f32 %v5358_v50, %v5358_v50  ;;  %v5095_v33 = vpop.f32.mrf.mxu1  ;;  %v6727_v53 = vld [vmem:[#allocation3 + $0x404] sm:$0xf] }
 0x248   : > { %v5182_v30 = vpop.f32.mrf.mxu2  ;;  %v5096_v23 = vadd.f32 %v5095_v33, %v7917_v24  ;;  %v6258_v16 = vor.u32 %v6727_v53, %v6255_v9  ;;  %v6741_v33 = vld [vmem:[#allocation3 + $0x470] sm:$0xf0] }
 0x249   : > { %7025 = vst [vmem:[%s8124_s18 + $0x20] sm:$0xff] %v6942_v42   ;;  %v5557_v27 = vadd.f32 %v5556_v7, %v5526_v35  ;;  %v5183_v8 = vadd.f32 %v5182_v30, %v5094_v44  ;;  %v5271_v51 = vpop.f32.mrf.mxu3  ;;  %v5360_v21 = vpop.f32.mrf.mxu0  ;;  %v6728_v7 = vld [vmem:[#allocation3 + $0x40c] sm:$0xf]  ;;  %v6297_v30 = vld [vmem:[#allocation3 + $0x450] sm:$0xf] }
 0x24a   : > { %v6266_v11 = vor.u32 %v6728_v7, %v6263_v2  ;;  %v6736_v35 = vld [vmem:[#allocation3 + $0x44c] sm:$0xf]  ;;  %v6305_v7 = vld [vmem:[#allocation3 + $0x458] sm:$0xf] }
 0x24b   : > { %v5272_v19 = vadd.f32 %v5271_v51, %v5183_v8  ;;  %v6294_v8 = vor.u32 %v6736_v35, %v6291_v4 }
 0x24c   : > { %5399 = vmatmul.bf16.gmra.mxu0 %v6234_v55  ;;  %v6742_v2 = vld [vmem:[#allocation3 + $0x478] sm:$0xf0] }
 0x24d   : > { %v5361_v52 = vadd.f32 %v5360_v21, %v5272_v19  ;;  %v6737_v21 = vld [vmem:[#allocation3 + $0x454] sm:$0xf]  ;;  %v6299_v19 = vld [vmem:[#allocation3 + $0x474] sm:$0xf0] }
 0x24f   : > { %v5488_v26 = vadd.f32 %v5487_v10, %v5361_v52  ;;  %v5527_v5 = vmul.f32 %v5361_v52, %v5361_v52  ;;  %v5098_v43 = vpop.f32.mrf.mxu1 }
 0x250   : > { %v5184_v14 = vpop.f32.mrf.mxu2  ;;  %v5099_v24 = vadd.f32 %v5098_v43, %v7930_v3 }
 0x251   : > { %v5558_v31 = vadd.f32 %v5557_v27, %v5527_v5  ;;  %v5185_v32 = vadd.f32 %v5184_v14, %v5096_v23  ;;  %v5273_v1 = vpop.f32.mrf.mxu3  ;;  %v5362_v40 = vpop.f32.mrf.mxu0  ;;  %v6302_v5 = vor.u32 %v6737_v21, %v6299_v19 }
 0x252   : > { %5137 = vmatmul.bf16.gmra.mxu1 %v6258_v16 }
 0x253   : > { %v5274_v0 = vadd.f32 %v5273_v1, %v5185_v32 }
 0x255   : > { %v5363_v57 = vadd.f32 %v5362_v40, %v5274_v0  ;;  %5226 = vmatmul.bf16.gmra.mxu2 %v6262_v58  ;;  %v6306_v40 = vor.u32 %v6742_v2, %v6305_v7 }
 0x256   : > { %5315 = vmatmul.bf16.gmra.mxu3 %v6266_v11 }
 0x257   : > { %v6947_v49 = vpack.c.bf16 %v5363_v57, %v5361_v52  ;;  %v5489_v47 = vadd.f32 %v5488_v26, %v5363_v57  ;;  %v5528_v45 = vmul.f32 %v5363_v57, %v5363_v57  ;;  %v5100_v50 = vpop.f32.mrf.mxu1  ;;  %v6298_v52 = vor.u32 %v6741_v33, %v6297_v30 }
 0x258   : > { %v5187_v17 = vpop.f32.mrf.mxu2  ;;  %v5101_v27 = vadd.f32 %v5100_v50, %v7937_v38 }
 0x259   : > { %7026 = vst [vmem:[%s8124_s18 + $0x28] sm:$0xff] %v6947_v49   ;;  %v5559_v41 = vadd.f32 %v5558_v31, %v5528_v45  ;;  %v5188_v44 = vadd.f32 %v5187_v17, %v5099_v24  ;;  %v5276_v36 = vpop.f32.mrf.mxu3  ;;  %v5365_v42 = vpop.f32.mrf.mxu0 }
 0x25b   : > { %v5277_v10 = vadd.f32 %v5276_v36, %v5188_v44 }
 0x25c   : > { %5404 = vmatmul.bf16.gmra.mxu0 %v6270_v48 }
 0x25d   : > { %v5366_v20 = vadd.f32 %v5365_v42, %v5277_v10 }
 0x25f   : > { %v5490_v13 = vadd.f32 %v5489_v47, %v5366_v20  ;;  %v5529_v3 = vmul.f32 %v5366_v20, %v5366_v20  ;;  %v5103_v51 = vpop.f32.mrf.mxu1 }
 0x260   : > { %v5189_v55 = vpop.f32.mrf.mxu2  ;;  %v5104_v38 = vadd.f32 %v5103_v51, %v7949_v39 }
 0x261   : > { %v5560_v53 = vadd.f32 %v5559_v41, %v5529_v3  ;;  %v5190_v9 = vadd.f32 %v5189_v55, %v5101_v27  ;;  %v5278_v59 = vpop.f32.mrf.mxu3  ;;  %v5367_v37 = vpop.f32.mrf.mxu0 }
 0x262   : > { %5142 = vmatmul.bf16.gmra.mxu1 %v6294_v8 }
 0x263   : > { %v5279_v26 = vadd.f32 %v5278_v59, %v5190_v9 }
 0x265   : > { %v5368_v23 = vadd.f32 %v5367_v37, %v5279_v26  ;;  %5231 = vmatmul.bf16.gmra.mxu2 %v6298_v52 }
 0x266   : > { %5320 = vmatmul.bf16.gmra.mxu3 %v6302_v5 }
 0x267   : > { %v6952_v16 = vpack.c.bf16 %v5368_v23, %v5366_v20  ;;  %v5491_v14 = vadd.f32 %v5490_v13, %v5368_v23  ;;  %v5530_v43 = vmul.f32 %v5368_v23, %v5368_v23  ;;  %v5105_v32 = vpop.f32.mrf.mxu1 }
 0x268   : > { %v5192_v31 = vpop.f32.mrf.mxu2  ;;  %v5106_v24 = vadd.f32 %v5105_v32, %v7959_v28 }
 0x269   : > { %7027 = vst [vmem:[%s8124_s18 + $0x30] sm:$0xff] %v6952_v16   ;;  %v5561_v58 = vadd.f32 %v5560_v53, %v5530_v43  ;;  %v5193_v1 = vadd.f32 %v5192_v31, %v5104_v38  ;;  %v5281_v0 = vpop.f32.mrf.mxu3  ;;  %v5370_v11 = vpop.f32.mrf.mxu0 }
 0x26b   : > { %v5282_v57 = vadd.f32 %v5281_v0, %v5193_v1 }
 0x26c   : > { %5409 = vmatmul.bf16.gmra.mxu0 %v6306_v40 }
 0x26d   : > { %v5371_v49 = vadd.f32 %v5370_v11, %v5282_v57 }
 0x26f   : > { %v5492_v47 = vadd.f32 %v5491_v14, %v5371_v49  ;;  %v5531_v45 = vmul.f32 %v5371_v49, %v5371_v49  ;;  %v5108_v63 = vpop.f32.mrf.mxu1 }
 0x270   : > { %v5194_v39 = vpop.f32.mrf.mxu2  ;;  %v5109_v35 = vadd.f32 %v5108_v63, %v7966_v18 }
 0x271   : > { %v5562_v54 = vadd.f32 %v5561_v58, %v5531_v45  ;;  %v5195_v17 = vadd.f32 %v5194_v39, %v5106_v24  ;;  %v5283_v50 = vpop.f32.mrf.mxu3  ;;  %v5372_v41 = vpop.f32.mrf.mxu0 }
 0x273   : > { %v5284_v44 = vadd.f32 %v5283_v50, %v5195_v17 }
 0x275   : > { %v5373_v48 = vadd.f32 %v5372_v41, %v5284_v44 }
 0x277   : > { %v6957_v36 = vpack.c.bf16 %v5373_v48, %v5371_v49  ;;  %v5493_v42 = vadd.f32 %v5492_v47, %v5373_v48  ;;  %v5532_v10 = vmul.f32 %v5373_v48, %v5373_v48  ;;  %v5110_v20 = vpop.f32.mrf.mxu1 }
 0x278   : > { %v5197_v4 = vpop.f32.mrf.mxu2  ;;  %v5111_v51 = vadd.f32 %v5110_v20, %v7977_v56 }
 0x279   : > { %7028 = vst [vmem:[%s8124_s18 + $0x38] sm:$0xff] %v6957_v36   ;;  %v5563_v30 = vadd.f32 %v5562_v54, %v5532_v10  ;;  %v5198_v33 = vadd.f32 %v5197_v4, %v5109_v35  ;;  %v5286_v13 = vpop.f32.mrf.mxu3  ;;  %v5375_v28 = vpop.f32.mrf.mxu0 }
 0x27b   : > { %v5287_v3 = vadd.f32 %v5286_v13, %v5198_v33 }
 0x27d   : > { %v5376_v27 = vadd.f32 %v5375_v28, %v5287_v3 }
 0x27f   : > { %v5494_v8 = vadd.f32 %v5493_v42, %v5376_v27  ;;  %v5533_v55 = vmul.f32 %v5376_v27, %v5376_v27  ;;  %v5113_v19 = vpop.f32.mrf.mxu1 }
 0x280   : > { %v5199_v21 = vpop.f32.mrf.mxu2  ;;  %v5114_v16 = vadd.f32 %v5113_v19, %v7984_v46 }
 0x281   : > { %v5564_v53 = vadd.f32 %v5563_v30, %v5533_v55  ;;  %v5200_v9 = vadd.f32 %v5199_v21, %v5111_v51  ;;  %v5288_v52 = vpop.f32.mrf.mxu3  ;;  %v5377_v18 = vpop.f32.mrf.mxu0 }
 0x283   : > { %v5289_v59 = vadd.f32 %v5288_v52, %v5200_v9 }
 0x285   : > { %v5378_v37 = vadd.f32 %v5377_v18, %v5289_v59 }
 0x287   : > { %v6962_v26 = vpack.c.bf16 %v5378_v37, %v5376_v27  ;;  %v5495_v5 = vadd.f32 %v5494_v8, %v5378_v37  ;;  %v5534_v23 = vmul.f32 %v5378_v37, %v5378_v37  ;;  %v5115_v43 = vpop.f32.mrf.mxu1 }
 0x288   : > { %v5202_v14 = vpop.f32.mrf.mxu2  ;;  %v5116_v40 = vadd.f32 %v5115_v43, %v7995_v60 }
 0x289   : > { %7029 = vst [vmem:[%s8124_s18 + $0x40] sm:$0xff] %v6962_v26   ;;  %v5565_v38 = vadd.f32 %v5564_v53, %v5534_v23  ;;  %v5203_v7 = vadd.f32 %v5202_v14, %v5114_v16  ;;  %v5291_v2 = vpop.f32.mrf.mxu3  ;;  %v5380_v56 = vpop.f32.mrf.mxu0 }
 0x28b   : > { %v5292_v31 = vadd.f32 %v5291_v2, %v5203_v7 }
 0x28d   : > { %v5381_v32 = vadd.f32 %v5380_v56, %v5292_v31 }
 0x28f   : > { %v5496_v58 = vadd.f32 %v5495_v5, %v5381_v32  ;;  %v5535_v1 = vmul.f32 %v5381_v32, %v5381_v32  ;;  %v5118_v11 = vpop.f32.mrf.mxu1 }
 0x290   : > { %v5204_v0 = vpop.f32.mrf.mxu2  ;;  %v5119_v17 = vadd.f32 %v5118_v11, %v8002_v6 }
 0x291   : > { %v5566_v57 = vadd.f32 %v5565_v38, %v5535_v1  ;;  %v5205_v49 = vadd.f32 %v5204_v0, %v5116_v40  ;;  %v5293_v47 = vpop.f32.mrf.mxu3  ;;  %v5382_v46 = vpop.f32.mrf.mxu0 }
 0x293   : > { %v5294_v45 = vadd.f32 %v5293_v47, %v5205_v49 }
 0x295   : > { %v5383_v24 = vadd.f32 %v5382_v46, %v5294_v45 }
 0x297   : > { %v6967_v39 = vpack.c.bf16 %v5383_v24, %v5381_v32  ;;  %v5497_v63 = vadd.f32 %v5496_v58, %v5383_v24  ;;  %v5536_v54 = vmul.f32 %v5383_v24, %v5383_v24  ;;  %v5120_v41 = vpop.f32.mrf.mxu1 }
 0x298   : > { %v5207_v50 = vpop.f32.mrf.mxu2  ;;  %v5121_v20 = vadd.f32 %v5120_v41, %v8013_v25 }
 0x299   : > { %7030 = vst [vmem:[%s8124_s18 + $0x48] sm:$0xff] %v6967_v39   ;;  %v5567_v44 = vadd.f32 %v5566_v57, %v5536_v54  ;;  %v5208_v48 = vadd.f32 %v5207_v50, %v5119_v17  ;;  %v5296_v36 = vpop.f32.mrf.mxu3  ;;  %v5385_v60 = vpop.f32.mrf.mxu0 }
 0x29b   : > { %v5297_v42 = vadd.f32 %v5296_v36, %v5208_v48 }
 0x29d   : > { %v5386_v10 = vadd.f32 %v5385_v60, %v5297_v42 }
 0x29f   : > { %v5498_v35 = vadd.f32 %v5497_v63, %v5386_v10  ;;  %v5537_v4 = vmul.f32 %v5386_v10, %v5386_v10  ;;  %v5123_v33 = vpop.f32.mrf.mxu1 }
 0x2a0   : > { %v5209_v30 = vpop.f32.mrf.mxu2  ;;  %v5124_v19 = vadd.f32 %v5123_v33, %v8020_v12 }
 0x2a1   : > { %v5568_v13 = vadd.f32 %v5567_v44, %v5537_v4  ;;  %v5210_v28 = vadd.f32 %v5209_v30, %v5121_v20  ;;  %v5298_v3 = vpop.f32.mrf.mxu3  ;;  %v5387_v6 = vpop.f32.mrf.mxu0 }
 0x2a3   : > { %v5299_v27 = vadd.f32 %v5298_v3, %v5210_v28 }
 0x2a5   : > { %v5388_v8 = vadd.f32 %v5387_v6, %v5299_v27 }
 0x2a7   : > { %v6972_v55 = vpack.c.bf16 %v5388_v8, %v5386_v10  ;;  %v5499_v51 = vadd.f32 %v5498_v35, %v5388_v8  ;;  %v5538_v21 = vmul.f32 %v5388_v8, %v5388_v8  ;;  %v5125_v9 = vpop.f32.mrf.mxu1 }
 0x2a8   : > { %v5212_v53 = vpop.f32.mrf.mxu2  ;;  %v5126_v16 = vadd.f32 %v5125_v9, %v8031_v61 }
 0x2a9   : > { %7031 = vst [vmem:[%s8124_s18 + $0x50] sm:$0xff] %v6972_v55   ;;  %v5569_v52 = vadd.f32 %v5568_v13, %v5538_v21  ;;  %v5213_v18 = vadd.f32 %v5212_v53, %v5124_v19  ;;  %v5301_v59 = vpop.f32.mrf.mxu3  ;;  %v5390_v25 = vpop.f32.mrf.mxu0 }
 0x2ab   : > { %v5302_v37 = vadd.f32 %v5301_v59, %v5213_v18 }
 0x2ad   : > { %v5391_v26 = vadd.f32 %v5390_v25, %v5302_v37 }
 0x2af   : > { %v5500_v5 = vadd.f32 %v5499_v51, %v5391_v26  ;;  %v5539_v23 = vmul.f32 %v5391_v26, %v5391_v26  ;;  %v5128_v43 = vpop.f32.mrf.mxu1 }
 0x2b0   : > { %v5214_v14 = vpop.f32.mrf.mxu2  ;;  %v5129_v40 = vadd.f32 %v5128_v43, %v8038_v62 }
 0x2b1   : > { %v5570_v38 = vadd.f32 %v5569_v52, %v5539_v23  ;;  %v5215_v7 = vadd.f32 %v5214_v14, %v5126_v16  ;;  %v5303_v2 = vpop.f32.mrf.mxu3  ;;  %v5392_v12 = vpop.f32.mrf.mxu0 }
 0x2b3   : > { %v5304_v56 = vadd.f32 %v5303_v2, %v5215_v7 }
 0x2b5   : > { %v5393_v31 = vadd.f32 %v5392_v12, %v5304_v56  ;;  %v8275_v12 = vld [vmem:[#allocation4_spill] sm:$0xff] }
 0x2b7   : > { %v6977_v32 = vpack.c.bf16 %v5393_v31, %v5391_v26  ;;  %v5501_v58 = vadd.f32 %v5500_v5, %v5393_v31  ;;  %v5540_v1 = vmul.f32 %v5393_v31, %v5393_v31  ;;  %v5130_v11 = vpop.f32.mrf.mxu1 }
 0x2b8   : > { %v5217_v0 = vpop.f32.mrf.mxu2  ;;  %v5131_v63 = vadd.f32 %v5130_v11, %v8049_v29 }
 0x2b9   : > { %7032 = vst [vmem:[%s8124_s18 + $0x58] sm:$0xff] %v6977_v32   ;;  %v5571_v57 = vadd.f32 %v5570_v38, %v5540_v1  ;;  %v5218_v49 = vadd.f32 %v5217_v0, %v5129_v40  ;;  %v5306_v47 = vpop.f32.mrf.mxu3  ;;  %v5395_v61 = vpop.f32.mrf.mxu0 }
 0x2bb   : > { %v5307_v46 = vadd.f32 %v5306_v47, %v5218_v49 }
 0x2bd   : > { %v5396_v45 = vadd.f32 %v5395_v61, %v5307_v46  ;;  %v8276_v61 = vld [vmem:[#allocation5_spill] sm:$0xff] }
 0x2bf   : > { %v5502_v24 = vadd.f32 %v5501_v58, %v5396_v45  ;;  %v5541_v39 = vmul.f32 %v5396_v45, %v5396_v45  ;;  %v5133_v17 = vpop.f32.mrf.mxu1 }
 0x2c0   : > { %v5219_v54 = vpop.f32.mrf.mxu2  ;;  %v5134_v35 = vadd.f32 %v5133_v17, %v8056_v15 }
 0x2c1   : > { %v5572_v50 = vadd.f32 %v5571_v57, %v5541_v39  ;;  %v5220_v41 = vadd.f32 %v5219_v54, %v5131_v63  ;;  %v5308_v44 = vpop.f32.mrf.mxu3  ;;  %v5397_v62 = vpop.f32.mrf.mxu0 }
 0x2c3   : > { %v5309_v48 = vadd.f32 %v5308_v44, %v5220_v41 }
 0x2c5   : > { %v5398_v36 = vadd.f32 %v5397_v62, %v5309_v48  ;;  %v8277_v48 = vld [vmem:[#allocation6_spill] sm:$0xff] }
 0x2c7   : > { %v6982_v60 = vpack.c.bf16 %v5398_v36, %v5396_v45  ;;  %v5503_v42 = vadd.f32 %v5502_v24, %v5398_v36  ;;  %v5542_v10 = vmul.f32 %v5398_v36, %v5398_v36  ;;  %v5135_v20 = vpop.f32.mrf.mxu1 }
 0x2c8   : > { %v5222_v4 = vpop.f32.mrf.mxu2  ;;  %v5136_v8 = vadd.f32 %v5135_v20, %v8067_v22 }
 0x2c9   : > { %7033 = vst [vmem:[%s8124_s18 + $0x60] sm:$0xff] %v6982_v60   ;;  %v5573_v30 = vadd.f32 %v5572_v50, %v5542_v10  ;;  %v5223_v33 = vadd.f32 %v5222_v4, %v5134_v35  ;;  %v5311_v13 = vpop.f32.mrf.mxu3  ;;  %v5400_v29 = vpop.f32.mrf.mxu0 }
 0x2cb   : > { %v5312_v28 = vadd.f32 %v5311_v13, %v5223_v33 }
 0x2cd   : > { %v5401_v3 = vadd.f32 %v5400_v29, %v5312_v28 }
 0x2cf   : > { %v5504_v6 = vadd.f32 %v5503_v42, %v5401_v3  ;;  %v5543_v27 = vmul.f32 %v5401_v3, %v5401_v3  ;;  %v5138_v51 = vpop.f32.mrf.mxu1 }
 0x2d0   : > { %v5224_v55 = vpop.f32.mrf.mxu2  ;;  %v5139_v37 = vadd.f32 %v5138_v51, %v8074_v34 }
 0x2d1   : > { %v5574_v21 = vadd.f32 %v5573_v30, %v5543_v27  ;;  %v5225_v19 = vadd.f32 %v5224_v55, %v5136_v8  ;;  %v5313_v53 = vpop.f32.mrf.mxu3  ;;  %v5402_v15 = vpop.f32.mrf.mxu0 }
 0x2d3   : > { %v5314_v9 = vadd.f32 %v5313_v53, %v5225_v19 }
 0x2d5   : > { %v5403_v52 = vadd.f32 %v5402_v15, %v5314_v9 }
 0x2d7   : > { %v6987_v18 = vpack.c.bf16 %v5403_v52, %v5401_v3  ;;  %v5505_v59 = vadd.f32 %v5504_v6, %v5403_v52  ;;  %v5544_v25 = vmul.f32 %v5403_v52, %v5403_v52  ;;  %v5140_v5 = vpop.f32.mrf.mxu1 }
 0x2d8   : > { %v5227_v26 = vpop.f32.mrf.mxu2  ;;  %v5141_v56 = vadd.f32 %v5140_v5, %v8275_v12 }
 0x2d9   : > { %7034 = vst [vmem:[%s8124_s18 + $0x68] sm:$0xff] %v6987_v18   ;;  %v5575_v23 = vadd.f32 %v5574_v21, %v5544_v25  ;;  %v5228_v16 = vadd.f32 %v5227_v26, %v5139_v37  ;;  %v5316_v14 = vpop.f32.mrf.mxu3  ;;  %v5405_v22 = vpop.f32.mrf.mxu0 }
 0x2db   : > { %v5317_v43 = vadd.f32 %v5316_v14, %v5228_v16 }
 0x2dd   : > { %v5406_v38 = vadd.f32 %v5405_v22, %v5317_v43 }
 0x2df   : > { %v5506_v7 = vadd.f32 %v5505_v59, %v5406_v38  ;;  %v5545_v2 = vmul.f32 %v5406_v38, %v5406_v38  ;;  %v5143_v40 = vpop.f32.mrf.mxu1 }
 0x2e0   : > { %v5229_v31 = vpop.f32.mrf.mxu2  ;;  %v5144_v46 = vadd.f32 %v5143_v40, %v8276_v61 }
 0x2e1   : > { %v5576_v32 = vadd.f32 %v5575_v23, %v5545_v2  ;;  %v5230_v58 = vadd.f32 %v5229_v31, %v5141_v56  ;;  %v5318_v1 = vpop.f32.mrf.mxu3  ;;  %v5407_v34 = vpop.f32.mrf.mxu0 }
 0x2e3   : > { %v5319_v0 = vadd.f32 %v5318_v1, %v5230_v58 }
 0x2e5   : > { %v5408_v11 = vadd.f32 %v5407_v34, %v5319_v0 }
 0x2e7   : > { %v6992_v57 = vpack.c.bf16 %v5408_v11, %v5406_v38  ;;  %v5507_v49 = vadd.f32 %v5506_v7, %v5408_v11  ;;  %v5546_v47 = vmul.f32 %v5408_v11, %v5408_v11  ;;  %v5145_v50 = vpop.f32.mrf.mxu1 }
 0x2e8   : > { %v5232_v45 = vpop.f32.mrf.mxu2  ;;  %v5146_v36 = vadd.f32 %v5145_v50, %v8277_v48 }
 0x2e9   : > { %7035 = vst [vmem:[%s8124_s18 + $0x70] sm:$0xff] %v6992_v57   ;;  %v5577_v24 = vadd.f32 %v5576_v32, %v5546_v47  ;;  %v5233_v39 = vadd.f32 %v5232_v45, %v5144_v46  ;;  %v5321_v63 = vpop.f32.mrf.mxu3  ;;  %v5410_v54 = vpop.f32.mrf.mxu0 }
 0x2eb   : > { %v5322_v17 = vadd.f32 %v5321_v63, %v5233_v39 }
 0x2ed   : > { %v5411_v41 = vadd.f32 %v5410_v54, %v5322_v17 }
 0x2ef   : > { %v5508_v44 = vadd.f32 %v5507_v49, %v5411_v41  ;;  %v5547_v62 = vmul.f32 %v5411_v41, %v5411_v41 }
 0x2f0   : > { %v5234_v60 = vpop.f32.mrf.mxu2 }
 0x2f1   : > { %v5578_v42 = vadd.f32 %v5577_v24, %v5547_v62  ;;  %v5235_v10 = vadd.f32 %v5234_v60, %v5146_v36  ;;  %v5323_v35 = vpop.f32.mrf.mxu3  ;;  %v5412_v20 = vpop.f32.mrf.mxu0 }
 0x2f3   : > { %v5324_v4 = vadd.f32 %v5323_v35, %v5235_v10 }
 0x2f5   : > { %v5413_v30 = vadd.f32 %v5412_v20, %v5324_v4 }
 0x2f7   : > { %v6997_v33 = vpack.c.bf16 %v5413_v30, %v5411_v41  ;;  %v5509_v13 = vadd.f32 %v5508_v44, %v5413_v30  ;;  %v5548_v29 = vmul.f32 %v5413_v30, %v5413_v30 }
 0x2f9   : > { %7036 = vst [vmem:[%s8124_s18 + $0x78] sm:$0xff] %v6997_v33   ;;  %v5510_v28 = vrot.slane %v5509_v13, 4  ;;  %v5579_v3 = vadd.f32 %v5578_v42, %v5548_v29 }
 0x2fb   : > { %v5511_v6 = vadd.f32 %v5510_v28, %v5509_v13  ;;  %v5580_v27 = vrot.slane %v5579_v3, 4 }
 0x2fd   : > { %v5512_v8 = vrot.slane %v5511_v6, 2  ;;  %v5581_v55 = vadd.f32 %v5580_v27, %v5579_v3 }
 0x2ff   : > { %v5513_v51 = vadd.f32 %v5512_v8, %v5511_v6  ;;  %v5582_v21 = vrot.slane %v5581_v55, 2 }
 0x301   : > { %v5514_v19 = vrot.slane %v5513_v51, 1  ;;  %v5583_v53 = vadd.f32 %v5582_v21, %v5581_v55 }
 0x303   : > { %v5515_v15 = vadd.f32 %v5514_v19, %v5513_v51  ;;  %v5584_v9 = vrot.slane %v5583_v53, 1 }
 0x305   : > { %5516 = vst [vmem:[%s208_s22] sm:$0x1] %v5515_v15  ;;  %v5585_v52 = vadd.f32 %v5584_v9, %v5583_v53 }
 0x307   : > { %5586 = vst [vmem:[%s208_s22 + $0x1] sm:$0x1] %v5585_v52 }
 0x308 PF: > { %s15_s15 = sadd.s32 1, %s7080_s15  }
 0x309   : > { %p12_p4 = scmp.ge.s32.totalorder %s15_s15, 4  }
 0x30b   :  { %14 = sbr.rel (!%p12_p4) target bundleno = 1 (0x1), region = 77 }

</bundles_post_ra>
